<compile_context>
chip_gen: v7x
topology: tpu7x:2x2x1
jax: 0.10.0
libtpu: 0.0.40
codegen_flags: <defaults>
</compile_context>

<pallas_src>
import functools

import jax
import jax.numpy as jnp
from jax.experimental import pallas as pl
from jax.experimental.pallas import tpu as pltpu


def _round_up(x, m):
    return (x + m - 1) // m * m


# ----------------------------------------------------------------------------
# Kernel
# ----------------------------------------------------------------------------
def _decoder_step_kernel(*refs, compute_context, quantized_head, hidden_size,
                         hidden_padded, batch_size):
    H, Hp, B = hidden_size, hidden_padded, batch_size

    it = iter(refs)
    seq_ref = next(it)          # SMEM (B,) int32 token ids (scalar prefetch)
    emb_hbm = next(it)          # HBM  (vocab_in, E) embedding table (pl.ANY)
    av_ref = next(it)           # VMEM (B, H) f32 incoming attn_vector
    h0_ref = next(it)           # VMEM (B, H) f32
    c0_ref = next(it)           # VMEM (B, H) f32
    if compute_context:
        encp_ref = next(it)     # VMEM (B, S, H)  enc @ W_attn (hoisted projection)
        enc_ref = next(it)      # VMEM (B, S, H)
    w_x_ref = next(it)          # VMEM (E, 4*Hp)   multiplies embedded token
    w_a_ref = next(it)          # VMEM (H, 4*Hp)   multiplies attn_vector
    w_h_ref = next(it)          # VMEM (H, 4*Hp)   multiplies h_prev
    b_lstm_ref = next(it)       # VMEM (1, 4*Hp) f32  (b_ih + b_hh)
    w_out_ref = next(it)        # VMEM (H, TV)   streamed over the vocab grid axis
    if quantized_head:
        w_scale_ref = next(it)  # VMEM (1, TV) f32 per-column dequant scales
    b_out_ref = next(it)        # VMEM (1, TV) f32
    logp_ref = next(it)         # VMEM (B, Vp) f32 (resident output)
    dh_ref = next(it)           # VMEM (B, H) f32
    dc_ref = next(it)           # VMEM (B, H) f32
    if compute_context:
        ctx_ref = next(it)      # VMEM (B, H) f32
    emb_buf = next(it)          # VMEM (B, E) scratch for gathered embedding rows
    emb_sem = next(it)          # DMA semaphores, one per gathered row
    m_ref = next(it)            # VMEM (B, 1) running max
    l_ref = next(it)            # VMEM (B, 1) running sum-exp

    v = pl.program_id(0)
    nv = pl.num_programs(0)

    # ---- grid step 0: embedding gather + LSTMCell + Luong attention ----------
    @pl.when(v == 0)
    def _():
        # In-kernel embedding gather: B tiny row DMAs HBM -> VMEM scratch driven
        # by the scalar-prefetched token ids (table kept f32 so the per-row DMA
        # stays at 32-bit sublane granularity).
        copies = [pltpu.make_async_copy(emb_hbm.at[seq_ref[i]], emb_buf.at[i],
                                        emb_sem.at[i]) for i in range(B)]
        for cp in copies:
            cp.start()
        for cp in copies:
            cp.wait()

        # gates = emb @ W_x + attn @ W_a + h_prev @ W_h + (b_ih + b_hh)
        # Activations stay f32 (recurrent path); only weights may be low precision.
        f32 = jnp.float32
        gates = (jnp.dot(emb_buf[...].astype(f32), w_x_ref[...].astype(f32),
                         preferred_element_type=f32)
                 + jnp.dot(av_ref[...], w_a_ref[...].astype(f32),
                           preferred_element_type=f32)
                 + jnp.dot(h0_ref[...], w_h_ref[...].astype(f32),
                           preferred_element_type=f32)
                 + b_lstm_ref[...])                                      # (B, 4*Hp)
        # gate blocks start on 128-lane boundaries (Hp is 128-padded)
        i_g = jax.nn.sigmoid(gates[:, 0 * Hp:0 * Hp + H])
        f_g = jax.nn.sigmoid(gates[:, 1 * Hp:1 * Hp + H])
        g_g = jnp.tanh(gates[:, 2 * Hp:2 * Hp + H])
        o_g = jax.nn.sigmoid(gates[:, 3 * Hp:3 * Hp + H])
        c_new = f_g * c0_ref[...] + i_g * g_g
        h_new = o_g * jnp.tanh(c_new)
        dh_ref[...] = h_new
        dc_ref[...] = c_new

        if compute_context:
            # score(h, enc) = (h W_a^T) . enc = h . (enc W_a) = h . enc_proj
            # NOTE: q=1 batched einsums degenerate to B one-row MXU pushes; this
            # path runs once per token and is OFF by default, so it is cheap.
            h_q = h_new[:, None, :]                                      # (B,1,H)
            scores = jnp.einsum("bqh,bsh->bqs", h_q,
                                encp_ref[...].astype(jnp.float32),
                                preferred_element_type=jnp.float32)      # (B,1,S)
            s_max = jnp.max(scores, axis=-1, keepdims=True)
            e = jnp.exp(scores - s_max)
            align = e / jnp.sum(e, axis=-1, keepdims=True)
            ctx = jnp.einsum("bqs,bsh->bqh", align,
                             enc_ref[...].astype(jnp.float32),
                             preferred_element_type=jnp.float32)
            ctx_ref[...] = ctx[:, 0, :]

        # init online log-sum-exp accumulators for the V-tiled output head
        m_ref[...] = jnp.full(m_ref.shape, -jnp.inf, dtype=m_ref.dtype)
        l_ref[...] = jnp.zeros(l_ref.shape, dtype=l_ref.dtype)

    # ---- every grid step: one vocab tile of the head (logits + online LSE) ---
    # output = log_softmax(out(dropout(attn_vector)))   (dropout == identity, eval)
    tv = w_out_ref.shape[1]
    if quantized_head:
        # int8 weights streamed from HBM; per-column dequant on the f32 logits.
        raw = jnp.dot(av_ref[...], w_out_ref[...].astype(jnp.float32),
                      preferred_element_type=jnp.float32)
        logits = raw * w_scale_ref[...] + b_out_ref[...]
    else:
        logits = jnp.dot(av_ref[...], w_out_ref[...].astype(jnp.float32),
                         preferred_element_type=jnp.float32) + b_out_ref[...]
    start = pl.multiple_of(v * tv, 128)
    logp_ref[:, pl.ds(start, tv)] = logits          # raw logits, normalized at the end
    m_prev = m_ref[...]
    m_new = jnp.maximum(m_prev, jnp.max(logits, axis=-1, keepdims=True))
    l_ref[...] = (l_ref[...] * jnp.exp(m_prev - m_new)
                  + jnp.sum(jnp.exp(logits - m_new), axis=-1, keepdims=True))
    m_ref[...] = m_new

    # ---- last grid step: normalize the VMEM-resident (B, Vp) block in place --
    @pl.when(v == nv - 1)
    def _():
        logp_ref[...] = logp_ref[...] - (m_ref[...] + jnp.log(l_ref[...]))


# ----------------------------------------------------------------------------
# Host-side, one-time weight preparation (hoisted out of the decode loop)
# ----------------------------------------------------------------------------
def prepare_params(params, param_dtype=jnp.bfloat16, tile_v=2048, w_out_quant=None):
    """Fuse/transposes LSTM weights, pad gate blocks to 128 lanes, pad the vocab
    to a head-tile multiple, optionally int8-quantize w_out (per-column scales).

    w_out_quant: None (store in param_dtype) or "int8".
    # TODO(synk): fp8 w_out for v7x (no native int8 MXU there) not implemented.
    """
    H = params["w_hh"].shape[1]
    E = params["w_ih"].shape[1] - H
    Hp = _round_up(H, 128)
    V = params["w_out"].shape[0]

    w_ih_t = params["w_ih"].T            # (E+H, 4H)
    w_hh_t = params["w_hh"].T            # (H, 4H)
    b_sum = (params["b_ih"] + params["b_hh"])[None, :]   # (1, 4H)

    def pad_gates(w):                     # (..., 4H) -> (..., 4Hp), per-gate pad
        if Hp == H:
            return w
        lead = w.shape[:-1]
        w4 = w.reshape(*lead, 4, H)
        w4 = jnp.pad(w4, [(0, 0)] * len(lead) + [(0, 0), (0, Hp - H)])
        return w4.reshape(*lead, 4 * Hp)

    w_x = pad_gates(w_ih_t[:E])           # (E, 4Hp)  embedded token
    w_a = pad_gates(w_ih_t[E:])           # (H, 4Hp)  attn_vector
    w_h = pad_gates(w_hh_t)               # (H, 4Hp)  h_prev
    b_lstm = pad_gates(b_sum)             # (1, 4Hp)

    # Head: pad the vocab to a multiple of the (large) head tile.
    TV = min(_round_up(tile_v, 128), _round_up(V, 128))
    Vp = _round_up(V, TV)
    w_out_t = params["w_out"].T           # (H, V)
    b_out = params["b_out"][None, :]      # (1, V)
    if Vp != V:
        w_out_t = jnp.pad(w_out_t, ((0, 0), (0, Vp - V)))
        # -1e9 (finite!) so a padded tile never produces -inf max -> NaN in the LSE.
        b_out = jnp.pad(b_out, ((0, 0), (0, Vp - V)), constant_values=-1e9)

    prep = {
        # Embedding kept f32: gathered by per-row DMA in-kernel (32-bit sublane
        # granularity); it is only B rows of traffic per token anyway.
        "embedding": params["embedding"].astype(jnp.float32),
        "w_lstm_x": w_x.astype(param_dtype),
        "w_lstm_a": w_a.astype(param_dtype),
        "w_lstm_h": w_h.astype(param_dtype),
        "b_lstm": b_lstm.astype(jnp.float32),
        "w_attn": params["w_attn"].astype(jnp.float32),   # used once per sentence
        "b_out": b_out.astype(jnp.float32),
        "embed": E, "hidden": H, "hidden_padded": Hp,
        "vocab_out": V, "vocab_out_padded": Vp, "head_tile": TV,
        "w_out_quant": w_out_quant,
    }
    if w_out_quant == "int8":
        amax = jnp.max(jnp.abs(w_out_t), axis=0, keepdims=True)          # (1, Vp)
        scale = jnp.maximum(amax, 1e-8) / 127.0
        prep["w_out"] = jnp.clip(jnp.round(w_out_t / scale), -127, 127).astype(jnp.int8)
        prep["w_out_scale"] = scale.astype(jnp.float32)
    else:
        prep["w_out"] = w_out_t.astype(param_dtype)
    return prep


def prepare_encoder(prep, encoder_outputs):
    """Once per source sentence: (S,B,H)->(B,S,H) layout + 'general' projection.

    (h W_a^T) . enc == h . (enc W_a), so the W_attn matmul is amortized over all
    decode steps instead of being an HxH matmul per generated token.
    """
    dt = prep["w_lstm_x"].dtype
    enc_bsh = jnp.transpose(encoder_outputs, (1, 0, 2)).astype(jnp.float32)  # (B,S,H)
    enc_proj = jnp.einsum("bsk,kj->bsj", enc_bsh, prep["w_attn"])            # (B,S,H)
    return enc_bsh.astype(dt), enc_proj.astype(dt)


# ----------------------------------------------------------------------------
# Per-token decoder step (mirrors LuongAttnDecoderRNN.forward, eval mode)
# ----------------------------------------------------------------------------
def luong_attn_decoder_step(prep, enc_prep, input_seq, last_hidden, attn_vector,
                            *, return_context=False, single_buffer_invariants=True):
    """Returns (log_probs (B,V), (d_h, d_c), attn_vector[, context])."""
    h0, c0 = last_hidden
    B, H = h0.shape
    E = prep["embed"]
    Hp = prep["hidden_padded"]
    V, Vp, TV = prep["vocab_out"], prep["vocab_out_padded"], prep["head_tile"]
    quant = prep["w_out_quant"] == "int8"
    num_v = Vp // TV

    # Guard the unchecked in-kernel HBM gather against out-of-range token ids.
    ids = jnp.clip(input_seq.astype(jnp.int32), 0, prep["embedding"].shape[0] - 1)
    av = attn_vector.astype(jnp.float32)
    h0 = h0.astype(jnp.float32)
    c0 = c0.astype(jnp.float32)

    inputs = [prep["embedding"], av, h0, c0]
    inv_shapes = [None, (B, H), (B, H), (B, H)]      # None -> stays in HBM (pl.ANY)
    S = 0
    if return_context:
        enc_bsh, enc_proj = enc_prep
        S = enc_bsh.shape[1]
        inputs += [enc_proj, enc_bsh]
        inv_shapes += [(B, S, H), (B, S, H)]
    inputs += [prep["w_lstm_x"], prep["w_lstm_a"], prep["w_lstm_h"], prep["b_lstm"]]
    inv_shapes += [(E, 4 * Hp), (H, 4 * Hp), (H, 4 * Hp), (1, 4 * Hp)]

    streamed = [(prep["w_out"], (H, TV))]
    if quant:
        streamed.append((prep["w_out_scale"], (1, TV)))
    streamed.append((prep["b_out"], (1, TV)))
    inputs += [x for x, _ in streamed]

    def build_in_specs(single_buffer):
        def inv(shape):
            kwargs = {}
            if single_buffer:
                kwargs["pipeline_mode"] = pl.Buffered(1)   # grid-invariant: 1 buffer
            return pl.BlockSpec(shape, lambda *_: (0,) * len(shape), **kwargs)
        specs = []
        for shp in inv_shapes:
            specs.append(pl.BlockSpec(memory_space=pl.ANY) if shp is None else inv(shp))
        for _, shp in streamed:                            # streamed over the V axis
            specs.append(pl.BlockSpec(shp, lambda v, *_: (0, v)))
        return specs

    out_shape = [jax.ShapeDtypeStruct((B, Vp), jnp.float32),   # log-probs (padded)
                 jax.ShapeDtypeStruct((B, H), jnp.float32),    # d_h
                 jax.ShapeDtypeStruct((B, H), jnp.float32)]    # d_c
    out_specs = [pl.BlockSpec((B, Vp), lambda *_: (0, 0)),     # resident across V tiles
                 pl.BlockSpec((B, H), lambda *_: (0, 0)),
                 pl.BlockSpec((B, H), lambda *_: (0, 0))]
    if return_context:
        out_shape.append(jax.ShapeDtypeStruct((B, H), jnp.float32))
        out_specs.append(pl.BlockSpec((B, H), lambda *_: (0, 0)))

    scratch = [pltpu.VMEM((B, E), prep["embedding"].dtype),    # gathered emb rows
               pltpu.SemaphoreType.DMA((B,)),                  # one sem per row DMA
               pltpu.VMEM((B, 1), jnp.float32),                # running max
               pltpu.VMEM((B, 1), jnp.float32)]                # running sum-exp

    def nbytes(x):
        return int(x.size) * x.dtype.itemsize

    # Advisory cost estimate (helps XLA schedule the per-token custom call).
    flops = 2 * B * (E + 2 * H) * 4 * Hp + 2 * B * H * Vp
    transcendentals = B * (4 * Hp + Vp)
    if return_context:
        flops += 4 * B * S * H
        transcendentals += B * S
    bytes_accessed = int(sum(nbytes(x) for x in inputs[1:]) + B * E * 4
                         + (B * Vp + (3 + int(return_context)) * B * H) * 4)
    cost = pl.CostEstimate(flops=int(flops), transcendentals=int(transcendentals),
                           bytes_accessed=bytes_accessed)

    # Rough VMEM footprint; raise the scoped limit only if it would not fit the
    # 32 MiB default (big Vp / long sources).
    inv_bytes = sum(nbytes(x) for x, shp in zip(inputs, inv_shapes) if shp is not None)
    stream_bytes = 2 * sum(h * w * x.dtype.itemsize for x, (h, w) in streamed)
    out_bytes = (B * Vp + (3 + int(return_context)) * B * H) * 4
    vmem_est = (inv_bytes * (1 if single_buffer_invariants else 2)
                + stream_bytes + out_bytes + B * E * 4 + 2 * B * 4)
    cp_kwargs = dict(dimension_semantics=("arbitrary",))      # LSE carry across V
    if vmem_est > 30 * 1024 * 1024:
        cp_kwargs["vmem_limit_bytes"] = min(int(vmem_est * 1.25), 120 * 1024 * 1024)

    kernel = functools.partial(
        _decoder_step_kernel,
        compute_context=return_context, quantized_head=quant,
        hidden_size=H, hidden_padded=Hp, batch_size=B)

    def run(single_buffer):
        return pl.pallas_call(
            kernel,
            out_shape=tuple(out_shape),
            grid_spec=pltpu.PrefetchScalarGridSpec(
                num_scalar_prefetch=1,
                grid=(num_v,),
                in_specs=build_in_specs(single_buffer),
                out_specs=tuple(out_specs),
                scratch_shapes=scratch),
            compiler_params=pltpu.CompilerParams(**cp_kwargs),
            cost_estimate=cost,
        )(ids, *inputs)

    if single_buffer_invariants:
        try:
            outs = run(True)
        except Exception:
            # Fallback: some JAX versions reject pl.Buffered(1); use default
            # double-buffering for the grid-invariant inputs instead.
            outs = run(False)
    else:
        outs = run(False)

    if return_context:
        logp, d_h, d_c, ctx = outs
        return logp[:, :V], (d_h, d_c), attn_vector, ctx
    logp, d_h, d_c = outs
    return logp[:, :V], (d_h, d_c), attn_vector


# ----------------------------------------------------------------------------
# Pure-JAX reference (PyTorch semantics, f32) and parameter init
# ----------------------------------------------------------------------------
def reference_forward(params, input_seq, last_hidden, encoder_outputs, attn_vector):
    h0, c0 = last_hidden
    H = h0.shape[1]
    emb = params["embedding"][input_seq]
    x = jnp.concatenate([emb, attn_vector], axis=1)
    gates = (x @ params["w_ih"].T + params["b_ih"]
             + h0 @ params["w_hh"].T + params["b_hh"])
    i_g = jax.nn.sigmoid(gates[:, 0 * H:1 * H])
    f_g = jax.nn.sigmoid(gates[:, 1 * H:2 * H])
    g_g = jnp.tanh(gates[:, 2 * H:3 * H])
    o_g = jax.nn.sigmoid(gates[:, 3 * H:4 * H])
    c_new = f_g * c0 + i_g * g_g
    h_new = o_g * jnp.tanh(c_new)
    enc = jnp.transpose(encoder_outputs, (1, 0, 2))                     # (B,S,H)
    h_t = h_new @ params["w_attn"].T
    scores = jnp.einsum("bh,bsh->bs", h_t, enc)
    align = jax.nn.softmax(scores, axis=-1)
    context = jnp.einsum("bs,bsh->bh", align, enc)
    logits = attn_vector @ params["w_out"].T + params["b_out"]
    logp = jax.nn.log_softmax(logits, axis=-1)
    return logp, (h_new, c_new), context


def init_params(key, input_vocab_size, embed_size, hidden_size, output_size):
    ks = jax.random.split(key, 8)
    s = 0.1
    return {
        "embedding": s * jax.random.normal(ks[0], (input_vocab_size, embed_size), jnp.float32),
        # nn.LSTMCell(embed_size + hidden_size, hidden_size); gate order i,f,g,o
        "w_ih": s * jax.random.normal(ks[1], (4 * hidden_size, embed_size + hidden_size), jnp.float32),
        "w_hh": s * jax.random.normal(ks[2], (4 * hidden_size, hidden_size), jnp.float32),
        "b_ih": s * jax.random.normal(ks[3], (4 * hidden_size,), jnp.float32),
        "b_hh": s * jax.random.normal(ks[4], (4 * hidden_size,), jnp.float32),
        # Attn 'general': nn.Linear(hidden, hidden, bias=False)
        "w_attn": s * jax.random.normal(ks[5], (hidden_size, hidden_size), jnp.float32),
        # nn.Linear(hidden, output_size)
        "w_out": s * jax.random.normal(ks[6], (output_size, hidden_size), jnp.float32),
        "b_out": s * jax.random.normal(ks[7], (output_size,), jnp.float32),
    }


if __name__ == "__main__":
    # TPU-friendly small shapes; VOCAB_OUT deliberately NOT a multiple of 128 so
    # the host-side vocab padding path is exercised.
    B, E, H, S = 8, 64, 128, 16
    VOCAB_IN, VOCAB_OUT = 50, 500

    key = jax.random.PRNGKey(0)
    kp, k1, k2, k3, k4, k5 = jax.random.split(key, 6)
    params = init_params(kp, VOCAB_IN, E, H, VOCAB_OUT)

    input_seq = jax.random.randint(k1, (B,), 0, VOCAB_IN, dtype=jnp.int32)
    last_hidden = (0.1 * jax.random.normal(k2, (B, H), jnp.float32),
                   0.1 * jax.random.normal(k3, (B, H), jnp.float32))
    encoder_outputs = 0.1 * jax.random.normal(k4, (S, B, H), jnp.float32)
    attn_vector = 0.1 * jax.random.normal(k5, (B, H), jnp.float32)

    ref_logp, (ref_h, ref_c), ref_ctx = reference_forward(
        params, input_seq, last_hidden, encoder_outputs, attn_vector)

    # ---- (a) f32 weights, context on, small head tile -> 2-step online LSE + padding
    prep32 = prepare_params(params, param_dtype=jnp.float32, tile_v=256)
    enc32 = prepare_encoder(prep32, encoder_outputs)
    logp, (d_h, d_c), av_out, ctx = luong_attn_decoder_step(
        prep32, enc32, input_seq, last_hidden, attn_vector, return_context=True)
    jax.block_until_ready((logp, d_h, d_c, ctx))
    assert logp.shape == (B, VOCAB_OUT) and d_h.shape == (B, H) and d_c.shape == (B, H)
    assert float(jnp.max(jnp.abs(logp - ref_logp))) < 2e-2
    assert float(jnp.max(jnp.abs(d_h - ref_h))) < 2e-2
    assert float(jnp.max(jnp.abs(d_c - ref_c))) < 2e-2
    assert float(jnp.max(jnp.abs(ctx - ref_ctx))) < 2e-2
    assert bool(jnp.allclose(jnp.sum(jnp.exp(logp), axis=1), 1.0, atol=1e-3))

    # ---- (b) bf16 LSTM weights + int8 head, default (large) head tile, no context
    prep8 = prepare_params(params, param_dtype=jnp.bfloat16, w_out_quant="int8")
    logp8, (dh8, dc8), _ = luong_attn_decoder_step(
        prep8, None, input_seq, last_hidden, attn_vector, return_context=False)
    jax.block_until_ready((logp8, dh8, dc8))
    assert logp8.shape == (B, VOCAB_OUT)
    assert float(jnp.max(jnp.abs(logp8 - ref_logp))) < 5e-2
    assert float(jnp.max(jnp.abs(dh8 - ref_h))) < 5e-2
    assert float(jnp.max(jnp.abs(dc8 - ref_c))) < 5e-2
    assert bool(jnp.allclose(jnp.sum(jnp.exp(logp8), axis=1), 1.0, atol=1e-3))

    print("KERNEL_OK")
</pallas_src>

<mosaic_0001>
module attributes {stable_mosaic.version = 11 : i64} {
  func.func @_decoder_step_kernel(%arg0: i32, %arg1: memref<8xi32, #tpu.memory_space<smem>>, %arg2: memref<50x64xf32, #tpu.memory_space<any>>, %arg3: memref<8x128xf32, #tpu.memory_space<vmem>>, %arg4: memref<8x128xf32, #tpu.memory_space<vmem>>, %arg5: memref<8x128xf32, #tpu.memory_space<vmem>>, %arg6: memref<8x16x128xf32, #tpu.memory_space<vmem>>, %arg7: memref<8x16x128xf32, #tpu.memory_space<vmem>>, %arg8: memref<64x512xf32, #tpu.memory_space<vmem>>, %arg9: memref<128x512xf32, #tpu.memory_space<vmem>>, %arg10: memref<128x512xf32, #tpu.memory_space<vmem>>, %arg11: memref<1x512xf32, #tpu.memory_space<vmem>>, %arg12: memref<128x256xf32, #tpu.memory_space<vmem>>, %arg13: memref<1x256xf32, #tpu.memory_space<vmem>>, %arg14: memref<8x512xf32, #tpu.memory_space<vmem>>, %arg15: memref<8x128xf32, #tpu.memory_space<vmem>>, %arg16: memref<8x128xf32, #tpu.memory_space<vmem>>, %arg17: memref<8x128xf32, #tpu.memory_space<vmem>>, %arg18: memref<8x64xf32, #tpu.memory_space<vmem>>, %arg19: memref<8x!tpu.dma_semaphore, #tpu.memory_space<semaphore_mem>>, %arg20: memref<8x1xf32, #tpu.memory_space<vmem>>, %arg21: memref<8x1xf32, #tpu.memory_space<vmem>>) attributes {dimension_semantics = [#tpu.dimension_semantics<arbitrary>], iteration_bounds = array<i64: 2>, scalar_prefetch = 1 : i64, scratch_operands = 4 : i64, tpu.core_type = #tpu.core_type<tc>, window_params = [{}, {pipeline_mode = #tpu.pipeline_mode<synchronous>, transform_indices = @transform_1, window_bounds = array<i64: 8, 128>}, {pipeline_mode = #tpu.pipeline_mode<synchronous>, transform_indices = @transform_2, window_bounds = array<i64: 8, 128>}, {pipeline_mode = #tpu.pipeline_mode<synchronous>, transform_indices = @transform_3, window_bounds = array<i64: 8, 128>}, {pipeline_mode = #tpu.pipeline_mode<synchronous>, transform_indices = @transform_4, window_bounds = array<i64: 8, 16, 128>}, {pipeline_mode = #tpu.pipeline_mode<synchronous>, transform_indices = @transform_5, window_bounds = array<i64: 8, 16, 128>}, {pipeline_mode = #tpu.pipeline_mode<synchronous>, transform_indices = @transform_6, window_bounds = array<i64: 64, 512>}, {pipeline_mode = #tpu.pipeline_mode<synchronous>, transform_indices = @transform_7, window_bounds = array<i64: 128, 512>}, {pipeline_mode = #tpu.pipeline_mode<synchronous>, transform_indices = @transform_8, window_bounds = array<i64: 128, 512>}, {pipeline_mode = #tpu.pipeline_mode<synchronous>, transform_indices = @transform_9, window_bounds = array<i64: 1, 512>}, {transform_indices = @transform_10, window_bounds = array<i64: 128, 256>}, {transform_indices = @transform_11, window_bounds = array<i64: 1, 256>}, {pipeline_mode = #tpu.pipeline_mode<synchronous>, transform_indices = @transform_12, window_bounds = array<i64: 8, 512>}, {pipeline_mode = #tpu.pipeline_mode<synchronous>, transform_indices = @transform_13, window_bounds = array<i64: 8, 128>}, {pipeline_mode = #tpu.pipeline_mode<synchronous>, transform_indices = @transform_14, window_bounds = array<i64: 8, 128>}, {pipeline_mode = #tpu.pipeline_mode<synchronous>, transform_indices = @transform_15, window_bounds = array<i64: 8, 128>}]} {
    %c0_i32 = arith.constant 0 : i32
    %0 = arith.cmpi eq, %arg0, %c0_i32 : i32
    %1 = arith.extui %0 : i1 to i32
    %c0_i32_0 = arith.constant 0 : i32
    %2 = arith.cmpi ne, %1, %c0_i32_0 : i32
    scf.if %2 {
      %c0_18 = arith.constant 0 : index
      %32 = memref.load %arg1[%c0_18] : memref<8xi32, #tpu.memory_space<smem>>
      %c1 = arith.constant 1 : index
      %33 = memref.load %arg1[%c1] : memref<8xi32, #tpu.memory_space<smem>>
      %c2 = arith.constant 2 : index
      %34 = memref.load %arg1[%c2] : memref<8xi32, #tpu.memory_space<smem>>
      %c3 = arith.constant 3 : index
      %35 = memref.load %arg1[%c3] : memref<8xi32, #tpu.memory_space<smem>>
      %c4 = arith.constant 4 : index
      %36 = memref.load %arg1[%c4] : memref<8xi32, #tpu.memory_space<smem>>
      %c5 = arith.constant 5 : index
      %37 = memref.load %arg1[%c5] : memref<8xi32, #tpu.memory_space<smem>>
      %c6 = arith.constant 6 : index
      %38 = memref.load %arg1[%c6] : memref<8xi32, #tpu.memory_space<smem>>
      %c7 = arith.constant 7 : index
      %39 = memref.load %arg1[%c7] : memref<8xi32, #tpu.memory_space<smem>>
      %c0_i32_19 = arith.constant 0 : i32
      %c0_i32_20 = arith.constant 0 : i32
      %c0_i32_21 = arith.constant 0 : i32
      %40 = tpu.memref_slice %arg2[%32, %c0_i32_21] : memref<50x64xf32, #tpu.memory_space<any>> -> memref<1x64xf32, #tpu.memory_space<any>>
      %41 = tpu.memref_squeeze %40 : memref<1x64xf32, #tpu.memory_space<any>> -> memref<64xf32, #tpu.memory_space<any>>
      %c0_i32_22 = arith.constant 0 : i32
      %42 = tpu.memref_slice %arg18[%c0_i32_19, %c0_i32_22] : memref<8x64xf32, #tpu.memory_space<vmem>> -> memref<1x64xf32, #tpu.memory_space<vmem>>
      %43 = tpu.memref_squeeze %42 : memref<1x64xf32, #tpu.memory_space<vmem>> -> memref<64xf32, #tpu.memory_space<vmem>>
      %44 = tpu.memref_slice %arg19[%c0_i32_20] : memref<8x!tpu.dma_semaphore, #tpu.memory_space<semaphore_mem>> -> memref<1x!tpu.dma_semaphore, #tpu.memory_space<semaphore_mem>>
      %45 = tpu.memref_squeeze %44 : memref<1x!tpu.dma_semaphore, #tpu.memory_space<semaphore_mem>> -> memref<!tpu.dma_semaphore, #tpu.memory_space<semaphore_mem>>
      tpu.enqueue_dma source(%41 : memref<64xf32, #tpu.memory_space<any>>) target(%43 : memref<64xf32, #tpu.memory_space<vmem>>) target_semaphore(%45 : memref<!tpu.dma_semaphore, #tpu.memory_space<semaphore_mem>>)
      %c1_i32_23 = arith.constant 1 : i32
      %c1_i32_24 = arith.constant 1 : i32
      %c0_i32_25 = arith.constant 0 : i32
      %46 = tpu.memref_slice %arg2[%33, %c0_i32_25] : memref<50x64xf32, #tpu.memory_space<any>> -> memref<1x64xf32, #tpu.memory_space<any>>
      %47 = tpu.memref_squeeze %46 : memref<1x64xf32, #tpu.memory_space<any>> -> memref<64xf32, #tpu.memory_space<any>>
      %c0_i32_26 = arith.constant 0 : i32
      %48 = tpu.memref_slice %arg18[%c1_i32_23, %c0_i32_26] : memref<8x64xf32, #tpu.memory_space<vmem>> -> memref<1x64xf32, #tpu.memory_space<vmem>>
      %49 = tpu.memref_squeeze %48 : memref<1x64xf32, #tpu.memory_space<vmem>> -> memref<64xf32, #tpu.memory_space<vmem>>
      %50 = tpu.memref_slice %arg19[%c1_i32_24] : memref<8x!tpu.dma_semaphore, #tpu.memory_space<semaphore_mem>> -> memref<1x!tpu.dma_semaphore, #tpu.memory_space<semaphore_mem>>
      %51 = tpu.memref_squeeze %50 : memref<1x!tpu.dma_semaphore, #tpu.memory_space<semaphore_mem>> -> memref<!tpu.dma_semaphore, #tpu.memory_space<semaphore_mem>>
      tpu.enqueue_dma source(%47 : memref<64xf32, #tpu.memory_space<any>>) target(%49 : memref<64xf32, #tpu.memory_space<vmem>>) target_semaphore(%51 : memref<!tpu.dma_semaphore, #tpu.memory_space<semaphore_mem>>)
      %c2_i32 = arith.constant 2 : i32
      %c2_i32_27 = arith.constant 2 : i32
      %c0_i32_28 = arith.constant 0 : i32
      %52 = tpu.memref_slice %arg2[%34, %c0_i32_28] : memref<50x64xf32, #tpu.memory_space<any>> -> memref<1x64xf32, #tpu.memory_space<any>>
      %53 = tpu.memref_squeeze %52 : memref<1x64xf32, #tpu.memory_space<any>> -> memref<64xf32, #tpu.memory_space<any>>
      %c0_i32_29 = arith.constant 0 : i32
      %54 = tpu.memref_slice %arg18[%c2_i32, %c0_i32_29] : memref<8x64xf32, #tpu.memory_space<vmem>> -> memref<1x64xf32, #tpu.memory_space<vmem>>
      %55 = tpu.memref_squeeze %54 : memref<1x64xf32, #tpu.memory_space<vmem>> -> memref<64xf32, #tpu.memory_space<vmem>>
      %56 = tpu.memref_slice %arg19[%c2_i32_27] : memref<8x!tpu.dma_semaphore, #tpu.memory_space<semaphore_mem>> -> memref<1x!tpu.dma_semaphore, #tpu.memory_space<semaphore_mem>>
      %57 = tpu.memref_squeeze %56 : memref<1x!tpu.dma_semaphore, #tpu.memory_space<semaphore_mem>> -> memref<!tpu.dma_semaphore, #tpu.memory_space<semaphore_mem>>
      tpu.enqueue_dma source(%53 : memref<64xf32, #tpu.memory_space<any>>) target(%55 : memref<64xf32, #tpu.memory_space<vmem>>) target_semaphore(%57 : memref<!tpu.dma_semaphore, #tpu.memory_space<semaphore_mem>>)
      %c3_i32 = arith.constant 3 : i32
      %c3_i32_30 = arith.constant 3 : i32
      %c0_i32_31 = arith.constant 0 : i32
      %58 = tpu.memref_slice %arg2[%35, %c0_i32_31] : memref<50x64xf32, #tpu.memory_space<any>> -> memref<1x64xf32, #tpu.memory_space<any>>
      %59 = tpu.memref_squeeze %58 : memref<1x64xf32, #tpu.memory_space<any>> -> memref<64xf32, #tpu.memory_space<any>>
      %c0_i32_32 = arith.constant 0 : i32
      %60 = tpu.memref_slice %arg18[%c3_i32, %c0_i32_32] : memref<8x64xf32, #tpu.memory_space<vmem>> -> memref<1x64xf32, #tpu.memory_space<vmem>>
      %61 = tpu.memref_squeeze %60 : memref<1x64xf32, #tpu.memory_space<vmem>> -> memref<64xf32, #tpu.memory_space<vmem>>
      %62 = tpu.memref_slice %arg19[%c3_i32_30] : memref<8x!tpu.dma_semaphore, #tpu.memory_space<semaphore_mem>> -> memref<1x!tpu.dma_semaphore, #tpu.memory_space<semaphore_mem>>
      %63 = tpu.memref_squeeze %62 : memref<1x!tpu.dma_semaphore, #tpu.memory_space<semaphore_mem>> -> memref<!tpu.dma_semaphore, #tpu.memory_space<semaphore_mem>>
      tpu.enqueue_dma source(%59 : memref<64xf32, #tpu.memory_space<any>>) target(%61 : memref<64xf32, #tpu.memory_space<vmem>>) target_semaphore(%63 : memref<!tpu.dma_semaphore, #tpu.memory_space<semaphore_mem>>)
      %c4_i32 = arith.constant 4 : i32
      %c4_i32_33 = arith.constant 4 : i32
      %c0_i32_34 = arith.constant 0 : i32
      %64 = tpu.memref_slice %arg2[%36, %c0_i32_34] : memref<50x64xf32, #tpu.memory_space<any>> -> memref<1x64xf32, #tpu.memory_space<any>>
      %65 = tpu.memref_squeeze %64 : memref<1x64xf32, #tpu.memory_space<any>> -> memref<64xf32, #tpu.memory_space<any>>
      %c0_i32_35 = arith.constant 0 : i32
      %66 = tpu.memref_slice %arg18[%c4_i32, %c0_i32_35] : memref<8x64xf32, #tpu.memory_space<vmem>> -> memref<1x64xf32, #tpu.memory_space<vmem>>
      %67 = tpu.memref_squeeze %66 : memref<1x64xf32, #tpu.memory_space<vmem>> -> memref<64xf32, #tpu.memory_space<vmem>>
      %68 = tpu.memref_slice %arg19[%c4_i32_33] : memref<8x!tpu.dma_semaphore, #tpu.memory_space<semaphore_mem>> -> memref<1x!tpu.dma_semaphore, #tpu.memory_space<semaphore_mem>>
      %69 = tpu.memref_squeeze %68 : memref<1x!tpu.dma_semaphore, #tpu.memory_space<semaphore_mem>> -> memref<!tpu.dma_semaphore, #tpu.memory_space<semaphore_mem>>
      tpu.enqueue_dma source(%65 : memref<64xf32, #tpu.memory_space<any>>) target(%67 : memref<64xf32, #tpu.memory_space<vmem>>) target_semaphore(%69 : memref<!tpu.dma_semaphore, #tpu.memory_space<semaphore_mem>>)
      %c5_i32 = arith.constant 5 : i32
      %c5_i32_36 = arith.constant 5 : i32
      %c0_i32_37 = arith.constant 0 : i32
      %70 = tpu.memref_slice %arg2[%37, %c0_i32_37] : memref<50x64xf32, #tpu.memory_space<any>> -> memref<1x64xf32, #tpu.memory_space<any>>
      %71 = tpu.memref_squeeze %70 : memref<1x64xf32, #tpu.memory_space<any>> -> memref<64xf32, #tpu.memory_space<any>>
      %c0_i32_38 = arith.constant 0 : i32
      %72 = tpu.memref_slice %arg18[%c5_i32, %c0_i32_38] : memref<8x64xf32, #tpu.memory_space<vmem>> -> memref<1x64xf32, #tpu.memory_space<vmem>>
      %73 = tpu.memref_squeeze %72 : memref<1x64xf32, #tpu.memory_space<vmem>> -> memref<64xf32, #tpu.memory_space<vmem>>
      %74 = tpu.memref_slice %arg19[%c5_i32_36] : memref<8x!tpu.dma_semaphore, #tpu.memory_space<semaphore_mem>> -> memref<1x!tpu.dma_semaphore, #tpu.memory_space<semaphore_mem>>
      %75 = tpu.memref_squeeze %74 : memref<1x!tpu.dma_semaphore, #tpu.memory_space<semaphore_mem>> -> memref<!tpu.dma_semaphore, #tpu.memory_space<semaphore_mem>>
      tpu.enqueue_dma source(%71 : memref<64xf32, #tpu.memory_space<any>>) target(%73 : memref<64xf32, #tpu.memory_space<vmem>>) target_semaphore(%75 : memref<!tpu.dma_semaphore, #tpu.memory_space<semaphore_mem>>)
      %c6_i32 = arith.constant 6 : i32
      %c6_i32_39 = arith.constant 6 : i32
      %c0_i32_40 = arith.constant 0 : i32
      %76 = tpu.memref_slice %arg2[%38, %c0_i32_40] : memref<50x64xf32, #tpu.memory_space<any>> -> memref<1x64xf32, #tpu.memory_space<any>>
      %77 = tpu.memref_squeeze %76 : memref<1x64xf32, #tpu.memory_space<any>> -> memref<64xf32, #tpu.memory_space<any>>
      %c0_i32_41 = arith.constant 0 : i32
      %78 = tpu.memref_slice %arg18[%c6_i32, %c0_i32_41] : memref<8x64xf32, #tpu.memory_space<vmem>> -> memref<1x64xf32, #tpu.memory_space<vmem>>
      %79 = tpu.memref_squeeze %78 : memref<1x64xf32, #tpu.memory_space<vmem>> -> memref<64xf32, #tpu.memory_space<vmem>>
      %80 = tpu.memref_slice %arg19[%c6_i32_39] : memref<8x!tpu.dma_semaphore, #tpu.memory_space<semaphore_mem>> -> memref<1x!tpu.dma_semaphore, #tpu.memory_space<semaphore_mem>>
      %81 = tpu.memref_squeeze %80 : memref<1x!tpu.dma_semaphore, #tpu.memory_space<semaphore_mem>> -> memref<!tpu.dma_semaphore, #tpu.memory_space<semaphore_mem>>
      tpu.enqueue_dma source(%77 : memref<64xf32, #tpu.memory_space<any>>) target(%79 : memref<64xf32, #tpu.memory_space<vmem>>) target_semaphore(%81 : memref<!tpu.dma_semaphore, #tpu.memory_space<semaphore_mem>>)
      %c7_i32 = arith.constant 7 : i32
      %c7_i32_42 = arith.constant 7 : i32
      %c0_i32_43 = arith.constant 0 : i32
      %82 = tpu.memref_slice %arg2[%39, %c0_i32_43] : memref<50x64xf32, #tpu.memory_space<any>> -> memref<1x64xf32, #tpu.memory_space<any>>
      %83 = tpu.memref_squeeze %82 : memref<1x64xf32, #tpu.memory_space<any>> -> memref<64xf32, #tpu.memory_space<any>>
      %c0_i32_44 = arith.constant 0 : i32
      %84 = tpu.memref_slice %arg18[%c7_i32, %c0_i32_44] : memref<8x64xf32, #tpu.memory_space<vmem>> -> memref<1x64xf32, #tpu.memory_space<vmem>>
      %85 = tpu.memref_squeeze %84 : memref<1x64xf32, #tpu.memory_space<vmem>> -> memref<64xf32, #tpu.memory_space<vmem>>
      %86 = tpu.memref_slice %arg19[%c7_i32_42] : memref<8x!tpu.dma_semaphore, #tpu.memory_space<semaphore_mem>> -> memref<1x!tpu.dma_semaphore, #tpu.memory_space<semaphore_mem>>
      %87 = tpu.memref_squeeze %86 : memref<1x!tpu.dma_semaphore, #tpu.memory_space<semaphore_mem>> -> memref<!tpu.dma_semaphore, #tpu.memory_space<semaphore_mem>>
      tpu.enqueue_dma source(%83 : memref<64xf32, #tpu.memory_space<any>>) target(%85 : memref<64xf32, #tpu.memory_space<vmem>>) target_semaphore(%87 : memref<!tpu.dma_semaphore, #tpu.memory_space<semaphore_mem>>)
      %c0_i32_45 = arith.constant 0 : i32
      %c0_i32_46 = arith.constant 0 : i32
      %c0_i32_47 = arith.constant 0 : i32
      %88 = tpu.memref_slice %arg2[%32, %c0_i32_47] : memref<50x64xf32, #tpu.memory_space<any>> -> memref<1x64xf32, #tpu.memory_space<any>>
      %89 = tpu.memref_squeeze %88 : memref<1x64xf32, #tpu.memory_space<any>> -> memref<64xf32, #tpu.memory_space<any>>
      %c0_i32_48 = arith.constant 0 : i32
      %90 = tpu.memref_slice %arg18[%c0_i32_45, %c0_i32_48] : memref<8x64xf32, #tpu.memory_space<vmem>> -> memref<1x64xf32, #tpu.memory_space<vmem>>
      %91 = tpu.memref_squeeze %90 : memref<1x64xf32, #tpu.memory_space<vmem>> -> memref<64xf32, #tpu.memory_space<vmem>>
      %92 = tpu.memref_slice %arg19[%c0_i32_46] : memref<8x!tpu.dma_semaphore, #tpu.memory_space<semaphore_mem>> -> memref<1x!tpu.dma_semaphore, #tpu.memory_space<semaphore_mem>>
      %93 = tpu.memref_squeeze %92 : memref<1x!tpu.dma_semaphore, #tpu.memory_space<semaphore_mem>> -> memref<!tpu.dma_semaphore, #tpu.memory_space<semaphore_mem>>
      tpu.wait_dma2 semaphore(%93 : memref<!tpu.dma_semaphore, #tpu.memory_space<semaphore_mem>>) src(%89 : memref<64xf32, #tpu.memory_space<any>>) dst(%91 : memref<64xf32, #tpu.memory_space<vmem>>)
      %c1_i32_49 = arith.constant 1 : i32
      %c1_i32_50 = arith.constant 1 : i32
      %c0_i32_51 = arith.constant 0 : i32
      %94 = tpu.memref_slice %arg2[%33, %c0_i32_51] : memref<50x64xf32, #tpu.memory_space<any>> -> memref<1x64xf32, #tpu.memory_space<any>>
      %95 = tpu.memref_squeeze %94 : memref<1x64xf32, #tpu.memory_space<any>> -> memref<64xf32, #tpu.memory_space<any>>
      %c0_i32_52 = arith.constant 0 : i32
      %96 = tpu.memref_slice %arg18[%c1_i32_49, %c0_i32_52] : memref<8x64xf32, #tpu.memory_space<vmem>> -> memref<1x64xf32, #tpu.memory_space<vmem>>
      %97 = tpu.memref_squeeze %96 : memref<1x64xf32, #tpu.memory_space<vmem>> -> memref<64xf32, #tpu.memory_space<vmem>>
      %98 = tpu.memref_slice %arg19[%c1_i32_50] : memref<8x!tpu.dma_semaphore, #tpu.memory_space<semaphore_mem>> -> memref<1x!tpu.dma_semaphore, #tpu.memory_space<semaphore_mem>>
      %99 = tpu.memref_squeeze %98 : memref<1x!tpu.dma_semaphore, #tpu.memory_space<semaphore_mem>> -> memref<!tpu.dma_semaphore, #tpu.memory_space<semaphore_mem>>
      tpu.wait_dma2 semaphore(%99 : memref<!tpu.dma_semaphore, #tpu.memory_space<semaphore_mem>>) src(%95 : memref<64xf32, #tpu.memory_space<any>>) dst(%97 : memref<64xf32, #tpu.memory_space<vmem>>)
      %c2_i32_53 = arith.constant 2 : i32
      %c2_i32_54 = arith.constant 2 : i32
      %c0_i32_55 = arith.constant 0 : i32
      %100 = tpu.memref_slice %arg2[%34, %c0_i32_55] : memref<50x64xf32, #tpu.memory_space<any>> -> memref<1x64xf32, #tpu.memory_space<any>>
      %101 = tpu.memref_squeeze %100 : memref<1x64xf32, #tpu.memory_space<any>> -> memref<64xf32, #tpu.memory_space<any>>
      %c0_i32_56 = arith.constant 0 : i32
      %102 = tpu.memref_slice %arg18[%c2_i32_53, %c0_i32_56] : memref<8x64xf32, #tpu.memory_space<vmem>> -> memref<1x64xf32, #tpu.memory_space<vmem>>
      %103 = tpu.memref_squeeze %102 : memref<1x64xf32, #tpu.memory_space<vmem>> -> memref<64xf32, #tpu.memory_space<vmem>>
      %104 = tpu.memref_slice %arg19[%c2_i32_54] : memref<8x!tpu.dma_semaphore, #tpu.memory_space<semaphore_mem>> -> memref<1x!tpu.dma_semaphore, #tpu.memory_space<semaphore_mem>>
      %105 = tpu.memref_squeeze %104 : memref<1x!tpu.dma_semaphore, #tpu.memory_space<semaphore_mem>> -> memref<!tpu.dma_semaphore, #tpu.memory_space<semaphore_mem>>
      tpu.wait_dma2 semaphore(%105 : memref<!tpu.dma_semaphore, #tpu.memory_space<semaphore_mem>>) src(%101 : memref<64xf32, #tpu.memory_space<any>>) dst(%103 : memref<64xf32, #tpu.memory_space<vmem>>)
      %c3_i32_57 = arith.constant 3 : i32
      %c3_i32_58 = arith.constant 3 : i32
      %c0_i32_59 = arith.constant 0 : i32
      %106 = tpu.memref_slice %arg2[%35, %c0_i32_59] : memref<50x64xf32, #tpu.memory_space<any>> -> memref<1x64xf32, #tpu.memory_space<any>>
      %107 = tpu.memref_squeeze %106 : memref<1x64xf32, #tpu.memory_space<any>> -> memref<64xf32, #tpu.memory_space<any>>
      %c0_i32_60 = arith.constant 0 : i32
      %108 = tpu.memref_slice %arg18[%c3_i32_57, %c0_i32_60] : memref<8x64xf32, #tpu.memory_space<vmem>> -> memref<1x64xf32, #tpu.memory_space<vmem>>
      %109 = tpu.memref_squeeze %108 : memref<1x64xf32, #tpu.memory_space<vmem>> -> memref<64xf32, #tpu.memory_space<vmem>>
      %110 = tpu.memref_slice %arg19[%c3_i32_58] : memref<8x!tpu.dma_semaphore, #tpu.memory_space<semaphore_mem>> -> memref<1x!tpu.dma_semaphore, #tpu.memory_space<semaphore_mem>>
      %111 = tpu.memref_squeeze %110 : memref<1x!tpu.dma_semaphore, #tpu.memory_space<semaphore_mem>> -> memref<!tpu.dma_semaphore, #tpu.memory_space<semaphore_mem>>
      tpu.wait_dma2 semaphore(%111 : memref<!tpu.dma_semaphore, #tpu.memory_space<semaphore_mem>>) src(%107 : memref<64xf32, #tpu.memory_space<any>>) dst(%109 : memref<64xf32, #tpu.memory_space<vmem>>)
      %c4_i32_61 = arith.constant 4 : i32
      %c4_i32_62 = arith.constant 4 : i32
      %c0_i32_63 = arith.constant 0 : i32
      %112 = tpu.memref_slice %arg2[%36, %c0_i32_63] : memref<50x64xf32, #tpu.memory_space<any>> -> memref<1x64xf32, #tpu.memory_space<any>>
      %113 = tpu.memref_squeeze %112 : memref<1x64xf32, #tpu.memory_space<any>> -> memref<64xf32, #tpu.memory_space<any>>
      %c0_i32_64 = arith.constant 0 : i32
      %114 = tpu.memref_slice %arg18[%c4_i32_61, %c0_i32_64] : memref<8x64xf32, #tpu.memory_space<vmem>> -> memref<1x64xf32, #tpu.memory_space<vmem>>
      %115 = tpu.memref_squeeze %114 : memref<1x64xf32, #tpu.memory_space<vmem>> -> memref<64xf32, #tpu.memory_space<vmem>>
      %116 = tpu.memref_slice %arg19[%c4_i32_62] : memref<8x!tpu.dma_semaphore, #tpu.memory_space<semaphore_mem>> -> memref<1x!tpu.dma_semaphore, #tpu.memory_space<semaphore_mem>>
      %117 = tpu.memref_squeeze %116 : memref<1x!tpu.dma_semaphore, #tpu.memory_space<semaphore_mem>> -> memref<!tpu.dma_semaphore, #tpu.memory_space<semaphore_mem>>
      tpu.wait_dma2 semaphore(%117 : memref<!tpu.dma_semaphore, #tpu.memory_space<semaphore_mem>>) src(%113 : memref<64xf32, #tpu.memory_space<any>>) dst(%115 : memref<64xf32, #tpu.memory_space<vmem>>)
      %c5_i32_65 = arith.constant 5 : i32
      %c5_i32_66 = arith.constant 5 : i32
      %c0_i32_67 = arith.constant 0 : i32
      %118 = tpu.memref_slice %arg2[%37, %c0_i32_67] : memref<50x64xf32, #tpu.memory_space<any>> -> memref<1x64xf32, #tpu.memory_space<any>>
      %119 = tpu.memref_squeeze %118 : memref<1x64xf32, #tpu.memory_space<any>> -> memref<64xf32, #tpu.memory_space<any>>
      %c0_i32_68 = arith.constant 0 : i32
      %120 = tpu.memref_slice %arg18[%c5_i32_65, %c0_i32_68] : memref<8x64xf32, #tpu.memory_space<vmem>> -> memref<1x64xf32, #tpu.memory_space<vmem>>
      %121 = tpu.memref_squeeze %120 : memref<1x64xf32, #tpu.memory_space<vmem>> -> memref<64xf32, #tpu.memory_space<vmem>>
      %122 = tpu.memref_slice %arg19[%c5_i32_66] : memref<8x!tpu.dma_semaphore, #tpu.memory_space<semaphore_mem>> -> memref<1x!tpu.dma_semaphore, #tpu.memory_space<semaphore_mem>>
      %123 = tpu.memref_squeeze %122 : memref<1x!tpu.dma_semaphore, #tpu.memory_space<semaphore_mem>> -> memref<!tpu.dma_semaphore, #tpu.memory_space<semaphore_mem>>
      tpu.wait_dma2 semaphore(%123 : memref<!tpu.dma_semaphore, #tpu.memory_space<semaphore_mem>>) src(%119 : memref<64xf32, #tpu.memory_space<any>>) dst(%121 : memref<64xf32, #tpu.memory_space<vmem>>)
      %c6_i32_69 = arith.constant 6 : i32
      %c6_i32_70 = arith.constant 6 : i32
      %c0_i32_71 = arith.constant 0 : i32
      %124 = tpu.memref_slice %arg2[%38, %c0_i32_71] : memref<50x64xf32, #tpu.memory_space<any>> -> memref<1x64xf32, #tpu.memory_space<any>>
      %125 = tpu.memref_squeeze %124 : memref<1x64xf32, #tpu.memory_space<any>> -> memref<64xf32, #tpu.memory_space<any>>
      %c0_i32_72 = arith.constant 0 : i32
      %126 = tpu.memref_slice %arg18[%c6_i32_69, %c0_i32_72] : memref<8x64xf32, #tpu.memory_space<vmem>> -> memref<1x64xf32, #tpu.memory_space<vmem>>
      %127 = tpu.memref_squeeze %126 : memref<1x64xf32, #tpu.memory_space<vmem>> -> memref<64xf32, #tpu.memory_space<vmem>>
      %128 = tpu.memref_slice %arg19[%c6_i32_70] : memref<8x!tpu.dma_semaphore, #tpu.memory_space<semaphore_mem>> -> memref<1x!tpu.dma_semaphore, #tpu.memory_space<semaphore_mem>>
      %129 = tpu.memref_squeeze %128 : memref<1x!tpu.dma_semaphore, #tpu.memory_space<semaphore_mem>> -> memref<!tpu.dma_semaphore, #tpu.memory_space<semaphore_mem>>
      tpu.wait_dma2 semaphore(%129 : memref<!tpu.dma_semaphore, #tpu.memory_space<semaphore_mem>>) src(%125 : memref<64xf32, #tpu.memory_space<any>>) dst(%127 : memref<64xf32, #tpu.memory_space<vmem>>)
      %c7_i32_73 = arith.constant 7 : i32
      %c7_i32_74 = arith.constant 7 : i32
      %c0_i32_75 = arith.constant 0 : i32
      %130 = tpu.memref_slice %arg2[%39, %c0_i32_75] : memref<50x64xf32, #tpu.memory_space<any>> -> memref<1x64xf32, #tpu.memory_space<any>>
      %131 = tpu.memref_squeeze %130 : memref<1x64xf32, #tpu.memory_space<any>> -> memref<64xf32, #tpu.memory_space<any>>
      %c0_i32_76 = arith.constant 0 : i32
      %132 = tpu.memref_slice %arg18[%c7_i32_73, %c0_i32_76] : memref<8x64xf32, #tpu.memory_space<vmem>> -> memref<1x64xf32, #tpu.memory_space<vmem>>
      %133 = tpu.memref_squeeze %132 : memref<1x64xf32, #tpu.memory_space<vmem>> -> memref<64xf32, #tpu.memory_space<vmem>>
      %134 = tpu.memref_slice %arg19[%c7_i32_74] : memref<8x!tpu.dma_semaphore, #tpu.memory_space<semaphore_mem>> -> memref<1x!tpu.dma_semaphore, #tpu.memory_space<semaphore_mem>>
      %135 = tpu.memref_squeeze %134 : memref<1x!tpu.dma_semaphore, #tpu.memory_space<semaphore_mem>> -> memref<!tpu.dma_semaphore, #tpu.memory_space<semaphore_mem>>
      tpu.wait_dma2 semaphore(%135 : memref<!tpu.dma_semaphore, #tpu.memory_space<semaphore_mem>>) src(%131 : memref<64xf32, #tpu.memory_space<any>>) dst(%133 : memref<64xf32, #tpu.memory_space<vmem>>)
      %c0_77 = arith.constant 0 : index
      %c0_78 = arith.constant 0 : index
      %136 = vector.load %arg18[%c0_77, %c0_78] : memref<8x64xf32, #tpu.memory_space<vmem>>, vector<8x64xf32>
      %c0_79 = arith.constant 0 : index
      %c0_80 = arith.constant 0 : index
      %137 = vector.load %arg8[%c0_79, %c0_80] : memref<64x512xf32, #tpu.memory_space<vmem>>, vector<64x512xf32>
      %cst_81 = arith.constant dense<0.000000e+00> : vector<8x512xf32>
      %138 = tpu.matmul %136, %137, %cst_81 {dimension_numbers = #tpu.dot_dimension_numbers<[1], [0], [0], [1], [0, 0, 1, 1], [], []>} : vector<8x64xf32>, vector<64x512xf32>, vector<8x512xf32> -> vector<8x512xf32>
      %c0_82 = arith.constant 0 : index
      %c0_83 = arith.constant 0 : index
      %139 = vector.load %arg3[%c0_82, %c0_83] : memref<8x128xf32, #tpu.memory_space<vmem>>, vector<8x128xf32>
      %c0_84 = arith.constant 0 : index
      %c0_85 = arith.constant 0 : index
      %140 = vector.load %arg9[%c0_84, %c0_85] : memref<128x512xf32, #tpu.memory_space<vmem>>, vector<128x512xf32>
      %cst_86 = arith.constant dense<0.000000e+00> : vector<8x512xf32>
      %141 = tpu.matmul %139, %140, %cst_86 {dimension_numbers = #tpu.dot_dimension_numbers<[1], [0], [0], [1], [0, 0, 1, 1], [], []>} : vector<8x128xf32>, vector<128x512xf32>, vector<8x512xf32> -> vector<8x512xf32>
      %142 = arith.addf %138, %141 : vector<8x512xf32>
      %c0_87 = arith.constant 0 : index
      %c0_88 = arith.constant 0 : index
      %143 = vector.load %arg4[%c0_87, %c0_88] : memref<8x128xf32, #tpu.memory_space<vmem>>, vector<8x128xf32>
      %c0_89 = arith.constant 0 : index
      %c0_90 = arith.constant 0 : index
      %144 = vector.load %arg10[%c0_89, %c0_90] : memref<128x512xf32, #tpu.memory_space<vmem>>, vector<128x512xf32>
      %cst_91 = arith.constant dense<0.000000e+00> : vector<8x512xf32>
      %145 = tpu.matmul %143, %144, %cst_91 {dimension_numbers = #tpu.dot_dimension_numbers<[1], [0], [0], [1], [0, 0, 1, 1], [], []>} : vector<8x128xf32>, vector<128x512xf32>, vector<8x512xf32> -> vector<8x512xf32>
      %146 = arith.addf %142, %145 : vector<8x512xf32>
      %c0_92 = arith.constant 0 : index
      %c0_93 = arith.constant 0 : index
      %147 = vector.load %arg11[%c0_92, %c0_93] : memref<1x512xf32, #tpu.memory_space<vmem>>, vector<1x512xf32>
      %148 = vector.broadcast %147 : vector<1x512xf32> to vector<8x512xf32>
      %149 = arith.addf %146, %148 : vector<8x512xf32>
      %150 = vector.extract_strided_slice %149 {offsets = [0, 0], sizes = [8, 128], strides = [1, 1]} : vector<8x512xf32> to vector<8x128xf32>
      %151 = arith.negf %150 : vector<8x128xf32>
      %152 = math.exp %151 : vector<8x128xf32>
      %cst_94 = arith.constant 1.000000e+00 : f32
      %153 = vector.broadcast %cst_94 : f32 to vector<8x128xf32>
      %154 = arith.addf %153, %152 : vector<8x128xf32>
      %155 = arith.divf %153, %154 : vector<8x128xf32>
      %156 = vector.extract_strided_slice %149 {offsets = [0, 128], sizes = [8, 128], strides = [1, 1]} : vector<8x512xf32> to vector<8x128xf32>
      %157 = arith.negf %156 : vector<8x128xf32>
      %158 = math.exp %157 : vector<8x128xf32>
      %cst_95 = arith.constant 1.000000e+00 : f32
      %159 = vector.broadcast %cst_95 : f32 to vector<8x128xf32>
      %160 = arith.addf %159, %158 : vector<8x128xf32>
      %161 = arith.divf %159, %160 : vector<8x128xf32>
      %162 = vector.extract_strided_slice %149 {offsets = [0, 256], sizes = [8, 128], strides = [1, 1]} : vector<8x512xf32> to vector<8x128xf32>
      %163 = math.tanh %162 : vector<8x128xf32>
      %164 = vector.extract_strided_slice %149 {offsets = [0, 384], sizes = [8, 128], strides = [1, 1]} : vector<8x512xf32> to vector<8x128xf32>
      %165 = arith.negf %164 : vector<8x128xf32>
      %166 = math.exp %165 : vector<8x128xf32>
      %cst_96 = arith.constant 1.000000e+00 : f32
      %167 = vector.broadcast %cst_96 : f32 to vector<8x128xf32>
      %168 = arith.addf %167, %166 : vector<8x128xf32>
      %169 = arith.divf %167, %168 : vector<8x128xf32>
      %c0_97 = arith.constant 0 : index
      %c0_98 = arith.constant 0 : index
      %170 = vector.load %arg5[%c0_97, %c0_98] : memref<8x128xf32, #tpu.memory_space<vmem>>, vector<8x128xf32>
      %171 = arith.mulf %161, %170 : vector<8x128xf32>
      %172 = arith.mulf %155, %163 : vector<8x128xf32>
      %173 = arith.addf %171, %172 : vector<8x128xf32>
      %174 = math.tanh %173 : vector<8x128xf32>
      %175 = arith.mulf %169, %174 : vector<8x128xf32>
      %c0_99 = arith.constant 0 : index
      %c0_100 = arith.constant 0 : index
      %176 = vector.load %arg15[%c0_99, %c0_100] : memref<8x128xf32, #tpu.memory_space<vmem>>, vector<8x128xf32>
      tpu.vector_store %arg15[%c0_99, %c0_100], %175 {strides = array<i32>} : memref<8x128xf32, #tpu.memory_space<vmem>>, vector<8x128xf32>,
      %c0_101 = arith.constant 0 : index
      %c0_102 = arith.constant 0 : index
      %177 = vector.load %arg16[%c0_101, %c0_102] : memref<8x128xf32, #tpu.memory_space<vmem>>, vector<8x128xf32>
      tpu.vector_store %arg16[%c0_101, %c0_102], %173 {strides = array<i32>} : memref<8x128xf32, #tpu.memory_space<vmem>>, vector<8x128xf32>,
      %178 = vector.shape_cast %175 : vector<8x128xf32> to vector<8x1x128xf32>
      %c0_103 = arith.constant 0 : index
      %c0_104 = arith.constant 0 : index
      %c0_105 = arith.constant 0 : index
      %179 = vector.load %arg6[%c0_103, %c0_104, %c0_105] : memref<8x16x128xf32, #tpu.memory_space<vmem>>, vector<8x16x128xf32>
      "tpu.trace_start"() <{level = 10 : i32, message = "bqh,bsh->bqs"}> : () -> ()
      %cst_106 = arith.constant dense<0.000000e+00> : vector<8x1x16xf32>
      %180 = tpu.matmul %178, %179, %cst_106 {dimension_numbers = #tpu.dot_dimension_numbers<[2], [2], [1], [1], [0, 0, 0, 1, 1, 1], [0], [0]>} : vector<8x1x128xf32>, vector<8x16x128xf32>, vector<8x1x16xf32> -> vector<8x1x16xf32>
      "tpu.trace_stop"() : () -> ()
      %cst_107 = arith.constant dense<0xFF800000> : vector<8x1xf32>
      %181 = vector.multi_reduction <maximumf>, %180, %cst_107 [2] : vector<8x1x16xf32> to vector<8x1xf32>
      %182 = vector.shape_cast %181 : vector<8x1xf32> to vector<8x1x1xf32>
      %183 = vector.broadcast %182 : vector<8x1x1xf32> to vector<8x1x16xf32>
      %184 = arith.subf %180, %183 : vector<8x1x16xf32>
      %185 = math.exp %184 : vector<8x1x16xf32>
      %cst_108 = arith.constant dense<0.000000e+00> : vector<8x1xf32>
      %186 = vector.multi_reduction <add>, %185, %cst_108 [2] : vector<8x1x16xf32> to vector<8x1xf32>
      %187 = vector.shape_cast %186 : vector<8x1xf32> to vector<8x1x1xf32>
      %188 = vector.broadcast %187 : vector<8x1x1xf32> to vector<8x1x16xf32>
      %189 = arith.divf %185, %188 : vector<8x1x16xf32>
      %c0_109 = arith.constant 0 : index
      %c0_110 = arith.constant 0 : index
      %c0_111 = arith.constant 0 : index
      %190 = vector.load %arg7[%c0_109, %c0_110, %c0_111] : memref<8x16x128xf32, #tpu.memory_space<vmem>>, vector<8x16x128xf32>
      "tpu.trace_start"() <{level = 10 : i32, message = "bqs,bsh->bqh"}> : () -> ()
      %cst_112 = arith.constant dense<0.000000e+00> : vector<8x1x128xf32>
      %191 = tpu.matmul %189, %190, %cst_112 {dimension_numbers = #tpu.dot_dimension_numbers<[2], [1], [1], [2], [0, 0, 0, 1, 1, 2], [0], [0]>} : vector<8x1x16xf32>, vector<8x16x128xf32>, vector<8x1x128xf32> -> vector<8x1x128xf32>
      "tpu.trace_stop"() : () -> ()
      %192 = vector.shape_cast %191 : vector<8x1x128xf32> to vector<8x128xf32>
      %c0_113 = arith.constant 0 : index
      %c0_114 = arith.constant 0 : index
      %193 = vector.load %arg17[%c0_113, %c0_114] : memref<8x128xf32, #tpu.memory_space<vmem>>, vector<8x128xf32>
      tpu.vector_store %arg17[%c0_113, %c0_114], %192 {strides = array<i32>} : memref<8x128xf32, #tpu.memory_space<vmem>>, vector<8x128xf32>,
      %cst_115 = arith.constant 0xFF800000 : f32
      %194 = vector.broadcast %cst_115 : f32 to vector<8x1xf32>
      %c0_116 = arith.constant 0 : index
      %c0_117 = arith.constant 0 : index
      %195 = vector.load %arg20[%c0_116, %c0_117] : memref<8x1xf32, #tpu.memory_space<vmem>>, vector<8x1xf32>
      tpu.vector_store %arg20[%c0_116, %c0_117], %194 {strides = array<i32>} : memref<8x1xf32, #tpu.memory_space<vmem>>, vector<8x1xf32>,
      %cst_118 = arith.constant 0.000000e+00 : f32
      %196 = vector.broadcast %cst_118 : f32 to vector<8x1xf32>
      %c0_119 = arith.constant 0 : index
      %c0_120 = arith.constant 0 : index
      %197 = vector.load %arg21[%c0_119, %c0_120] : memref<8x1xf32, #tpu.memory_space<vmem>>, vector<8x1xf32>
      tpu.vector_store %arg21[%c0_119, %c0_120], %196 {strides = array<i32>} : memref<8x1xf32, #tpu.memory_space<vmem>>, vector<8x1xf32>,
    } else {
    }
    %c0 = arith.constant 0 : index
    %c0_1 = arith.constant 0 : index
    %3 = vector.load %arg3[%c0, %c0_1] : memref<8x128xf32, #tpu.memory_space<vmem>>, vector<8x128xf32>
    %c0_2 = arith.constant 0 : index
    %c0_3 = arith.constant 0 : index
    %4 = vector.load %arg12[%c0_2, %c0_3] : memref<128x256xf32, #tpu.memory_space<vmem>>, vector<128x256xf32>
    %cst = arith.constant dense<0.000000e+00> : vector<8x256xf32>
    %5 = tpu.matmul %3, %4, %cst {dimension_numbers = #tpu.dot_dimension_numbers<[1], [0], [0], [1], [0, 0, 1, 1], [], []>} : vector<8x128xf32>, vector<128x256xf32>, vector<8x256xf32> -> vector<8x256xf32>
    %c0_4 = arith.constant 0 : index
    %c0_5 = arith.constant 0 : index
    %6 = vector.load %arg13[%c0_4, %c0_5] : memref<1x256xf32, #tpu.memory_space<vmem>>, vector<1x256xf32>
    %7 = vector.broadcast %6 : vector<1x256xf32> to vector<8x256xf32>
    %8 = arith.addf %5, %7 : vector<8x256xf32>
    %c256_i32 = arith.constant 256 : i32
    %9 = arith.muli %arg0, %c256_i32 : i32
    %10 = tpu.assume_multiple %9, 128 : i32
    %c0_6 = arith.constant 0 : index
    %11 = arith.index_cast %10 : i32 to index
    %12 = vector.load %arg14[%c0_6, %11] : memref<8x512xf32, #tpu.memory_space<vmem>>, vector<8x256xf32>
    tpu.vector_store %arg14[%c0_6, %11], %8 {strides = array<i32>} : memref<8x512xf32, #tpu.memory_space<vmem>>, vector<8x256xf32>,
    %c0_7 = arith.constant 0 : index
    %c0_8 = arith.constant 0 : index
    %13 = vector.load %arg20[%c0_7, %c0_8] : memref<8x1xf32, #tpu.memory_space<vmem>>, vector<8x1xf32>
    %cst_9 = arith.constant dense<0xFF800000> : vector<8xf32>
    %14 = vector.multi_reduction <maximumf>, %8, %cst_9 [1] : vector<8x256xf32> to vector<8xf32>
    %15 = vector.shape_cast %14 : vector<8xf32> to vector<8x1xf32>
    %16 = arith.maximumf %13, %15 : vector<8x1xf32>
    %c0_10 = arith.constant 0 : index
    %c0_11 = arith.constant 0 : index
    %17 = vector.load %arg21[%c0_10, %c0_11] : memref<8x1xf32, #tpu.memory_space<vmem>>, vector<8x1xf32>
    %18 = arith.subf %13, %16 : vector<8x1xf32>
    %19 = math.exp %18 : vector<8x1xf32>
    %20 = arith.mulf %17, %19 : vector<8x1xf32>
    %21 = vector.broadcast %16 : vector<8x1xf32> to vector<8x256xf32>
    %22 = arith.subf %8, %21 : vector<8x256xf32>
    %23 = math.exp %22 : vector<8x256xf32>
    %cst_12 = arith.constant dense<0.000000e+00> : vector<8xf32>
    %24 = vector.multi_reduction <add>, %23, %cst_12 [1] : vector<8x256xf32> to vector<8xf32>
    %25 = vector.shape_cast %24 : vector<8xf32> to vector<8x1xf32>
    %26 = arith.addf %20, %25 : vector<8x1xf32>
    %c0_13 = arith.constant 0 : index
    %c0_14 = arith.constant 0 : index
    %27 = vector.load %arg21[%c0_13, %c0_14] : memref<8x1xf32, #tpu.memory_space<vmem>>, vector<8x1xf32>
    tpu.vector_store %arg21[%c0_13, %c0_14], %26 {strides = array<i32>} : memref<8x1xf32, #tpu.memory_space<vmem>>, vector<8x1xf32>,
    %c0_15 = arith.constant 0 : index
    %c0_16 = arith.constant 0 : index
    %28 = vector.load %arg20[%c0_15, %c0_16] : memref<8x1xf32, #tpu.memory_space<vmem>>, vector<8x1xf32>
    tpu.vector_store %arg20[%c0_15, %c0_16], %16 {strides = array<i32>} : memref<8x1xf32, #tpu.memory_space<vmem>>, vector<8x1xf32>,
    %c1_i32 = arith.constant 1 : i32
    %29 = arith.cmpi eq, %arg0, %c1_i32 : i32
    %30 = arith.extui %29 : i1 to i32
    %c0_i32_17 = arith.constant 0 : i32
    %31 = arith.cmpi ne, %30, %c0_i32_17 : i32
    scf.if %31 {
      %c0_18 = arith.constant 0 : index
      %c0_19 = arith.constant 0 : index
      %32 = vector.load %arg14[%c0_18, %c0_19] : memref<8x512xf32, #tpu.memory_space<vmem>>, vector<8x512xf32>
      %c0_20 = arith.constant 0 : index
      %c0_21 = arith.constant 0 : index
      %33 = vector.load %arg20[%c0_20, %c0_21] : memref<8x1xf32, #tpu.memory_space<vmem>>, vector<8x1xf32>
      %c0_22 = arith.constant 0 : index
      %c0_23 = arith.constant 0 : index
      %34 = vector.load %arg21[%c0_22, %c0_23] : memref<8x1xf32, #tpu.memory_space<vmem>>, vector<8x1xf32>
      %35 = math.log %34 : vector<8x1xf32>
      %36 = arith.addf %33, %35 : vector<8x1xf32>
      %37 = vector.broadcast %36 : vector<8x1xf32> to vector<8x512xf32>
      %38 = arith.subf %32, %37 : vector<8x512xf32>
      %c0_24 = arith.constant 0 : index
      %c0_25 = arith.constant 0 : index
      %39 = vector.load %arg14[%c0_24, %c0_25] : memref<8x512xf32, #tpu.memory_space<vmem>>, vector<8x512xf32>
      tpu.vector_store %arg14[%c0_24, %c0_25], %38 {strides = array<i32>} : memref<8x512xf32, #tpu.memory_space<vmem>>, vector<8x512xf32>,
    } else {
    }
    return
  }
  func.func @transform_1(%arg0: i32, %arg1: memref<8xi32, #tpu.memory_space<smem>>) -> (i32, i32) {
    %c0_i32 = arith.constant 0 : i32
    %c0_i32_0 = arith.constant 0 : i32
    %c0_i32_1 = arith.constant 0 : i32
    return %c0_i32, %c0_i32_0 : i32, i32
  }
  func.func @transform_2(%arg0: i32, %arg1: memref<8xi32, #tpu.memory_space<smem>>) -> (i32, i32) {
    %c0_i32 = arith.constant 0 : i32
    %c0_i32_0 = arith.constant 0 : i32
    %c0_i32_1 = arith.constant 0 : i32
    return %c0_i32, %c0_i32_0 : i32, i32
  }
  func.func @transform_3(%arg0: i32, %arg1: memref<8xi32, #tpu.memory_space<smem>>) -> (i32, i32) {
    %c0_i32 = arith.constant 0 : i32
    %c0_i32_0 = arith.constant 0 : i32
    %c0_i32_1 = arith.constant 0 : i32
    return %c0_i32, %c0_i32_0 : i32, i32
  }
  func.func @transform_4(%arg0: i32, %arg1: memref<8xi32, #tpu.memory_space<smem>>) -> (i32, i32, i32) {
    %c0_i32 = arith.constant 0 : i32
    %c0_i32_0 = arith.constant 0 : i32
    %c0_i32_1 = arith.constant 0 : i32
    %c0_i32_2 = arith.constant 0 : i32
    return %c0_i32, %c0_i32_0, %c0_i32_1 : i32, i32, i32
  }
  func.func @transform_5(%arg0: i32, %arg1: memref<8xi32, #tpu.memory_space<smem>>) -> (i32, i32, i32) {
    %c0_i32 = arith.constant 0 : i32
    %c0_i32_0 = arith.constant 0 : i32
    %c0_i32_1 = arith.constant 0 : i32
    %c0_i32_2 = arith.constant 0 : i32
    return %c0_i32, %c0_i32_0, %c0_i32_1 : i32, i32, i32
  }
  func.func @transform_6(%arg0: i32, %arg1: memref<8xi32, #tpu.memory_space<smem>>) -> (i32, i32) {
    %c0_i32 = arith.constant 0 : i32
    %c0_i32_0 = arith.constant 0 : i32
    %c0_i32_1 = arith.constant 0 : i32
    return %c0_i32, %c0_i32_0 : i32, i32
  }
  func.func @transform_7(%arg0: i32, %arg1: memref<8xi32, #tpu.memory_space<smem>>) -> (i32, i32) {
    %c0_i32 = arith.constant 0 : i32
    %c0_i32_0 = arith.constant 0 : i32
    %c0_i32_1 = arith.constant 0 : i32
    return %c0_i32, %c0_i32_0 : i32, i32
  }
  func.func @transform_8(%arg0: i32, %arg1: memref<8xi32, #tpu.memory_space<smem>>) -> (i32, i32) {
    %c0_i32 = arith.constant 0 : i32
    %c0_i32_0 = arith.constant 0 : i32
    %c0_i32_1 = arith.constant 0 : i32
    return %c0_i32, %c0_i32_0 : i32, i32
  }
  func.func @transform_9(%arg0: i32, %arg1: memref<8xi32, #tpu.memory_space<smem>>) -> (i32, i32) {
    %c0_i32 = arith.constant 0 : i32
    %c0_i32_0 = arith.constant 0 : i32
    %c0_i32_1 = arith.constant 0 : i32
    return %c0_i32, %c0_i32_0 : i32, i32
  }
  func.func @transform_10(%arg0: i32, %arg1: memref<8xi32, #tpu.memory_space<smem>>) -> (i32, i32) {
    %c0_i32 = arith.constant 0 : i32
    %c0_i32_0 = arith.constant 0 : i32
    return %c0_i32, %arg0 : i32, i32
  }
  func.func @transform_11(%arg0: i32, %arg1: memref<8xi32, #tpu.memory_space<smem>>) -> (i32, i32) {
    %c0_i32 = arith.constant 0 : i32
    %c0_i32_0 = arith.constant 0 : i32
    return %c0_i32, %arg0 : i32, i32
  }
  func.func @transform_12(%arg0: i32, %arg1: memref<8xi32, #tpu.memory_space<smem>>) -> (i32, i32) {
    %c0_i32 = arith.constant 0 : i32
    %c0_i32_0 = arith.constant 0 : i32
    %c0_i32_1 = arith.constant 0 : i32
    return %c0_i32, %c0_i32_0 : i32, i32
  }
  func.func @transform_13(%arg0: i32, %arg1: memref<8xi32, #tpu.memory_space<smem>>) -> (i32, i32) {
    %c0_i32 = arith.constant 0 : i32
    %c0_i32_0 = arith.constant 0 : i32
    %c0_i32_1 = arith.constant 0 : i32
    return %c0_i32, %c0_i32_0 : i32, i32
  }
  func.func @transform_14(%arg0: i32, %arg1: memref<8xi32, #tpu.memory_space<smem>>) -> (i32, i32) {
    %c0_i32 = arith.constant 0 : i32
    %c0_i32_0 = arith.constant 0 : i32
    %c0_i32_1 = arith.constant 0 : i32
    return %c0_i32, %c0_i32_0 : i32, i32
  }
  func.func @transform_15(%arg0: i32, %arg1: memref<8xi32, #tpu.memory_space<smem>>) -> (i32, i32) {
    %c0_i32 = arith.constant 0 : i32
    %c0_i32_0 = arith.constant 0 : i32
    %c0_i32_1 = arith.constant 0 : i32
    return %c0_i32, %c0_i32_0 : i32, i32
  }
}

module attributes {stable_mosaic.version = 11 : i64} {
  func.func @_decoder_step_kernel(%arg0: i32, %arg1: memref<8xi32, #tpu.memory_space<smem>>, %arg2: memref<50x64xf32, #tpu.memory_space<any>>, %arg3: memref<8x128xf32, #tpu.memory_space<vmem>>, %arg4: memref<8x128xf32, #tpu.memory_space<vmem>>, %arg5: memref<8x128xf32, #tpu.memory_space<vmem>>, %arg6: memref<8x16x128xf32, #tpu.memory_space<vmem>>, %arg7: memref<8x16x128xf32, #tpu.memory_space<vmem>>, %arg8: memref<64x512xf32, #tpu.memory_space<vmem>>, %arg9: memref<128x512xf32, #tpu.memory_space<vmem>>, %arg10: memref<128x512xf32, #tpu.memory_space<vmem>>, %arg11: memref<1x512xf32, #tpu.memory_space<vmem>>, %arg12: memref<128x256xf32, #tpu.memory_space<vmem>>, %arg13: memref<1x256xf32, #tpu.memory_space<vmem>>, %arg14: memref<8x512xf32, #tpu.memory_space<vmem>>, %arg15: memref<8x128xf32, #tpu.memory_space<vmem>>, %arg16: memref<8x128xf32, #tpu.memory_space<vmem>>, %arg17: memref<8x128xf32, #tpu.memory_space<vmem>>, %arg18: memref<8x64xf32, #tpu.memory_space<vmem>>, %arg19: memref<8x!tpu.dma_semaphore, #tpu.memory_space<semaphore_mem>>, %arg20: memref<8x1xf32, #tpu.memory_space<vmem>>, %arg21: memref<8x1xf32, #tpu.memory_space<vmem>>) attributes {dimension_semantics = [#tpu.dimension_semantics<arbitrary>], iteration_bounds = array<i64: 2>, scalar_prefetch = 1 : i64, scratch_operands = 4 : i64, tpu.core_type = #tpu.core_type<tc>, window_params = [{}, {pipeline_mode = #tpu.pipeline_mode<synchronous>, transform_indices = @transform_1, window_bounds = array<i64: 8, 128>}, {pipeline_mode = #tpu.pipeline_mode<synchronous>, transform_indices = @transform_2, window_bounds = array<i64: 8, 128>}, {pipeline_mode = #tpu.pipeline_mode<synchronous>, transform_indices = @transform_3, window_bounds = array<i64: 8, 128>}, {pipeline_mode = #tpu.pipeline_mode<synchronous>, transform_indices = @transform_4, window_bounds = array<i64: 8, 16, 128>}, {pipeline_mode = #tpu.pipeline_mode<synchronous>, transform_indices = @transform_5, window_bounds = array<i64: 8, 16, 128>}, {pipeline_mode = #tpu.pipeline_mode<synchronous>, transform_indices = @transform_6, window_bounds = array<i64: 64, 512>}, {pipeline_mode = #tpu.pipeline_mode<synchronous>, transform_indices = @transform_7, window_bounds = array<i64: 128, 512>}, {pipeline_mode = #tpu.pipeline_mode<synchronous>, transform_indices = @transform_8, window_bounds = array<i64: 128, 512>}, {pipeline_mode = #tpu.pipeline_mode<synchronous>, transform_indices = @transform_9, window_bounds = array<i64: 1, 512>}, {transform_indices = @transform_10, window_bounds = array<i64: 128, 256>}, {transform_indices = @transform_11, window_bounds = array<i64: 1, 256>}, {pipeline_mode = #tpu.pipeline_mode<synchronous>, transform_indices = @transform_12, window_bounds = array<i64: 8, 512>}, {pipeline_mode = #tpu.pipeline_mode<synchronous>, transform_indices = @transform_13, window_bounds = array<i64: 8, 128>}, {pipeline_mode = #tpu.pipeline_mode<synchronous>, transform_indices = @transform_14, window_bounds = array<i64: 8, 128>}, {pipeline_mode = #tpu.pipeline_mode<synchronous>, transform_indices = @transform_15, window_bounds = array<i64: 8, 128>}]} {
    %c0_i32 = arith.constant 0 : i32
    %0 = arith.cmpi eq, %arg0, %c0_i32 : i32
    %1 = arith.extui %0 : i1 to i32
    %c0_i32_0 = arith.constant 0 : i32
    %2 = arith.cmpi ne, %1, %c0_i32_0 : i32
    scf.if %2 {
      %c0_18 = arith.constant 0 : index
      %32 = memref.load %arg1[%c0_18] : memref<8xi32, #tpu.memory_space<smem>>
      %c1 = arith.constant 1 : index
      %33 = memref.load %arg1[%c1] : memref<8xi32, #tpu.memory_space<smem>>
      %c2 = arith.constant 2 : index
      %34 = memref.load %arg1[%c2] : memref<8xi32, #tpu.memory_space<smem>>
      %c3 = arith.constant 3 : index
      %35 = memref.load %arg1[%c3] : memref<8xi32, #tpu.memory_space<smem>>
      %c4 = arith.constant 4 : index
      %36 = memref.load %arg1[%c4] : memref<8xi32, #tpu.memory_space<smem>>
      %c5 = arith.constant 5 : index
      %37 = memref.load %arg1[%c5] : memref<8xi32, #tpu.memory_space<smem>>
      %c6 = arith.constant 6 : index
      %38 = memref.load %arg1[%c6] : memref<8xi32, #tpu.memory_space<smem>>
      %c7 = arith.constant 7 : index
      %39 = memref.load %arg1[%c7] : memref<8xi32, #tpu.memory_space<smem>>
      %c0_i32_19 = arith.constant 0 : i32
      %c0_i32_20 = arith.constant 0 : i32
      %c0_i32_21 = arith.constant 0 : i32
      %40 = tpu.memref_slice %arg2[%32, %c0_i32_21] : memref<50x64xf32, #tpu.memory_space<any>> -> memref<1x64xf32, #tpu.memory_space<any>>
      %41 = tpu.memref_squeeze %40 : memref<1x64xf32, #tpu.memory_space<any>> -> memref<64xf32, #tpu.memory_space<any>>
      %c0_i32_22 = arith.constant 0 : i32
      %42 = tpu.memref_slice %arg18[%c0_i32_19, %c0_i32_22] : memref<8x64xf32, #tpu.memory_space<vmem>> -> memref<1x64xf32, #tpu.memory_space<vmem>>
      %43 = tpu.memref_squeeze %42 : memref<1x64xf32, #tpu.memory_space<vmem>> -> memref<64xf32, #tpu.memory_space<vmem>>
      %44 = tpu.memref_slice %arg19[%c0_i32_20] : memref<8x!tpu.dma_semaphore, #tpu.memory_space<semaphore_mem>> -> memref<1x!tpu.dma_semaphore, #tpu.memory_space<semaphore_mem>>
      %45 = tpu.memref_squeeze %44 : memref<1x!tpu.dma_semaphore, #tpu.memory_space<semaphore_mem>> -> memref<!tpu.dma_semaphore, #tpu.memory_space<semaphore_mem>>
      tpu.enqueue_dma source(%41 : memref<64xf32, #tpu.memory_space<any>>) target(%43 : memref<64xf32, #tpu.memory_space<vmem>>) target_semaphore(%45 : memref<!tpu.dma_semaphore, #tpu.memory_space<semaphore_mem>>)
      %c1_i32_23 = arith.constant 1 : i32
      %c1_i32_24 = arith.constant 1 : i32
      %c0_i32_25 = arith.constant 0 : i32
      %46 = tpu.memref_slice %arg2[%33, %c0_i32_25] : memref<50x64xf32, #tpu.memory_space<any>> -> memref<1x64xf32, #tpu.memory_space<any>>
      %47 = tpu.memref_squeeze %46 : memref<1x64xf32, #tpu.memory_space<any>> -> memref<64xf32, #tpu.memory_space<any>>
      %c0_i32_26 = arith.constant 0 : i32
      %48 = tpu.memref_slice %arg18[%c1_i32_23, %c0_i32_26] : memref<8x64xf32, #tpu.memory_space<vmem>> -> memref<1x64xf32, #tpu.memory_space<vmem>>
      %49 = tpu.memref_squeeze %48 : memref<1x64xf32, #tpu.memory_space<vmem>> -> memref<64xf32, #tpu.memory_space<vmem>>
      %50 = tpu.memref_slice %arg19[%c1_i32_24] : memref<8x!tpu.dma_semaphore, #tpu.memory_space<semaphore_mem>> -> memref<1x!tpu.dma_semaphore, #tpu.memory_space<semaphore_mem>>
      %51 = tpu.memref_squeeze %50 : memref<1x!tpu.dma_semaphore, #tpu.memory_space<semaphore_mem>> -> memref<!tpu.dma_semaphore, #tpu.memory_space<semaphore_mem>>
      tpu.enqueue_dma source(%47 : memref<64xf32, #tpu.memory_space<any>>) target(%49 : memref<64xf32, #tpu.memory_space<vmem>>) target_semaphore(%51 : memref<!tpu.dma_semaphore, #tpu.memory_space<semaphore_mem>>)
      %c2_i32 = arith.constant 2 : i32
      %c2_i32_27 = arith.constant 2 : i32
      %c0_i32_28 = arith.constant 0 : i32
      %52 = tpu.memref_slice %arg2[%34, %c0_i32_28] : memref<50x64xf32, #tpu.memory_space<any>> -> memref<1x64xf32, #tpu.memory_space<any>>
      %53 = tpu.memref_squeeze %52 : memref<1x64xf32, #tpu.memory_space<any>> -> memref<64xf32, #tpu.memory_space<any>>
      %c0_i32_29 = arith.constant 0 : i32
      %54 = tpu.memref_slice %arg18[%c2_i32, %c0_i32_29] : memref<8x64xf32, #tpu.memory_space<vmem>> -> memref<1x64xf32, #tpu.memory_space<vmem>>
      %55 = tpu.memref_squeeze %54 : memref<1x64xf32, #tpu.memory_space<vmem>> -> memref<64xf32, #tpu.memory_space<vmem>>
      %56 = tpu.memref_slice %arg19[%c2_i32_27] : memref<8x!tpu.dma_semaphore, #tpu.memory_space<semaphore_mem>> -> memref<1x!tpu.dma_semaphore, #tpu.memory_space<semaphore_mem>>
      %57 = tpu.memref_squeeze %56 : memref<1x!tpu.dma_semaphore, #tpu.memory_space<semaphore_mem>> -> memref<!tpu.dma_semaphore, #tpu.memory_space<semaphore_mem>>
      tpu.enqueue_dma source(%53 : memref<64xf32, #tpu.memory_space<any>>) target(%55 : memref<64xf32, #tpu.memory_space<vmem>>) target_semaphore(%57 : memref<!tpu.dma_semaphore, #tpu.memory_space<semaphore_mem>>)
      %c3_i32 = arith.constant 3 : i32
      %c3_i32_30 = arith.constant 3 : i32
      %c0_i32_31 = arith.constant 0 : i32
      %58 = tpu.memref_slice %arg2[%35, %c0_i32_31] : memref<50x64xf32, #tpu.memory_space<any>> -> memref<1x64xf32, #tpu.memory_space<any>>
      %59 = tpu.memref_squeeze %58 : memref<1x64xf32, #tpu.memory_space<any>> -> memref<64xf32, #tpu.memory_space<any>>
      %c0_i32_32 = arith.constant 0 : i32
      %60 = tpu.memref_slice %arg18[%c3_i32, %c0_i32_32] : memref<8x64xf32, #tpu.memory_space<vmem>> -> memref<1x64xf32, #tpu.memory_space<vmem>>
      %61 = tpu.memref_squeeze %60 : memref<1x64xf32, #tpu.memory_space<vmem>> -> memref<64xf32, #tpu.memory_space<vmem>>
      %62 = tpu.memref_slice %arg19[%c3_i32_30] : memref<8x!tpu.dma_semaphore, #tpu.memory_space<semaphore_mem>> -> memref<1x!tpu.dma_semaphore, #tpu.memory_space<semaphore_mem>>
      %63 = tpu.memref_squeeze %62 : memref<1x!tpu.dma_semaphore, #tpu.memory_space<semaphore_mem>> -> memref<!tpu.dma_semaphore, #tpu.memory_space<semaphore_mem>>
      tpu.enqueue_dma source(%59 : memref<64xf32, #tpu.memory_space<any>>) target(%61 : memref<64xf32, #tpu.memory_space<vmem>>) target_semaphore(%63 : memref<!tpu.dma_semaphore, #tpu.memory_space<semaphore_mem>>)
      %c4_i32 = arith.constant 4 : i32
      %c4_i32_33 = arith.constant 4 : i32
      %c0_i32_34 = arith.constant 0 : i32
      %64 = tpu.memref_slice %arg2[%36, %c0_i32_34] : memref<50x64xf32, #tpu.memory_space<any>> -> memref<1x64xf32, #tpu.memory_space<any>>
      %65 = tpu.memref_squeeze %64 : memref<1x64xf32, #tpu.memory_space<any>> -> memref<64xf32, #tpu.memory_space<any>>
      %c0_i32_35 = arith.constant 0 : i32
      %66 = tpu.memref_slice %arg18[%c4_i32, %c0_i32_35] : memref<8x64xf32, #tpu.memory_space<vmem>> -> memref<1x64xf32, #tpu.memory_space<vmem>>
      %67 = tpu.memref_squeeze %66 : memref<1x64xf32, #tpu.memory_space<vmem>> -> memref<64xf32, #tpu.memory_space<vmem>>
      %68 = tpu.memref_slice %arg19[%c4_i32_33] : memref<8x!tpu.dma_semaphore, #tpu.memory_space<semaphore_mem>> -> memref<1x!tpu.dma_semaphore, #tpu.memory_space<semaphore_mem>>
      %69 = tpu.memref_squeeze %68 : memref<1x!tpu.dma_semaphore, #tpu.memory_space<semaphore_mem>> -> memref<!tpu.dma_semaphore, #tpu.memory_space<semaphore_mem>>
      tpu.enqueue_dma source(%65 : memref<64xf32, #tpu.memory_space<any>>) target(%67 : memref<64xf32, #tpu.memory_space<vmem>>) target_semaphore(%69 : memref<!tpu.dma_semaphore, #tpu.memory_space<semaphore_mem>>)
      %c5_i32 = arith.constant 5 : i32
      %c5_i32_36 = arith.constant 5 : i32
      %c0_i32_37 = arith.constant 0 : i32
      %70 = tpu.memref_slice %arg2[%37, %c0_i32_37] : memref<50x64xf32, #tpu.memory_space<any>> -> memref<1x64xf32, #tpu.memory_space<any>>
      %71 = tpu.memref_squeeze %70 : memref<1x64xf32, #tpu.memory_space<any>> -> memref<64xf32, #tpu.memory_space<any>>
      %c0_i32_38 = arith.constant 0 : i32
      %72 = tpu.memref_slice %arg18[%c5_i32, %c0_i32_38] : memref<8x64xf32, #tpu.memory_space<vmem>> -> memref<1x64xf32, #tpu.memory_space<vmem>>
      %73 = tpu.memref_squeeze %72 : memref<1x64xf32, #tpu.memory_space<vmem>> -> memref<64xf32, #tpu.memory_space<vmem>>
      %74 = tpu.memref_slice %arg19[%c5_i32_36] : memref<8x!tpu.dma_semaphore, #tpu.memory_space<semaphore_mem>> -> memref<1x!tpu.dma_semaphore, #tpu.memory_space<semaphore_mem>>
      %75 = tpu.memref_squeeze %74 : memref<1x!tpu.dma_semaphore, #tpu.memory_space<semaphore_mem>> -> memref<!tpu.dma_semaphore, #tpu.memory_space<semaphore_mem>>
      tpu.enqueue_dma source(%71 : memref<64xf32, #tpu.memory_space<any>>) target(%73 : memref<64xf32, #tpu.memory_space<vmem>>) target_semaphore(%75 : memref<!tpu.dma_semaphore, #tpu.memory_space<semaphore_mem>>)
      %c6_i32 = arith.constant 6 : i32
      %c6_i32_39 = arith.constant 6 : i32
      %c0_i32_40 = arith.constant 0 : i32
      %76 = tpu.memref_slice %arg2[%38, %c0_i32_40] : memref<50x64xf32, #tpu.memory_space<any>> -> memref<1x64xf32, #tpu.memory_space<any>>
      %77 = tpu.memref_squeeze %76 : memref<1x64xf32, #tpu.memory_space<any>> -> memref<64xf32, #tpu.memory_space<any>>
      %c0_i32_41 = arith.constant 0 : i32
      %78 = tpu.memref_slice %arg18[%c6_i32, %c0_i32_41] : memref<8x64xf32, #tpu.memory_space<vmem>> -> memref<1x64xf32, #tpu.memory_space<vmem>>
      %79 = tpu.memref_squeeze %78 : memref<1x64xf32, #tpu.memory_space<vmem>> -> memref<64xf32, #tpu.memory_space<vmem>>
      %80 = tpu.memref_slice %arg19[%c6_i32_39] : memref<8x!tpu.dma_semaphore, #tpu.memory_space<semaphore_mem>> -> memref<1x!tpu.dma_semaphore, #tpu.memory_space<semaphore_mem>>
      %81 = tpu.memref_squeeze %80 : memref<1x!tpu.dma_semaphore, #tpu.memory_space<semaphore_mem>> -> memref<!tpu.dma_semaphore, #tpu.memory_space<semaphore_mem>>
      tpu.enqueue_dma source(%77 : memref<64xf32, #tpu.memory_space<any>>) target(%79 : memref<64xf32, #tpu.memory_space<vmem>>) target_semaphore(%81 : memref<!tpu.dma_semaphore, #tpu.memory_space<semaphore_mem>>)
      %c7_i32 = arith.constant 7 : i32
      %c7_i32_42 = arith.constant 7 : i32
      %c0_i32_43 = arith.constant 0 : i32
      %82 = tpu.memref_slice %arg2[%39, %c0_i32_43] : memref<50x64xf32, #tpu.memory_space<any>> -> memref<1x64xf32, #tpu.memory_space<any>>
      %83 = tpu.memref_squeeze %82 : memref<1x64xf32, #tpu.memory_space<any>> -> memref<64xf32, #tpu.memory_space<any>>
      %c0_i32_44 = arith.constant 0 : i32
      %84 = tpu.memref_slice %arg18[%c7_i32, %c0_i32_44] : memref<8x64xf32, #tpu.memory_space<vmem>> -> memref<1x64xf32, #tpu.memory_space<vmem>>
      %85 = tpu.memref_squeeze %84 : memref<1x64xf32, #tpu.memory_space<vmem>> -> memref<64xf32, #tpu.memory_space<vmem>>
      %86 = tpu.memref_slice %arg19[%c7_i32_42] : memref<8x!tpu.dma_semaphore, #tpu.memory_space<semaphore_mem>> -> memref<1x!tpu.dma_semaphore, #tpu.memory_space<semaphore_mem>>
      %87 = tpu.memref_squeeze %86 : memref<1x!tpu.dma_semaphore, #tpu.memory_space<semaphore_mem>> -> memref<!tpu.dma_semaphore, #tpu.memory_space<semaphore_mem>>
      tpu.enqueue_dma source(%83 : memref<64xf32, #tpu.memory_space<any>>) target(%85 : memref<64xf32, #tpu.memory_space<vmem>>) target_semaphore(%87 : memref<!tpu.dma_semaphore, #tpu.memory_space<semaphore_mem>>)
      %c0_i32_45 = arith.constant 0 : i32
      %c0_i32_46 = arith.constant 0 : i32
      %c0_i32_47 = arith.constant 0 : i32
      %88 = tpu.memref_slice %arg2[%32, %c0_i32_47] : memref<50x64xf32, #tpu.memory_space<any>> -> memref<1x64xf32, #tpu.memory_space<any>>
      %89 = tpu.memref_squeeze %88 : memref<1x64xf32, #tpu.memory_space<any>> -> memref<64xf32, #tpu.memory_space<any>>
      %c0_i32_48 = arith.constant 0 : i32
      %90 = tpu.memref_slice %arg18[%c0_i32_45, %c0_i32_48] : memref<8x64xf32, #tpu.memory_space<vmem>> -> memref<1x64xf32, #tpu.memory_space<vmem>>
      %91 = tpu.memref_squeeze %90 : memref<1x64xf32, #tpu.memory_space<vmem>> -> memref<64xf32, #tpu.memory_space<vmem>>
      %92 = tpu.memref_slice %arg19[%c0_i32_46] : memref<8x!tpu.dma_semaphore, #tpu.memory_space<semaphore_mem>> -> memref<1x!tpu.dma_semaphore, #tpu.memory_space<semaphore_mem>>
      %93 = tpu.memref_squeeze %92 : memref<1x!tpu.dma_semaphore, #tpu.memory_space<semaphore_mem>> -> memref<!tpu.dma_semaphore, #tpu.memory_space<semaphore_mem>>
      tpu.wait_dma2 semaphore(%93 : memref<!tpu.dma_semaphore, #tpu.memory_space<semaphore_mem>>) src(%89 : memref<64xf32, #tpu.memory_space<any>>) dst(%91 : memref<64xf32, #tpu.memory_space<vmem>>)
      %c1_i32_49 = arith.constant 1 : i32
      %c1_i32_50 = arith.constant 1 : i32
      %c0_i32_51 = arith.constant 0 : i32
      %94 = tpu.memref_slice %arg2[%33, %c0_i32_51] : memref<50x64xf32, #tpu.memory_space<any>> -> memref<1x64xf32, #tpu.memory_space<any>>
      %95 = tpu.memref_squeeze %94 : memref<1x64xf32, #tpu.memory_space<any>> -> memref<64xf32, #tpu.memory_space<any>>
      %c0_i32_52 = arith.constant 0 : i32
      %96 = tpu.memref_slice %arg18[%c1_i32_49, %c0_i32_52] : memref<8x64xf32, #tpu.memory_space<vmem>> -> memref<1x64xf32, #tpu.memory_space<vmem>>
      %97 = tpu.memref_squeeze %96 : memref<1x64xf32, #tpu.memory_space<vmem>> -> memref<64xf32, #tpu.memory_space<vmem>>
      %98 = tpu.memref_slice %arg19[%c1_i32_50] : memref<8x!tpu.dma_semaphore, #tpu.memory_space<semaphore_mem>> -> memref<1x!tpu.dma_semaphore, #tpu.memory_space<semaphore_mem>>
      %99 = tpu.memref_squeeze %98 : memref<1x!tpu.dma_semaphore, #tpu.memory_space<semaphore_mem>> -> memref<!tpu.dma_semaphore, #tpu.memory_space<semaphore_mem>>
      tpu.wait_dma2 semaphore(%99 : memref<!tpu.dma_semaphore, #tpu.memory_space<semaphore_mem>>) src(%95 : memref<64xf32, #tpu.memory_space<any>>) dst(%97 : memref<64xf32, #tpu.memory_space<vmem>>)
      %c2_i32_53 = arith.constant 2 : i32
      %c2_i32_54 = arith.constant 2 : i32
      %c0_i32_55 = arith.constant 0 : i32
      %100 = tpu.memref_slice %arg2[%34, %c0_i32_55] : memref<50x64xf32, #tpu.memory_space<any>> -> memref<1x64xf32, #tpu.memory_space<any>>
      %101 = tpu.memref_squeeze %100 : memref<1x64xf32, #tpu.memory_space<any>> -> memref<64xf32, #tpu.memory_space<any>>
      %c0_i32_56 = arith.constant 0 : i32
      %102 = tpu.memref_slice %arg18[%c2_i32_53, %c0_i32_56] : memref<8x64xf32, #tpu.memory_space<vmem>> -> memref<1x64xf32, #tpu.memory_space<vmem>>
      %103 = tpu.memref_squeeze %102 : memref<1x64xf32, #tpu.memory_space<vmem>> -> memref<64xf32, #tpu.memory_space<vmem>>
      %104 = tpu.memref_slice %arg19[%c2_i32_54] : memref<8x!tpu.dma_semaphore, #tpu.memory_space<semaphore_mem>> -> memref<1x!tpu.dma_semaphore, #tpu.memory_space<semaphore_mem>>
      %105 = tpu.memref_squeeze %104 : memref<1x!tpu.dma_semaphore, #tpu.memory_space<semaphore_mem>> -> memref<!tpu.dma_semaphore, #tpu.memory_space<semaphore_mem>>
      tpu.wait_dma2 semaphore(%105 : memref<!tpu.dma_semaphore, #tpu.memory_space<semaphore_mem>>) src(%101 : memref<64xf32, #tpu.memory_space<any>>) dst(%103 : memref<64xf32, #tpu.memory_space<vmem>>)
      %c3_i32_57 = arith.constant 3 : i32
      %c3_i32_58 = arith.constant 3 : i32
      %c0_i32_59 = arith.constant 0 : i32
      %106 = tpu.memref_slice %arg2[%35, %c0_i32_59] : memref<50x64xf32, #tpu.memory_space<any>> -> memref<1x64xf32, #tpu.memory_space<any>>
      %107 = tpu.memref_squeeze %106 : memref<1x64xf32, #tpu.memory_space<any>> -> memref<64xf32, #tpu.memory_space<any>>
      %c0_i32_60 = arith.constant 0 : i32
      %108 = tpu.memref_slice %arg18[%c3_i32_57, %c0_i32_60] : memref<8x64xf32, #tpu.memory_space<vmem>> -> memref<1x64xf32, #tpu.memory_space<vmem>>
      %109 = tpu.memref_squeeze %108 : memref<1x64xf32, #tpu.memory_space<vmem>> -> memref<64xf32, #tpu.memory_space<vmem>>
      %110 = tpu.memref_slice %arg19[%c3_i32_58] : memref<8x!tpu.dma_semaphore, #tpu.memory_space<semaphore_mem>> -> memref<1x!tpu.dma_semaphore, #tpu.memory_space<semaphore_mem>>
      %111 = tpu.memref_squeeze %110 : memref<1x!tpu.dma_semaphore, #tpu.memory_space<semaphore_mem>> -> memref<!tpu.dma_semaphore, #tpu.memory_space<semaphore_mem>>
      tpu.wait_dma2 semaphore(%111 : memref<!tpu.dma_semaphore, #tpu.memory_space<semaphore_mem>>) src(%107 : memref<64xf32, #tpu.memory_space<any>>) dst(%109 : memref<64xf32, #tpu.memory_space<vmem>>)
      %c4_i32_61 = arith.constant 4 : i32
      %c4_i32_62 = arith.constant 4 : i32
      %c0_i32_63 = arith.constant 0 : i32
      %112 = tpu.memref_slice %arg2[%36, %c0_i32_63] : memref<50x64xf32, #tpu.memory_space<any>> -> memref<1x64xf32, #tpu.memory_space<any>>
      %113 = tpu.memref_squeeze %112 : memref<1x64xf32, #tpu.memory_space<any>> -> memref<64xf32, #tpu.memory_space<any>>
      %c0_i32_64 = arith.constant 0 : i32
      %114 = tpu.memref_slice %arg18[%c4_i32_61, %c0_i32_64] : memref<8x64xf32, #tpu.memory_space<vmem>> -> memref<1x64xf32, #tpu.memory_space<vmem>>
      %115 = tpu.memref_squeeze %114 : memref<1x64xf32, #tpu.memory_space<vmem>> -> memref<64xf32, #tpu.memory_space<vmem>>
      %116 = tpu.memref_slice %arg19[%c4_i32_62] : memref<8x!tpu.dma_semaphore, #tpu.memory_space<semaphore_mem>> -> memref<1x!tpu.dma_semaphore, #tpu.memory_space<semaphore_mem>>
      %117 = tpu.memref_squeeze %116 : memref<1x!tpu.dma_semaphore, #tpu.memory_space<semaphore_mem>> -> memref<!tpu.dma_semaphore, #tpu.memory_space<semaphore_mem>>
      tpu.wait_dma2 semaphore(%117 : memref<!tpu.dma_semaphore, #tpu.memory_space<semaphore_mem>>) src(%113 : memref<64xf32, #tpu.memory_space<any>>) dst(%115 : memref<64xf32, #tpu.memory_space<vmem>>)
      %c5_i32_65 = arith.constant 5 : i32
      %c5_i32_66 = arith.constant 5 : i32
      %c0_i32_67 = arith.constant 0 : i32
      %118 = tpu.memref_slice %arg2[%37, %c0_i32_67] : memref<50x64xf32, #tpu.memory_space<any>> -> memref<1x64xf32, #tpu.memory_space<any>>
      %119 = tpu.memref_squeeze %118 : memref<1x64xf32, #tpu.memory_space<any>> -> memref<64xf32, #tpu.memory_space<any>>
      %c0_i32_68 = arith.constant 0 : i32
      %120 = tpu.memref_slice %arg18[%c5_i32_65, %c0_i32_68] : memref<8x64xf32, #tpu.memory_space<vmem>> -> memref<1x64xf32, #tpu.memory_space<vmem>>
      %121 = tpu.memref_squeeze %120 : memref<1x64xf32, #tpu.memory_space<vmem>> -> memref<64xf32, #tpu.memory_space<vmem>>
      %122 = tpu.memref_slice %arg19[%c5_i32_66] : memref<8x!tpu.dma_semaphore, #tpu.memory_space<semaphore_mem>> -> memref<1x!tpu.dma_semaphore, #tpu.memory_space<semaphore_mem>>
      %123 = tpu.memref_squeeze %122 : memref<1x!tpu.dma_semaphore, #tpu.memory_space<semaphore_mem>> -> memref<!tpu.dma_semaphore, #tpu.memory_space<semaphore_mem>>
      tpu.wait_dma2 semaphore(%123 : memref<!tpu.dma_semaphore, #tpu.memory_space<semaphore_mem>>) src(%119 : memref<64xf32, #tpu.memory_space<any>>) dst(%121 : memref<64xf32, #tpu.memory_space<vmem>>)
      %c6_i32_69 = arith.constant 6 : i32
      %c6_i32_70 = arith.constant 6 : i32
      %c0_i32_71 = arith.constant 0 : i32
      %124 = tpu.memref_slice %arg2[%38, %c0_i32_71] : memref<50x64xf32, #tpu.memory_space<any>> -> memref<1x64xf32, #tpu.memory_space<any>>
      %125 = tpu.memref_squeeze %124 : memref<1x64xf32, #tpu.memory_space<any>> -> memref<64xf32, #tpu.memory_space<any>>
      %c0_i32_72 = arith.constant 0 : i32
      %126 = tpu.memref_slice %arg18[%c6_i32_69, %c0_i32_72] : memref<8x64xf32, #tpu.memory_space<vmem>> -> memref<1x64xf32, #tpu.memory_space<vmem>>
      %127 = tpu.memref_squeeze %126 : memref<1x64xf32, #tpu.memory_space<vmem>> -> memref<64xf32, #tpu.memory_space<vmem>>
      %128 = tpu.memref_slice %arg19[%c6_i32_70] : memref<8x!tpu.dma_semaphore, #tpu.memory_space<semaphore_mem>> -> memref<1x!tpu.dma_semaphore, #tpu.memory_space<semaphore_mem>>
      %129 = tpu.memref_squeeze %128 : memref<1x!tpu.dma_semaphore, #tpu.memory_space<semaphore_mem>> -> memref<!tpu.dma_semaphore, #tpu.memory_space<semaphore_mem>>
      tpu.wait_dma2 semaphore(%129 : memref<!tpu.dma_semaphore, #tpu.memory_space<semaphore_mem>>) src(%125 : memref<64xf32, #tpu.memory_space<any>>) dst(%127 : memref<64xf32, #tpu.memory_space<vmem>>)
      %c7_i32_73 = arith.constant 7 : i32
      %c7_i32_74 = arith.constant 7 : i32
      %c0_i32_75 = arith.constant 0 : i32
      %130 = tpu.memref_slice %arg2[%39, %c0_i32_75] : memref<50x64xf32, #tpu.memory_space<any>> -> memref<1x64xf32, #tpu.memory_space<any>>
      %131 = tpu.memref_squeeze %130 : memref<1x64xf32, #tpu.memory_space<any>> -> memref<64xf32, #tpu.memory_space<any>>
      %c0_i32_76 = arith.constant 0 : i32
      %132 = tpu.memref_slice %arg18[%c7_i32_73, %c0_i32_76] : memref<8x64xf32, #tpu.memory_space<vmem>> -> memref<1x64xf32, #tpu.memory_space<vmem>>
      %133 = tpu.memref_squeeze %132 : memref<1x64xf32, #tpu.memory_space<vmem>> -> memref<64xf32, #tpu.memory_space<vmem>>
      %134 = tpu.memref_slice %arg19[%c7_i32_74] : memref<8x!tpu.dma_semaphore, #tpu.memory_space<semaphore_mem>> -> memref<1x!tpu.dma_semaphore, #tpu.memory_space<semaphore_mem>>
      %135 = tpu.memref_squeeze %134 : memref<1x!tpu.dma_semaphore, #tpu.memory_space<semaphore_mem>> -> memref<!tpu.dma_semaphore, #tpu.memory_space<semaphore_mem>>
      tpu.wait_dma2 semaphore(%135 : memref<!tpu.dma_semaphore, #tpu.memory_space<semaphore_mem>>) src(%131 : memref<64xf32, #tpu.memory_space<any>>) dst(%133 : memref<64xf32, #tpu.memory_space<vmem>>)
      %c0_77 = arith.constant 0 : index
      %c0_78 = arith.constant 0 : index
      %136 = vector.load %arg18[%c0_77, %c0_78] : memref<8x64xf32, #tpu.memory_space<vmem>>, vector<8x64xf32>
      %c0_79 = arith.constant 0 : index
      %c0_80 = arith.constant 0 : index
      %137 = vector.load %arg8[%c0_79, %c0_80] : memref<64x512xf32, #tpu.memory_space<vmem>>, vector<64x512xf32>
      %cst_81 = arith.constant dense<0.000000e+00> : vector<8x512xf32>
      %138 = tpu.matmul %136, %137, %cst_81 {dimension_numbers = #tpu.dot_dimension_numbers<[1], [0], [0], [1], [0, 0, 1, 1], [], []>} : vector<8x64xf32>, vector<64x512xf32>, vector<8x512xf32> -> vector<8x512xf32>
      %c0_82 = arith.constant 0 : index
      %c0_83 = arith.constant 0 : index
      %139 = vector.load %arg3[%c0_82, %c0_83] : memref<8x128xf32, #tpu.memory_space<vmem>>, vector<8x128xf32>
      %c0_84 = arith.constant 0 : index
      %c0_85 = arith.constant 0 : index
      %140 = vector.load %arg9[%c0_84, %c0_85] : memref<128x512xf32, #tpu.memory_space<vmem>>, vector<128x512xf32>
      %cst_86 = arith.constant dense<0.000000e+00> : vector<8x512xf32>
      %141 = tpu.matmul %139, %140, %cst_86 {dimension_numbers = #tpu.dot_dimension_numbers<[1], [0], [0], [1], [0, 0, 1, 1], [], []>} : vector<8x128xf32>, vector<128x512xf32>, vector<8x512xf32> -> vector<8x512xf32>
      %142 = arith.addf %138, %141 : vector<8x512xf32>
      %c0_87 = arith.constant 0 : index
      %c0_88 = arith.constant 0 : index
      %143 = vector.load %arg4[%c0_87, %c0_88] : memref<8x128xf32, #tpu.memory_space<vmem>>, vector<8x128xf32>
      %c0_89 = arith.constant 0 : index
      %c0_90 = arith.constant 0 : index
      %144 = vector.load %arg10[%c0_89, %c0_90] : memref<128x512xf32, #tpu.memory_space<vmem>>, vector<128x512xf32>
      %cst_91 = arith.constant dense<0.000000e+00> : vector<8x512xf32>
      %145 = tpu.matmul %143, %144, %cst_91 {dimension_numbers = #tpu.dot_dimension_numbers<[1], [0], [0], [1], [0, 0, 1, 1], [], []>} : vector<8x128xf32>, vector<128x512xf32>, vector<8x512xf32> -> vector<8x512xf32>
      %146 = arith.addf %142, %145 : vector<8x512xf32>
      %c0_92 = arith.constant 0 : index
      %c0_93 = arith.constant 0 : index
      %147 = vector.load %arg11[%c0_92, %c0_93] : memref<1x512xf32, #tpu.memory_space<vmem>>, vector<1x512xf32>
      %148 = vector.broadcast %147 : vector<1x512xf32> to vector<8x512xf32>
      %149 = arith.addf %146, %148 : vector<8x512xf32>
      %150 = vector.extract_strided_slice %149 {offsets = [0, 0], sizes = [8, 128], strides = [1, 1]} : vector<8x512xf32> to vector<8x128xf32>
      %151 = arith.negf %150 : vector<8x128xf32>
      %152 = math.exp %151 : vector<8x128xf32>
      %cst_94 = arith.constant 1.000000e+00 : f32
      %153 = vector.broadcast %cst_94 : f32 to vector<8x128xf32>
      %154 = arith.addf %153, %152 : vector<8x128xf32>
      %155 = arith.divf %153, %154 : vector<8x128xf32>
      %156 = vector.extract_strided_slice %149 {offsets = [0, 128], sizes = [8, 128], strides = [1, 1]} : vector<8x512xf32> to vector<8x128xf32>
      %157 = arith.negf %156 : vector<8x128xf32>
      %158 = math.exp %157 : vector<8x128xf32>
      %cst_95 = arith.constant 1.000000e+00 : f32
      %159 = vector.broadcast %cst_95 : f32 to vector<8x128xf32>
      %160 = arith.addf %159, %158 : vector<8x128xf32>
      %161 = arith.divf %159, %160 : vector<8x128xf32>
      %162 = vector.extract_strided_slice %149 {offsets = [0, 256], sizes = [8, 128], strides = [1, 1]} : vector<8x512xf32> to vector<8x128xf32>
      %163 = math.tanh %162 : vector<8x128xf32>
      %164 = vector.extract_strided_slice %149 {offsets = [0, 384], sizes = [8, 128], strides = [1, 1]} : vector<8x512xf32> to vector<8x128xf32>
      %165 = arith.negf %164 : vector<8x128xf32>
      %166 = math.exp %165 : vector<8x128xf32>
      %cst_96 = arith.constant 1.000000e+00 : f32
      %167 = vector.broadcast %cst_96 : f32 to vector<8x128xf32>
      %168 = arith.addf %167, %166 : vector<8x128xf32>
      %169 = arith.divf %167, %168 : vector<8x128xf32>
      %c0_97 = arith.constant 0 : index
      %c0_98 = arith.constant 0 : index
      %170 = vector.load %arg5[%c0_97, %c0_98] : memref<8x128xf32, #tpu.memory_space<vmem>>, vector<8x128xf32>
      %171 = arith.mulf %161, %170 : vector<8x128xf32>
      %172 = arith.mulf %155, %163 : vector<8x128xf32>
      %173 = arith.addf %171, %172 : vector<8x128xf32>
      %174 = math.tanh %173 : vector<8x128xf32>
      %175 = arith.mulf %169, %174 : vector<8x128xf32>
      %c0_99 = arith.constant 0 : index
      %c0_100 = arith.constant 0 : index
      %176 = vector.load %arg15[%c0_99, %c0_100] : memref<8x128xf32, #tpu.memory_space<vmem>>, vector<8x128xf32>
      tpu.vector_store %arg15[%c0_99, %c0_100], %175 {strides = array<i32>} : memref<8x128xf32, #tpu.memory_space<vmem>>, vector<8x128xf32>,
      %c0_101 = arith.constant 0 : index
      %c0_102 = arith.constant 0 : index
      %177 = vector.load %arg16[%c0_101, %c0_102] : memref<8x128xf32, #tpu.memory_space<vmem>>, vector<8x128xf32>
      tpu.vector_store %arg16[%c0_101, %c0_102], %173 {strides = array<i32>} : memref<8x128xf32, #tpu.memory_space<vmem>>, vector<8x128xf32>,
      %178 = vector.shape_cast %175 : vector<8x128xf32> to vector<8x1x128xf32>
      %c0_103 = arith.constant 0 : index
      %c0_104 = arith.constant 0 : index
      %c0_105 = arith.constant 0 : index
      %179 = vector.load %arg6[%c0_103, %c0_104, %c0_105] : memref<8x16x128xf32, #tpu.memory_space<vmem>>, vector<8x16x128xf32>
      "tpu.trace_start"() <{level = 10 : i32, message = "bqh,bsh->bqs"}> : () -> ()
      %cst_106 = arith.constant dense<0.000000e+00> : vector<8x1x16xf32>
      %180 = tpu.matmul %178, %179, %cst_106 {dimension_numbers = #tpu.dot_dimension_numbers<[2], [2], [1], [1], [0, 0, 0, 1, 1, 1], [0], [0]>} : vector<8x1x128xf32>, vector<8x16x128xf32>, vector<8x1x16xf32> -> vector<8x1x16xf32>
      "tpu.trace_stop"() : () -> ()
      %cst_107 = arith.constant dense<0xFF800000> : vector<8x1xf32>
      %181 = vector.multi_reduction <maximumf>, %180, %cst_107 [2] : vector<8x1x16xf32> to vector<8x1xf32>
      %182 = vector.shape_cast %181 : vector<8x1xf32> to vector<8x1x1xf32>
      %183 = vector.broadcast %182 : vector<8x1x1xf32> to vector<8x1x16xf32>
      %184 = arith.subf %180, %183 : vector<8x1x16xf32>
      %185 = math.exp %184 : vector<8x1x16xf32>
      %cst_108 = arith.constant dense<0.000000e+00> : vector<8x1xf32>
      %186 = vector.multi_reduction <add>, %185, %cst_108 [2] : vector<8x1x16xf32> to vector<8x1xf32>
      %187 = vector.shape_cast %186 : vector<8x1xf32> to vector<8x1x1xf32>
      %188 = vector.broadcast %187 : vector<8x1x1xf32> to vector<8x1x16xf32>
      %189 = arith.divf %185, %188 : vector<8x1x16xf32>
      %c0_109 = arith.constant 0 : index
      %c0_110 = arith.constant 0 : index
      %c0_111 = arith.constant 0 : index
      %190 = vector.load %arg7[%c0_109, %c0_110, %c0_111] : memref<8x16x128xf32, #tpu.memory_space<vmem>>, vector<8x16x128xf32>
      "tpu.trace_start"() <{level = 10 : i32, message = "bqs,bsh->bqh"}> : () -> ()
      %cst_112 = arith.constant dense<0.000000e+00> : vector<8x1x128xf32>
      %191 = tpu.matmul %189, %190, %cst_112 {dimension_numbers = #tpu.dot_dimension_numbers<[2], [1], [1], [2], [0, 0, 0, 1, 1, 2], [0], [0]>} : vector<8x1x16xf32>, vector<8x16x128xf32>, vector<8x1x128xf32> -> vector<8x1x128xf32>
      "tpu.trace_stop"() : () -> ()
      %192 = vector.shape_cast %191 : vector<8x1x128xf32> to vector<8x128xf32>
      %c0_113 = arith.constant 0 : index
      %c0_114 = arith.constant 0 : index
      %193 = vector.load %arg17[%c0_113, %c0_114] : memref<8x128xf32, #tpu.memory_space<vmem>>, vector<8x128xf32>
      tpu.vector_store %arg17[%c0_113, %c0_114], %192 {strides = array<i32>} : memref<8x128xf32, #tpu.memory_space<vmem>>, vector<8x128xf32>,
      %cst_115 = arith.constant 0xFF800000 : f32
      %194 = vector.broadcast %cst_115 : f32 to vector<8x1xf32>
      %c0_116 = arith.constant 0 : index
      %c0_117 = arith.constant 0 : index
      %195 = vector.load %arg20[%c0_116, %c0_117] : memref<8x1xf32, #tpu.memory_space<vmem>>, vector<8x1xf32>
      tpu.vector_store %arg20[%c0_116, %c0_117], %194 {strides = array<i32>} : memref<8x1xf32, #tpu.memory_space<vmem>>, vector<8x1xf32>,
      %cst_118 = arith.constant 0.000000e+00 : f32
      %196 = vector.broadcast %cst_118 : f32 to vector<8x1xf32>
      %c0_119 = arith.constant 0 : index
      %c0_120 = arith.constant 0 : index
      %197 = vector.load %arg21[%c0_119, %c0_120] : memref<8x1xf32, #tpu.memory_space<vmem>>, vector<8x1xf32>
      tpu.vector_store %arg21[%c0_119, %c0_120], %196 {strides = array<i32>} : memref<8x1xf32, #tpu.memory_space<vmem>>, vector<8x1xf32>,
    } else {
    }
    %c0 = arith.constant 0 : index
    %c0_1 = arith.constant 0 : index
    %3 = vector.load %arg3[%c0, %c0_1] : memref<8x128xf32, #tpu.memory_space<vmem>>, vector<8x128xf32>
    %c0_2 = arith.constant 0 : index
    %c0_3 = arith.constant 0 : index
    %4 = vector.load %arg12[%c0_2, %c0_3] : memref<128x256xf32, #tpu.memory_space<vmem>>, vector<128x256xf32>
    %cst = arith.constant dense<0.000000e+00> : vector<8x256xf32>
    %5 = tpu.matmul %3, %4, %cst {dimension_numbers = #tpu.dot_dimension_numbers<[1], [0], [0], [1], [0, 0, 1, 1], [], []>} : vector<8x128xf32>, vector<128x256xf32>, vector<8x256xf32> -> vector<8x256xf32>
    %c0_4 = arith.constant 0 : index
    %c0_5 = arith.constant 0 : index
    %6 = vector.load %arg13[%c0_4, %c0_5] : memref<1x256xf32, #tpu.memory_space<vmem>>, vector<1x256xf32>
    %7 = vector.broadcast %6 : vector<1x256xf32> to vector<8x256xf32>
    %8 = arith.addf %5, %7 : vector<8x256xf32>
    %c256_i32 = arith.constant 256 : i32
    %9 = arith.muli %arg0, %c256_i32 : i32
    %10 = tpu.assume_multiple %9, 128 : i32
    %c0_6 = arith.constant 0 : index
    %11 = arith.index_cast %10 : i32 to index
    %12 = vector.load %arg14[%c0_6, %11] : memref<8x512xf32, #tpu.memory_space<vmem>>, vector<8x256xf32>
    tpu.vector_store %arg14[%c0_6, %11], %8 {strides = array<i32>} : memref<8x512xf32, #tpu.memory_space<vmem>>, vector<8x256xf32>,
    %c0_7 = arith.constant 0 : index
    %c0_8 = arith.constant 0 : index
    %13 = vector.load %arg20[%c0_7, %c0_8] : memref<8x1xf32, #tpu.memory_space<vmem>>, vector<8x1xf32>
    %cst_9 = arith.constant dense<0xFF800000> : vector<8xf32>
    %14 = vector.multi_reduction <maximumf>, %8, %cst_9 [1] : vector<8x256xf32> to vector<8xf32>
    %15 = vector.shape_cast %14 : vector<8xf32> to vector<8x1xf32>
    %16 = arith.maximumf %13, %15 : vector<8x1xf32>
    %c0_10 = arith.constant 0 : index
    %c0_11 = arith.constant 0 : index
    %17 = vector.load %arg21[%c0_10, %c0_11] : memref<8x1xf32, #tpu.memory_space<vmem>>, vector<8x1xf32>
    %18 = arith.subf %13, %16 : vector<8x1xf32>
    %19 = math.exp %18 : vector<8x1xf32>
    %20 = arith.mulf %17, %19 : vector<8x1xf32>
    %21 = vector.broadcast %16 : vector<8x1xf32> to vector<8x256xf32>
    %22 = arith.subf %8, %21 : vector<8x256xf32>
    %23 = math.exp %22 : vector<8x256xf32>
    %cst_12 = arith.constant dense<0.000000e+00> : vector<8xf32>
    %24 = vector.multi_reduction <add>, %23, %cst_12 [1] : vector<8x256xf32> to vector<8xf32>
    %25 = vector.shape_cast %24 : vector<8xf32> to vector<8x1xf32>
    %26 = arith.addf %20, %25 : vector<8x1xf32>
    %c0_13 = arith.constant 0 : index
    %c0_14 = arith.constant 0 : index
    %27 = vector.load %arg21[%c0_13, %c0_14] : memref<8x1xf32, #tpu.memory_space<vmem>>, vector<8x1xf32>
    tpu.vector_store %arg21[%c0_13, %c0_14], %26 {strides = array<i32>} : memref<8x1xf32, #tpu.memory_space<vmem>>, vector<8x1xf32>,
    %c0_15 = arith.constant 0 : index
    %c0_16 = arith.constant 0 : index
    %28 = vector.load %arg20[%c0_15, %c0_16] : memref<8x1xf32, #tpu.memory_space<vmem>>, vector<8x1xf32>
    tpu.vector_store %arg20[%c0_15, %c0_16], %16 {strides = array<i32>} : memref<8x1xf32, #tpu.memory_space<vmem>>, vector<8x1xf32>,
    %c1_i32 = arith.constant 1 : i32
    %29 = arith.cmpi eq, %arg0, %c1_i32 : i32
    %30 = arith.extui %29 : i1 to i32
    %c0_i32_17 = arith.constant 0 : i32
    %31 = arith.cmpi ne, %30, %c0_i32_17 : i32
    scf.if %31 {
      %c0_18 = arith.constant 0 : index
      %c0_19 = arith.constant 0 : index
      %32 = vector.load %arg14[%c0_18, %c0_19] : memref<8x512xf32, #tpu.memory_space<vmem>>, vector<8x512xf32>
      %c0_20 = arith.constant 0 : index
      %c0_21 = arith.constant 0 : index
      %33 = vector.load %arg20[%c0_20, %c0_21] : memref<8x1xf32, #tpu.memory_space<vmem>>, vector<8x1xf32>
      %c0_22 = arith.constant 0 : index
      %c0_23 = arith.constant 0 : index
      %34 = vector.load %arg21[%c0_22, %c0_23] : memref<8x1xf32, #tpu.memory_space<vmem>>, vector<8x1xf32>
      %35 = math.log %34 : vector<8x1xf32>
      %36 = arith.addf %33, %35 : vector<8x1xf32>
      %37 = vector.broadcast %36 : vector<8x1xf32> to vector<8x512xf32>
      %38 = arith.subf %32, %37 : vector<8x512xf32>
      %c0_24 = arith.constant 0 : index
      %c0_25 = arith.constant 0 : index
      %39 = vector.load %arg14[%c0_24, %c0_25] : memref<8x512xf32, #tpu.memory_space<vmem>>, vector<8x512xf32>
      tpu.vector_store %arg14[%c0_24, %c0_25], %38 {strides = array<i32>} : memref<8x512xf32, #tpu.memory_space<vmem>>, vector<8x512xf32>,
    } else {
    }
    return
  }
  func.func @transform_1(%arg0: i32, %arg1: memref<8xi32, #tpu.memory_space<smem>>) -> (i32, i32) {
    %c0_i32 = arith.constant 0 : i32
    %c0_i32_0 = arith.constant 0 : i32
    %c0_i32_1 = arith.constant 0 : i32
    return %c0_i32, %c0_i32_0 : i32, i32
  }
  func.func @transform_2(%arg0: i32, %arg1: memref<8xi32, #tpu.memory_space<smem>>) -> (i32, i32) {
    %c0_i32 = arith.constant 0 : i32
    %c0_i32_0 = arith.constant 0 : i32
    %c0_i32_1 = arith.constant 0 : i32
    return %c0_i32, %c0_i32_0 : i32, i32
  }
  func.func @transform_3(%arg0: i32, %arg1: memref<8xi32, #tpu.memory_space<smem>>) -> (i32, i32) {
    %c0_i32 = arith.constant 0 : i32
    %c0_i32_0 = arith.constant 0 : i32
    %c0_i32_1 = arith.constant 0 : i32
    return %c0_i32, %c0_i32_0 : i32, i32
  }
  func.func @transform_4(%arg0: i32, %arg1: memref<8xi32, #tpu.memory_space<smem>>) -> (i32, i32, i32) {
    %c0_i32 = arith.constant 0 : i32
    %c0_i32_0 = arith.constant 0 : i32
    %c0_i32_1 = arith.constant 0 : i32
    %c0_i32_2 = arith.constant 0 : i32
    return %c0_i32, %c0_i32_0, %c0_i32_1 : i32, i32, i32
  }
  func.func @transform_5(%arg0: i32, %arg1: memref<8xi32, #tpu.memory_space<smem>>) -> (i32, i32, i32) {
    %c0_i32 = arith.constant 0 : i32
    %c0_i32_0 = arith.constant 0 : i32
    %c0_i32_1 = arith.constant 0 : i32
    %c0_i32_2 = arith.constant 0 : i32
    return %c0_i32, %c0_i32_0, %c0_i32_1 : i32, i32, i32
  }
  func.func @transform_6(%arg0: i32, %arg1: memref<8xi32, #tpu.memory_space<smem>>) -> (i32, i32) {
    %c0_i32 = arith.constant 0 : i32
    %c0_i32_0 = arith.constant 0 : i32
    %c0_i32_1 = arith.constant 0 : i32
    return %c0_i32, %c0_i32_0 : i32, i32
  }
  func.func @transform_7(%arg0: i32, %arg1: memref<8xi32, #tpu.memory_space<smem>>) -> (i32, i32) {
    %c0_i32 = arith.constant 0 : i32
    %c0_i32_0 = arith.constant 0 : i32
    %c0_i32_1 = arith.constant 0 : i32
    return %c0_i32, %c0_i32_0 : i32, i32
  }
  func.func @transform_8(%arg0: i32, %arg1: memref<8xi32, #tpu.memory_space<smem>>) -> (i32, i32) {
    %c0_i32 = arith.constant 0 : i32
    %c0_i32_0 = arith.constant 0 : i32
    %c0_i32_1 = arith.constant 0 : i32
    return %c0_i32, %c0_i32_0 : i32, i32
  }
  func.func @transform_9(%arg0: i32, %arg1: memref<8xi32, #tpu.memory_space<smem>>) -> (i32, i32) {
    %c0_i32 = arith.constant 0 : i32
    %c0_i32_0 = arith.constant 0 : i32
    %c0_i32_1 = arith.constant 0 : i32
    return %c0_i32, %c0_i32_0 : i32, i32
  }
  func.func @transform_10(%arg0: i32, %arg1: memref<8xi32, #tpu.memory_space<smem>>) -> (i32, i32) {
    %c0_i32 = arith.constant 0 : i32
    %c0_i32_0 = arith.constant 0 : i32
    return %c0_i32, %arg0 : i32, i32
  }
  func.func @transform_11(%arg0: i32, %arg1: memref<8xi32, #tpu.memory_space<smem>>) -> (i32, i32) {
    %c0_i32 = arith.constant 0 : i32
    %c0_i32_0 = arith.constant 0 : i32
    return %c0_i32, %arg0 : i32, i32
  }
  func.func @transform_12(%arg0: i32, %arg1: memref<8xi32, #tpu.memory_space<smem>>) -> (i32, i32) {
    %c0_i32 = arith.constant 0 : i32
    %c0_i32_0 = arith.constant 0 : i32
    %c0_i32_1 = arith.constant 0 : i32
    return %c0_i32, %c0_i32_0 : i32, i32
  }
  func.func @transform_13(%arg0: i32, %arg1: memref<8xi32, #tpu.memory_space<smem>>) -> (i32, i32) {
    %c0_i32 = arith.constant 0 : i32
    %c0_i32_0 = arith.constant 0 : i32
    %c0_i32_1 = arith.constant 0 : i32
    return %c0_i32, %c0_i32_0 : i32, i32
  }
  func.func @transform_14(%arg0: i32, %arg1: memref<8xi32, #tpu.memory_space<smem>>) -> (i32, i32) {
    %c0_i32 = arith.constant 0 : i32
    %c0_i32_0 = arith.constant 0 : i32
    %c0_i32_1 = arith.constant 0 : i32
    return %c0_i32, %c0_i32_0 : i32, i32
  }
  func.func @transform_15(%arg0: i32, %arg1: memref<8xi32, #tpu.memory_space<smem>>) -> (i32, i32) {
    %c0_i32 = arith.constant 0 : i32
    %c0_i32_0 = arith.constant 0 : i32
    %c0_i32_1 = arith.constant 0 : i32
    return %c0_i32, %c0_i32_0 : i32, i32
  }
}

</mosaic_0001>

<bundles_post_ra>
// kernel: tpu_custom_call.1
= control target key start
LH: loop header
LB: loop body
LE: loop exit
PB: predicated region body
PF: predicated region fallthrough
CT: control target
= control target key end

     0   :  { %s5322_s0 = inlined_call_operand.hbm [shape: s32[8], index: 0, kind: input, shape index: {}]   ;;  %s5323_s1 = inlined_call_operand.hbm [shape: f32[50,64], index: 1, kind: input, shape index: {}]   ;;  %s5324_s2 = inlined_call_operand.hbm [shape: f32[8,128], index: 2, kind: input, shape index: {}]   ;;  %s5325_s3 = inlined_call_operand.vmem [shape: f32[8,128], index: 3, kind: input, shape index: {}]   ;;  %s5326_s4 = inlined_call_operand.hbm [shape: f32[8,128], index: 4, kind: input, shape index: {}]   ;;  %s5327_s5 = inlined_call_operand.hbm [shape: f32[8,16,128], index: 5, kind: input, shape index: {}]   ;;  %s5328_s6 = inlined_call_operand.hbm [shape: f32[8,16,128], index: 6, kind: input, shape index: {}]   ;;  %s5329_s7 = inlined_call_operand.hbm [shape: f32[64,512], index: 7, kind: input, shape index: {}]   ;;  %s5330_s8 = inlined_call_operand.hbm [shape: f32[128,512], index: 8, kind: input, shape index: {}]   ;;  %s5331_s9 = inlined_call_operand.hbm [shape: f32[128,512], index: 9, kind: input, shape index: {}]   ;;  %s5332_s10 = inlined_call_operand.vmem [shape: f32[1,512], index: 10, kind: input, shape index: {}]   ;;  %s5333_s11 = inlined_call_operand.hbm [shape: f32[128,512], index: 11, kind: input, shape index: {}]   ;;  %s5334_s12 = inlined_call_operand.vmem [shape: f32[1,512], index: 12, kind: input, shape index: {}]   ;;  %s5335_s13 = inlined_call_operand.hbm [shape: f32[8,512], index: 13, kind: output, shape index: {0}]   ;;  %s5336_s14 = inlined_call_operand.hbm [shape: f32[8,128], index: 14, kind: output, shape index: {1}]   ;;  %s5337_s15 = inlined_call_operand.hbm [shape: f32[8,128], index: 15, kind: output, shape index: {2}]   ;;  %s5338_s16 = inlined_call_operand.hbm [shape: f32[8,128], index: 16, kind: output, shape index: {3}]  }
   0x1   :  { %5351 = sst [smem:[#allocation63_spill]] %s5322_s0 }
   0x2   :  { %5352 = sst [smem:[#allocation64_spill]] %s5323_s1  ;;  %s5364_s23 = sld [smem:[#allocation63_spill]] }
   0x3   :  { %5353 = sst [smem:[#allocation65_spill]] %s5324_s2 }
   0x4   :  { %5354 = sst [smem:[#allocation66_spill]] %s5325_s3 }
   0x5   :  { %5355 = sst [smem:[#allocation67_spill]] %s5326_s4 }
   0x6   :  { %5356 = sst [smem:[#allocation68_spill]] %s5327_s5 }
   0x7   :  { %5357 = sst [smem:[#allocation69_spill]] %s5328_s6 }
   0x8   :  { %5358 = sst [smem:[#allocation70_spill]] %s5329_s7 }
   0x9   :  { %5359 = sst [smem:[#allocation71_spill]] %s5332_s10  ;;  %s3897_s10 = scalar_lea.hbm %s5364_s23, 16 }
   0xa   :  { %5360 = sst [smem:[#allocation72_spill]] %s5335_s13  ;;  %p3898_p0 = scmp.ne.s32.totalorder %s5364_s23, %s3897_s10 }
   0xb   :  { %5361 = sst [smem:[#allocation73_spill]] %s5336_s14  ;;  %p3901_p1 = scmp.lt.u32.totalorder %s3897_s10, %s5364_s23 }
   0xc   :  { %5362 = sst [smem:[#allocation74_spill]] %s5337_s15 }
   0xd   :  { %5363 = sst [smem:[#allocation75_spill]] %s5338_s16  ;;  %p3903_p2 = pnand %p3901_p1, %p3898_p0 }
   0xf   :  { %3906 = shalt.err (!%p3903_p2)  }
  0x10   :  { %s4511_s28 = smov [#allocation7]  }
  0x11   :  { %23 = dma.hbm_to_smem %s5364_s23, 16, %s4511_s28, [#allocation6] }
  0x12   :  { %4445 = dma.done.wait [#allocation6], 16 }
  0x13   :  { %4446 = vsyncadd [#allocation6], 4294967280 }
  0x14   :  { %25 = sfence }
  0x15   :  { %26 = vsyncpa [#allocation9], 0 }
  0x16   :  { %27 = vsyncpa [#allocation12], 0 }
  0x17   :  { %28 = vsyncpa [#allocation15], 0 }
  0x18   :  { %29 = vsyncpa [#allocation18], 0 }
  0x19   :  { %30 = vsyncpa [#allocation21], 0 }
  0x1a   :  { %32 = vsyncpa [#allocation21 + $0x1], 0 }
  0x1b   :  { %33 = vsyncpa [#allocation10], 0 }
  0x1c   :  { %34 = vsyncpa [#allocation24], 0 }
  0x1d   :  { %35 = vsyncpa [#allocation27], 0  ;;  %s4643_s10 = smov 0   ;;  %s4645_s0 = smov 0  }
  0x1e   :  { %s4647_s17 = smov 0   ;;  %s4649_s18 = smov 0  }
  0x1f LB: > { %s4512_s19 = smov [#allocation11]   ;;  %s4664_s21 = sadd.s32 4294967295, %s4509_s18   ;;  %s4509_s18 = sphi %s4649_s18, %s5400_s18   ;;  %s4505_s17 = sphi %s4647_s17, %s5399_s17   ;;  %s4501_s0 = sphi %s4645_s0, %s5398_s0   ;;  %s4497_s10 = sphi %s4643_s10, %s5397_s10  }
  0x20   : > { %s398_s20 = sshll.u32 %s4512_s19, 4  ;;  %p3197_p3 = scmp.ge.s32.totalorder %s4509_s18, 1  ;;  %s399_s20 = int_to_ptr.vmem [resolvable:$true] %s398_s20 }
  0x21   : > { %p5342_p4 = scmp.eq.s32.totalorder %s4664_s21, 0  ;;  %p371_p5 = scmp.lt.s32.totalorder %s4509_s18, 3 }
  0x22   : > { %s4513_s23 = smov [#allocation14]   ;;  %s4514_s26 = smov [#allocation17]  }
  0x23   : > { %p4670_p7 = pnand %p3197_p3, %p371_p5  ;;  %s421_s24 = sshll.u32 %s4513_s23, 4  ;;  %s4682_s24 = int_to_ptr.vmem [resolvable:$true] %s421_s24 }
  0x24   : > { %s4684_s27 = sshll.u32 %s4514_s26, 4  ;;  %s5367_s4 = sld [smem:[#allocation67_spill]]  ;;  %s448_s27 = int_to_ptr.vmem [resolvable:$true] %s4684_s27 }
  0x25   : > { %s5365_s22 = scalar_select %p4670_p7, 1, 0 }
  0x26   : > { %p3724_p8 = pneg %p4670_p7 }
  0x28   : > { %p4678_p9 = pnand %p3724_p8, %p5342_p4 }
  0x2a   : > { %s3907_s30 = scalar_lea.hbm %s5367_s4, 128  ;;  %p4694_p11 = pneg %p4678_p9 }
  0x2b   : > { %p3908_p10 = scmp.ne.s32.totalorder %s5367_s4, %s3907_s30  ;;  %p3914_p0 = scmp.lt.u32.totalorder %s3907_s30, %s5367_s4 }
  0x2d   : > { %p3910_p12 = pnand %p4694_p11, %p3908_p10 }
  0x2f   : > { %p3911_p13 = pneg %p3910_p12 }
  0x31   : > { %p3916_p1 = pnand %p3914_p0, %p3911_p13 }
  0x33   : > { %3919 = shalt.err (!%p3916_p1)
}
  0x34   : > { %s3920_s28 = scalar_lea.vmem %s399_s20, 128  ;;  %p3928_p8 = scmp.lt.s32.totalorder %s399_s20, %s399_s20 }
  0x35   : > { %p3921_p2 = scmp.ne.s32.totalorder %s399_s20, %s3920_s28  ;;  %p3929_p6 = scmp.lt.s32.totalorder %s3920_s28, %s3920_s28 }
  0x37   : > { %p3923_p3 = pnand %p3921_p2, %p4694_p11  ;;  %p3930_p4 = por %p3929_p6, %p3928_p8 }
  0x39   : > { %p3924_p5 = pneg %p3923_p3 }
  0x3b   : > { %p3931_p7 = pnand %p3930_p4, %p3924_p5 }
  0x3d   : > { %3934 = shalt.err (!%p3931_p7)
}
  0x3e   : > { %3730 = dma.hbm_to_vmem [thread:$0]  (!%p4678_p9), %s5367_s4, 128, %s399_s20, [#allocation12]  }
  0x3f   : > { %s5369_s6 = sld [smem:[#allocation69_spill]] }
  0x45   : > { %s3935_s19 = scalar_lea.hbm %s5369_s6, 2048 }
  0x46   : > { %p3936_p10 = scmp.ne.s32.totalorder %s5369_s6, %s3935_s19  ;;  %p3942_p4 = scmp.lt.u32.totalorder %s3935_s19, %s5369_s6 }
  0x48   : > { %p3938_p12 = pnand %p3936_p10, %p4694_p11 }
  0x4a   : > { %p3939_p6 = pneg %p3938_p12 }
  0x4c   : > { %p3944_p7 = pnand %p3942_p4, %p3939_p6 }
  0x4e   : > { %3947 = shalt.err (!%p3944_p7)
}
  0x4f   : > { %s3948_s20 = scalar_lea.vmem %s4682_s24, 2048  ;;  %p3956_p2 = scmp.lt.s32.totalorder %s4682_s24, %s4682_s24 }
  0x50   : > { %p3949_p13 = scmp.ne.s32.totalorder %s4682_s24, %s3948_s20  ;;  %p3957_p3 = scmp.lt.s32.totalorder %s3948_s20, %s3948_s20 }
  0x52   : > { %p3951_p0 = pnand %p3949_p13, %p4694_p11  ;;  %p3958_p5 = por %p3957_p3, %p3956_p2 }
  0x54   : > { %p3952_p1 = pneg %p3951_p0 }
  0x56   : > { %p3959_p8 = pnand %p3958_p5, %p3952_p1 }
  0x58   : > { %3962 = shalt.err (!%p3959_p8)
}
  0x59   : > { %s5346_s13 = smov 128   ;;  %s5347_s14 = smov 8  }
  0x5a   : > { %3736 = dma.hbm_to_vmem [thread:$0]  (!%p4678_p9), %s5369_s6, 2048, %s4682_s24, [#allocation15], %s5346_s13, %s5346_s13, %s5347_s14  }
  0x5b   : > { %s3963_s19 = scalar_lea.hbm %s5330_s8, 8192 }
  0x5c   : > { %p3964_p10 = scmp.ne.s32.totalorder %s5330_s8, %s3963_s19  ;;  %p3970_p4 = scmp.lt.u32.totalorder %s3963_s19, %s5330_s8 }
  0x5e   : > { %p3966_p12 = pnand %p3964_p10, %p4694_p11 }
  0x60   : > { %p3967_p6 = pneg %p3966_p12 }
  0x62   : > { %p3972_p7 = pnand %p3970_p4, %p3967_p6 }
  0x64   : > { %3975 = shalt.err (!%p3972_p7)
}
  0x65   : > { %s3976_s16 = scalar_lea.vmem %s448_s27, 8192  ;;  %p3984_p2 = scmp.lt.s32.totalorder %s448_s27, %s448_s27 }
  0x66   : > { %p3977_p13 = scmp.ne.s32.totalorder %s448_s27, %s3976_s16  ;;  %p3985_p3 = scmp.lt.s32.totalorder %s3976_s16, %s3976_s16 }
  0x68   : > { %p3979_p0 = pnand %p3977_p13, %p4694_p11  ;;  %p3986_p5 = por %p3985_p3, %p3984_p2 }
  0x6a   : > { %p3980_p1 = pneg %p3979_p0 }
  0x6c   : > { %p3987_p8 = pnand %p3986_p5, %p3980_p1 }
  0x6e   : > { %3990 = shalt.err (!%p3987_p8)
}
  0x6f   : > { %s5349_s24 = smov 512   ;;  %s4518_s29 = smov 32  }
  0x70   : > { %3742 = dma.hbm_to_vmem [thread:$0]  (!%p4678_p9), %s5330_s8, 8192, %s448_s27, [#allocation18], %s5349_s24, %s5349_s24, %s4518_s29  }
  0x71   : > { %s4519_s30 = smov [#allocation8]   ;;  %s4520_s26 = smov [#allocation13]  }
  0x72   : > { %s384_s19 = sshll.u32 %s4519_s30, 4  ;;  %s408_s28 = sshll.u32 %s4520_s26, 4  ;;  %s385_s19 = int_to_ptr.vmem [resolvable:$true] %s384_s19  ;;  %s409_s28 = int_to_ptr.vmem [resolvable:$true] %s408_s28 }
  0x73   : > { %s5370_s2 = sld [smem:[#allocation65_spill]] }
  0x79   : > { %s3991_s13 = scalar_lea.hbm %s5370_s2, 128 }
  0x7a   : > { %p3992_p10 = scmp.ne.s32.totalorder %s5370_s2, %s3991_s13  ;;  %p3998_p4 = scmp.lt.u32.totalorder %s3991_s13, %s5370_s2 }
  0x7c   : > { %p3994_p12 = pnand %p3992_p10, %p4694_p11 }
  0x7e   : > { %p3995_p6 = pneg %p3994_p12 }
  0x80   : > { %p4000_p7 = pnand %p3998_p4, %p3995_p6 }
  0x82   : > { %4003 = shalt.err (!%p4000_p7)
}
  0x83   : > { %s4004_s27 = scalar_lea.vmem %s385_s19, 128  ;;  %p4012_p2 = scmp.lt.s32.totalorder %s385_s19, %s385_s19 }
  0x84   : > { %p4005_p13 = scmp.ne.s32.totalorder %s385_s19, %s4004_s27  ;;  %p4013_p3 = scmp.lt.s32.totalorder %s4004_s27, %s4004_s27 }
  0x86   : > { %p4007_p0 = pnand %p4005_p13, %p4694_p11  ;;  %p4014_p5 = por %p4013_p3, %p4012_p2 }
  0x88   : > { %p4008_p1 = pneg %p4007_p0 }
  0x8a   : > { %p4015_p8 = pnand %p4014_p5, %p4008_p1 }
  0x8c   : > { %4018 = shalt.err (!%p4015_p8)
}
  0x8d   : > { %3727 = dma.hbm_to_vmem [thread:$0]  (!%p4678_p9), %s5370_s2, 128, %s385_s19, [#allocation9]  }
  0x8e   : > { %s5371_s5 = sld [smem:[#allocation68_spill]] }
  0x94   : > { %s4019_s13 = scalar_lea.hbm %s5371_s5, 2048 }
  0x95   : > { %p4020_p10 = scmp.ne.s32.totalorder %s5371_s5, %s4019_s13  ;;  %p4026_p4 = scmp.lt.u32.totalorder %s4019_s13, %s5371_s5 }
  0x97   : > { %p4022_p12 = pnand %p4020_p10, %p4694_p11 }
  0x99   : > { %p4023_p6 = pneg %p4022_p12 }
  0x9b   : > { %p4028_p7 = pnand %p4026_p4, %p4023_p6 }
  0x9d   : > { %4031 = shalt.err (!%p4028_p7)
}
  0x9e   : > { %s4032_s20 = scalar_lea.vmem %s409_s28, 2048  ;;  %p4040_p2 = scmp.lt.s32.totalorder %s409_s28, %s409_s28 }
  0x9f   : > { %p4033_p13 = scmp.ne.s32.totalorder %s409_s28, %s4032_s20  ;;  %p4041_p3 = scmp.lt.s32.totalorder %s4032_s20, %s4032_s20 }
  0xa1   : > { %p4035_p0 = pnand %p4033_p13, %p4694_p11  ;;  %p4042_p5 = por %p4041_p3, %p4040_p2 }
  0xa3   : > { %p4036_p1 = pneg %p4035_p0 }
  0xa5   : > { %p4043_p8 = pnand %p4042_p5, %p4036_p1 }
  0xa7   : > { %4046 = shalt.err (!%p4043_p8)
}
  0xa8   : > { %s5372_s19 = smov 8   ;;  %s5373_s16 = smov 128  }
  0xa9   : > { %3733 = dma.hbm_to_vmem [thread:$0]  (!%p4678_p9), %s5371_s5, 2048, %s409_s28, [#allocation12], %s5373_s16, %s5373_s16, %s5372_s19  }
  0xaa   : > { %s4521_s14 = smov [#allocation16]   ;;  %s4522_s3 = smov [#allocation19]  }
  0xab   : > { %s434_s1 = sshll.u32 %s4521_s14, 4  ;;  %s460_s13 = sshll.u32 %s4522_s3, 4  ;;  %s435_s1 = int_to_ptr.vmem [resolvable:$true] %s434_s1  ;;  %s461_s13 = int_to_ptr.vmem [resolvable:$true] %s460_s13 }
  0xac   : > { %s5374_s7 = sld [smem:[#allocation70_spill]] }
  0xb2   : > { %s4047_s30 = scalar_lea.hbm %s5374_s7, 4096 }
  0xb3   : > { %p4048_p10 = scmp.ne.s32.totalorder %s5374_s7, %s4047_s30  ;;  %p4054_p4 = scmp.lt.u32.totalorder %s4047_s30, %s5374_s7 }
  0xb5   : > { %p4050_p12 = pnand %p4048_p10, %p4694_p11 }
  0xb7   : > { %p4051_p6 = pneg %p4050_p12 }
  0xb9   : > { %p4056_p7 = pnand %p4054_p4, %p4051_p6 }
  0xbb   : > { %4059 = shalt.err (!%p4056_p7)
}
  0xbc   : > { %s4060_s28 = scalar_lea.vmem %s435_s1, 4096  ;;  %p4068_p2 = scmp.lt.s32.totalorder %s435_s1, %s435_s1 }
  0xbd   : > { %p4061_p13 = scmp.ne.s32.totalorder %s435_s1, %s4060_s28  ;;  %p4069_p3 = scmp.lt.s32.totalorder %s4060_s28, %s4060_s28 }
  0xbf   : > { %p4063_p0 = pnand %p4061_p13, %p4694_p11  ;;  %p4070_p5 = por %p4069_p3, %p4068_p2 }
  0xc1   : > { %p4064_p1 = pneg %p4063_p0 }
  0xc3   : > { %p4071_p8 = pnand %p4070_p5, %p4064_p1 }
  0xc5   : > { %4074 = shalt.err (!%p4071_p8)
}
  0xc6   : > { %s5375_s19 = smov 512   ;;  %s4075_s3 = scalar_lea.hbm %s5331_s9, 8192 }
  0xc7   : > { %3739 = dma.hbm_to_vmem [thread:$0]  (!%p4678_p9), %s5374_s7, 4096, %s435_s1, [#allocation15], %s5375_s19, %s5375_s19, %s4518_s29  }
  0xc8   : > { %p4076_p10 = scmp.ne.s32.totalorder %s5331_s9, %s4075_s3  ;;  %p4082_p4 = scmp.lt.u32.totalorder %s4075_s3, %s5331_s9 }
  0xca   : > { %p4078_p12 = pnand %p4076_p10, %p4694_p11 }
  0xcc   : > { %p4079_p6 = pneg %p4078_p12 }
  0xce   : > { %p4084_p7 = pnand %p4082_p4, %p4079_p6 }
  0xd0   : > { %4087 = shalt.err (!%p4084_p7)
}
  0xd1   : > { %s4088_s20 = scalar_lea.vmem %s461_s13, 8192  ;;  %p4096_p2 = scmp.lt.s32.totalorder %s461_s13, %s461_s13 }
  0xd2   : > { %p4089_p13 = scmp.ne.s32.totalorder %s461_s13, %s4088_s20  ;;  %p4097_p3 = scmp.lt.s32.totalorder %s4088_s20, %s4088_s20 }
  0xd4   : > { %p4091_p0 = pnand %p4089_p13, %p4694_p11  ;;  %p4098_p5 = por %p4097_p3, %p4096_p2 }
  0xd6   : > { %p4092_p1 = pneg %p4091_p0 }
  0xd8   : > { %p4099_p8 = pnand %p4098_p5, %p4092_p1 }
  0xda   : > { %4102 = shalt.err (!%p4099_p8)
}
  0xdb   : > { %3745 = dma.hbm_to_vmem [thread:$0]  (!%p4678_p9), %s5331_s9, 8192, %s461_s13, [#allocation18], %s5375_s19, %s5375_s19, %s4518_s29  }
  0xdc   : > { %s4840_s25 = sadd.s32 1, %s4509_s18   ;;  %s237_s28 = sadd.s32 1, %s4505_s17 }
  0xdd   : > { %s234_s23 = ssub.s32 %s4509_s18, %s4840_s25  ;;  %p244_p10 = scmp.ne.s32.totalorder %s4505_s17, %s4501_s0 }
  0xde   : > { %p235_p11 = scmp.eq.s32.totalorder %s234_s23, 0  ;;  %p245_p12 = scmp.eq.s32.totalorder %s4509_s18, 0 }
  0xdf   : > { %p250_p6 = scmp.ne.s32.totalorder %s4501_s0, %s4497_s10  ;;  %p5376_p7 = scmp.eq.s32.totalorder %s4664_s21, 0 }
  0xe0   : > { %s4851_s24 = scalar_select %p235_p11, %s4505_s17, %s237_s28  }
  0xe1   : > { %p246_p4 = por %p245_p12, %p244_p10  ;;  %p4855_p13 = por %p5376_p7, %p250_p6 }
  0xe2   : > { %p3757_p0 = scmp.lt.s32.totalorder %s4509_s18, 2  ;;  %s477_s6 = sand.u32 1, %s4505_s17  }
  0xe3   : > { %s3206_s29 = sshll.u32 %s477_s6, 8  ;;  %s3269_s13 = sshll.u32 %s4509_s18, 8 }
  0xe4   : > { %s4865_s4 = scalar_lea.hbm %s5333_s11, %s3269_s13  ;;  %s481_s10 = scalar_lea.vmem [#allocation20], %s3206_s29 }
  0xe5   : > { %s488_s15 = sshll.u32 %s481_s10, 4  ;;  %p4869_p9 = pnand %p3757_p0, %p246_p4  ;;  %s4867_s15 = int_to_ptr.vmem [resolvable:$true] %s488_s15 }
  0xe6   : > { %s4873_s18 = scalar_lea.sflag [#allocation21], %s477_s6  ;;  %s4103_s26 = scalar_lea.hbm %s4865_s4, 4096 }
  0xe7   : > { %p4104_p1 = scmp.ne.s32.totalorder %s4865_s4, %s4103_s26  ;;  %p4105_p2 = pneg %p4869_p9 }
  0xe8   : > { %s4108_s27 = scalar_lea.hbm %s5333_s11, 8192  ;;  %p4109_p8 = scmp.lt.u32.totalorder %s4865_s4, %s5333_s11 }
  0xe9   : > { %p4106_p3 = pnand %p4105_p2, %p4104_p1  ;;  %p4110_p11 = scmp.lt.u32.totalorder %s4108_s27, %s4103_s26 }
  0xea   : > { %p4112_p12 = scmp.lt.u32.totalorder %s4103_s26, %s4865_s4 }
  0xeb   : > { %p4107_p5 = pneg %p4106_p3  ;;  %p4111_p10 = por %p4110_p11, %p4109_p8 }
  0xed   : > { %p4113_p6 = por %p4112_p12, %p4111_p10 }
  0xef   : > { %p4114_p4 = pnand %p4113_p6, %p4107_p5 }
  0xf1   : > { %4117 = shalt.err (!%p4114_p4)
}
  0xf2   : > { %s4118_s6 = scalar_lea.vmem %s4867_s15, 4096  ;;  %s4523_s29 = smov [#allocation20]  }
  0xf3   : > { %p4119_p7 = scmp.ne.s32.totalorder %s4867_s15, %s4118_s6  ;;  %s4123_s13 = sshll.u32 %s4523_s29, 4  ;;  %s4124_s13 = int_to_ptr.vmem [resolvable:$false] %s4123_s13 }
  0xf4   : > { %s4125_s14 = scalar_lea.vmem %s4124_s13, 8192  ;;  %p4126_p3 = scmp.lt.s32.totalorder %s4867_s15, %s4124_s13 }
  0xf5   : > { %p4121_p0 = pnand %p4119_p7, %p4105_p2  ;;  %p4127_p8 = scmp.lt.s32.totalorder %s4125_s14, %s4118_s6 }
  0xf7   : > { %p4122_p1 = pneg %p4121_p0  ;;  %p4128_p11 = por %p4127_p8, %p4126_p3 }
  0xf9   : > { %p4129_p10 = pnand %p4128_p11, %p4122_p1 }
  0xfb   : > { %4132 = shalt.err (!%p4129_p10)
}
  0xfc   : > { %s4524_s3 = smov 256   ;;  %s4525_s10 = smov 16  }
  0xfd   : > { %3749 = dma.hbm_to_vmem [thread:$0]  (!%p4869_p9), %s4865_s4, 4096, %s4867_s15, %s4873_s18, %s5375_s19, %s4524_s3, %s4525_s10  }
  0xfe   : > { %p5379_p2 = scmp.ne.s32.totalorder %s5365_s22, 0 }
  0xff   : > { %p5380_p5 = scmp.eq.s32.totalorder (!%p5379_p2), %s4664_s21, 0 }
 0x100   : > { %508 = sbr.rel (%p5379_p2) target bundleno = 2550 (0x9f6), region = 64 }
 0x107   : > { %4448 = dma.done.wait (%p5380_p5), [#allocation9], 128   ;;  %p5381_p12 = pmov %p5380_p5 }
 0x108   : > { %p5382_p6 = pmov %p5380_p5 }
 0x109   : > { %4450 = vsyncadd (%p5381_p12), [#allocation9], 4294967168 }
 0x10a   : > { %4452 = dma.done.wait (%p5382_p6), [#allocation12], 2176   ;;  %p5383_p4 = pmov %p5380_p5 }
 0x10c   : > { %4454 = vsyncadd (%p5383_p4), [#allocation12], 4294965120  ;;  %p5384_p7 = pmov %p5383_p4 }
 0x10d   : > { %p5385_p9 = pmov %p5383_p4 }
 0x10e   : > { %4456 = dma.done.wait (%p5384_p7), [#allocation15], 6144  }
 0x10f   : > { %4458 = vsyncadd (%p5385_p9), [#allocation15], 4294961152  ;;  %p5386_p0 = pmov %p5383_p4 }
 0x111   : > { %4460 = dma.done.wait (%p5386_p0), [#allocation18], 16384   ;;  %p5387_p1 = pmov %p5386_p0 }
 0x112   : > { %s538_s22 = sand.u32 1, %s4501_s0  }
 0x113   : > { %4462 = vsyncadd (%p5387_p1), [#allocation18], 4294950912  ;;  %s3217_s19 = sshll.u32 %s538_s22, 8  ;;  %s539_s4 = scalar_lea.sflag [#allocation21], %s538_s22 }
 0x114   : > { %s4921_s15 = scalar_lea.vmem [#allocation20], %s3217_s19 }
 0x115   : > { %4464 = dma.done.wait (%p4855_p13), %s539_s4, 4096  }
 0x116   : > { %4466 = vsyncadd (%p4855_p13), %s539_s4, 4294963200  ;;  %s3218_s30 = sshll.u32 %s4664_s21, 1  ;;  %p5388_p8 = scmp.ne.s32.totalorder %s4664_s21, 0 }
 0x117   : > { %p588_p3 = scmp.lt.s32.totalorder %s3218_s30, 3  ;;  %s596_s1 = sld [smem:[#allocation7]] (!%p5388_p8) }
 0x118   : > { %595 = sbr.rel (%p5388_p8) target bundleno = 1591 (0x637), region = 100  ;;  %s4526_s27 = smov (!%p5388_p8), [#allocation2]  }
 0x119   : > { %s5402_s30 = smov (!%p588_p3, %s3218_s30), 3  ;;  %s613_s23 = sshll.u32 (!%p5388_p8), %s4526_s27, 4  ;;  %s4938_s23 = int_to_ptr.vmem [resolvable:$true] %s613_s23 }
 0x11a   : > { %s4936_s28 = sld [smem:[#allocation7 + $0x1]] (!%p5388_p8)  ;;  %s4527_s16 = smov (!%p5388_p8), [#allocation2 + $0x1]  }
 0x11b   : > { %s628_s6 = sshll.u32 (!%p5388_p8), %s4527_s16, 4  ;;  %s4940_s29 = sld [smem:[#allocation7 + $0x2]] (!%p5388_p8)  ;;  %s4942_s6 = int_to_ptr.vmem [resolvable:$true] %s628_s6 }
 0x11c   : > { %s4528_s13 = smov (!%p5388_p8), [#allocation2 + $0x2]   ;;  %s4944_s3 = sld [smem:[#allocation7 + $0x3]] (!%p5388_p8) }
 0x11d   : > { %s643_s14 = sshll.u32 (!%p5388_p8), %s4528_s13, 4  ;;  %s3227_s10 = sshll.u32 (!%p5388_p8), %s596_s1, 4  ;;  %s4946_s14 = int_to_ptr.vmem [resolvable:$true] %s643_s14 }
 0x11e   : > { %s5389_s4 = sld [smem:[#allocation64_spill]] (!%p5388_p8) }
 0x120   : > { %s3228_s26 = sshll.u32 %s4936_s28, 4 }
 0x124   : > { %s605_s18 = scalar_lea.hbm %s5389_s4, %s3227_s10  ;;  %s4955_s2 = scalar_lea.hbm %s5389_s4, 896 }
 0x125   : > { %s4133_s27 = scalar_lea.hbm %s605_s18, 16  ;;  %p4136_p11 = scmp.lt.u32.totalorder %s605_s18, %s5389_s4 }
 0x126   : > { %p4134_p13 = scmp.ne.s32.totalorder %s605_s18, %s4133_s27  ;;  %p4137_p10 = scmp.lt.u32.totalorder %s4955_s2, %s4133_s27 }
 0x127   : > { %p4139_p5 = scmp.lt.u32.totalorder %s4133_s27, %s605_s18 }
 0x128   : > { %p4138_p2 = por %p4137_p10, %p4136_p11 }
 0x12a   : > { %p4140_p12 = por %p4139_p5, %p4138_p2 }
 0x12c   : > { %p4141_p6 = pnand %p4140_p12, %p4134_p13 }
 0x12e   : > { %4144 = shalt.err (!%p4141_p6)  }
 0x12f   : > { %s4145_s1 = scalar_lea.vmem %s4938_s23, 16  ;;  %s4964_s20 = scalar_lea.vmem %s4938_s23, 128 }
 0x130   : > { %p4146_p4 = scmp.ne.s32.totalorder %s4938_s23, %s4145_s1  ;;  %p4150_p7 = scmp.lt.s32.totalorder %s4938_s23, %s4938_s23 }
 0x131   : > { %p4151_p9 = scmp.lt.s32.totalorder %s4964_s20, %s4145_s1 }
 0x133   : > { %p4152_p0 = por %p4151_p9, %p4150_p7 }
 0x135   : > { %p4153_p1 = pnand %p4152_p0, %p4146_p4 }
 0x137   : > { %4156 = shalt.err (!%p4153_p1)  }
 0x138   : > { %616 = dma.hbm_to_vmem [thread:$0]  %s605_s18, 16, %s4938_s23, [#allocation3] }
 0x139   : > { %s618_s28 = scalar_lea.hbm %s5389_s4, %s3228_s26  ;;  %s3229_s13 = sshll.u32 %s4940_s29, 4 }
 0x13a   : > { %s4157_s10 = scalar_lea.hbm %s618_s28, 16  ;;  %p4160_p8 = scmp.lt.u32.totalorder %s618_s28, %s5389_s4 }
 0x13b   : > { %p4158_p3 = scmp.ne.s32.totalorder %s618_s28, %s4157_s10  ;;  %p4161_p13 = scmp.lt.u32.totalorder %s4955_s2, %s4157_s10 }
 0x13c   : > { %p4163_p10 = scmp.lt.u32.totalorder %s4157_s10, %s618_s28 }
 0x13d   : > { %p4162_p11 = por %p4161_p13, %p4160_p8 }
 0x13f   : > { %p4164_p2 = por %p4163_p10, %p4162_p11 }
 0x141   : > { %p4165_p5 = pnand %p4164_p2, %p4158_p3 }
 0x143   : > { %4168 = shalt.err (!%p4165_p5)  }
 0x144   : > { %s4169_s18 = scalar_lea.vmem %s4942_s6, 16  ;;  %p4174_p6 = scmp.lt.s32.totalorder %s4942_s6, %s4938_s23 }
 0x145   : > { %p4170_p12 = scmp.ne.s32.totalorder %s4942_s6, %s4169_s18  ;;  %p4175_p4 = scmp.lt.s32.totalorder %s4964_s20, %s4169_s18 }
 0x147   : > { %p4176_p7 = por %p4175_p4, %p4174_p6 }
 0x149   : > { %p4177_p9 = pnand %p4176_p7, %p4170_p12 }
 0x14b   : > { %4180 = shalt.err (!%p4177_p9)  }
 0x14c   : > { %631 = dma.hbm_to_vmem [thread:$0]  %s618_s28, 16, %s4942_s6, [#allocation3 + $0x1] }
 0x14d   : > { %s633_s27 = scalar_lea.hbm %s5389_s4, %s3229_s13  ;;  %s3230_s16 = sshll.u32 %s4944_s3, 4 }
 0x14e   : > { %s4181_s1 = scalar_lea.hbm %s633_s27, 16  ;;  %p4184_p1 = scmp.lt.u32.totalorder %s633_s27, %s5389_s4 }
 0x14f   : > { %p4182_p0 = scmp.ne.s32.totalorder %s633_s27, %s4181_s1  ;;  %p4185_p3 = scmp.lt.u32.totalorder %s4955_s2, %s4181_s1 }
 0x150   : > { %p4187_p13 = scmp.lt.u32.totalorder %s4181_s1, %s633_s27 }
 0x151   : > { %p4186_p8 = por %p4185_p3, %p4184_p1 }
 0x153   : > { %p4188_p11 = por %p4187_p13, %p4186_p8 }
 0x155   : > { %p4189_p10 = pnand %p4188_p11, %p4182_p0 }
 0x157   : > { %4192 = shalt.err (!%p4189_p10)  }
 0x158   : > { %s4193_s6 = scalar_lea.vmem %s4946_s14, 16  ;;  %p4198_p5 = scmp.lt.s32.totalorder %s4946_s14, %s4938_s23 }
 0x159   : > { %p4194_p2 = scmp.ne.s32.totalorder %s4946_s14, %s4193_s6  ;;  %p4199_p12 = scmp.lt.s32.totalorder %s4964_s20, %s4193_s6 }
 0x15b   : > { %p4200_p6 = por %p4199_p12, %p4198_p5 }
 0x15d   : > { %p4201_p4 = pnand %p4200_p6, %p4194_p2 }
 0x15f   : > { %4204 = shalt.err (!%p4201_p4)  }
 0x160   : > { %646 = dma.hbm_to_vmem [thread:$0]  %s633_s27, 16, %s4946_s14, [#allocation3 + $0x2] }
 0x161   : > { %s648_s13 = scalar_lea.hbm %s5389_s4, %s3230_s16  ;;  %s4529_s10 = smov [#allocation2 + $0x3]  }
 0x162   : > { %s658_s22 = sshll.u32 %s4529_s10, 4  ;;  %s5001_s19 = sld [smem:[#allocation7 + $0x4]]  ;;  %s659_s22 = int_to_ptr.vmem [resolvable:$true] %s658_s22 }
 0x163   : > { %s4205_s18 = scalar_lea.hbm %s648_s13, 16  ;;  %p4208_p9 = scmp.lt.u32.totalorder %s648_s13, %s5389_s4 }
 0x164   : > { %p4206_p7 = scmp.ne.s32.totalorder %s648_s13, %s4205_s18  ;;  %p4209_p0 = scmp.lt.u32.totalorder %s4955_s2, %s4205_s18 }
 0x165   : > { %p4211_p3 = scmp.lt.u32.totalorder %s4205_s18, %s648_s13 }
 0x166   : > { %p4210_p1 = por %p4209_p0, %p4208_p9 }
 0x168   : > { %p4212_p8 = por %p4211_p3, %p4210_p1 }
 0x16a   : > { %p4213_p13 = pnand %p4212_p8, %p4206_p7 }
 0x16c   : > { %4216 = shalt.err (!%p4213_p13)  }
 0x16d   : > { %s4217_s14 = scalar_lea.vmem %s659_s22, 16  ;;  %p4222_p10 = scmp.lt.s32.totalorder %s659_s22, %s4938_s23 }
 0x16e   : > { %p4218_p11 = scmp.ne.s32.totalorder %s659_s22, %s4217_s14  ;;  %p4223_p2 = scmp.lt.s32.totalorder %s4964_s20, %s4217_s14 }
 0x170   : > { %p4224_p5 = por %p4223_p2, %p4222_p10 }
 0x172   : > { %p4225_p12 = pnand %p4224_p5, %p4218_p11 }
 0x174   : > { %4228 = shalt.err (!%p4225_p12)  }
 0x175   : > { %661 = dma.hbm_to_vmem [thread:$0]  %s648_s13, 16, %s659_s22, [#allocation3 + $0x3] }
 0x176   : > { %s4530_s27 = smov [#allocation2 + $0x4]   ;;  %s5009_s1 = sld [smem:[#allocation7 + $0x5]] }
 0x177   : > { %s673_s16 = sshll.u32 %s4530_s27, 4  ;;  %s4531_s5 = smov [#allocation2 + $0x5]   ;;  %s674_s16 = int_to_ptr.vmem [resolvable:$true] %s673_s16 }
 0x178   : > { %s688_s7 = sshll.u32 %s4531_s5, 4  ;;  %s5011_s6 = sld [smem:[#allocation7 + $0x6]]  ;;  %s5014_s7 = int_to_ptr.vmem [resolvable:$true] %s688_s7 }
 0x179   : > { %s3231_s3 = sshll.u32 %s5001_s19, 4 }
 0x17a   : > { %s663_s18 = scalar_lea.hbm %s5389_s4, %s3231_s3 }
 0x17b   : > { %s4229_s29 = scalar_lea.hbm %s663_s18, 16  ;;  %p4232_p4 = scmp.lt.u32.totalorder %s663_s18, %s5389_s4 }
 0x17c   : > { %p4230_p6 = scmp.ne.s32.totalorder %s663_s18, %s4229_s29  ;;  %p4233_p7 = scmp.lt.u32.totalorder %s4955_s2, %s4229_s29 }
 0x17d   : > { %p4235_p0 = scmp.lt.u32.totalorder %s4229_s29, %s663_s18 }
 0x17e   : > { %p4234_p9 = por %p4233_p7, %p4232_p4 }
 0x180   : > { %p4236_p1 = por %p4235_p0, %p4234_p9 }
 0x182   : > { %p4237_p3 = pnand %p4236_p1, %p4230_p6 }
 0x184   : > { %4240 = shalt.err (!%p4237_p3)  }
 0x185   : > { %s4241_s26 = scalar_lea.vmem %s674_s16, 16  ;;  %p4246_p13 = scmp.lt.s32.totalorder %s674_s16, %s4938_s23 }
 0x186   : > { %p4242_p8 = scmp.ne.s32.totalorder %s674_s16, %s4241_s26  ;;  %p4247_p11 = scmp.lt.s32.totalorder %s4964_s20, %s4241_s26 }
 0x188   : > { %p4248_p10 = por %p4247_p11, %p4246_p13 }
 0x18a   : > { %p4249_p2 = pnand %p4248_p10, %p4242_p8 }
 0x18c   : > { %4252 = shalt.err (!%p4249_p2)  }
 0x18d   : > { %676 = dma.hbm_to_vmem [thread:$0]  %s663_s18, 16, %s674_s16, [#allocation3 + $0x4] }
 0x18e   : > { %s3232_s19 = sshll.u32 %s5009_s1, 4  ;;  %s4532_s14 = smov [#allocation2 + $0x6]  }
 0x18f   : > { %s703_s27 = sshll.u32 %s4532_s14, 4  ;;  %s678_s28 = scalar_lea.hbm %s5389_s4, %s3232_s19  ;;  %s5029_s27 = int_to_ptr.vmem [resolvable:$true] %s703_s27 }
 0x190   : > { %s4253_s10 = scalar_lea.hbm %s678_s28, 16  ;;  %p4256_p12 = scmp.lt.u32.totalorder %s678_s28, %s5389_s4 }
 0x191   : > { %p4254_p5 = scmp.ne.s32.totalorder %s678_s28, %s4253_s10  ;;  %p4257_p6 = scmp.lt.u32.totalorder %s4955_s2, %s4253_s10 }
 0x192   : > { %p4259_p7 = scmp.lt.u32.totalorder %s4253_s10, %s678_s28 }
 0x193   : > { %p4258_p4 = por %p4257_p6, %p4256_p12 }
 0x195   : > { %p4260_p9 = por %p4259_p7, %p4258_p4 }
 0x197   : > { %p4261_p0 = pnand %p4260_p9, %p4254_p5 }
 0x199   : > { %4264 = shalt.err (!%p4261_p0)  }
 0x19a   : > { %s4265_s16 = scalar_lea.vmem %s5014_s7, 16  ;;  %p4270_p3 = scmp.lt.s32.totalorder %s5014_s7, %s4938_s23 }
 0x19b   : > { %p4266_p1 = scmp.ne.s32.totalorder %s5014_s7, %s4265_s16  ;;  %p4271_p8 = scmp.lt.s32.totalorder %s4964_s20, %s4265_s16 }
 0x19d   : > { %p4272_p13 = por %p4271_p8, %p4270_p3 }
 0x19f   : > { %p4273_p11 = pnand %p4272_p13, %p4266_p1 }
 0x1a1   : > { %4276 = shalt.err (!%p4273_p11)  }
 0x1a2   : > { %691 = dma.hbm_to_vmem [thread:$0]  %s678_s28, 16, %s5014_s7, [#allocation3 + $0x5] }
 0x1a3   : > { %s3233_s1 = sshll.u32 %s5011_s6, 4  ;;  %s3226_s18 = sld [smem:[#allocation7 + $0x7]] }
 0x1a4   : > { %s693_s19 = scalar_lea.hbm %s5389_s4, %s3233_s1 }
 0x1a5   : > { %s4277_s14 = scalar_lea.hbm %s693_s19, 16  ;;  %p4280_p2 = scmp.lt.u32.totalorder %s693_s19, %s5389_s4 }
 0x1a6   : > { %p4278_p10 = scmp.ne.s32.totalorder %s693_s19, %s4277_s14  ;;  %p4281_p5 = scmp.lt.u32.totalorder %s4955_s2, %s4277_s14 }
 0x1a7   : > { %p4283_p6 = scmp.lt.u32.totalorder %s4277_s14, %s693_s19 }
 0x1a8   : > { %p4282_p12 = por %p4281_p5, %p4280_p2 }
 0x1aa   : > { %p4284_p4 = por %p4283_p6, %p4282_p12 }
 0x1ac   : > { %p4285_p7 = pnand %p4284_p4, %p4278_p10 }
 0x1ae   : > { %4288 = shalt.err (!%p4285_p7)  }
 0x1af   : > { %s4289_s7 = scalar_lea.vmem %s5029_s27, 16  ;;  %p4294_p0 = scmp.lt.s32.totalorder %s5029_s27, %s4938_s23 }
 0x1b0   : > { %p4290_p9 = scmp.ne.s32.totalorder %s5029_s27, %s4289_s7  ;;  %p4295_p1 = scmp.lt.s32.totalorder %s4964_s20, %s4289_s7 }
 0x1b2   : > { %p4296_p3 = por %p4295_p1, %p4294_p0 }
 0x1b4   : > { %p4297_p8 = pnand %p4296_p3, %p4290_p9 }
 0x1b6   : > { %4300 = shalt.err (!%p4297_p8)  }
 0x1b7   : > { %706 = dma.hbm_to_vmem [thread:$0]  %s693_s19, 16, %s5029_s27, [#allocation3 + $0x6] }
 0x1b8   : > { %s4533_s6 = smov [#allocation2 + $0x7]   ;;  %s3234_s10 = sshll.u32 %s3226_s18, 4 }
 0x1b9   : > { %s718_s28 = sshll.u32 %s4533_s6, 4  ;;  %s708_s16 = scalar_lea.hbm %s5389_s4, %s3234_s10  ;;  %s719_s28 = int_to_ptr.vmem [resolvable:$true] %s718_s28 }
 0x1ba   : > { %s4301_s1 = scalar_lea.hbm %s708_s16, 16  ;;  %p4304_p11 = scmp.lt.u32.totalorder %s708_s16, %s5389_s4 }
 0x1bb   : > { %p4302_p13 = scmp.ne.s32.totalorder %s708_s16, %s4301_s1  ;;  %p4305_p10 = scmp.lt.u32.totalorder %s4955_s2, %s4301_s1 }
 0x1bc   : > { %p4307_p5 = scmp.lt.u32.totalorder %s4301_s1, %s708_s16 }
 0x1bd   : > { %p4306_p2 = por %p4305_p10, %p4304_p11 }
 0x1bf   : > { %p4308_p12 = por %p4307_p5, %p4306_p2 }
 0x1c1   : > { %p4309_p6 = pnand %p4308_p12, %p4302_p13 }
 0x1c3   : > { %4312 = shalt.err (!%p4309_p6)  }
 0x1c4   : > { %s4313_s27 = scalar_lea.vmem %s719_s28, 16  ;;  %p4318_p7 = scmp.lt.s32.totalorder %s719_s28, %s4938_s23 }
 0x1c5   : > { %p4314_p4 = scmp.ne.s32.totalorder %s719_s28, %s4313_s27  ;;  %p4319_p9 = scmp.lt.s32.totalorder %s4964_s20, %s4313_s27 }
 0x1c7   : > { %p4320_p0 = por %p4319_p9, %p4318_p7 }
 0x1c9   : > { %p4321_p1 = pnand %p4320_p0, %p4314_p4 }
 0x1cb   : > { %4324 = shalt.err (!%p4321_p1)  }
 0x1cc   : > { %721 = dma.hbm_to_vmem [thread:$0]  %s708_s16, 16, %s719_s28, [#allocation3 + $0x7] }
 0x1cd   : > { %4467 = dma.done.wait [#allocation3], 16 }
 0x1ce   : > { %4468 = vsyncadd [#allocation3], 4294967280 }
 0x1cf   : > { %4469 = dma.done.wait [#allocation3 + $0x1], 16 }
 0x1d0   : > { %4470 = vsyncadd [#allocation3 + $0x1], 4294967280 }
 0x1d1   : > { %4471 = dma.done.wait [#allocation3 + $0x2], 16 }
 0x1d2   : > { %4472 = vsyncadd [#allocation3 + $0x2], 4294967280 }
 0x1d3   : > { %4473 = dma.done.wait [#allocation3 + $0x3], 16 }
 0x1d4   : > { %4474 = vsyncadd [#allocation3 + $0x3], 4294967280 }
 0x1d5   : > { %4475 = dma.done.wait [#allocation3 + $0x4], 16 }
 0x1d6   : > { %4476 = vsyncadd [#allocation3 + $0x4], 4294967280 }
 0x1d7   : > { %4477 = dma.done.wait [#allocation3 + $0x5], 16 }
 0x1d8   : > { %4478 = vsyncadd [#allocation3 + $0x5], 4294967280 }
 0x1d9   : > { %4479 = dma.done.wait [#allocation3 + $0x6], 16 }
 0x1da   : > { %4480 = vsyncadd [#allocation3 + $0x6], 4294967280 }
 0x1db   : > { %4481 = dma.done.wait [#allocation3 + $0x7], 16 }
 0x1dc   : > { %4482 = vsyncadd [#allocation3 + $0x7], 4294967280  ;;  %vm2743_vm0 = vcmask 7168   ;;  %v4534_v0 = vmov 0.0   ;;  %v4535_v1 = vmov -inf   ;;  %v773_v2 = vld [vmem:[#allocation17 + $0x8] sm:$0xff] }
 0x1dd   : > { %900 = vmatprep.mubr.f32.mxu0 %v4534_v0  ;;  %2744 = vst.msk [vmem:[#allocation4] sm:$0xff] %vm2743_vm0, %v4535_v1  ;;  %2745 = vst.msk [vmem:[#allocation5] sm:$0xff] %vm2743_vm0, %v4534_v0  ;;  %971 = vmatprep.mubr.f32.mxu1 %v4534_v0  ;;  %v777_v3 = vld [vmem:[#allocation17 + $0x28] sm:$0xff]  ;;  %v775_v4 = vld [vmem:[#allocation17 + $0x18] sm:$0xff]  ;;  %vm978_vm1 = vcmask 523264   ;;  %s5390_s20 = sld [smem:[#allocation66_spill]] }
 0x1de   : > { %v3430_v5 = vpack.c.bf16 %v777_v3, %v773_v2  ;;  %v779_v6 = vld [vmem:[#allocation17 + $0x38] sm:$0xff]  ;;  %v772_v7 = vld [vmem:[#allocation17] sm:$0xff]  ;;  %v774_v11 = vld [vmem:[#allocation17 + $0x10] sm:$0xff]  ;;  %vm4537_vm2 = vmmov 0   ;;  %s5391_s14 = sld [smem:[#allocation71_spill]]  ;;  %vm2022_vm3 = vcmask 122880  }
 0x1df   : > { %v776_v8 = vld [vmem:[#allocation17 + $0x20] sm:$0xff]  ;;  %v3462_v9 = vpack.c.bf16 %v779_v6, %v775_v4  ;;  %v778_v12 = vld [vmem:[#allocation17 + $0x30] sm:$0xff]  ;;  %v781_v13 = vld [vmem:[#allocation17 + $0x48] sm:$0xff]  ;;  %vm2127_vm4 = vcmask 130048   ;;  %vm2721_vm5 = vcmask 1041409   ;;  %vm2724_vm6 = vcmask 1042434  }
 0x1e0   : > { %v3432_v10 = vpack.c.bf16 %v776_v8, %v772_v7  ;;  %3431 = vmatprep.subr.bf16.mxu0 %v3430_v5  ;;  %v3464_v14 = vpack.c.bf16 %v778_v12, %v774_v11  ;;  %v785_v15 = vld [vmem:[#allocation17 + $0x68] sm:$0xff]  ;;  %v783_v16 = vld [vmem:[#allocation17 + $0x58] sm:$0xff]  ;;  %v780_v20 = vld [vmem:[#allocation17 + $0x40] sm:$0xff]  ;;  %vm2727_vm7 = vcmask 1043459   ;;  %vm2730_vm8 = vcmask 1044484  }
 0x1e1   : > { %v787_v17 = vld [vmem:[#allocation17 + $0x78] sm:$0xff]  ;;  %3463 = vmatprep.subr.bf16.mxu1 %v3462_v9  ;;  %v3434_v18 = vpack.c.bf16 %v785_v15, %v781_v13  ;;  %v784_v21 = vld [vmem:[#allocation17 + $0x60] sm:$0xff]  ;;  %v782_v22 = vld [vmem:[#allocation17 + $0x50] sm:$0xff]  ;;  %vm2733_vm9 = vcmask 1045509   ;;  %vm2736_vm10 = vcmask 1046534   ;;  %vm2739_vm11 = vcmask 1047559  }
 0x1e2   : > { %3433 = vmatpush1.bf16.msra.mxu0 %v3432_v10  ;;  %v3466_v19 = vpack.c.bf16 %v787_v17, %v783_v16  ;;  %3465 = vmatpush1.bf16.msra.mxu1 %v3464_v14  ;;  %v3436_v23 = vpack.c.bf16 %v784_v21, %v780_v20  ;;  %v786_v24 = vld [vmem:[#allocation17 + $0x70] sm:$0xff]  ;;  %v789_v25 = vld [vmem:[#allocation17 + $0x88] sm:$0xff]  ;;  %v791_v29 = vld [vmem:[#allocation17 + $0x98] sm:$0xff] }
 0x1e3   : > { %v793_v26 = vld [vmem:[#allocation17 + $0xa8] sm:$0xff]  ;;  %3435 = vmatprep.subr.bf16.mxu0 %v3434_v18  ;;  %v3468_v27 = vpack.c.bf16 %v786_v24, %v782_v22  ;;  %v795_v30 = vld [vmem:[#allocation17 + $0xb8] sm:$0xff]  ;;  %v788_v31 = vld [vmem:[#allocation17 + $0x80] sm:$0xff] }
 0x1e4   : > { %3467 = vmatprep.subr.bf16.mxu1 %v3466_v19  ;;  %v3438_v28 = vpack.c.bf16 %v793_v26, %v789_v25  ;;  %v3470_v32 = vpack.c.bf16 %v795_v30, %v791_v29  ;;  %v792_v33 = vld [vmem:[#allocation17 + $0xa0] sm:$0xff]  ;;  %v790_v34 = vld [vmem:[#allocation17 + $0x90] sm:$0xff]  ;;  %v797_v37 = vld [vmem:[#allocation17 + $0xc8] sm:$0xff] }
 0x1e5   : > { %v794_v35 = vld [vmem:[#allocation17 + $0xb0] sm:$0xff]  ;;  %v3440_v36 = vpack.c.bf16 %v792_v33, %v788_v31  ;;  %v801_v38 = vld [vmem:[#allocation17 + $0xe8] sm:$0xff]  ;;  %v799_v39 = vld [vmem:[#allocation17 + $0xd8] sm:$0xff] }
 0x1e6   : > { %3437 = vmatpush1.bf16.msra.mxu0 %v3436_v23  ;;  %3469 = vmatpush1.bf16.msra.mxu1 %v3468_v27  ;;  %v3472_v40 = vpack.c.bf16 %v794_v35, %v790_v34  ;;  %v3442_v41 = vpack.c.bf16 %v801_v38, %v797_v37  ;;  %v803_v42 = vld [vmem:[#allocation17 + $0xf8] sm:$0xff]  ;;  %v796_v43 = vld [vmem:[#allocation17 + $0xc0] sm:$0xff]  ;;  %v798_v46 = vld [vmem:[#allocation17 + $0xd0] sm:$0xff] }
 0x1e7   : > { %3439 = vmatprep.subr.bf16.mxu0 %v3438_v28  ;;  %v800_v44 = vld [vmem:[#allocation17 + $0xe0] sm:$0xff]  ;;  %3471 = vmatprep.subr.bf16.mxu1 %v3470_v32  ;;  %v3474_v45 = vpack.c.bf16 %v803_v42, %v799_v39  ;;  %v802_v47 = vld [vmem:[#allocation17 + $0xf0] sm:$0xff]  ;;  %v805_v48 = vld [vmem:[#allocation17 + $0x108] sm:$0xff] }
 0x1e8   : > { %v809_v49 = vld [vmem:[#allocation17 + $0x128] sm:$0xff]  ;;  %v807_v50 = vld [vmem:[#allocation17 + $0x118] sm:$0xff]  ;;  %v3444_v52 = vpack.c.bf16 %v800_v44, %v796_v43  ;;  %v3476_v53 = vpack.c.bf16 %v802_v47, %v798_v46  ;;  %v804_v55 = vld [vmem:[#allocation17 + $0x100] sm:$0xff] }
 0x1e9   : > { %v811_v51 = vld [vmem:[#allocation17 + $0x138] sm:$0xff]  ;;  %v3446_v54 = vpack.c.bf16 %v809_v49, %v805_v48  ;;  %v808_v56 = vld [vmem:[#allocation17 + $0x120] sm:$0xff]  ;;  %v806_v57 = vld [vmem:[#allocation17 + $0x110] sm:$0xff] }
 0x1ea   : > { %3441 = vmatpush1.bf16.msra.mxu0 %v3440_v36  ;;  %3473 = vmatpush1.bf16.msra.mxu1 %v3472_v40  ;;  %v3478_v58 = vpack.c.bf16 %v811_v51, %v807_v50  ;;  %v810_v59 = vld [vmem:[#allocation17 + $0x130] sm:$0xff]  ;;  %v813_v60 = vld [vmem:[#allocation17 + $0x148] sm:$0xff]  ;;  %v815_v62 = vld [vmem:[#allocation17 + $0x158] sm:$0xff]  ;;  %v3448_v1 = vpack.c.bf16 %v808_v56, %v804_v55 }
 0x1eb   : > { %3443 = vmatprep.subr.bf16.mxu0 %v3442_v41  ;;  %3475 = vmatprep.subr.bf16.mxu1 %v3474_v45  ;;  %v817_v61 = vld [vmem:[#allocation17 + $0x168] sm:$0xff]  ;;  %v819_v63 = vld [vmem:[#allocation17 + $0x178] sm:$0xff]  ;;  %v3480_v2 = vpack.c.bf16 %v810_v59, %v806_v57  ;;  %v812_v4 = vld [vmem:[#allocation17 + $0x140] sm:$0xff] }
 0x1ec   : > { %v3450_v3 = vpack.c.bf16 %v817_v61, %v813_v60  ;;  %v816_v5 = vld [vmem:[#allocation17 + $0x160] sm:$0xff]  ;;  %v814_v6 = vld [vmem:[#allocation17 + $0x150] sm:$0xff]  ;;  %v3482_v7 = vpack.c.bf16 %v819_v63, %v815_v62  ;;  %v821_v9 = vld [vmem:[#allocation17 + $0x188] sm:$0xff] }
 0x1ed   : > { %v818_v8 = vld [vmem:[#allocation17 + $0x170] sm:$0xff]  ;;  %v825_v10 = vld [vmem:[#allocation17 + $0x1a8] sm:$0xff]  ;;  %v823_v11 = vld [vmem:[#allocation17 + $0x198] sm:$0xff]  ;;  %v3452_v13 = vpack.c.bf16 %v816_v5, %v812_v4 }
 0x1ee   : > { %3445 = vmatpush1.bf16.msra.mxu0 %v3444_v52  ;;  %3477 = vmatpush1.bf16.msra.mxu1 %v3476_v53  ;;  %v827_v12 = vld [vmem:[#allocation17 + $0x1b8] sm:$0xff]  ;;  %v3484_v14 = vpack.c.bf16 %v818_v8, %v814_v6  ;;  %v3454_v15 = vpack.c.bf16 %v825_v10, %v821_v9  ;;  %v820_v16 = vld [vmem:[#allocation17 + $0x180] sm:$0xff]  ;;  %v822_v18 = vld [vmem:[#allocation17 + $0x190] sm:$0xff] }
 0x1ef   : > { %3447 = vmatprep.subr.bf16.mxu0 %v3446_v54  ;;  %3479 = vmatprep.subr.bf16.mxu1 %v3478_v58  ;;  %v824_v17 = vld [vmem:[#allocation17 + $0x1a0] sm:$0xff]  ;;  %v3486_v19 = vpack.c.bf16 %v827_v12, %v823_v11  ;;  %v826_v20 = vld [vmem:[#allocation17 + $0x1b0] sm:$0xff]  ;;  %v829_v21 = vld [vmem:[#allocation17 + $0x1c8] sm:$0xff] }
 0x1f0   : > { %v833_v22 = vld [vmem:[#allocation17 + $0x1e8] sm:$0xff]  ;;  %v831_v23 = vld [vmem:[#allocation17 + $0x1d8] sm:$0xff]  ;;  %v3456_v25 = vpack.c.bf16 %v824_v17, %v820_v16  ;;  %v3488_v26 = vpack.c.bf16 %v826_v20, %v822_v18  ;;  %v828_v28 = vld [vmem:[#allocation17 + $0x1c0] sm:$0xff] }
 0x1f1   : > { %v835_v24 = vld [vmem:[#allocation17 + $0x1f8] sm:$0xff]  ;;  %v3458_v27 = vpack.c.bf16 %v833_v22, %v829_v21  ;;  %v832_v29 = vld [vmem:[#allocation17 + $0x1e0] sm:$0xff]  ;;  %v830_v30 = vld [vmem:[#allocation17 + $0x1d0] sm:$0xff] }
 0x1f2   : > { %3449 = vmatpush1.bf16.msra.mxu0 %v3448_v1  ;;  %3481 = vmatpush1.bf16.msra.mxu1 %v3480_v2  ;;  %v3490_v31 = vpack.c.bf16 %v835_v24, %v831_v23  ;;  %v834_v32 = vld [vmem:[#allocation17 + $0x1f0] sm:$0xff]  ;;  %v740_v33 = vld [vmem:[#allocation16 + $0x8] sm:$0xff]  ;;  %v742_v35 = vld [vmem:[#allocation16 + $0x18] sm:$0xff]  ;;  %v3460_v37 = vpack.c.bf16 %v832_v29, %v828_v28 }
 0x1f3   : > { %3451 = vmatprep.subr.bf16.mxu0 %v3450_v3  ;;  %3483 = vmatprep.subr.bf16.mxu1 %v3482_v7  ;;  %v744_v34 = vld [vmem:[#allocation16 + $0x28] sm:$0xff]  ;;  %v746_v36 = vld [vmem:[#allocation16 + $0x38] sm:$0xff]  ;;  %v3492_v38 = vpack.c.bf16 %v834_v32, %v830_v30  ;;  %v739_v40 = vld [vmem:[#allocation16] sm:$0xff] }
 0x1f4   : > { %v3494_v39 = vpack.c.bf16 %v744_v34, %v740_v33  ;;  %v743_v41 = vld [vmem:[#allocation16 + $0x20] sm:$0xff]  ;;  %v741_v42 = vld [vmem:[#allocation16 + $0x10] sm:$0xff]  ;;  %v3510_v43 = vpack.c.bf16 %v746_v36, %v742_v35  ;;  %v748_v45 = vld [vmem:[#allocation16 + $0x48] sm:$0xff] }
 0x1f5   : > { %v745_v44 = vld [vmem:[#allocation16 + $0x30] sm:$0xff]  ;;  %v752_v46 = vld [vmem:[#allocation16 + $0x68] sm:$0xff]  ;;  %v750_v47 = vld [vmem:[#allocation16 + $0x58] sm:$0xff]  ;;  %v3496_v50 = vpack.c.bf16 %v743_v41, %v739_v40 }
 0x1f6   : > { %3453 = vmatpush1.bf16.msra.mxu0 %v3452_v13  ;;  %3485 = vmatpush1.bf16.msra.mxu1 %v3484_v14  ;;  %v754_v48 = vld [vmem:[#allocation16 + $0x78] sm:$0xff]  ;;  %v771_v49 = vld [vmem:[#allocation8] sm:$0xff]  ;;  %v3512_v51 = vpack.c.bf16 %v745_v44, %v741_v42  ;;  %v3498_v52 = vpack.c.bf16 %v752_v46, %v748_v45  ;;  %v747_v53 = vld [vmem:[#allocation16 + $0x40] sm:$0xff] }
 0x1f7   : > { %3455 = vmatprep.subr.bf16.mxu0 %v3454_v15  ;;  %3487 = vmatprep.subr.bf16.mxu1 %v3486_v19  ;;  %v751_v54 = vld [vmem:[#allocation16 + $0x60] sm:$0xff]  ;;  %v749_v55 = vld [vmem:[#allocation16 + $0x50] sm:$0xff]  ;;  %v3514_v56 = vpack.c.bf16 %v754_v48, %v750_v47  ;;  %v756_v58 = vld [vmem:[#allocation16 + $0x88] sm:$0xff] }
 0x1f8   : > { %v753_v57 = vld [vmem:[#allocation16 + $0x70] sm:$0xff]  ;;  %v760_v59 = vld [vmem:[#allocation16 + $0xa8] sm:$0xff]  ;;  %v758_v60 = vld [vmem:[#allocation16 + $0x98] sm:$0xff]  ;;  %v3500_v62 = vpack.c.bf16 %v751_v54, %v747_v53 }
 0x1f9   : > { %v762_v61 = vld [vmem:[#allocation16 + $0xb8] sm:$0xff]  ;;  %v3516_v63 = vpack.c.bf16 %v753_v57, %v749_v55  ;;  %v3502_v1 = vpack.c.bf16 %v760_v59, %v756_v58  ;;  %v755_v2 = vld [vmem:[#allocation16 + $0x80] sm:$0xff]  ;;  %v757_v4 = vld [vmem:[#allocation16 + $0x90] sm:$0xff] }
 0x1fa   : > { %3457 = vmatpush1.bf16.msra.mxu0 %v3456_v25  ;;  %3489 = vmatpush1.bf16.msra.mxu1 %v3488_v26  ;;  %v759_v3 = vld [vmem:[#allocation16 + $0xa0] sm:$0xff]  ;;  %v3518_v5 = vpack.c.bf16 %v762_v61, %v758_v60  ;;  %v761_v6 = vld [vmem:[#allocation16 + $0xb0] sm:$0xff]  ;;  %v764_v7 = vld [vmem:[#allocation16 + $0xc8] sm:$0xff] }
 0x1fb   : > { %3459 = vmatprep.subr.bf16.mxu0 %v3458_v27  ;;  %3491 = vmatprep.subr.bf16.mxu1 %v3490_v31  ;;  %v768_v8 = vld [vmem:[#allocation16 + $0xe8] sm:$0xff]  ;;  %v766_v9 = vld [vmem:[#allocation16 + $0xd8] sm:$0xff]  ;;  %v3504_v11 = vpack.c.bf16 %v759_v3, %v755_v2  ;;  %v3520_v12 = vpack.c.bf16 %v761_v6, %v757_v4  ;;  %v763_v14 = vld [vmem:[#allocation16 + $0xc0] sm:$0xff] }
 0x1fc   : > { %v770_v10 = vld [vmem:[#allocation16 + $0xf8] sm:$0xff]  ;;  %v3506_v13 = vpack.c.bf16 %v768_v8, %v764_v7  ;;  %v767_v15 = vld [vmem:[#allocation16 + $0xe0] sm:$0xff]  ;;  %v765_v16 = vld [vmem:[#allocation16 + $0xd0] sm:$0xff] }
 0x1fd   : > { %v3522_v17 = vpack.c.bf16 %v770_v10, %v766_v9  ;;  %v769_v18 = vld [vmem:[#allocation16 + $0xf0] sm:$0xff]  ;;  %v1126_v19 = vld [vmem:[#allocation19 + $0x8] sm:$0xff]  ;;  %v1128_v21 = vld [vmem:[#allocation19 + $0x18] sm:$0xff]  ;;  %v3508_v23 = vpack.c.bf16 %v767_v15, %v763_v14 }
 0x1fe   : > { %3461 = vmatpush1.bf16.msra.mxu0 %v3460_v37  ;;  %3493 = vmatpush1.bf16.msra.mxu1 %v3492_v38  ;;  %v1130_v20 = vld [vmem:[#allocation19 + $0x28] sm:$0xff]  ;;  %v1132_v22 = vld [vmem:[#allocation19 + $0x38] sm:$0xff]  ;;  %v3524_v24 = vpack.c.bf16 %v769_v18, %v765_v16  ;;  %v1125_v26 = vld [vmem:[#allocation19] sm:$0xff] }
 0x1ff   : > { %3495 = vmatprep.subr.bf16.mxu0 %v3494_v39  ;;  %3511 = vmatprep.subr.bf16.mxu1 %v3510_v43  ;;  %v3526_v25 = vpack.c.bf16 %v1130_v20, %v1126_v19  ;;  %v1129_v27 = vld [vmem:[#allocation19 + $0x20] sm:$0xff]  ;;  %v1127_v28 = vld [vmem:[#allocation19 + $0x10] sm:$0xff]  ;;  %v3558_v29 = vpack.c.bf16 %v1132_v22, %v1128_v21  ;;  %v1134_v31 = vld [vmem:[#allocation19 + $0x48] sm:$0xff] }
 0x200   : > { %v1131_v30 = vld [vmem:[#allocation19 + $0x30] sm:$0xff]  ;;  %v1138_v32 = vld [vmem:[#allocation19 + $0x68] sm:$0xff]  ;;  %v1136_v33 = vld [vmem:[#allocation19 + $0x58] sm:$0xff]  ;;  %v3528_v36 = vpack.c.bf16 %v1129_v27, %v1125_v26 }
 0x201   : > { %901 = vmatmul.mubr.f32.vlgmr.msra.gmra.mrb[0].mxu0 %v771_v49  ;;  %972 = vmatmul.mubr.f32.vlgmr.msra.gmra.mrb[0].mxu1 %v771_v49  ;;  %v1140_v34 = vld [vmem:[#allocation19 + $0x78] sm:$0xff]  ;;  %v3560_v37 = vpack.c.bf16 %v1131_v30, %v1127_v28  ;;  %v3530_v38 = vpack.c.bf16 %v1138_v32, %v1134_v31  ;;  %v1133_v39 = vld [vmem:[#allocation19 + $0x40] sm:$0xff]  ;;  %v1135_v41 = vld [vmem:[#allocation19 + $0x50] sm:$0xff] }
 0x202   : > { %3497 = vmatpush1.bf16.msra.mxu0 %v3496_v50  ;;  %3513 = vmatpush1.bf16.msra.mxu1 %v3512_v51  ;;  %v738_v35 = vld [vmem:[#allocation2] sm:$0xff]  ;;  %v1137_v40 = vld [vmem:[#allocation19 + $0x60] sm:$0xff]  ;;  %v3562_v42 = vpack.c.bf16 %v1140_v34, %v1136_v33  ;;  %v1139_v43 = vld [vmem:[#allocation19 + $0x70] sm:$0xff] }
 0x203   : > { %3499 = vmatprep.subr.bf16.mxu0 %v3498_v52  ;;  %3515 = vmatprep.subr.bf16.mxu1 %v3514_v56  ;;  %v1142_v44 = vld [vmem:[#allocation19 + $0x88] sm:$0xff]  ;;  %v1144_v46 = vld [vmem:[#allocation19 + $0x98] sm:$0xff]  ;;  %v3532_v48 = vpack.c.bf16 %v1137_v40, %v1133_v39  ;;  %v3564_v49 = vpack.c.bf16 %v1139_v43, %v1135_v41  ;;  %v1141_v51 = vld [vmem:[#allocation19 + $0x80] sm:$0xff] }
 0x204   : > { %1046 = vmatprep.mubr.f32.mxu0 %v4534_v0  ;;  %1117 = vmatprep.mubr.f32.mxu1 %v4534_v0  ;;  %v1146_v45 = vld [vmem:[#allocation19 + $0xa8] sm:$0xff]  ;;  %v1148_v47 = vld [vmem:[#allocation19 + $0xb8] sm:$0xff]  ;;  %v1145_v52 = vld [vmem:[#allocation19 + $0xa0] sm:$0xff] }
 0x205   : > { %v3534_v50 = vpack.c.bf16 %v1146_v45, %v1142_v44  ;;  %v1143_v53 = vld [vmem:[#allocation19 + $0x90] sm:$0xff]  ;;  %v3566_v54 = vpack.c.bf16 %v1148_v47, %v1144_v46  ;;  %v1150_v56 = vld [vmem:[#allocation19 + $0xc8] sm:$0xff]  ;;  %v1152_v58 = vld [vmem:[#allocation19 + $0xd8] sm:$0xff]  ;;  %v3536_v60 = vpack.c.bf16 %v1145_v52, %v1141_v51 }
 0x206   : > { %3501 = vmatpush1.bf16.msra.mxu0 %v3500_v62  ;;  %3517 = vmatpush1.bf16.msra.mxu1 %v3516_v63  ;;  %v1147_v55 = vld [vmem:[#allocation19 + $0xb0] sm:$0xff]  ;;  %v1154_v57 = vld [vmem:[#allocation19 + $0xe8] sm:$0xff]  ;;  %v1156_v59 = vld [vmem:[#allocation19 + $0xf8] sm:$0xff] }
 0x207   : > { %3503 = vmatprep.subr.bf16.mxu0 %v3502_v1  ;;  %3519 = vmatprep.subr.bf16.mxu1 %v3518_v5  ;;  %v3568_v61 = vpack.c.bf16 %v1147_v55, %v1143_v53  ;;  %v3538_v62 = vpack.c.bf16 %v1154_v57, %v1150_v56  ;;  %v1149_v63 = vld [vmem:[#allocation19 + $0xc0] sm:$0xff]  ;;  %v1151_v2 = vld [vmem:[#allocation19 + $0xd0] sm:$0xff]  ;;  %v3570_v3 = vpack.c.bf16 %v1156_v59, %v1152_v58  ;;  %v1158_v5 = vld [vmem:[#allocation19 + $0x108] sm:$0xff]  ;;  %v4536_v59 = vmov 0.0|0.0  }
 0x208   : > { %v1153_v1 = vld [vmem:[#allocation19 + $0xe0] sm:$0xff]  ;;  %v1155_v4 = vld [vmem:[#allocation19 + $0xf0] sm:$0xff]  ;;  %v1162_v6 = vld [vmem:[#allocation19 + $0x128] sm:$0xff] }
 0x209   : > { %v1160_v7 = vld [vmem:[#allocation19 + $0x118] sm:$0xff]  ;;  %v3540_v9 = vpack.c.bf16 %v1153_v1, %v1149_v63  ;;  %v3572_v10 = vpack.c.bf16 %v1155_v4, %v1151_v2  ;;  %v1159_v14 = vld [vmem:[#allocation19 + $0x110] sm:$0xff]  ;;  %v1170_v18 = vld [vmem:[#allocation19 + $0x168] sm:$0xff]  ;;  %v1337_v63 = vlaneseq }
 0x20a   : > { %3505 = vmatpush1.bf16.msra.mxu0 %v3504_v11  ;;  %3521 = vmatpush1.bf16.msra.mxu1 %v3520_v12  ;;  %v1164_v8 = vld [vmem:[#allocation19 + $0x138] sm:$0xff]  ;;  %v3542_v11 = vpack.c.bf16 %v1162_v6, %v1158_v5  ;;  %v1157_v12 = vld [vmem:[#allocation19 + $0x100] sm:$0xff]  ;;  %v1163_v16 = vld [vmem:[#allocation19 + $0x130] sm:$0xff] }
 0x20b   : > { %3507 = vmatprep.subr.bf16.mxu0 %v3506_v13  ;;  %3523 = vmatprep.subr.bf16.mxu1 %v3522_v17  ;;  %v1161_v13 = vld [vmem:[#allocation19 + $0x120] sm:$0xff]  ;;  %v3574_v15 = vpack.c.bf16 %v1164_v8, %v1160_v7  ;;  %v1166_v17 = vld [vmem:[#allocation19 + $0x148] sm:$0xff]  ;;  %v1168_v19 = vld [vmem:[#allocation19 + $0x158] sm:$0xff]  ;;  %v3576_v22 = vpack.c.bf16 %v1163_v16, %v1159_v14  ;;  %v1338_v1 = vshrl.u32 %v1337_v63, 7 }
 0x20c   : > { %v1172_v20 = vld [vmem:[#allocation19 + $0x178] sm:$0xff]  ;;  %v3544_v21 = vpack.c.bf16 %v1161_v13, %v1157_v12  ;;  %v1167_v26 = vld [vmem:[#allocation19 + $0x150] sm:$0xff]  ;;  %v1178_v30 = vld [vmem:[#allocation19 + $0x1a8] sm:$0xff] }
 0x20d   : > { %v3578_v27 = vpack.c.bf16 %v1172_v20, %v1168_v19  ;;  %v1171_v28 = vld [vmem:[#allocation19 + $0x170] sm:$0xff]  ;;  %v1176_v31 = vld [vmem:[#allocation19 + $0x198] sm:$0xff]  ;;  %v1182_v41 = vld [vmem:[#allocation19 + $0x1c8] sm:$0xff]  ;;  %v1339_v2 = vsub.s32 0, %v1338_v1  ;;  %v1343_v4 = vsub.s32 1, %v1338_v1  ;;  %v1351_v8 = vsub.s32 3, %v1338_v1 }
 0x20e   : > { %3509 = vmatpush1.bf16.msra.mxu0 %v3508_v23  ;;  %3525 = vmatpush1.bf16.msra.mxu1 %v3524_v24  ;;  %v3546_v23 = vpack.c.bf16 %v1170_v18, %v1166_v17  ;;  %v1165_v24 = vld [vmem:[#allocation19 + $0x140] sm:$0xff]  ;;  %v1180_v32 = vld [vmem:[#allocation19 + $0x1b8] sm:$0xff]  ;;  %v3580_v34 = vpack.c.bf16 %v1171_v28, %v1167_v26  ;;  %v1179_v40 = vld [vmem:[#allocation19 + $0x1b0] sm:$0xff]  ;;  %v1347_v17 = vsub.s32 2, %v1338_v1 }
 0x20f   : > { %3527 = vmatprep.subr.bf16.mxu0 %v3526_v25  ;;  %3559 = vmatprep.subr.bf16.mxu1 %v3558_v29  ;;  %v1169_v25 = vld [vmem:[#allocation19 + $0x160] sm:$0xff]  ;;  %v1174_v29 = vld [vmem:[#allocation19 + $0x188] sm:$0xff]  ;;  %v3582_v39 = vpack.c.bf16 %v1180_v32, %v1176_v31  ;;  %v1184_v43 = vld [vmem:[#allocation19 + $0x1d8] sm:$0xff] }
 0x210   : > { %v3548_v33 = vpack.c.bf16 %v1169_v25, %v1165_v24  ;;  %v1188_v44 = vld [vmem:[#allocation19 + $0x1f8] sm:$0xff]  ;;  %v1183_v51 = vld [vmem:[#allocation19 + $0x1d0] sm:$0xff]  ;;  %v1124_v55 = vld [vmem:[%s5390_s20] sm:$0xff] }
 0x211   : > { %3235 = vmatmul.mubr.msk.f32.vlgmr.msra.gmra.mrb[0].mxu0 %vm978_vm1, %v738_v35  ;;  %3236 = vmatmul.mubr.msk.f32.vlgmr.msra.gmra.mrb[0].mxu1 %vm978_vm1, %v738_v35  ;;  %v3550_v35 = vpack.c.bf16 %v1178_v30, %v1174_v29  ;;  %v1187_v52 = vld [vmem:[#allocation19 + $0x1f0] sm:$0xff]  ;;  %v1446_v56 = vld [vmem:[#allocation13] sm:$0xff]  ;;  %v1447_v57 = vld [vmem:[#allocation13 + $0x8] sm:$0xff] }
 0x212   : > { %3529 = vmatpush1.bf16.msra.mxu0 %v3528_v36  ;;  %3561 = vmatpush1.bf16.msra.mxu1 %v3560_v37  ;;  %v1173_v36 = vld [vmem:[#allocation19 + $0x180] sm:$0xff]  ;;  %v1448_v58 = vld [vmem:[#allocation13 + $0x10] sm:$0xff]  ;;  %v1380_v28 = vld [vmem:[#allocation11] sm:$0xff] }
 0x213   : > { %3531 = vmatprep.subr.bf16.mxu0 %v3530_v38  ;;  %3563 = vmatprep.subr.bf16.mxu1 %v3562_v42  ;;  %v1177_v37 = vld [vmem:[#allocation19 + $0x1a0] sm:$0xff]  ;;  %v1175_v38 = vld [vmem:[#allocation19 + $0x190] sm:$0xff]  ;;  %v1186_v42 = vld [vmem:[#allocation19 + $0x1e8] sm:$0xff] }
 0x214   : > { %1253 = vmatprep.mubr.f32.mxu0 %v4534_v0  ;;  %1324 = vmatprep.mubr.f32.mxu1 %v4534_v0  ;;  %v3552_v45 = vpack.c.bf16 %v1177_v37, %v1173_v36  ;;  %v3584_v46 = vpack.c.bf16 %v1179_v40, %v1175_v38  ;;  %v3554_v47 = vpack.c.bf16 %v1186_v42, %v1182_v41  ;;  %v1450_v42 = vld [vmem:[#allocation13 + $0x20] sm:$0xff] }
 0x215   : > { %v1458_v63 = vld [vmem:[#allocation13 + $0x60] sm:$0xff] }
 0x216   : > { %3533 = vmatpush1.bf16.msra.mxu0 %v3532_v48  ;;  %3565 = vmatpush1.bf16.msra.mxu1 %v3564_v49  ;;  %v1181_v48 = vld [vmem:[#allocation19 + $0x1c0] sm:$0xff] }
 0x217   : > { %3535 = vmatprep.subr.bf16.mxu0 %v3534_v50  ;;  %3567 = vmatprep.subr.bf16.mxu1 %v3566_v54  ;;  %v1185_v49 = vld [vmem:[#allocation19 + $0x1e0] sm:$0xff]  ;;  %v3586_v50 = vpack.c.bf16 %v1188_v44, %v1184_v43  ;;  %v3588_v54 = vpack.c.bf16 %v1187_v52, %v1183_v51  ;;  %v1451_v43 = vld [vmem:[#allocation13 + $0x28] sm:$0xff] }
 0x218   : > { %v3556_v53 = vpack.c.bf16 %v1185_v49, %v1181_v48  ;;  %v1454_v52 = vld [vmem:[#allocation13 + $0x40] sm:$0xff] }
 0x21a   : > { %3537 = vmatpush1.bf16.msra.mxu0 %v3536_v60  ;;  %3569 = vmatpush1.bf16.msra.mxu1 %v3568_v61  ;;  %v3591_v60 = vpack.c.bf16 %v1447_v57, %v1446_v56  ;;  %v1449_v61 = vld [vmem:[#allocation13 + $0x18] sm:$0xff] }
 0x21b   : > { %3539 = vmatprep.subr.bf16.mxu0 %v3538_v62  ;;  %3571 = vmatprep.subr.bf16.mxu1 %v3570_v3  ;;  %v3594_v62 = vpack.c.bf16 %v1449_v61, %v1448_v58  ;;  %v1335_v3 = vld [vmem:[%s5391_s14] sm:$0xf] }
 0x21c   : > { %v1340_v5 = vrot.slane %v1335_v3, %v1339_v2  ;;  %v1344_v6 = vrot.slane %v1335_v3, %v1343_v4  ;;  %v1352_v16 = vrot.slane %v1335_v3, %v1351_v8  ;;  %v1348_v19 = vrot.slane %v1335_v3, %v1347_v17  ;;  %v1460_v3 = vld [vmem:[#allocation13 + $0x70] sm:$0xff]  ;;  %v1461_v4 = vld [vmem:[#allocation13 + $0x78] sm:$0xff] }
 0x21e   : > { %3541 = vmatpush1.bf16.msra.mxu0 %v3540_v9  ;;  %3573 = vmatpush1.bf16.msra.mxu1 %v3572_v10 }
 0x21f   : > { %3543 = vmatprep.subr.bf16.mxu0 %v3542_v11  ;;  %3575 = vmatprep.subr.bf16.mxu1 %v3574_v15 }
 0x222   : > { %3545 = vmatpush1.bf16.msra.mxu0 %v3544_v21  ;;  %3577 = vmatpush1.bf16.msra.mxu1 %v3576_v22 }
 0x223   : > { %3547 = vmatprep.subr.bf16.mxu0 %v3546_v23  ;;  %3579 = vmatprep.subr.bf16.mxu1 %v3578_v27 }
 0x226   : > { %3549 = vmatpush1.bf16.msra.mxu0 %v3548_v33  ;;  %3581 = vmatpush1.bf16.msra.mxu1 %v3580_v34 }
 0x227   : > { %3551 = vmatprep.subr.bf16.mxu0 %v3550_v35  ;;  %3583 = vmatprep.subr.bf16.mxu1 %v3582_v39  ;;  %v4538_v35 = vmov 1966171168  }
 0x228   : > { %v1391_v36 = vunpack.c.l.s4 %v4538_v35 }
 0x22a   : > { %3553 = vmatpush1.bf16.msra.mxu0 %v3552_v45  ;;  %3585 = vmatpush1.bf16.msra.mxu1 %v3584_v46  ;;  %v1392_v37 = vunpack.c.0.s8 %v1391_v36  ;;  %v1452_v45 = vld [vmem:[#allocation13 + $0x30] sm:$0xff]  ;;  %v1453_v46 = vld [vmem:[#allocation13 + $0x38] sm:$0xff] }
 0x22b   : > { %3555 = vmatprep.subr.bf16.mxu0 %v3554_v47  ;;  %3587 = vmatprep.subr.bf16.mxu1 %v3586_v50  ;;  %v3597_v47 = vpack.c.bf16 %v1451_v43, %v1450_v42  ;;  %v3600_v50 = vpack.c.bf16 %v1453_v46, %v1452_v45 }
 0x22c   : > { %v1395_v39 = vsub.s32 %v1392_v37, %v1338_v1  ;;  %v1459_v1 = vld [vmem:[#allocation13 + $0x68] sm:$0xff] }
 0x22e   : > { %3557 = vmatpush1.bf16.msra.mxu0 %v3556_v53  ;;  %3589 = vmatpush1.bf16.msra.mxu1 %v3588_v54  ;;  %v1455_v53 = vld [vmem:[#allocation13 + $0x48] sm:$0xff]  ;;  %v1456_v54 = vld [vmem:[#allocation13 + $0x50] sm:$0xff] }
 0x22f   : > { %3590 = vmatprep.subr.bf16.mxu0 %v4536_v59  ;;  %3593 = vmatprep.subr.bf16.mxu1 %v4536_v59  ;;  %v3603_v57 = vpack.c.bf16 %v1455_v53, %v1454_v52 }
 0x231   : > { %1254 = vmatmul.mubr.f32.vlgmr.msra.gmra.mrb[0].mxu0 %v1124_v55  ;;  %1325 = vmatmul.mubr.f32.vlgmr.msra.gmra.mrb[0].mxu1 %v1124_v55  ;;  %v1457_v55 = vld [vmem:[#allocation13 + $0x58] sm:$0xff] }
 0x232   : > { %3322 = vmatprep.mubr.msk.f32.mxu0 %vm4537_vm2, %v4534_v0  ;;  %3329 = vmatprep.mubr.msk.f32.mxu1 %vm4537_vm2, %v4534_v0 }
 0x237   : > { %3592 = vmatpush3.bf16.xpose.msra.mxu0 %v3591_v60  ;;  %3595 = vmatpush3.bf16.xpose.msra.mxu1 %v3594_v62  ;;  %v3606_v60 = vpack.c.bf16 %v1457_v55, %v1456_v54 }
 0x238   : > { %3596 = vmatprep.subr.bf16.mxu0 %v4536_v59  ;;  %3599 = vmatprep.subr.bf16.mxu1 %v4536_v59 }
 0x304   : > { %v1255_v7 = vpop.f32.mrb[0].mxu0  ;;  %v1326_v10 = vpop.f32.mrb[0].mxu1 }
 0x305   : > { %v1357_v9 = vadd.f32 %v1340_v5, %v1255_v7  ;;  %v1257_v11 = vpop.f32.mrb[1].mxu0  ;;  %v1328_v13 = vpop.f32.mrb[1].mxu1  ;;  %v1359_v21 = vadd.f32 %v1348_v19, %v1326_v10  ;;  %v3609_v5 = vpack.c.bf16 %v1459_v1, %v1458_v63  ;;  %v3612_v7 = vpack.c.bf16 %v1461_v4, %v1460_v3 }
 0x306   : > { %v1358_v12 = vadd.f32 %v1344_v6, %v1257_v11  ;;  %v1360_v18 = vadd.f32 %v1352_v16, %v1328_v13 }
 0x307   : > { %v3237_v14 = vmul.f32 -1.442695, %v1357_v9 }
 0x308   : > { %v3238_v15 = vmul.f32 -1.442695, %v1358_v12  ;;  %v3239_v20 = vmul.f32 -1.442695, %v1360_v18 }
 0x309   : > { %3839 = vpow2.f32 %v3237_v14 }
 0x30a   : > { %3841 = vpow2.f32 %v3238_v15 }
 0x30b   : > { %3843 = vpow2.f32 %v3239_v20 }
 0x30c   : > { %3845 = vtanh.f32 %v1359_v21 }
 0x313   : > { %v3840_v22 = vpop.eup %3839 }
 0x314   : > { %v3842_v23 = vpop.eup %3841  ;;  %v1364_v24 = vadd.f32 1.0, %v3840_v22 }
 0x315   : > { %v1370_v25 = vadd.f32 1.0, %v3842_v23  ;;  %v3844_v26 = vpop.eup %3843 }
 0x316   : > { %3847 = vrcp.f32 %v1364_v24  ;;  %v3846_v27 = vpop.eup %3845  ;;  %v1377_v32 = vadd.f32 1.0, %v3844_v26 }
 0x317   : > { %3849 = vrcp.f32 %v1370_v25 }
 0x318   : > { %3851 = vrcp.f32 %v1377_v32 }
 0x320   : > { %v3848_v29 = vpop.eup %3847 }
 0x321   : > { %v3850_v30 = vpop.eup %3849  ;;  %v1382_v31 = vmul.f32 %v3848_v29, %v3846_v27 }
 0x322   : > { %v1381_v33 = vmul.f32 %v3850_v30, %v1380_v28  ;;  %v3852_v38 = vpop.eup %3851 }
 0x324   : > { %v1383_v34 = vadd.f32 %v1382_v31, %v1381_v33 }
 0x326   : > { %3853 = vtanh.f32 %v1383_v34  ;;  %1387 = vst [vmem:[#allocation25] sm:$0xff] %v1383_v34 }
 0x330   : > { %v3854_v40 = vpop.eup %3853 }
 0x331   : > { %v1385_v41 = vmul.f32 %v3854_v40, %v3852_v38 }
 0x333   : > { %1386 = vst [vmem:[#allocation23] sm:$0xff] %v1385_v41  ;;  %v1396_v44 = vrot.slane %v1385_v41, %v1395_v39  ;;  %v1389_v56 = vcombine.high %v1385_v41, %v1385_v41 }
 0x335   : > { %v1412_v48 = vrot.slane %v1396_v44, %v1395_v39  ;;  %v1404_v49 = vcombine.high %v1396_v44, %v1396_v44  ;;  %v1403_v62 = vrot.slane %v1389_v56, %v1395_v39 }
 0x337   : > { %3323 = vmatmul.mubr.f32.vlgmr.msra.gmra.mrb[2].mxu0 %v1412_v48  ;;  %v1426_v51 = vrot.slane %v1404_v49, %v1395_v39  ;;  %v1434_v58 = vcombine.high %v1412_v48, %v1412_v48  ;;  %v1405_v2 = vcombine.high %v1403_v62, %v1403_v62  ;;  %v1419_v6 = vrot.slane %v1403_v62, %v1395_v39 }
 0x338   : > { %3598 = vmatpush3.bf16.xpose.msra.mxu0 %v3597_v47  ;;  %3336 = vmatprep.mubr.msk.f32.mxu0 %vm4537_vm2, %v4534_v0 }
 0x339   : > { %3330 = vmatmul.mubr.f32.vlgmr.msra.gmra.mrb[2].mxu1 %v1426_v51  ;;  %3602 = vmatprep.subr.bf16.mxu0 %v4536_v59  ;;  %v1436_v61 = vcombine.high %v1426_v51, %v1426_v51  ;;  %v1433_v8 = vrot.slane %v1405_v2, %v1395_v39  ;;  %v1435_v9 = vcombine.high %v1419_v6, %v1419_v6 }
 0x33a   : > { %3601 = vmatpush3.bf16.xpose.msra.mxu1 %v3600_v50  ;;  %3343 = vmatprep.mubr.msk.f32.mxu1 %vm4537_vm2, %v4534_v0 }
 0x33b   : > { %3605 = vmatprep.subr.bf16.mxu1 %v4536_v59  ;;  %v1437_v10 = vcombine.high %v1433_v8, %v1433_v8 }
 0x33f   : > { %3337 = vmatmul.mubr.f32.vlgmr.msra.gmra.mrb[4].mxu0 %v1434_v58 }
 0x340   : > { %3604 = vmatpush3.bf16.xpose.msra.mxu0 %v3603_v57  ;;  %3350 = vmatprep.mubr.msk.f32.mxu0 %vm4537_vm2, %v4534_v0 }
 0x341   : > { %3344 = vmatmul.mubr.f32.vlgmr.msra.gmra.mrb[4].mxu1 %v1436_v61  ;;  %3608 = vmatprep.subr.bf16.mxu0 %v4536_v59 }
 0x342   : > { %3607 = vmatpush3.bf16.xpose.msra.mxu1 %v3606_v60  ;;  %3357 = vmatprep.mubr.msk.f32.mxu1 %vm4537_vm2, %v4534_v0 }
 0x343   : > { %3611 = vmatprep.subr.bf16.mxu1 %v4536_v59 }
 0x347   : > { %3351 = vmatmul.mubr.f32.vlgmr.msra.gmra.mrb[6].mxu0 %v1419_v6 }
 0x348   : > { %3610 = vmatpush3.bf16.xpose.msra.mxu0 %v3609_v5  ;;  %3364 = vmatprep.mubr.msk.f32.mxu0 %vm4537_vm2, %v4534_v0 }
 0x349   : > { %3358 = vmatmul.mubr.f32.vlgmr.msra.gmra.mrb[6].mxu1 %v1433_v8  ;;  %3614 = vmatprep.subr.bf16.mxu0 %v4536_v59 }
 0x34a   : > { %3613 = vmatpush3.bf16.xpose.msra.mxu1 %v3612_v7  ;;  %3371 = vmatprep.mubr.msk.f32.mxu1 %vm4537_vm2, %v4534_v0 }
 0x34b   : > { %3617 = vmatprep.subr.bf16.mxu1 %v4536_v59 }
 0x34f   : > { %3365 = vmatmul.mubr.f32.vlgmr.msra.gmra.mrb[8].mxu0 %v1435_v9 }
 0x350   : > { %3378 = vmatprep.mubr.msk.f32.mxu0 %vm4537_vm2, %v4534_v0 }
 0x351   : > { %3372 = vmatmul.mubr.f32.vlgmr.msra.gmra.mrb[8].mxu1 %v1437_v10  ;;  %v2111_v10 = vld [vmem:[#allocation14] sm:$0xff] }
 0x352   : > { %3385 = vmatprep.mubr.msk.f32.mxu1 %vm4537_vm2, %v4534_v0 }
 0x40a   : > { %v1528_v11 = vpop.f32.mrb[2].mxu0 }
 0x40b   : > { %v3324_v12 = vpop.f32.mrb[3].mxu0  ;;  %v2023_v13 = vsel %vm2022_vm3, %v1528_v11, -inf }
 0x40c   : > { %2024 = vmax.xlane.f32.xlu0 %v2023_v13  ;;  %v1598_v14 = vpop.f32.mrb[2].mxu1 }
 0x40d   : > { %v3331_v15 = vpop.f32.mrb[3].mxu1  ;;  %v2026_v16 = vsel %vm2022_vm3, %v1598_v14, -inf }
 0x410   : > { %2027 = vmax.xlane.f32.xlu0 %v2026_v16  ;;  %v2113_v16 = vld [vmem:[#allocation14 + $0x10] sm:$0xff] }
 0x412   : > { %v1668_v17 = vpop.f32.mrb[4].mxu0 }
 0x413   : > { %v3338_v18 = vpop.f32.mrb[5].mxu0  ;;  %v2029_v19 = vsel %vm2022_vm3, %v1668_v17, -inf }
 0x414   : > { %2030 = vmax.xlane.f32.xlu1 %v2029_v19  ;;  %v1738_v20 = vpop.f32.mrb[4].mxu1 }
 0x415   : > { %v3345_v21 = vpop.f32.mrb[5].mxu1  ;;  %v2032_v22 = vsel %vm2022_vm3, %v1738_v20, -inf }
 0x418   : > { %2033 = vmax.xlane.f32.xlu1 %v2032_v22  ;;  %v2115_v22 = vld [vmem:[#allocation14 + $0x20] sm:$0xff] }
 0x41a   : > { %v1808_v23 = vpop.f32.mrb[6].mxu0 }
 0x41b   : > { %v3352_v24 = vpop.f32.mrb[7].mxu0  ;;  %v2035_v25 = vsel %vm2022_vm3, %v1808_v23, -inf }
 0x41c   : > { %2036 = vmax.xlane.f32.xlu0 %v2035_v25  ;;  %v1878_v26 = vpop.f32.mrb[6].mxu1 }
 0x41d   : > { %v3359_v27 = vpop.f32.mrb[7].mxu1  ;;  %v2038_v28 = vsel %vm2022_vm3, %v1878_v26, -inf }
 0x41e   : > { %2039 = vmax.xlane.f32.xlu1 %v2038_v28  ;;  %v2117_v28 = vld [vmem:[#allocation14 + $0x30] sm:$0xff] }
 0x422   : > { %v1948_v29 = vpop.f32.mrb[8].mxu0 }
 0x423   : > { %v3366_v30 = vpop.f32.mrb[9].mxu0  ;;  %v2041_v31 = vsel %vm2022_vm3, %v1948_v29, -inf }
 0x424   : > { %2042 = vmax.xlane.f32.xlu0 %v2041_v31  ;;  %v2018_v32 = vpop.f32.mrb[8].mxu1 }
 0x425   : > { %v3373_v33 = vpop.f32.mrb[9].mxu1  ;;  %v2044_v34 = vsel %vm2022_vm3, %v2018_v32, -inf }
 0x426   : > { %2045 = vmax.xlane.f32.xlu1 %v2044_v34  ;;  %v2119_v34 = vld [vmem:[#allocation14 + $0x40] sm:$0xff] }
 0x499   : > { %v2025_v35 = vpop.xlane.xlu0 %2024 }
 0x49a   : > { %v2047_v36 = vsub.f32 %v1528_v11, %v2025_v35  ;;  %v2112_v11 = vld [vmem:[#allocation14 + $0x8] sm:$0xff] }
 0x49b   : > { %v3615_v13 = vpack.c.bf16 %v2112_v11, %v2111_v10  ;;  %v2120_v35 = vld [vmem:[#allocation14 + $0x48] sm:$0xff] }
 0x49c   : > { %v2055_v37 = vmul.f32 1.442695, %v2047_v36 }
 0x49d   : > { %v2028_v38 = vpop.xlane.xlu0 %2027  ;;  %3616 = vmatpush3.bf16.msra.mxu0 %v3615_v13 }
 0x49e   : > { %3855 = vpow2.f32 %v2055_v37  ;;  %v2048_v39 = vsub.f32 %v1598_v14, %v2028_v38  ;;  %3620 = vmatprep.subr.bf16.mxu0 %v4536_v59  ;;  %v3627_v38 = vpack.c.bf16 %v2120_v35, %v2119_v34 }
 0x4a0   : > { %v2057_v40 = vmul.f32 1.442695, %v2048_v39 }
 0x4a1   : > { %v2031_v41 = vpop.xlane.xlu1 %2030 }
 0x4a2   : > { %3857 = vpow2.f32 %v2057_v40  ;;  %v2049_v42 = vsub.f32 %v1668_v17, %v2031_v41  ;;  %v2114_v17 = vld [vmem:[#allocation14 + $0x18] sm:$0xff]  ;;  %v2121_v40 = vld [vmem:[#allocation14 + $0x50] sm:$0xff] }
 0x4a3   : > { %v3618_v18 = vpack.c.bf16 %v2114_v17, %v2113_v16  ;;  %v2122_v41 = vld [vmem:[#allocation14 + $0x58] sm:$0xff] }
 0x4a4   : > { %v2059_v43 = vmul.f32 1.442695, %v2049_v42 }
 0x4a5   : > { %v2034_v44 = vpop.xlane.xlu1 %2033  ;;  %3619 = vmatpush3.bf16.msra.mxu1 %v3618_v18 }
 0x4a6   : > { %3859 = vpow2.f32 %v2059_v43  ;;  %v2050_v45 = vsub.f32 %v1738_v20, %v2034_v44  ;;  %3623 = vmatprep.subr.bf16.mxu1 %v4536_v59  ;;  %v3630_v43 = vpack.c.bf16 %v2122_v41, %v2121_v40 }
 0x4a8   : > { %v5117_v46 = vpop.eup %3855  ;;  %v2061_v47 = vmul.f32 1.442695, %v2050_v45 }
 0x4a9   : > { %v2037_v48 = vpop.xlane.xlu0 %2036  ;;  %v2071_v49 = vsel %vm2022_vm3, %v5117_v46, 0.0 }
 0x4aa   : > { %3861 = vpow2.f32 %v2061_v47  ;;  %v2051_v50 = vsub.f32 %v1808_v23, %v2037_v48  ;;  %2072 = vadd.xlane.f32.xlu0 %v2071_v49  ;;  %v2116_v23 = vld [vmem:[#allocation14 + $0x28] sm:$0xff]  ;;  %v2125_v49 = vld [vmem:[#allocation14 + $0x70] sm:$0xff] }
 0x4ab   : > { %v2040_v51 = vpop.xlane.xlu1 %2039  ;;  %v3621_v25 = vpack.c.bf16 %v2116_v23, %v2115_v22  ;;  %v2124_v47 = vld [vmem:[#allocation14 + $0x68] sm:$0xff] }
 0x4ac   : > { %v5121_v52 = vpop.eup %3857  ;;  %v2063_v53 = vmul.f32 1.442695, %v2051_v50  ;;  %v2052_v54 = vsub.f32 %v1878_v26, %v2040_v51  ;;  %v2126_v50 = vld [vmem:[#allocation14 + $0x78] sm:$0xff] }
 0x4ad   : > { %v2074_v55 = vsel %vm2022_vm3, %v5121_v52, 0.0 }
 0x4ae   : > { %3863 = vpow2.f32 %v2063_v53  ;;  %v2065_v56 = vmul.f32 1.442695, %v2052_v54  ;;  %2075 = vadd.xlane.f32.xlu1 %v2074_v55  ;;  %v3636_v55 = vpack.c.bf16 %v2126_v50, %v2125_v49 }
 0x4b0   : > { %v5125_v57 = vpop.eup %3859  ;;  %3865 = vpow2.f32 %v2065_v56 }
 0x4b1   : > { %v2043_v58 = vpop.xlane.xlu0 %2042  ;;  %v2077_v60 = vsel %vm2022_vm3, %v5125_v57, 0.0 }
 0x4b2   : > { %v2053_v61 = vsub.f32 %v1948_v29, %v2043_v58  ;;  %2078 = vadd.xlane.f32.xlu0 %v2077_v60  ;;  %v2118_v29 = vld [vmem:[#allocation14 + $0x38] sm:$0xff] }
 0x4b3   : > { %v2046_v62 = vpop.xlane.xlu1 %2045  ;;  %v3624_v31 = vpack.c.bf16 %v2118_v29, %v2117_v28 }
 0x4b4   : > { %v5129_v63 = vpop.eup %3861  ;;  %v2067_v1 = vmul.f32 1.442695, %v2053_v61  ;;  %v2054_v2 = vsub.f32 %v2018_v32, %v2046_v62 }
 0x4b5   : > { %v2080_v3 = vsel %vm2022_vm3, %v5129_v63, 0.0 }
 0x4b6   : > { %3867 = vpow2.f32 %v2067_v1  ;;  %v2069_v4 = vmul.f32 1.442695, %v2054_v2  ;;  %2081 = vadd.xlane.f32.xlu1 %v2080_v3 }
 0x4b8   : > { %v5133_v5 = vpop.eup %3863  ;;  %3869 = vpow2.f32 %v2069_v4 }
 0x4b9   : > { %v2083_v6 = vsel %vm2022_vm3, %v5133_v5, 0.0 }
 0x4ba   : > { %v5137_v7 = vpop.eup %3865  ;;  %2084 = vadd.xlane.f32.xlu0 %v2083_v6 }
 0x4bb   : > { %v2086_v8 = vsel %vm2022_vm3, %v5137_v7, 0.0 }
 0x4bc   : > { %2087 = vadd.xlane.f32.xlu1 %v2086_v8 }
 0x4c0   : > { %v5141_v9 = vpop.eup %3867 }
 0x4c1   : > { %v2089_v12 = vsel %vm2022_vm3, %v5141_v9, 0.0 }
 0x4c2   : > { %v5145_v14 = vpop.eup %3869  ;;  %2090 = vadd.xlane.f32.xlu0 %v2089_v12 }
 0x4c3   : > { %v2092_v15 = vsel %vm2022_vm3, %v5145_v14, 0.0 }
 0x4c4   : > { %2093 = vadd.xlane.f32.xlu1 %v2092_v15 }
 0x537   : > { %v2073_v19 = vpop.xlane.xlu0 %2072 }
 0x538   : > { %3871 = vrcp.f32 %v2073_v19 }
 0x53b   : > { %v2076_v20 = vpop.xlane.xlu1 %2075 }
 0x53c   : > { %3873 = vrcp.f32 %v2076_v20 }
 0x53f   : > { %v2079_v21 = vpop.xlane.xlu0 %2078 }
 0x540   : > { %3875 = vrcp.f32 %v2079_v21 }
 0x542   : > { %v3872_v24 = vpop.eup %3871 }
 0x543   : > { %v2096_v26 = vmul.f32 %v3872_v24, %v5117_v46  ;;  %v2082_v27 = vpop.xlane.xlu1 %2081  ;;  %v2123_v46 = vld [vmem:[#allocation14 + $0x60] sm:$0xff] }
 0x544   : > { %3877 = vrcp.f32 %v2082_v27 }
 0x545   : > { %3379 = vmatmul.mubr.msk.f32.vlgmr.msra.gmra.mrb[10].mxu0 %vm2127_vm4, %v2096_v26 }
 0x546   : > { %v3874_v30 = vpop.eup %3873  ;;  %3622 = vmatpush3.bf16.msra.mxu0 %v3621_v25  ;;  %3392 = vmatprep.mubr.msk.f32.mxu0 %vm4537_vm2, %v4534_v0 }
 0x547   : > { %v2098_v32 = vmul.f32 %v3874_v30, %v5121_v52  ;;  %v2085_v33 = vpop.xlane.xlu0 %2084  ;;  %3626 = vmatprep.subr.bf16.mxu0 %v4536_v59  ;;  %v3633_v52 = vpack.c.bf16 %v2124_v47, %v2123_v46 }
 0x548   : > { %3879 = vrcp.f32 %v2085_v33 }
 0x549   : > { %v2088_v36 = vpop.xlane.xlu1 %2087  ;;  %3386 = vmatmul.mubr.msk.f32.vlgmr.msra.gmra.mrb[10].mxu1 %vm2127_vm4, %v2098_v32 }
 0x54a   : > { %v3876_v37 = vpop.eup %3875  ;;  %3881 = vrcp.f32 %v2088_v36  ;;  %3625 = vmatpush3.bf16.msra.mxu1 %v3624_v31  ;;  %3399 = vmatprep.mubr.msk.f32.mxu1 %vm4537_vm2, %v4534_v0 }
 0x54b   : > { %v2100_v39 = vmul.f32 %v3876_v37, %v5125_v57  ;;  %3629 = vmatprep.subr.bf16.mxu1 %v4536_v59 }
 0x54d   : > { %3393 = vmatmul.mubr.msk.f32.vlgmr.msra.gmra.mrb[12].mxu0 %vm2127_vm4, %v2100_v39 }
 0x54e   : > { %v3878_v42 = vpop.eup %3877  ;;  %3628 = vmatpush3.bf16.msra.mxu0 %v3627_v38  ;;  %3406 = vmatprep.mubr.msk.f32.mxu0 %vm4537_vm2, %v4534_v0 }
 0x54f   : > { %v2102_v44 = vmul.f32 %v3878_v42, %v5129_v63  ;;  %v2091_v45 = vpop.xlane.xlu0 %2090  ;;  %3632 = vmatprep.subr.bf16.mxu0 %v4536_v59 }
 0x550   : > { %3883 = vrcp.f32 %v2091_v45 }
 0x551   : > { %3400 = vmatmul.mubr.msk.f32.vlgmr.msra.gmra.mrb[12].mxu1 %vm2127_vm4, %v2102_v44  ;;  %v2094_v48 = vpop.xlane.xlu1 %2093 }
 0x552   : > { %v3880_v51 = vpop.eup %3879  ;;  %3885 = vrcp.f32 %v2094_v48  ;;  %3631 = vmatpush3.bf16.msra.mxu1 %v3630_v43  ;;  %3413 = vmatprep.mubr.msk.f32.mxu1 %vm4537_vm2, %v4534_v0 }
 0x553   : > { %v2104_v53 = vmul.f32 %v3880_v51, %v5133_v5  ;;  %3635 = vmatprep.subr.bf16.mxu1 %v4536_v59 }
 0x554   : > { %v3882_v54 = vpop.eup %3881 }
 0x555   : > { %v2106_v56 = vmul.f32 %v3882_v54, %v5137_v7  ;;  %3407 = vmatmul.mubr.msk.f32.vlgmr.msra.gmra.mrb[14].mxu0 %vm2127_vm4, %v2104_v53 }
 0x556   : > { %3634 = vmatpush3.bf16.msra.mxu0 %v3633_v52  ;;  %3420 = vmatprep.mubr.msk.f32.mxu0 %vm4537_vm2, %v4534_v0 }
 0x557   : > { %3414 = vmatmul.mubr.msk.f32.vlgmr.msra.gmra.mrb[14].mxu1 %vm2127_vm4, %v2106_v56 }
 0x558   : > { %3637 = vmatpush3.bf16.msra.mxu1 %v3636_v55  ;;  %3427 = vmatprep.mubr.msk.f32.mxu1 %vm4537_vm2, %v4534_v0 }
 0x55a   : > { %v3884_v57 = vpop.eup %3883 }
 0x55b   : > { %v2108_v58 = vmul.f32 %v3884_v57, %v5141_v9 }
 0x55c   : > { %v3886_v59 = vpop.eup %3885 }
 0x55d   : > { %v2110_v60 = vmul.f32 %v3886_v59, %v5145_v14  ;;  %3421 = vmatmul.mubr.msk.f32.vlgmr.msra.gmra.mrb[16].mxu0 %vm2127_vm4, %v2108_v58 }
 0x55f   : > { %3428 = vmatmul.mubr.msk.f32.vlgmr.msra.gmra.mrb[16].mxu1 %vm2127_vm4, %v2110_v60 }
 0x618   : > { %v2197_v61 = vpop.f32.mrb[10].mxu0 }
 0x619   : > { %v3380_v62 = vpop.f32.mrb[11].mxu0 }
 0x61c   : > { %v2270_v63 = vpop.f32.mrb[10].mxu1 }
 0x61d   : > { %v2720_v1 = vrot.slane %v2270_v63, 7  ;;  %v3387_v2 = vpop.f32.mrb[11].mxu1 }
 0x61f   : > { %v2722_v3 = vsel %vm2721_vm5, %v2720_v1, %v2197_v61 }
 0x620   : > { %v2343_v4 = vpop.f32.mrb[12].mxu0 }
 0x621   : > { %v2723_v0 = vrot.slane %v2343_v4, 6  ;;  %v3394_v5 = vpop.f32.mrb[13].mxu0 }
 0x623   : > { %v2725_v6 = vsel %vm2724_vm6, %v2723_v0, %v2722_v3 }
 0x624   : > { %v2416_v7 = vpop.f32.mrb[12].mxu1 }
 0x625   : > { %v2726_v8 = vrot.slane %v2416_v7, 5  ;;  %v3401_v9 = vpop.f32.mrb[13].mxu1 }
 0x627   : > { %v2728_v10 = vsel %vm2727_vm7, %v2726_v8, %v2725_v6 }
 0x628   : > { %v2489_v11 = vpop.f32.mrb[14].mxu0 }
 0x629   : > { %v2729_v12 = vrot.slane %v2489_v11, 4  ;;  %v3408_v13 = vpop.f32.mrb[15].mxu0 }
 0x62a   : > { %v2562_v14 = vpop.f32.mrb[14].mxu1 }
 0x62b   : > { %v2731_v15 = vsel %vm2730_vm8, %v2729_v12, %v2728_v10  ;;  %v2732_v16 = vrot.slane %v2562_v14, 3  ;;  %v3415_v17 = vpop.f32.mrb[15].mxu1 }
 0x62d   : > { %v2734_v18 = vsel %vm2733_vm9, %v2732_v16, %v2731_v15 }
 0x630   : > { %v2635_v19 = vpop.f32.mrb[16].mxu0 }
 0x631   : > { %v2735_v20 = vrot.slane %v2635_v19, 2  ;;  %v3422_v21 = vpop.f32.mrb[17].mxu0 }
 0x632   : > { %v2708_v22 = vpop.f32.mrb[16].mxu1 }
 0x633   : > { %v2737_v23 = vsel %vm2736_vm10, %v2735_v20, %v2734_v18  ;;  %v2738_v24 = vrot.slane %v2708_v22, 1  ;;  %v3429_v25 = vpop.f32.mrb[17].mxu1 }
 0x635   : > { %v2740_v26 = vsel %vm2739_vm11, %v2738_v24, %v2737_v23 }
 0x636   : > { %2742 = vst [vmem:[#allocation26] sm:$0xff] %v2740_v26 }
 0x637 PF: > { %v2748_v27 = vld [vmem:[%s4921_s15 + $0x8] sm:$0xff]  ;;  %v2750_v28 = vld [vmem:[%s4921_s15 + $0x18] sm:$0xff]  ;;  %v2747_v29 = vld [vmem:[%s4921_s15] sm:$0xff]  ;;  %v4539_v34 = vmov 0.0   ;;  %v2781_v13 = vlaneseq  ;;  %s3248_s5 = sshll.u32 %s4664_s21, 8  ;;  %s5392_s6 = scalar_lea.vmem %s5334_s12, %s5402_s30  ;;  %v4540_v25 = vmov 0  }
 0x638   : > { %v3638_v30 = vpack.c.bf16 %v2750_v28, %v2748_v27  ;;  %v2749_v31 = vld [vmem:[%s4921_s15 + $0x10] sm:$0xff]  ;;  %v2752_v32 = vld [vmem:[%s4921_s15 + $0x28] sm:$0xff]  ;;  %v2754_v33 = vld [vmem:[%s4921_s15 + $0x38] sm:$0xff]  ;;  %2855 = vmatprep.mubr.f32.mxu0 %v4539_v34  ;;  %s2863_s28 = sshra.s32 %s3248_s5, 7  ;;  %3887 = vset.pattern.permute.xlu0 %v4540_v25  ;;  %vm2894_vm12 = vcmask 7168   ;;  %p3250_p3 = scmp.ne.s32.totalorder %s4664_s21, 1 }
 0x639   : > { %v3640_v35 = vpack.c.bf16 %v2749_v31, %v2747_v29  ;;  %v3642_v36 = vpack.c.bf16 %v2754_v33, %v2752_v32  ;;  %v2751_v37 = vld [vmem:[%s4921_s15 + $0x20] sm:$0xff]  ;;  %v2753_v38 = vld [vmem:[%s4921_s15 + $0x30] sm:$0xff]  ;;  %v2756_v39 = vld [vmem:[%s4921_s15 + $0x48] sm:$0xff]  ;;  %v2782_v14 = vshrl.u32 %v2781_v13, 7  ;;  %s3249_s10 = sshll.u32 %s2863_s28, 3 }
 0x63a   : > { %3639 = vmatprep.subr.bf16.mxu0 %v3638_v30  ;;  %v2758_v40 = vld [vmem:[%s4921_s15 + $0x58] sm:$0xff]  ;;  %v3644_v41 = vpack.c.bf16 %v2753_v38, %v2751_v37  ;;  %v2755_v43 = vld [vmem:[%s4921_s15 + $0x40] sm:$0xff]  ;;  %v2757_v44 = vld [vmem:[%s4921_s15 + $0x50] sm:$0xff] }
 0x63b   : > { %3641 = vmatpush1.bf16.msra.mxu0 %v3640_v35  ;;  %v3646_v42 = vpack.c.bf16 %v2758_v40, %v2756_v39  ;;  %v2760_v45 = vld [vmem:[%s4921_s15 + $0x68] sm:$0xff]  ;;  %v2762_v46 = vld [vmem:[%s4921_s15 + $0x78] sm:$0xff]  ;;  %v3648_v47 = vpack.c.bf16 %v2757_v44, %v2755_v43  ;;  %v2759_v49 = vld [vmem:[%s4921_s15 + $0x60] sm:$0xff]  ;;  %v2783_v15 = vsub.s32 0, %v2782_v14  ;;  %v2787_v17 = vsub.s32 1, %v2782_v14 }
 0x63c   : > { %3643 = vmatprep.subr.bf16.mxu0 %v3642_v36  ;;  %v3650_v48 = vpack.c.bf16 %v2762_v46, %v2760_v45  ;;  %v2761_v50 = vld [vmem:[%s4921_s15 + $0x70] sm:$0xff]  ;;  %v2764_v51 = vld [vmem:[%s4921_s15 + $0x88] sm:$0xff]  ;;  %v2766_v52 = vld [vmem:[%s4921_s15 + $0x98] sm:$0xff]  ;;  %v4541_v45 = vmov (!%p3250_p3), 0  }
 0x63d   : > { %v3652_v53 = vpack.c.bf16 %v2761_v50, %v2759_v49  ;;  %v3654_v54 = vpack.c.bf16 %v2766_v52, %v2764_v51  ;;  %v2763_v55 = vld [vmem:[%s4921_s15 + $0x80] sm:$0xff]  ;;  %v2765_v56 = vld [vmem:[%s4921_s15 + $0x90] sm:$0xff]  ;;  %v2768_v57 = vld [vmem:[%s4921_s15 + $0xa8] sm:$0xff] }
 0x63e   : > { %v2770_v58 = vld [vmem:[%s4921_s15 + $0xb8] sm:$0xff]  ;;  %v3656_v59 = vpack.c.bf16 %v2765_v56, %v2763_v55  ;;  %v2767_v61 = vld [vmem:[%s4921_s15 + $0xa0] sm:$0xff]  ;;  %v2769_v62 = vld [vmem:[%s4921_s15 + $0xb0] sm:$0xff] }
 0x63f   : > { %3645 = vmatpush1.bf16.msra.mxu0 %v3644_v41  ;;  %v3658_v60 = vpack.c.bf16 %v2770_v58, %v2768_v57  ;;  %v2772_v63 = vld [vmem:[%s4921_s15 + $0xc8] sm:$0xff]  ;;  %v2774_v1 = vld [vmem:[%s4921_s15 + $0xd8] sm:$0xff]  ;;  %v3660_v2 = vpack.c.bf16 %v2769_v62, %v2767_v61  ;;  %v2771_v4 = vld [vmem:[%s4921_s15 + $0xc0] sm:$0xff] }
 0x640   : > { %3647 = vmatprep.subr.bf16.mxu0 %v3646_v42  ;;  %v3662_v3 = vpack.c.bf16 %v2774_v1, %v2772_v63  ;;  %v2773_v0 = vld [vmem:[%s4921_s15 + $0xd0] sm:$0xff]  ;;  %v2776_v5 = vld [vmem:[%s4921_s15 + $0xe8] sm:$0xff]  ;;  %v2778_v6 = vld [vmem:[%s4921_s15 + $0xf8] sm:$0xff] }
 0x641   : > { %v3664_v7 = vpack.c.bf16 %v2773_v0, %v2771_v4  ;;  %v3666_v8 = vpack.c.bf16 %v2778_v6, %v2776_v5  ;;  %v2775_v9 = vld [vmem:[%s4921_s15 + $0xe0] sm:$0xff]  ;;  %v2777_v10 = vld [vmem:[%s4921_s15 + $0xf0] sm:$0xff]  ;;  %s2866_s15 = scalar_lea.vmem [#allocation22], %s3249_s10  ;;  %v2874_v40 = vld [vmem:[#allocation5] sm:$0xff] }
 0x642   : > { %v3668_v11 = vpack.c.bf16 %v2777_v10, %v2775_v9  ;;  %v2746_v12 = vld [vmem:[#allocation8] sm:$0xff]  ;;  %v2779_v16 = vld [vmem:[%s5392_s6] sm:$0x3] }
 0x643   : > { %3649 = vmatpush1.bf16.msra.mxu0 %v3648_v47  ;;  %v2784_v18 = vrot.slane %v2779_v16, %v2783_v15  ;;  %v2788_v19 = vrot.slane %v2779_v16, %v2787_v17  ;;  %v2869_v26 = vld [vmem:[#allocation4] sm:$0xff] }
 0x644   : > { %3651 = vmatprep.subr.bf16.mxu0 %v3650_v48 }
 0x647   : > { %3653 = vmatpush1.bf16.msra.mxu0 %v3652_v53 }
 0x648   : > { %3655 = vmatprep.subr.bf16.mxu0 %v3654_v54 }
 0x64b   : > { %3657 = vmatpush1.bf16.msra.mxu0 %v3656_v59 }
 0x64c   : > { %3659 = vmatprep.subr.bf16.mxu0 %v3658_v60 }
 0x64f   : > { %3661 = vmatpush1.bf16.msra.mxu0 %v3660_v2 }
 0x650   : > { %3663 = vmatprep.subr.bf16.mxu0 %v3662_v3 }
 0x653   : > { %3665 = vmatpush1.bf16.msra.mxu0 %v3664_v7 }
 0x654   : > { %3667 = vmatprep.subr.bf16.mxu0 %v3666_v8 }
 0x657   : > { %3669 = vmatpush1.bf16.msra.mxu0 %v3668_v11 }
 0x65a   : > { %2856 = vmatmul.mubr.f32.vlgmr.msra.gmra.mrb[0].mxu0 %v2746_v12 }
 0x72d   : > { %v2857_v20 = vpop.f32.mrb[0].mxu0 }
 0x72e   : > { %v2858_v21 = vadd.f32 %v2857_v20, %v2784_v18  ;;  %v2859_v22 = vpop.f32.mrb[1].mxu0 }
 0x72f   : > { %v2860_v23 = vadd.f32 %v2859_v22, %v2788_v19 }
 0x730   : > { %2867 = vst [vmem:[%s2866_s15] sm:$0xff] %v2858_v21 }
 0x731   : > { %2868 = vst [vmem:[%s2866_s15 + $0x8] sm:$0xff] %v2860_v23  ;;  %v2870_v24 = vmax.f32 %v2858_v21, %v2860_v23 }
 0x733   : > { %2871 = vmax.xlane.f32.xlu0 %v2870_v24 }
 0x738   : > { %v2901_v50 = vld [vmem:[#allocation22] sm:$0xff] (!%p3250_p3)  ;;  %v2902_v51 = vld [vmem:[#allocation22 + $0x8] sm:$0xff] (!%p3250_p3)  ;;  %v2903_v52 = vld [vmem:[#allocation22 + $0x10] sm:$0xff] (!%p3250_p3) }
 0x739   : > { %v2904_v53 = vld [vmem:[#allocation22 + $0x18] sm:$0xff] (!%p3250_p3) }
 0x7c0   : > { %v2872_v27 = vpop.xlane.xlu0 %2871 }
 0x7c1   : > { %v2873_v28 = vmax.f32 %v2869_v26, %v2872_v27 }
 0x7c3   : > { %v2875_v29 = vsub.f32 %v2869_v26, %v2873_v28  ;;  %2896 = vst.msk [vmem:[#allocation4] sm:$0xff] %vm2894_vm12, %v2873_v28  ;;  %2881 = vperm.xlu0 %3887, %v2873_v28  }
 0x7c5   : > { %v2876_v38 = vmul.f32 1.442695, %v2875_v29 }
 0x7c7   : > { %3894 = vset.pattern.permute.xlu0 (!%p3250_p3), %v4541_v45 }
 0x7ca   : > { %v2905_v47 = vld [vmem:[#allocation4] sm:$0xff] (!%p3250_p3) }
 0x842   : > { %v2882_v30 = vpop.permute.xlu0 %2881 }
 0x843   : > { %v2884_v31 = vsub.f32 %v2858_v21, %v2882_v30  ;;  %v2885_v32 = vsub.f32 %v2860_v23, %v2882_v30 }
 0x845   : > { %v2886_v33 = vmul.f32 1.442695, %v2884_v31  ;;  %v2888_v34 = vmul.f32 1.442695, %v2885_v32 }
 0x847   : > { %3888 = vpow2.f32 %v2886_v33 }
 0x848   : > { %3890 = vpow2.f32 %v2888_v34 }
 0x849   : > { %3892 = vpow2.f32 %v2876_v38 }
 0x851   : > { %v3889_v35 = vpop.eup %3888 }
 0x852   : > { %v3891_v36 = vpop.eup %3890 }
 0x853   : > { %v2890_v37 = vadd.f32 %v3891_v36, %v3889_v35  ;;  %v3893_v39 = vpop.eup %3892 }
 0x854   : > { %v2878_v41 = vmul.f32 %v3893_v39, %v2874_v40 }
 0x855   : > { %2891 = vadd.xlane.f32.xlu1 %v2890_v37 }
 0x8df   : > { %2900 = sbr.rel (%p3250_p3) target bundleno = 2432 (0x980), region = 136 }
 0x8e2   : > { %v2892_v42 = vpop.xlane.xlu1 %2891 }
 0x8e3   : > { %v2893_v43 = vadd.f32 %v2892_v42, %v2878_v41 }
 0x8e5   : > { %2895 = vst.msk [vmem:[#allocation5] sm:$0xff] %vm2894_vm12, %v2893_v43 }
 0x8ec   : > { %v2906_v44 = vld [vmem:[#allocation5] sm:$0xff] }
 0x8ed   : > { %3895 = vlog2.f32 %v2906_v44 }
 0x8f7   : > { %v3896_v46 = vpop.eup %3895 }
 0x8f8   : > { %v2908_v48 = vmul.f32 0.6931472, %v3896_v46 }
 0x8fa   : > { %v2909_v49 = vadd.f32 %v2908_v48, %v2905_v47 }
 0x8fc   : > { %2912 = vperm.xlu0 %3894, %v2909_v49  }
 0x97b   : > { %v2913_v54 = vpop.permute.xlu0 %2912 }
 0x97c   : > { %v2915_v55 = vsub.f32 %v2901_v50, %v2913_v54  ;;  %v2916_v56 = vsub.f32 %v2902_v51, %v2913_v54  ;;  %v2917_v57 = vsub.f32 %v2903_v52, %v2913_v54  ;;  %v2918_v58 = vsub.f32 %v2904_v53, %v2913_v54 }
 0x97e   : > { %2919 = vst [vmem:[#allocation22] sm:$0xff] %v2915_v55  ;;  %2920 = vst [vmem:[#allocation22 + $0x8] sm:$0xff] %v2916_v56 }
 0x97f   : > { %2921 = vst [vmem:[#allocation22 + $0x10] sm:$0xff] %v2917_v57  ;;  %2922 = vst [vmem:[#allocation22 + $0x18] sm:$0xff] %v2918_v58 }
 0x980 PF: > { %p3765_p8 = scmp.eq.s32.totalorder %s4664_s21, 1  ;;  %s4542_s30 = smov [#allocation23]  }
 0x981   : > { %s2941_s29 = sshll.u32 %s4542_s30, 4  ;;  %s4543_s13 = smov [#allocation22]   ;;  %s2942_s29 = int_to_ptr.vmem [resolvable:$true] %s2941_s29 }
 0x982   : > { %s2930_s16 = sshll.u32 %s4543_s13, 4  ;;  %s4325_s1 = scalar_lea.vmem %s2942_s29, 128  ;;  %s2931_s16 = int_to_ptr.vmem [resolvable:$true] %s2930_s16 }
 0x983   : > { %p4326_p13 = scmp.ne.s32.totalorder %s2942_s29, %s4325_s1  ;;  %p4332_p2 = scmp.lt.s32.totalorder %s2942_s29, %s2942_s29 }
 0x984   : > { %p4333_p5 = scmp.lt.s32.totalorder %s4325_s1, %s4325_s1 }
 0x985   : > { %p4327_p11 = pnand %p4326_p13, %p3765_p8 }
 0x986   : > { %p4334_p12 = por %p4333_p5, %p4332_p2 }
 0x987   : > { %p4328_p10 = pneg %p4327_p11 }
 0x989   : > { %p4335_p6 = pnand %p4334_p12, %p4328_p10 }
 0x98b   : > { %4338 = shalt.err (!%p4335_p6)
}
 0x98c   : > { %s5393_s27 = sld [smem:[#allocation73_spill]] }
 0x992   : > { %s4339_s2 = scalar_lea.hbm %s5393_s27, 128 }
 0x993   : > { %p4340_p4 = scmp.ne.s32.totalorder %s5393_s27, %s4339_s2  ;;  %p4345_p0 = scmp.lt.u32.totalorder %s4339_s2, %s5393_s27 }
 0x995   : > { %p4341_p7 = pnand %p4340_p4, %p3765_p8 }
 0x997   : > { %p4342_p9 = pneg %p4341_p7 }
 0x999   : > { %p4347_p1 = pnand %p4345_p0, %p4342_p9 }
 0x99b   : > { %4350 = shalt.err (!%p4347_p1)
}
 0x99c   : > { %3711 = dma.vmem_to_hbm [thread:$0]  (%p3765_p8), %s2942_s29, 128, %s5393_s27, [#allocation24]  }
 0x99d   : > { %s4351_s3 = scalar_lea.vmem %s2931_s16, 512  ;;  %p4358_p10 = scmp.lt.s32.totalorder %s2931_s16, %s2931_s16 }
 0x99e   : > { %p4352_p3 = scmp.ne.s32.totalorder %s2931_s16, %s4351_s3  ;;  %p4359_p2 = scmp.lt.s32.totalorder %s4351_s3, %s4351_s3 }
 0x9a0   : > { %p4353_p13 = pnand %p4352_p3, %p3765_p8  ;;  %p4360_p5 = por %p4359_p2, %p4358_p10 }
 0x9a2   : > { %p4354_p11 = pneg %p4353_p13 }
 0x9a4   : > { %p4361_p12 = pnand %p4360_p5, %p4354_p11 }
 0x9a6   : > { %4364 = shalt.err (!%p4361_p12)
}
 0x9a7   : > { %s5394_s28 = sld [smem:[#allocation72_spill]] }
 0x9ad   : > { %s4365_s10 = scalar_lea.hbm %s5394_s28, 512 }
 0x9ae   : > { %p4366_p6 = scmp.ne.s32.totalorder %s5394_s28, %s4365_s10  ;;  %p4371_p9 = scmp.lt.u32.totalorder %s4365_s10, %s5394_s28 }
 0x9b0   : > { %p4367_p4 = pnand %p4366_p6, %p3765_p8 }
 0x9b2   : > { %p4368_p7 = pneg %p4367_p4 }
 0x9b4   : > { %p4373_p0 = pnand %p4371_p9, %p4368_p7 }
 0x9b6   : > { %4376 = shalt.err (!%p4373_p0)
}
 0x9b7   : > { %3709 = dma.vmem_to_hbm [thread:$0]  (%p3765_p8), %s2931_s16, 512, %s5394_s28, [#allocation10]  }
 0x9b8   : > { %s4544_s26 = smov [#allocation25]   ;;  %s4545_s23 = smov [#allocation26]  }
 0x9b9   : > { %s2952_s2 = sshll.u32 %s4544_s26, 4  ;;  %s2963_s20 = sshll.u32 %s4545_s23, 4  ;;  %s2953_s2 = int_to_ptr.vmem [resolvable:$true] %s2952_s2  ;;  %s2964_s20 = int_to_ptr.vmem [resolvable:$true] %s2963_s20 }
 0x9ba   : > { %s4377_s18 = scalar_lea.vmem %s2953_s2, 128  ;;  %p4384_p11 = scmp.lt.s32.totalorder %s2953_s2, %s2953_s2 }
 0x9bb   : > { %p4378_p1 = scmp.ne.s32.totalorder %s2953_s2, %s4377_s18  ;;  %p4385_p10 = scmp.lt.s32.totalorder %s4377_s18, %s4377_s18 }
 0x9bd   : > { %p4379_p3 = pnand %p4378_p1, %p3765_p8  ;;  %p4386_p2 = por %p4385_p10, %p4384_p11 }
 0x9bf   : > { %p4380_p13 = pneg %p4379_p3 }
 0x9c1   : > { %p4387_p5 = pnand %p4386_p2, %p4380_p13 }
 0x9c3   : > { %4390 = shalt.err (!%p4387_p5)
}
 0x9c4   : > { %s5395_s5 = sld [smem:[#allocation74_spill]] }
 0x9ca   : > { %s4391_s16 = scalar_lea.hbm %s5395_s5, 128 }
 0x9cb   : > { %p4392_p12 = scmp.ne.s32.totalorder %s5395_s5, %s4391_s16  ;;  %p4397_p7 = scmp.lt.u32.totalorder %s4391_s16, %s5395_s5 }
 0x9cd   : > { %p4393_p6 = pnand %p4392_p12, %p3765_p8 }
 0x9cf   : > { %p4394_p4 = pneg %p4393_p6 }
 0x9d1   : > { %p4399_p9 = pnand %p4397_p7, %p4394_p4 }
 0x9d3   : > { %4402 = shalt.err (!%p4399_p9)
}
 0x9d4   : > { %3713 = dma.vmem_to_hbm [thread:$0]  (%p3765_p8), %s2953_s2, 128, %s5395_s5, [#allocation24]  }
 0x9d5   : > { %s4403_s29 = scalar_lea.vmem %s2964_s20, 128  ;;  %p4410_p13 = scmp.lt.s32.totalorder %s2964_s20, %s2964_s20 }
 0x9d6   : > { %p4404_p0 = scmp.ne.s32.totalorder %s2964_s20, %s4403_s29  ;;  %p4411_p11 = scmp.lt.s32.totalorder %s4403_s29, %s4403_s29 }
 0x9d8   : > { %p4405_p1 = pnand %p4404_p0, %p3765_p8  ;;  %p4412_p10 = por %p4411_p11, %p4410_p13 }
 0x9da   : > { %p4406_p3 = pneg %p4405_p1 }
 0x9dc   : > { %p4413_p2 = pnand %p4412_p10, %p4406_p3 }
 0x9de   : > { %4416 = shalt.err (!%p4413_p2)
}
 0x9df   : > { %s5396_s22 = sld [smem:[#allocation75_spill]] }
 0x9e5   : > { %s4417_s26 = scalar_lea.hbm %s5396_s22, 128 }
 0x9e6   : > { %p4418_p5 = scmp.ne.s32.totalorder %s5396_s22, %s4417_s26  ;;  %p4423_p4 = scmp.lt.u32.totalorder %s4417_s26, %s5396_s22 }
 0x9e8   : > { %p4419_p12 = pnand %p4418_p5, %p3765_p8 }
 0x9ea   : > { %p4420_p6 = pneg %p4419_p12 }
 0x9ec   : > { %p4425_p7 = pnand %p4423_p4, %p4420_p6 }
 0x9ee   : > { %4428 = shalt.err (!%p4425_p7)
}
 0x9ef   : > { %3715 = dma.vmem_to_hbm [thread:$0]  (%p3765_p8), %s2964_s20, 128, %s5396_s22, [#allocation27]  }
 0x9f0   : > { %4484 = dma.done.wait (%p3765_p8), [#allocation10], 512  }
 0x9f1   : > { %4486 = vsyncadd (%p3765_p8), [#allocation10], 4294966784 }
 0x9f2   : > { %4488 = dma.done.wait (%p3765_p8), [#allocation24], 256  }
 0x9f3   : > { %4490 = vsyncadd (%p3765_p8), [#allocation24], 4294967040 }
 0x9f4   : > { %4492 = dma.done.wait (%p3765_p8), [#allocation27], 128  }
 0x9f5   : > { %4494 = vsyncadd (%p3765_p8), [#allocation27], 4294967168 }
 0x9f6 PF: > { %p38_p9 = scmp.ge.s32.totalorder %s4840_s25, 4   ;;  %s5397_s10 = smov %s4501_s0 }
 0x9f7   : > { %s5398_s0 = smov %s4505_s17  ;;  %s5399_s17 = smov %s4851_s24 }
 0x9f8   : > { %s5400_s18 = smov %s4840_s25  ;;  %40 = sbr.rel (!%p38_p9) target bundleno = 31 (0x1f), region = 227 }
 0x9ff   :  { %2988 = vsyncpa [#allocation9], 1 }
 0xa00   :  { %2990 = vsyncpa [#allocation9 + $0x1], 1 }
 0xa01   :  { %2991 = vsyncpa [#allocation12], 1 }
 0xa02   :  { %2992 = vsyncpa [#allocation15], 1 }
 0xa03   :  { %2993 = vsyncpa [#allocation18], 1 }
 0xa04   :  { %2994 = vsyncpa [#allocation21], 1 }
 0xa05   :  { %2996 = vsyncpa [#allocation21 + $0x1], 1 }
 0xa06   :  { %2997 = vsyncpa [#allocation10], 1 }
 0xa07   :  { %2999 = vsyncpa [#allocation10 + $0x1], 1 }
 0xa08   :  { %3000 = vsyncpa [#allocation24], 1 }
 0xa09   :  { %3001 = vsyncpa [#allocation27], 1 }
 0xa0a   :  { %3002 = vsyncmov [#allocation3] }
 0xa0d   :  { %s3003_s21 = vpop.sfrf %3002 }
 0xa0e   :  { %p3261_p8 = scmp.ne.s32.totalorder %s3003_s21, 0 }
 0xa10   :  { %3007 = shalt.err (%p3261_p8)  }
 0xa11   :  { %3009 = vsyncmov [#allocation3 + $0x1] }
 0xa14   :  { %s3010_s24 = vpop.sfrf %3009 }
 0xa15   :  { %p3262_p0 = scmp.ne.s32.totalorder %s3010_s24, 0 }
 0xa17   :  { %3014 = shalt.err (%p3262_p0)  }
 0xa18   :  { %3016 = vsyncmov [#allocation3 + $0x2] }
 0xa1b   :  { %s3017_s8 = vpop.sfrf %3016 }
 0xa1c   :  { %p3263_p1 = scmp.ne.s32.totalorder %s3017_s8, 0 }
 0xa1e   :  { %3021 = shalt.err (%p3263_p1)  }
 0xa1f   :  { %3023 = vsyncmov [#allocation3 + $0x3] }
 0xa22   :  { %s3024_s9 = vpop.sfrf %3023 }
 0xa23   :  { %p3264_p3 = scmp.ne.s32.totalorder %s3024_s9, 0 }
 0xa25   :  { %3028 = shalt.err (%p3264_p3)  }
 0xa26   :  { %3030 = vsyncmov [#allocation3 + $0x4] }
 0xa29   :  { %s3031_s11 = vpop.sfrf %3030 }
 0xa2a   :  { %p3265_p13 = scmp.ne.s32.totalorder %s3031_s11, 0 }
 0xa2c   :  { %3035 = shalt.err (%p3265_p13)  }
 0xa2d   :  { %3037 = vsyncmov [#allocation3 + $0x5] }
 0xa30   :  { %s3038_s12 = vpop.sfrf %3037 }
 0xa31   :  { %p3266_p11 = scmp.ne.s32.totalorder %s3038_s12, 0 }
 0xa33   :  { %3042 = shalt.err (%p3266_p11)  }
 0xa34   :  { %3044 = vsyncmov [#allocation3 + $0x6] }
 0xa37   :  { %s3045_s0 = vpop.sfrf %3044 }
 0xa38   :  { %p3267_p10 = scmp.ne.s32.totalorder %s3045_s0, 0 }
 0xa3a   :  { %3049 = shalt.err (%p3267_p10)  }
 0xa3b   :  { %3051 = vsyncmov [#allocation3 + $0x7] }
 0xa3e   :  { %s3052_s17 = vpop.sfrf %3051 }
 0xa3f   :  { %p3268_p2 = scmp.ne.s32.totalorder %s3052_s17, 0 }
 0xa41   :  { %3056 = shalt.err (%p3268_p2)  }

// kernel: tpu_custom_call.1
= control target key start
LH: loop header
LB: loop body
LE: loop exit
PB: predicated region body
PF: predicated region fallthrough
CT: control target
= control target key end

     0   :  { %s5322_s0 = inlined_call_operand.hbm [shape: s32[8], index: 0, kind: input, shape index: {}]   ;;  %s5323_s1 = inlined_call_operand.hbm [shape: f32[50,64], index: 1, kind: input, shape index: {}]   ;;  %s5324_s2 = inlined_call_operand.hbm [shape: f32[8,128], index: 2, kind: input, shape index: {}]   ;;  %s5325_s3 = inlined_call_operand.vmem [shape: f32[8,128], index: 3, kind: input, shape index: {}]   ;;  %s5326_s4 = inlined_call_operand.hbm [shape: f32[8,128], index: 4, kind: input, shape index: {}]   ;;  %s5327_s5 = inlined_call_operand.hbm [shape: f32[8,16,128], index: 5, kind: input, shape index: {}]   ;;  %s5328_s6 = inlined_call_operand.hbm [shape: f32[8,16,128], index: 6, kind: input, shape index: {}]   ;;  %s5329_s7 = inlined_call_operand.hbm [shape: f32[64,512], index: 7, kind: input, shape index: {}]   ;;  %s5330_s8 = inlined_call_operand.hbm [shape: f32[128,512], index: 8, kind: input, shape index: {}]   ;;  %s5331_s9 = inlined_call_operand.hbm [shape: f32[128,512], index: 9, kind: input, shape index: {}]   ;;  %s5332_s10 = inlined_call_operand.vmem [shape: f32[1,512], index: 10, kind: input, shape index: {}]   ;;  %s5333_s11 = inlined_call_operand.hbm [shape: f32[128,512], index: 11, kind: input, shape index: {}]   ;;  %s5334_s12 = inlined_call_operand.vmem [shape: f32[1,512], index: 12, kind: input, shape index: {}]   ;;  %s5335_s13 = inlined_call_operand.hbm [shape: f32[8,512], index: 13, kind: output, shape index: {0}]   ;;  %s5336_s14 = inlined_call_operand.hbm [shape: f32[8,128], index: 14, kind: output, shape index: {1}]   ;;  %s5337_s15 = inlined_call_operand.hbm [shape: f32[8,128], index: 15, kind: output, shape index: {2}]   ;;  %s5338_s16 = inlined_call_operand.hbm [shape: f32[8,128], index: 16, kind: output, shape index: {3}]  }
   0x1   :  { %5351 = sst [smem:[#allocation63_spill]] %s5322_s0 }
   0x2   :  { %5352 = sst [smem:[#allocation64_spill]] %s5323_s1  ;;  %s5364_s23 = sld [smem:[#allocation63_spill]] }
   0x3   :  { %5353 = sst [smem:[#allocation65_spill]] %s5324_s2 }
   0x4   :  { %5354 = sst [smem:[#allocation66_spill]] %s5325_s3 }
   0x5   :  { %5355 = sst [smem:[#allocation67_spill]] %s5326_s4 }
   0x6   :  { %5356 = sst [smem:[#allocation68_spill]] %s5327_s5 }
   0x7   :  { %5357 = sst [smem:[#allocation69_spill]] %s5328_s6 }
   0x8   :  { %5358 = sst [smem:[#allocation70_spill]] %s5329_s7 }
   0x9   :  { %5359 = sst [smem:[#allocation71_spill]] %s5332_s10  ;;  %s3897_s10 = scalar_lea.hbm %s5364_s23, 16 }
   0xa   :  { %5360 = sst [smem:[#allocation72_spill]] %s5335_s13  ;;  %p3898_p0 = scmp.ne.s32.totalorder %s5364_s23, %s3897_s10 }
   0xb   :  { %5361 = sst [smem:[#allocation73_spill]] %s5336_s14  ;;  %p3901_p1 = scmp.lt.u32.totalorder %s3897_s10, %s5364_s23 }
   0xc   :  { %5362 = sst [smem:[#allocation74_spill]] %s5337_s15 }
   0xd   :  { %5363 = sst [smem:[#allocation75_spill]] %s5338_s16  ;;  %p3903_p2 = pnand %p3901_p1, %p3898_p0 }
   0xf   :  { %3906 = shalt.err (!%p3903_p2)  }
  0x10   :  { %s4511_s28 = smov [#allocation7]  }
  0x11   :  { %23 = dma.hbm_to_smem %s5364_s23, 16, %s4511_s28, [#allocation6] }
  0x12   :  { %4445 = dma.done.wait [#allocation6], 16 }
  0x13   :  { %4446 = vsyncadd [#allocation6], 4294967280 }
  0x14   :  { %25 = sfence }
  0x15   :  { %26 = vsyncpa [#allocation9], 0 }
  0x16   :  { %27 = vsyncpa [#allocation12], 0 }
  0x17   :  { %28 = vsyncpa [#allocation15], 0 }
  0x18   :  { %29 = vsyncpa [#allocation18], 0 }
  0x19   :  { %30 = vsyncpa [#allocation21], 0 }
  0x1a   :  { %32 = vsyncpa [#allocation21 + $0x1], 0 }
  0x1b   :  { %33 = vsyncpa [#allocation10], 0 }
  0x1c   :  { %34 = vsyncpa [#allocation24], 0 }
  0x1d   :  { %35 = vsyncpa [#allocation27], 0  ;;  %s4643_s10 = smov 0   ;;  %s4645_s0 = smov 0  }
  0x1e   :  { %s4647_s17 = smov 0   ;;  %s4649_s18 = smov 0  }
  0x1f LB: > { %s4512_s19 = smov [#allocation11]   ;;  %s4664_s21 = sadd.s32 4294967295, %s4509_s18   ;;  %s4509_s18 = sphi %s4649_s18, %s5400_s18   ;;  %s4505_s17 = sphi %s4647_s17, %s5399_s17   ;;  %s4501_s0 = sphi %s4645_s0, %s5398_s0   ;;  %s4497_s10 = sphi %s4643_s10, %s5397_s10  }
  0x20   : > { %s398_s20 = sshll.u32 %s4512_s19, 4  ;;  %p3197_p3 = scmp.ge.s32.totalorder %s4509_s18, 1  ;;  %s399_s20 = int_to_ptr.vmem [resolvable:$true] %s398_s20 }
  0x21   : > { %p5342_p4 = scmp.eq.s32.totalorder %s4664_s21, 0  ;;  %p371_p5 = scmp.lt.s32.totalorder %s4509_s18, 3 }
  0x22   : > { %s4513_s23 = smov [#allocation14]   ;;  %s4514_s26 = smov [#allocation17]  }
  0x23   : > { %p4670_p7 = pnand %p3197_p3, %p371_p5  ;;  %s421_s24 = sshll.u32 %s4513_s23, 4  ;;  %s4682_s24 = int_to_ptr.vmem [resolvable:$true] %s421_s24 }
  0x24   : > { %s4684_s27 = sshll.u32 %s4514_s26, 4  ;;  %s5367_s4 = sld [smem:[#allocation67_spill]]  ;;  %s448_s27 = int_to_ptr.vmem [resolvable:$true] %s4684_s27 }
  0x25   : > { %s5365_s22 = scalar_select %p4670_p7, 1, 0 }
  0x26   : > { %p3724_p8 = pneg %p4670_p7 }
  0x28   : > { %p4678_p9 = pnand %p3724_p8, %p5342_p4 }
  0x2a   : > { %s3907_s30 = scalar_lea.hbm %s5367_s4, 128  ;;  %p4694_p11 = pneg %p4678_p9 }
  0x2b   : > { %p3908_p10 = scmp.ne.s32.totalorder %s5367_s4, %s3907_s30  ;;  %p3914_p0 = scmp.lt.u32.totalorder %s3907_s30, %s5367_s4 }
  0x2d   : > { %p3910_p12 = pnand %p4694_p11, %p3908_p10 }
  0x2f   : > { %p3911_p13 = pneg %p3910_p12 }
  0x31   : > { %p3916_p1 = pnand %p3914_p0, %p3911_p13 }
  0x33   : > { %3919 = shalt.err (!%p3916_p1)
}
  0x34   : > { %s3920_s28 = scalar_lea.vmem %s399_s20, 128  ;;  %p3928_p8 = scmp.lt.s32.totalorder %s399_s20, %s399_s20 }
  0x35   : > { %p3921_p2 = scmp.ne.s32.totalorder %s399_s20, %s3920_s28  ;;  %p3929_p6 = scmp.lt.s32.totalorder %s3920_s28, %s3920_s28 }
  0x37   : > { %p3923_p3 = pnand %p3921_p2, %p4694_p11  ;;  %p3930_p4 = por %p3929_p6, %p3928_p8 }
  0x39   : > { %p3924_p5 = pneg %p3923_p3 }
  0x3b   : > { %p3931_p7 = pnand %p3930_p4, %p3924_p5 }
  0x3d   : > { %3934 = shalt.err (!%p3931_p7)
}
  0x3e   : > { %3730 = dma.hbm_to_vmem [thread:$0]  (!%p4678_p9), %s5367_s4, 128, %s399_s20, [#allocation12]  }
  0x3f   : > { %s5369_s6 = sld [smem:[#allocation69_spill]] }
  0x45   : > { %s3935_s19 = scalar_lea.hbm %s5369_s6, 2048 }
  0x46   : > { %p3936_p10 = scmp.ne.s32.totalorder %s5369_s6, %s3935_s19  ;;  %p3942_p4 = scmp.lt.u32.totalorder %s3935_s19, %s5369_s6 }
  0x48   : > { %p3938_p12 = pnand %p3936_p10, %p4694_p11 }
  0x4a   : > { %p3939_p6 = pneg %p3938_p12 }
  0x4c   : > { %p3944_p7 = pnand %p3942_p4, %p3939_p6 }
  0x4e   : > { %3947 = shalt.err (!%p3944_p7)
}
  0x4f   : > { %s3948_s20 = scalar_lea.vmem %s4682_s24, 2048  ;;  %p3956_p2 = scmp.lt.s32.totalorder %s4682_s24, %s4682_s24 }
  0x50   : > { %p3949_p13 = scmp.ne.s32.totalorder %s4682_s24, %s3948_s20  ;;  %p3957_p3 = scmp.lt.s32.totalorder %s3948_s20, %s3948_s20 }
  0x52   : > { %p3951_p0 = pnand %p3949_p13, %p4694_p11  ;;  %p3958_p5 = por %p3957_p3, %p3956_p2 }
  0x54   : > { %p3952_p1 = pneg %p3951_p0 }
  0x56   : > { %p3959_p8 = pnand %p3958_p5, %p3952_p1 }
  0x58   : > { %3962 = shalt.err (!%p3959_p8)
}
  0x59   : > { %s5346_s13 = smov 128   ;;  %s5347_s14 = smov 8  }
  0x5a   : > { %3736 = dma.hbm_to_vmem [thread:$0]  (!%p4678_p9), %s5369_s6, 2048, %s4682_s24, [#allocation15], %s5346_s13, %s5346_s13, %s5347_s14  }
  0x5b   : > { %s3963_s19 = scalar_lea.hbm %s5330_s8, 8192 }
  0x5c   : > { %p3964_p10 = scmp.ne.s32.totalorder %s5330_s8, %s3963_s19  ;;  %p3970_p4 = scmp.lt.u32.totalorder %s3963_s19, %s5330_s8 }
  0x5e   : > { %p3966_p12 = pnand %p3964_p10, %p4694_p11 }
  0x60   : > { %p3967_p6 = pneg %p3966_p12 }
  0x62   : > { %p3972_p7 = pnand %p3970_p4, %p3967_p6 }
  0x64   : > { %3975 = shalt.err (!%p3972_p7)
}
  0x65   : > { %s3976_s16 = scalar_lea.vmem %s448_s27, 8192  ;;  %p3984_p2 = scmp.lt.s32.totalorder %s448_s27, %s448_s27 }
  0x66   : > { %p3977_p13 = scmp.ne.s32.totalorder %s448_s27, %s3976_s16  ;;  %p3985_p3 = scmp.lt.s32.totalorder %s3976_s16, %s3976_s16 }
  0x68   : > { %p3979_p0 = pnand %p3977_p13, %p4694_p11  ;;  %p3986_p5 = por %p3985_p3, %p3984_p2 }
  0x6a   : > { %p3980_p1 = pneg %p3979_p0 }
  0x6c   : > { %p3987_p8 = pnand %p3986_p5, %p3980_p1 }
  0x6e   : > { %3990 = shalt.err (!%p3987_p8)
}
  0x6f   : > { %s5349_s24 = smov 512   ;;  %s4518_s29 = smov 32  }
  0x70   : > { %3742 = dma.hbm_to_vmem [thread:$0]  (!%p4678_p9), %s5330_s8, 8192, %s448_s27, [#allocation18], %s5349_s24, %s5349_s24, %s4518_s29  }
  0x71   : > { %s4519_s30 = smov [#allocation8]   ;;  %s4520_s26 = smov [#allocation13]  }
  0x72   : > { %s384_s19 = sshll.u32 %s4519_s30, 4  ;;  %s408_s28 = sshll.u32 %s4520_s26, 4  ;;  %s385_s19 = int_to_ptr.vmem [resolvable:$true] %s384_s19  ;;  %s409_s28 = int_to_ptr.vmem [resolvable:$true] %s408_s28 }
  0x73   : > { %s5370_s2 = sld [smem:[#allocation65_spill]] }
  0x79   : > { %s3991_s13 = scalar_lea.hbm %s5370_s2, 128 }
  0x7a   : > { %p3992_p10 = scmp.ne.s32.totalorder %s5370_s2, %s3991_s13  ;;  %p3998_p4 = scmp.lt.u32.totalorder %s3991_s13, %s5370_s2 }
  0x7c   : > { %p3994_p12 = pnand %p3992_p10, %p4694_p11 }
  0x7e   : > { %p3995_p6 = pneg %p3994_p12 }
  0x80   : > { %p4000_p7 = pnand %p3998_p4, %p3995_p6 }
  0x82   : > { %4003 = shalt.err (!%p4000_p7)
}
  0x83   : > { %s4004_s27 = scalar_lea.vmem %s385_s19, 128  ;;  %p4012_p2 = scmp.lt.s32.totalorder %s385_s19, %s385_s19 }
  0x84   : > { %p4005_p13 = scmp.ne.s32.totalorder %s385_s19, %s4004_s27  ;;  %p4013_p3 = scmp.lt.s32.totalorder %s4004_s27, %s4004_s27 }
  0x86   : > { %p4007_p0 = pnand %p4005_p13, %p4694_p11  ;;  %p4014_p5 = por %p4013_p3, %p4012_p2 }
  0x88   : > { %p4008_p1 = pneg %p4007_p0 }
  0x8a   : > { %p4015_p8 = pnand %p4014_p5, %p4008_p1 }
  0x8c   : > { %4018 = shalt.err (!%p4015_p8)
}
  0x8d   : > { %3727 = dma.hbm_to_vmem [thread:$0]  (!%p4678_p9), %s5370_s2, 128, %s385_s19, [#allocation9]  }
  0x8e   : > { %s5371_s5 = sld [smem:[#allocation68_spill]] }
  0x94   : > { %s4019_s13 = scalar_lea.hbm %s5371_s5, 2048 }
  0x95   : > { %p4020_p10 = scmp.ne.s32.totalorder %s5371_s5, %s4019_s13  ;;  %p4026_p4 = scmp.lt.u32.totalorder %s4019_s13, %s5371_s5 }
  0x97   : > { %p4022_p12 = pnand %p4020_p10, %p4694_p11 }
  0x99   : > { %p4023_p6 = pneg %p4022_p12 }
  0x9b   : > { %p4028_p7 = pnand %p4026_p4, %p4023_p6 }
  0x9d   : > { %4031 = shalt.err (!%p4028_p7)
}
  0x9e   : > { %s4032_s20 = scalar_lea.vmem %s409_s28, 2048  ;;  %p4040_p2 = scmp.lt.s32.totalorder %s409_s28, %s409_s28 }
  0x9f   : > { %p4033_p13 = scmp.ne.s32.totalorder %s409_s28, %s4032_s20  ;;  %p4041_p3 = scmp.lt.s32.totalorder %s4032_s20, %s4032_s20 }
  0xa1   : > { %p4035_p0 = pnand %p4033_p13, %p4694_p11  ;;  %p4042_p5 = por %p4041_p3, %p4040_p2 }
  0xa3   : > { %p4036_p1 = pneg %p4035_p0 }
  0xa5   : > { %p4043_p8 = pnand %p4042_p5, %p4036_p1 }
  0xa7   : > { %4046 = shalt.err (!%p4043_p8)
}
  0xa8   : > { %s5372_s19 = smov 8   ;;  %s5373_s16 = smov 128  }
  0xa9   : > { %3733 = dma.hbm_to_vmem [thread:$0]  (!%p4678_p9), %s5371_s5, 2048, %s409_s28, [#allocation12], %s5373_s16, %s5373_s16, %s5372_s19  }
  0xaa   : > { %s4521_s14 = smov [#allocation16]   ;;  %s4522_s3 = smov [#allocation19]  }
  0xab   : > { %s434_s1 = sshll.u32 %s4521_s14, 4  ;;  %s460_s13 = sshll.u32 %s4522_s3, 4  ;;  %s435_s1 = int_to_ptr.vmem [resolvable:$true] %s434_s1  ;;  %s461_s13 = int_to_ptr.vmem [resolvable:$true] %s460_s13 }
  0xac   : > { %s5374_s7 = sld [smem:[#allocation70_spill]] }
  0xb2   : > { %s4047_s30 = scalar_lea.hbm %s5374_s7, 4096 }
  0xb3   : > { %p4048_p10 = scmp.ne.s32.totalorder %s5374_s7, %s4047_s30  ;;  %p4054_p4 = scmp.lt.u32.totalorder %s4047_s30, %s5374_s7 }
  0xb5   : > { %p4050_p12 = pnand %p4048_p10, %p4694_p11 }
  0xb7   : > { %p4051_p6 = pneg %p4050_p12 }
  0xb9   : > { %p4056_p7 = pnand %p4054_p4, %p4051_p6 }
  0xbb   : > { %4059 = shalt.err (!%p4056_p7)
}
  0xbc   : > { %s4060_s28 = scalar_lea.vmem %s435_s1, 4096  ;;  %p4068_p2 = scmp.lt.s32.totalorder %s435_s1, %s435_s1 }
  0xbd   : > { %p4061_p13 = scmp.ne.s32.totalorder %s435_s1, %s4060_s28  ;;  %p4069_p3 = scmp.lt.s32.totalorder %s4060_s28, %s4060_s28 }
  0xbf   : > { %p4063_p0 = pnand %p4061_p13, %p4694_p11  ;;  %p4070_p5 = por %p4069_p3, %p4068_p2 }
  0xc1   : > { %p4064_p1 = pneg %p4063_p0 }
  0xc3   : > { %p4071_p8 = pnand %p4070_p5, %p4064_p1 }
  0xc5   : > { %4074 = shalt.err (!%p4071_p8)
}
  0xc6   : > { %s5375_s19 = smov 512   ;;  %s4075_s3 = scalar_lea.hbm %s5331_s9, 8192 }
  0xc7   : > { %3739 = dma.hbm_to_vmem [thread:$0]  (!%p4678_p9), %s5374_s7, 4096, %s435_s1, [#allocation15], %s5375_s19, %s5375_s19, %s4518_s29  }
  0xc8   : > { %p4076_p10 = scmp.ne.s32.totalorder %s5331_s9, %s4075_s3  ;;  %p4082_p4 = scmp.lt.u32.totalorder %s4075_s3, %s5331_s9 }
  0xca   : > { %p4078_p12 = pnand %p4076_p10, %p4694_p11 }
  0xcc   : > { %p4079_p6 = pneg %p4078_p12 }
  0xce   : > { %p4084_p7 = pnand %p4082_p4, %p4079_p6 }
  0xd0   : > { %4087 = shalt.err (!%p4084_p7)
}
  0xd1   : > { %s4088_s20 = scalar_lea.vmem %s461_s13, 8192  ;;  %p4096_p2 = scmp.lt.s32.totalorder %s461_s13, %s461_s13 }
  0xd2   : > { %p4089_p13 = scmp.ne.s32.totalorder %s461_s13, %s4088_s20  ;;  %p4097_p3 = scmp.lt.s32.totalorder %s4088_s20, %s4088_s20 }
  0xd4   : > { %p4091_p0 = pnand %p4089_p13, %p4694_p11  ;;  %p4098_p5 = por %p4097_p3, %p4096_p2 }
  0xd6   : > { %p4092_p1 = pneg %p4091_p0 }
  0xd8   : > { %p4099_p8 = pnand %p4098_p5, %p4092_p1 }
  0xda   : > { %4102 = shalt.err (!%p4099_p8)
}
  0xdb   : > { %3745 = dma.hbm_to_vmem [thread:$0]  (!%p4678_p9), %s5331_s9, 8192, %s461_s13, [#allocation18], %s5375_s19, %s5375_s19, %s4518_s29  }
  0xdc   : > { %s4840_s25 = sadd.s32 1, %s4509_s18   ;;  %s237_s28 = sadd.s32 1, %s4505_s17 }
  0xdd   : > { %s234_s23 = ssub.s32 %s4509_s18, %s4840_s25  ;;  %p244_p10 = scmp.ne.s32.totalorder %s4505_s17, %s4501_s0 }
  0xde   : > { %p235_p11 = scmp.eq.s32.totalorder %s234_s23, 0  ;;  %p245_p12 = scmp.eq.s32.totalorder %s4509_s18, 0 }
  0xdf   : > { %p250_p6 = scmp.ne.s32.totalorder %s4501_s0, %s4497_s10  ;;  %p5376_p7 = scmp.eq.s32.totalorder %s4664_s21, 0 }
  0xe0   : > { %s4851_s24 = scalar_select %p235_p11, %s4505_s17, %s237_s28  }
  0xe1   : > { %p246_p4 = por %p245_p12, %p244_p10  ;;  %p4855_p13 = por %p5376_p7, %p250_p6 }
  0xe2   : > { %p3757_p0 = scmp.lt.s32.totalorder %s4509_s18, 2  ;;  %s477_s6 = sand.u32 1, %s4505_s17  }
  0xe3   : > { %s3206_s29 = sshll.u32 %s477_s6, 8  ;;  %s3269_s13 = sshll.u32 %s4509_s18, 8 }
  0xe4   : > { %s4865_s4 = scalar_lea.hbm %s5333_s11, %s3269_s13  ;;  %s481_s10 = scalar_lea.vmem [#allocation20], %s3206_s29 }
  0xe5   : > { %s488_s15 = sshll.u32 %s481_s10, 4  ;;  %p4869_p9 = pnand %p3757_p0, %p246_p4  ;;  %s4867_s15 = int_to_ptr.vmem [resolvable:$true] %s488_s15 }
  0xe6   : > { %s4873_s18 = scalar_lea.sflag [#allocation21], %s477_s6  ;;  %s4103_s26 = scalar_lea.hbm %s4865_s4, 4096 }
  0xe7   : > { %p4104_p1 = scmp.ne.s32.totalorder %s4865_s4, %s4103_s26  ;;  %p4105_p2 = pneg %p4869_p9 }
  0xe8   : > { %s4108_s27 = scalar_lea.hbm %s5333_s11, 8192  ;;  %p4109_p8 = scmp.lt.u32.totalorder %s4865_s4, %s5333_s11 }
  0xe9   : > { %p4106_p3 = pnand %p4105_p2, %p4104_p1  ;;  %p4110_p11 = scmp.lt.u32.totalorder %s4108_s27, %s4103_s26 }
  0xea   : > { %p4112_p12 = scmp.lt.u32.totalorder %s4103_s26, %s4865_s4 }
  0xeb   : > { %p4107_p5 = pneg %p4106_p3  ;;  %p4111_p10 = por %p4110_p11, %p4109_p8 }
  0xed   : > { %p4113_p6 = por %p4112_p12, %p4111_p10 }
  0xef   : > { %p4114_p4 = pnand %p4113_p6, %p4107_p5 }
  0xf1   : > { %4117 = shalt.err (!%p4114_p4)
}
  0xf2   : > { %s4118_s6 = scalar_lea.vmem %s4867_s15, 4096  ;;  %s4523_s29 = smov [#allocation20]  }
  0xf3   : > { %p4119_p7 = scmp.ne.s32.totalorder %s4867_s15, %s4118_s6  ;;  %s4123_s13 = sshll.u32 %s4523_s29, 4  ;;  %s4124_s13 = int_to_ptr.vmem [resolvable:$false] %s4123_s13 }
  0xf4   : > { %s4125_s14 = scalar_lea.vmem %s4124_s13, 8192  ;;  %p4126_p3 = scmp.lt.s32.totalorder %s4867_s15, %s4124_s13 }
  0xf5   : > { %p4121_p0 = pnand %p4119_p7, %p4105_p2  ;;  %p4127_p8 = scmp.lt.s32.totalorder %s4125_s14, %s4118_s6 }
  0xf7   : > { %p4122_p1 = pneg %p4121_p0  ;;  %p4128_p11 = por %p4127_p8, %p4126_p3 }
  0xf9   : > { %p4129_p10 = pnand %p4128_p11, %p4122_p1 }
  0xfb   : > { %4132 = shalt.err (!%p4129_p10)
}
  0xfc   : > { %s4524_s3 = smov 256   ;;  %s4525_s10 = smov 16  }
  0xfd   : > { %3749 = dma.hbm_to_vmem [thread:$0]  (!%p4869_p9), %s4865_s4, 4096, %s4867_s15, %s4873_s18, %s5375_s19, %s4524_s3, %s4525_s10  }
  0xfe   : > { %p5379_p2 = scmp.ne.s32.totalorder %s5365_s22, 0 }
  0xff   : > { %p5380_p5 = scmp.eq.s32.totalorder (!%p5379_p2), %s4664_s21, 0 }
 0x100   : > { %508 = sbr.rel (%p5379_p2) target bundleno = 2550 (0x9f6), region = 64 }
 0x107   : > { %4448 = dma.done.wait (%p5380_p5), [#allocation9], 128   ;;  %p5381_p12 = pmov %p5380_p5 }
 0x108   : > { %p5382_p6 = pmov %p5380_p5 }
 0x109   : > { %4450 = vsyncadd (%p5381_p12), [#allocation9], 4294967168 }
 0x10a   : > { %4452 = dma.done.wait (%p5382_p6), [#allocation12], 2176   ;;  %p5383_p4 = pmov %p5380_p5 }
 0x10c   : > { %4454 = vsyncadd (%p5383_p4), [#allocation12], 4294965120  ;;  %p5384_p7 = pmov %p5383_p4 }
 0x10d   : > { %p5385_p9 = pmov %p5383_p4 }
 0x10e   : > { %4456 = dma.done.wait (%p5384_p7), [#allocation15], 6144  }
 0x10f   : > { %4458 = vsyncadd (%p5385_p9), [#allocation15], 4294961152  ;;  %p5386_p0 = pmov %p5383_p4 }
 0x111   : > { %4460 = dma.done.wait (%p5386_p0), [#allocation18], 16384   ;;  %p5387_p1 = pmov %p5386_p0 }
 0x112   : > { %s538_s22 = sand.u32 1, %s4501_s0  }
 0x113   : > { %4462 = vsyncadd (%p5387_p1), [#allocation18], 4294950912  ;;  %s3217_s19 = sshll.u32 %s538_s22, 8  ;;  %s539_s4 = scalar_lea.sflag [#allocation21], %s538_s22 }
 0x114   : > { %s4921_s15 = scalar_lea.vmem [#allocation20], %s3217_s19 }
 0x115   : > { %4464 = dma.done.wait (%p4855_p13), %s539_s4, 4096  }
 0x116   : > { %4466 = vsyncadd (%p4855_p13), %s539_s4, 4294963200  ;;  %s3218_s30 = sshll.u32 %s4664_s21, 1  ;;  %p5388_p8 = scmp.ne.s32.totalorder %s4664_s21, 0 }
 0x117   : > { %p588_p3 = scmp.lt.s32.totalorder %s3218_s30, 3  ;;  %s596_s1 = sld [smem:[#allocation7]] (!%p5388_p8) }
 0x118   : > { %595 = sbr.rel (%p5388_p8) target bundleno = 1591 (0x637), region = 100  ;;  %s4526_s27 = smov (!%p5388_p8), [#allocation2]  }
 0x119   : > { %s5402_s30 = smov (!%p588_p3, %s3218_s30), 3  ;;  %s613_s23 = sshll.u32 (!%p5388_p8), %s4526_s27, 4  ;;  %s4938_s23 = int_to_ptr.vmem [resolvable:$true] %s613_s23 }
 0x11a   : > { %s4936_s28 = sld [smem:[#allocation7 + $0x1]] (!%p5388_p8)  ;;  %s4527_s16 = smov (!%p5388_p8), [#allocation2 + $0x1]  }
 0x11b   : > { %s628_s6 = sshll.u32 (!%p5388_p8), %s4527_s16, 4  ;;  %s4940_s29 = sld [smem:[#allocation7 + $0x2]] (!%p5388_p8)  ;;  %s4942_s6 = int_to_ptr.vmem [resolvable:$true] %s628_s6 }
 0x11c   : > { %s4528_s13 = smov (!%p5388_p8), [#allocation2 + $0x2]   ;;  %s4944_s3 = sld [smem:[#allocation7 + $0x3]] (!%p5388_p8) }
 0x11d   : > { %s643_s14 = sshll.u32 (!%p5388_p8), %s4528_s13, 4  ;;  %s3227_s10 = sshll.u32 (!%p5388_p8), %s596_s1, 4  ;;  %s4946_s14 = int_to_ptr.vmem [resolvable:$true] %s643_s14 }
 0x11e   : > { %s5389_s4 = sld [smem:[#allocation64_spill]] (!%p5388_p8) }
 0x120   : > { %s3228_s26 = sshll.u32 %s4936_s28, 4 }
 0x124   : > { %s605_s18 = scalar_lea.hbm %s5389_s4, %s3227_s10  ;;  %s4955_s2 = scalar_lea.hbm %s5389_s4, 896 }
 0x125   : > { %s4133_s27 = scalar_lea.hbm %s605_s18, 16  ;;  %p4136_p11 = scmp.lt.u32.totalorder %s605_s18, %s5389_s4 }
 0x126   : > { %p4134_p13 = scmp.ne.s32.totalorder %s605_s18, %s4133_s27  ;;  %p4137_p10 = scmp.lt.u32.totalorder %s4955_s2, %s4133_s27 }
 0x127   : > { %p4139_p5 = scmp.lt.u32.totalorder %s4133_s27, %s605_s18 }
 0x128   : > { %p4138_p2 = por %p4137_p10, %p4136_p11 }
 0x12a   : > { %p4140_p12 = por %p4139_p5, %p4138_p2 }
 0x12c   : > { %p4141_p6 = pnand %p4140_p12, %p4134_p13 }
 0x12e   : > { %4144 = shalt.err (!%p4141_p6)  }
 0x12f   : > { %s4145_s1 = scalar_lea.vmem %s4938_s23, 16  ;;  %s4964_s20 = scalar_lea.vmem %s4938_s23, 128 }
 0x130   : > { %p4146_p4 = scmp.ne.s32.totalorder %s4938_s23, %s4145_s1  ;;  %p4150_p7 = scmp.lt.s32.totalorder %s4938_s23, %s4938_s23 }
 0x131   : > { %p4151_p9 = scmp.lt.s32.totalorder %s4964_s20, %s4145_s1 }
 0x133   : > { %p4152_p0 = por %p4151_p9, %p4150_p7 }
 0x135   : > { %p4153_p1 = pnand %p4152_p0, %p4146_p4 }
 0x137   : > { %4156 = shalt.err (!%p4153_p1)  }
 0x138   : > { %616 = dma.hbm_to_vmem [thread:$0]  %s605_s18, 16, %s4938_s23, [#allocation3] }
 0x139   : > { %s618_s28 = scalar_lea.hbm %s5389_s4, %s3228_s26  ;;  %s3229_s13 = sshll.u32 %s4940_s29, 4 }
 0x13a   : > { %s4157_s10 = scalar_lea.hbm %s618_s28, 16  ;;  %p4160_p8 = scmp.lt.u32.totalorder %s618_s28, %s5389_s4 }
 0x13b   : > { %p4158_p3 = scmp.ne.s32.totalorder %s618_s28, %s4157_s10  ;;  %p4161_p13 = scmp.lt.u32.totalorder %s4955_s2, %s4157_s10 }
 0x13c   : > { %p4163_p10 = scmp.lt.u32.totalorder %s4157_s10, %s618_s28 }
 0x13d   : > { %p4162_p11 = por %p4161_p13, %p4160_p8 }
 0x13f   : > { %p4164_p2 = por %p4163_p10, %p4162_p11 }
 0x141   : > { %p4165_p5 = pnand %p4164_p2, %p4158_p3 }
 0x143   : > { %4168 = shalt.err (!%p4165_p5)  }
 0x144   : > { %s4169_s18 = scalar_lea.vmem %s4942_s6, 16  ;;  %p4174_p6 = scmp.lt.s32.totalorder %s4942_s6, %s4938_s23 }
 0x145   : > { %p4170_p12 = scmp.ne.s32.totalorder %s4942_s6, %s4169_s18  ;;  %p4175_p4 = scmp.lt.s32.totalorder %s4964_s20, %s4169_s18 }
 0x147   : > { %p4176_p7 = por %p4175_p4, %p4174_p6 }
 0x149   : > { %p4177_p9 = pnand %p4176_p7, %p4170_p12 }
 0x14b   : > { %4180 = shalt.err (!%p4177_p9)  }
 0x14c   : > { %631 = dma.hbm_to_vmem [thread:$0]  %s618_s28, 16, %s4942_s6, [#allocation3 + $0x1] }
 0x14d   : > { %s633_s27 = scalar_lea.hbm %s5389_s4, %s3229_s13  ;;  %s3230_s16 = sshll.u32 %s4944_s3, 4 }
 0x14e   : > { %s4181_s1 = scalar_lea.hbm %s633_s27, 16  ;;  %p4184_p1 = scmp.lt.u32.totalorder %s633_s27, %s5389_s4 }
 0x14f   : > { %p4182_p0 = scmp.ne.s32.totalorder %s633_s27, %s4181_s1  ;;  %p4185_p3 = scmp.lt.u32.totalorder %s4955_s2, %s4181_s1 }
 0x150   : > { %p4187_p13 = scmp.lt.u32.totalorder %s4181_s1, %s633_s27 }
 0x151   : > { %p4186_p8 = por %p4185_p3, %p4184_p1 }
 0x153   : > { %p4188_p11 = por %p4187_p13, %p4186_p8 }
 0x155   : > { %p4189_p10 = pnand %p4188_p11, %p4182_p0 }
 0x157   : > { %4192 = shalt.err (!%p4189_p10)  }
 0x158   : > { %s4193_s6 = scalar_lea.vmem %s4946_s14, 16  ;;  %p4198_p5 = scmp.lt.s32.totalorder %s4946_s14, %s4938_s23 }
 0x159   : > { %p4194_p2 = scmp.ne.s32.totalorder %s4946_s14, %s4193_s6  ;;  %p4199_p12 = scmp.lt.s32.totalorder %s4964_s20, %s4193_s6 }
 0x15b   : > { %p4200_p6 = por %p4199_p12, %p4198_p5 }
 0x15d   : > { %p4201_p4 = pnand %p4200_p6, %p4194_p2 }
 0x15f   : > { %4204 = shalt.err (!%p4201_p4)  }
 0x160   : > { %646 = dma.hbm_to_vmem [thread:$0]  %s633_s27, 16, %s4946_s14, [#allocation3 + $0x2] }
 0x161   : > { %s648_s13 = scalar_lea.hbm %s5389_s4, %s3230_s16  ;;  %s4529_s10 = smov [#allocation2 + $0x3]  }
 0x162   : > { %s658_s22 = sshll.u32 %s4529_s10, 4  ;;  %s5001_s19 = sld [smem:[#allocation7 + $0x4]]  ;;  %s659_s22 = int_to_ptr.vmem [resolvable:$true] %s658_s22 }
 0x163   : > { %s4205_s18 = scalar_lea.hbm %s648_s13, 16  ;;  %p4208_p9 = scmp.lt.u32.totalorder %s648_s13, %s5389_s4 }
 0x164   : > { %p4206_p7 = scmp.ne.s32.totalorder %s648_s13, %s4205_s18  ;;  %p4209_p0 = scmp.lt.u32.totalorder %s4955_s2, %s4205_s18 }
 0x165   : > { %p4211_p3 = scmp.lt.u32.totalorder %s4205_s18, %s648_s13 }
 0x166   : > { %p4210_p1 = por %p4209_p0, %p4208_p9 }
 0x168   : > { %p4212_p8 = por %p4211_p3, %p4210_p1 }
 0x16a   : > { %p4213_p13 = pnand %p4212_p8, %p4206_p7 }
 0x16c   : > { %4216 = shalt.err (!%p4213_p13)  }
 0x16d   : > { %s4217_s14 = scalar_lea.vmem %s659_s22, 16  ;;  %p4222_p10 = scmp.lt.s32.totalorder %s659_s22, %s4938_s23 }
 0x16e   : > { %p4218_p11 = scmp.ne.s32.totalorder %s659_s22, %s4217_s14  ;;  %p4223_p2 = scmp.lt.s32.totalorder %s4964_s20, %s4217_s14 }
 0x170   : > { %p4224_p5 = por %p4223_p2, %p4222_p10 }
 0x172   : > { %p4225_p12 = pnand %p4224_p5, %p4218_p11 }
 0x174   : > { %4228 = shalt.err (!%p4225_p12)  }
 0x175   : > { %661 = dma.hbm_to_vmem [thread:$0]  %s648_s13, 16, %s659_s22, [#allocation3 + $0x3] }
 0x176   : > { %s4530_s27 = smov [#allocation2 + $0x4]   ;;  %s5009_s1 = sld [smem:[#allocation7 + $0x5]] }
 0x177   : > { %s673_s16 = sshll.u32 %s4530_s27, 4  ;;  %s4531_s5 = smov [#allocation2 + $0x5]   ;;  %s674_s16 = int_to_ptr.vmem [resolvable:$true] %s673_s16 }
 0x178   : > { %s688_s7 = sshll.u32 %s4531_s5, 4  ;;  %s5011_s6 = sld [smem:[#allocation7 + $0x6]]  ;;  %s5014_s7 = int_to_ptr.vmem [resolvable:$true] %s688_s7 }
 0x179   : > { %s3231_s3 = sshll.u32 %s5001_s19, 4 }
 0x17a   : > { %s663_s18 = scalar_lea.hbm %s5389_s4, %s3231_s3 }
 0x17b   : > { %s4229_s29 = scalar_lea.hbm %s663_s18, 16  ;;  %p4232_p4 = scmp.lt.u32.totalorder %s663_s18, %s5389_s4 }
 0x17c   : > { %p4230_p6 = scmp.ne.s32.totalorder %s663_s18, %s4229_s29  ;;  %p4233_p7 = scmp.lt.u32.totalorder %s4955_s2, %s4229_s29 }
 0x17d   : > { %p4235_p0 = scmp.lt.u32.totalorder %s4229_s29, %s663_s18 }
 0x17e   : > { %p4234_p9 = por %p4233_p7, %p4232_p4 }
 0x180   : > { %p4236_p1 = por %p4235_p0, %p4234_p9 }
 0x182   : > { %p4237_p3 = pnand %p4236_p1, %p4230_p6 }
 0x184   : > { %4240 = shalt.err (!%p4237_p3)  }
 0x185   : > { %s4241_s26 = scalar_lea.vmem %s674_s16, 16  ;;  %p4246_p13 = scmp.lt.s32.totalorder %s674_s16, %s4938_s23 }
 0x186   : > { %p4242_p8 = scmp.ne.s32.totalorder %s674_s16, %s4241_s26  ;;  %p4247_p11 = scmp.lt.s32.totalorder %s4964_s20, %s4241_s26 }
 0x188   : > { %p4248_p10 = por %p4247_p11, %p4246_p13 }
 0x18a   : > { %p4249_p2 = pnand %p4248_p10, %p4242_p8 }
 0x18c   : > { %4252 = shalt.err (!%p4249_p2)  }
 0x18d   : > { %676 = dma.hbm_to_vmem [thread:$0]  %s663_s18, 16, %s674_s16, [#allocation3 + $0x4] }
 0x18e   : > { %s3232_s19 = sshll.u32 %s5009_s1, 4  ;;  %s4532_s14 = smov [#allocation2 + $0x6]  }
 0x18f   : > { %s703_s27 = sshll.u32 %s4532_s14, 4  ;;  %s678_s28 = scalar_lea.hbm %s5389_s4, %s3232_s19  ;;  %s5029_s27 = int_to_ptr.vmem [resolvable:$true] %s703_s27 }
 0x190   : > { %s4253_s10 = scalar_lea.hbm %s678_s28, 16  ;;  %p4256_p12 = scmp.lt.u32.totalorder %s678_s28, %s5389_s4 }
 0x191   : > { %p4254_p5 = scmp.ne.s32.totalorder %s678_s28, %s4253_s10  ;;  %p4257_p6 = scmp.lt.u32.totalorder %s4955_s2, %s4253_s10 }
 0x192   : > { %p4259_p7 = scmp.lt.u32.totalorder %s4253_s10, %s678_s28 }
 0x193   : > { %p4258_p4 = por %p4257_p6, %p4256_p12 }
 0x195   : > { %p4260_p9 = por %p4259_p7, %p4258_p4 }
 0x197   : > { %p4261_p0 = pnand %p4260_p9, %p4254_p5 }
 0x199   : > { %4264 = shalt.err (!%p4261_p0)  }
 0x19a   : > { %s4265_s16 = scalar_lea.vmem %s5014_s7, 16  ;;  %p4270_p3 = scmp.lt.s32.totalorder %s5014_s7, %s4938_s23 }
 0x19b   : > { %p4266_p1 = scmp.ne.s32.totalorder %s5014_s7, %s4265_s16  ;;  %p4271_p8 = scmp.lt.s32.totalorder %s4964_s20, %s4265_s16 }
 0x19d   : > { %p4272_p13 = por %p4271_p8, %p4270_p3 }
 0x19f   : > { %p4273_p11 = pnand %p4272_p13, %p4266_p1 }
 0x1a1   : > { %4276 = shalt.err (!%p4273_p11)  }
 0x1a2   : > { %691 = dma.hbm_to_vmem [thread:$0]  %s678_s28, 16, %s5014_s7, [#allocation3 + $0x5] }
 0x1a3   : > { %s3233_s1 = sshll.u32 %s5011_s6, 4  ;;  %s3226_s18 = sld [smem:[#allocation7 + $0x7]] }
 0x1a4   : > { %s693_s19 = scalar_lea.hbm %s5389_s4, %s3233_s1 }
 0x1a5   : > { %s4277_s14 = scalar_lea.hbm %s693_s19, 16  ;;  %p4280_p2 = scmp.lt.u32.totalorder %s693_s19, %s5389_s4 }
 0x1a6   : > { %p4278_p10 = scmp.ne.s32.totalorder %s693_s19, %s4277_s14  ;;  %p4281_p5 = scmp.lt.u32.totalorder %s4955_s2, %s4277_s14 }
 0x1a7   : > { %p4283_p6 = scmp.lt.u32.totalorder %s4277_s14, %s693_s19 }
 0x1a8   : > { %p4282_p12 = por %p4281_p5, %p4280_p2 }
 0x1aa   : > { %p4284_p4 = por %p4283_p6, %p4282_p12 }
 0x1ac   : > { %p4285_p7 = pnand %p4284_p4, %p4278_p10 }
 0x1ae   : > { %4288 = shalt.err (!%p4285_p7)  }
 0x1af   : > { %s4289_s7 = scalar_lea.vmem %s5029_s27, 16  ;;  %p4294_p0 = scmp.lt.s32.totalorder %s5029_s27, %s4938_s23 }
 0x1b0   : > { %p4290_p9 = scmp.ne.s32.totalorder %s5029_s27, %s4289_s7  ;;  %p4295_p1 = scmp.lt.s32.totalorder %s4964_s20, %s4289_s7 }
 0x1b2   : > { %p4296_p3 = por %p4295_p1, %p4294_p0 }
 0x1b4   : > { %p4297_p8 = pnand %p4296_p3, %p4290_p9 }
 0x1b6   : > { %4300 = shalt.err (!%p4297_p8)  }
 0x1b7   : > { %706 = dma.hbm_to_vmem [thread:$0]  %s693_s19, 16, %s5029_s27, [#allocation3 + $0x6] }
 0x1b8   : > { %s4533_s6 = smov [#allocation2 + $0x7]   ;;  %s3234_s10 = sshll.u32 %s3226_s18, 4 }
 0x1b9   : > { %s718_s28 = sshll.u32 %s4533_s6, 4  ;;  %s708_s16 = scalar_lea.hbm %s5389_s4, %s3234_s10  ;;  %s719_s28 = int_to_ptr.vmem [resolvable:$true] %s718_s28 }
 0x1ba   : > { %s4301_s1 = scalar_lea.hbm %s708_s16, 16  ;;  %p4304_p11 = scmp.lt.u32.totalorder %s708_s16, %s5389_s4 }
 0x1bb   : > { %p4302_p13 = scmp.ne.s32.totalorder %s708_s16, %s4301_s1  ;;  %p4305_p10 = scmp.lt.u32.totalorder %s4955_s2, %s4301_s1 }
 0x1bc   : > { %p4307_p5 = scmp.lt.u32.totalorder %s4301_s1, %s708_s16 }
 0x1bd   : > { %p4306_p2 = por %p4305_p10, %p4304_p11 }
 0x1bf   : > { %p4308_p12 = por %p4307_p5, %p4306_p2 }
 0x1c1   : > { %p4309_p6 = pnand %p4308_p12, %p4302_p13 }
 0x1c3   : > { %4312 = shalt.err (!%p4309_p6)  }
 0x1c4   : > { %s4313_s27 = scalar_lea.vmem %s719_s28, 16  ;;  %p4318_p7 = scmp.lt.s32.totalorder %s719_s28, %s4938_s23 }
 0x1c5   : > { %p4314_p4 = scmp.ne.s32.totalorder %s719_s28, %s4313_s27  ;;  %p4319_p9 = scmp.lt.s32.totalorder %s4964_s20, %s4313_s27 }
 0x1c7   : > { %p4320_p0 = por %p4319_p9, %p4318_p7 }
 0x1c9   : > { %p4321_p1 = pnand %p4320_p0, %p4314_p4 }
 0x1cb   : > { %4324 = shalt.err (!%p4321_p1)  }
 0x1cc   : > { %721 = dma.hbm_to_vmem [thread:$0]  %s708_s16, 16, %s719_s28, [#allocation3 + $0x7] }
 0x1cd   : > { %4467 = dma.done.wait [#allocation3], 16 }
 0x1ce   : > { %4468 = vsyncadd [#allocation3], 4294967280 }
 0x1cf   : > { %4469 = dma.done.wait [#allocation3 + $0x1], 16 }
 0x1d0   : > { %4470 = vsyncadd [#allocation3 + $0x1], 4294967280 }
 0x1d1   : > { %4471 = dma.done.wait [#allocation3 + $0x2], 16 }
 0x1d2   : > { %4472 = vsyncadd [#allocation3 + $0x2], 4294967280 }
 0x1d3   : > { %4473 = dma.done.wait [#allocation3 + $0x3], 16 }
 0x1d4   : > { %4474 = vsyncadd [#allocation3 + $0x3], 4294967280 }
 0x1d5   : > { %4475 = dma.done.wait [#allocation3 + $0x4], 16 }
 0x1d6   : > { %4476 = vsyncadd [#allocation3 + $0x4], 4294967280 }
 0x1d7   : > { %4477 = dma.done.wait [#allocation3 + $0x5], 16 }
 0x1d8   : > { %4478 = vsyncadd [#allocation3 + $0x5], 4294967280 }
 0x1d9   : > { %4479 = dma.done.wait [#allocation3 + $0x6], 16 }
 0x1da   : > { %4480 = vsyncadd [#allocation3 + $0x6], 4294967280 }
 0x1db   : > { %4481 = dma.done.wait [#allocation3 + $0x7], 16 }
 0x1dc   : > { %4482 = vsyncadd [#allocation3 + $0x7], 4294967280  ;;  %vm2743_vm0 = vcmask 7168   ;;  %v4534_v0 = vmov 0.0   ;;  %v4535_v1 = vmov -inf   ;;  %v773_v2 = vld [vmem:[#allocation17 + $0x8] sm:$0xff] }
 0x1dd   : > { %900 = vmatprep.mubr.f32.mxu0 %v4534_v0  ;;  %2744 = vst.msk [vmem:[#allocation4] sm:$0xff] %vm2743_vm0, %v4535_v1  ;;  %2745 = vst.msk [vmem:[#allocation5] sm:$0xff] %vm2743_vm0, %v4534_v0  ;;  %971 = vmatprep.mubr.f32.mxu1 %v4534_v0  ;;  %v777_v3 = vld [vmem:[#allocation17 + $0x28] sm:$0xff]  ;;  %v775_v4 = vld [vmem:[#allocation17 + $0x18] sm:$0xff]  ;;  %vm978_vm1 = vcmask 523264   ;;  %s5390_s20 = sld [smem:[#allocation66_spill]] }
 0x1de   : > { %v3430_v5 = vpack.c.bf16 %v777_v3, %v773_v2  ;;  %v779_v6 = vld [vmem:[#allocation17 + $0x38] sm:$0xff]  ;;  %v772_v7 = vld [vmem:[#allocation17] sm:$0xff]  ;;  %v774_v11 = vld [vmem:[#allocation17 + $0x10] sm:$0xff]  ;;  %vm4537_vm2 = vmmov 0   ;;  %s5391_s14 = sld [smem:[#allocation71_spill]]  ;;  %vm2022_vm3 = vcmask 122880  }
 0x1df   : > { %v776_v8 = vld [vmem:[#allocation17 + $0x20] sm:$0xff]  ;;  %v3462_v9 = vpack.c.bf16 %v779_v6, %v775_v4  ;;  %v778_v12 = vld [vmem:[#allocation17 + $0x30] sm:$0xff]  ;;  %v781_v13 = vld [vmem:[#allocation17 + $0x48] sm:$0xff]  ;;  %vm2127_vm4 = vcmask 130048   ;;  %vm2721_vm5 = vcmask 1041409   ;;  %vm2724_vm6 = vcmask 1042434  }
 0x1e0   : > { %v3432_v10 = vpack.c.bf16 %v776_v8, %v772_v7  ;;  %3431 = vmatprep.subr.bf16.mxu0 %v3430_v5  ;;  %v3464_v14 = vpack.c.bf16 %v778_v12, %v774_v11  ;;  %v785_v15 = vld [vmem:[#allocation17 + $0x68] sm:$0xff]  ;;  %v783_v16 = vld [vmem:[#allocation17 + $0x58] sm:$0xff]  ;;  %v780_v20 = vld [vmem:[#allocation17 + $0x40] sm:$0xff]  ;;  %vm2727_vm7 = vcmask 1043459   ;;  %vm2730_vm8 = vcmask 1044484  }
 0x1e1   : > { %v787_v17 = vld [vmem:[#allocation17 + $0x78] sm:$0xff]  ;;  %3463 = vmatprep.subr.bf16.mxu1 %v3462_v9  ;;  %v3434_v18 = vpack.c.bf16 %v785_v15, %v781_v13  ;;  %v784_v21 = vld [vmem:[#allocation17 + $0x60] sm:$0xff]  ;;  %v782_v22 = vld [vmem:[#allocation17 + $0x50] sm:$0xff]  ;;  %vm2733_vm9 = vcmask 1045509   ;;  %vm2736_vm10 = vcmask 1046534   ;;  %vm2739_vm11 = vcmask 1047559  }
 0x1e2   : > { %3433 = vmatpush1.bf16.msra.mxu0 %v3432_v10  ;;  %v3466_v19 = vpack.c.bf16 %v787_v17, %v783_v16  ;;  %3465 = vmatpush1.bf16.msra.mxu1 %v3464_v14  ;;  %v3436_v23 = vpack.c.bf16 %v784_v21, %v780_v20  ;;  %v786_v24 = vld [vmem:[#allocation17 + $0x70] sm:$0xff]  ;;  %v789_v25 = vld [vmem:[#allocation17 + $0x88] sm:$0xff]  ;;  %v791_v29 = vld [vmem:[#allocation17 + $0x98] sm:$0xff] }
 0x1e3   : > { %v793_v26 = vld [vmem:[#allocation17 + $0xa8] sm:$0xff]  ;;  %3435 = vmatprep.subr.bf16.mxu0 %v3434_v18  ;;  %v3468_v27 = vpack.c.bf16 %v786_v24, %v782_v22  ;;  %v795_v30 = vld [vmem:[#allocation17 + $0xb8] sm:$0xff]  ;;  %v788_v31 = vld [vmem:[#allocation17 + $0x80] sm:$0xff] }
 0x1e4   : > { %3467 = vmatprep.subr.bf16.mxu1 %v3466_v19  ;;  %v3438_v28 = vpack.c.bf16 %v793_v26, %v789_v25  ;;  %v3470_v32 = vpack.c.bf16 %v795_v30, %v791_v29  ;;  %v792_v33 = vld [vmem:[#allocation17 + $0xa0] sm:$0xff]  ;;  %v790_v34 = vld [vmem:[#allocation17 + $0x90] sm:$0xff]  ;;  %v797_v37 = vld [vmem:[#allocation17 + $0xc8] sm:$0xff] }
 0x1e5   : > { %v794_v35 = vld [vmem:[#allocation17 + $0xb0] sm:$0xff]  ;;  %v3440_v36 = vpack.c.bf16 %v792_v33, %v788_v31  ;;  %v801_v38 = vld [vmem:[#allocation17 + $0xe8] sm:$0xff]  ;;  %v799_v39 = vld [vmem:[#allocation17 + $0xd8] sm:$0xff] }
 0x1e6   : > { %3437 = vmatpush1.bf16.msra.mxu0 %v3436_v23  ;;  %3469 = vmatpush1.bf16.msra.mxu1 %v3468_v27  ;;  %v3472_v40 = vpack.c.bf16 %v794_v35, %v790_v34  ;;  %v3442_v41 = vpack.c.bf16 %v801_v38, %v797_v37  ;;  %v803_v42 = vld [vmem:[#allocation17 + $0xf8] sm:$0xff]  ;;  %v796_v43 = vld [vmem:[#allocation17 + $0xc0] sm:$0xff]  ;;  %v798_v46 = vld [vmem:[#allocation17 + $0xd0] sm:$0xff] }
 0x1e7   : > { %3439 = vmatprep.subr.bf16.mxu0 %v3438_v28  ;;  %v800_v44 = vld [vmem:[#allocation17 + $0xe0] sm:$0xff]  ;;  %3471 = vmatprep.subr.bf16.mxu1 %v3470_v32  ;;  %v3474_v45 = vpack.c.bf16 %v803_v42, %v799_v39  ;;  %v802_v47 = vld [vmem:[#allocation17 + $0xf0] sm:$0xff]  ;;  %v805_v48 = vld [vmem:[#allocation17 + $0x108] sm:$0xff] }
 0x1e8   : > { %v809_v49 = vld [vmem:[#allocation17 + $0x128] sm:$0xff]  ;;  %v807_v50 = vld [vmem:[#allocation17 + $0x118] sm:$0xff]  ;;  %v3444_v52 = vpack.c.bf16 %v800_v44, %v796_v43  ;;  %v3476_v53 = vpack.c.bf16 %v802_v47, %v798_v46  ;;  %v804_v55 = vld [vmem:[#allocation17 + $0x100] sm:$0xff] }
 0x1e9   : > { %v811_v51 = vld [vmem:[#allocation17 + $0x138] sm:$0xff]  ;;  %v3446_v54 = vpack.c.bf16 %v809_v49, %v805_v48  ;;  %v808_v56 = vld [vmem:[#allocation17 + $0x120] sm:$0xff]  ;;  %v806_v57 = vld [vmem:[#allocation17 + $0x110] sm:$0xff] }
 0x1ea   : > { %3441 = vmatpush1.bf16.msra.mxu0 %v3440_v36  ;;  %3473 = vmatpush1.bf16.msra.mxu1 %v3472_v40  ;;  %v3478_v58 = vpack.c.bf16 %v811_v51, %v807_v50  ;;  %v810_v59 = vld [vmem:[#allocation17 + $0x130] sm:$0xff]  ;;  %v813_v60 = vld [vmem:[#allocation17 + $0x148] sm:$0xff]  ;;  %v815_v62 = vld [vmem:[#allocation17 + $0x158] sm:$0xff]  ;;  %v3448_v1 = vpack.c.bf16 %v808_v56, %v804_v55 }
 0x1eb   : > { %3443 = vmatprep.subr.bf16.mxu0 %v3442_v41  ;;  %3475 = vmatprep.subr.bf16.mxu1 %v3474_v45  ;;  %v817_v61 = vld [vmem:[#allocation17 + $0x168] sm:$0xff]  ;;  %v819_v63 = vld [vmem:[#allocation17 + $0x178] sm:$0xff]  ;;  %v3480_v2 = vpack.c.bf16 %v810_v59, %v806_v57  ;;  %v812_v4 = vld [vmem:[#allocation17 + $0x140] sm:$0xff] }
 0x1ec   : > { %v3450_v3 = vpack.c.bf16 %v817_v61, %v813_v60  ;;  %v816_v5 = vld [vmem:[#allocation17 + $0x160] sm:$0xff]  ;;  %v814_v6 = vld [vmem:[#allocation17 + $0x150] sm:$0xff]  ;;  %v3482_v7 = vpack.c.bf16 %v819_v63, %v815_v62  ;;  %v821_v9 = vld [vmem:[#allocation17 + $0x188] sm:$0xff] }
 0x1ed   : > { %v818_v8 = vld [vmem:[#allocation17 + $0x170] sm:$0xff]  ;;  %v825_v10 = vld [vmem:[#allocation17 + $0x1a8] sm:$0xff]  ;;  %v823_v11 = vld [vmem:[#allocation17 + $0x198] sm:$0xff]  ;;  %v3452_v13 = vpack.c.bf16 %v816_v5, %v812_v4 }
 0x1ee   : > { %3445 = vmatpush1.bf16.msra.mxu0 %v3444_v52  ;;  %3477 = vmatpush1.bf16.msra.mxu1 %v3476_v53  ;;  %v827_v12 = vld [vmem:[#allocation17 + $0x1b8] sm:$0xff]  ;;  %v3484_v14 = vpack.c.bf16 %v818_v8, %v814_v6  ;;  %v3454_v15 = vpack.c.bf16 %v825_v10, %v821_v9  ;;  %v820_v16 = vld [vmem:[#allocation17 + $0x180] sm:$0xff]  ;;  %v822_v18 = vld [vmem:[#allocation17 + $0x190] sm:$0xff] }
 0x1ef   : > { %3447 = vmatprep.subr.bf16.mxu0 %v3446_v54  ;;  %3479 = vmatprep.subr.bf16.mxu1 %v3478_v58  ;;  %v824_v17 = vld [vmem:[#allocation17 + $0x1a0] sm:$0xff]  ;;  %v3486_v19 = vpack.c.bf16 %v827_v12, %v823_v11  ;;  %v826_v20 = vld [vmem:[#allocation17 + $0x1b0] sm:$0xff]  ;;  %v829_v21 = vld [vmem:[#allocation17 + $0x1c8] sm:$0xff] }
 0x1f0   : > { %v833_v22 = vld [vmem:[#allocation17 + $0x1e8] sm:$0xff]  ;;  %v831_v23 = vld [vmem:[#allocation17 + $0x1d8] sm:$0xff]  ;;  %v3456_v25 = vpack.c.bf16 %v824_v17, %v820_v16  ;;  %v3488_v26 = vpack.c.bf16 %v826_v20, %v822_v18  ;;  %v828_v28 = vld [vmem:[#allocation17 + $0x1c0] sm:$0xff] }
 0x1f1   : > { %v835_v24 = vld [vmem:[#allocation17 + $0x1f8] sm:$0xff]  ;;  %v3458_v27 = vpack.c.bf16 %v833_v22, %v829_v21  ;;  %v832_v29 = vld [vmem:[#allocation17 + $0x1e0] sm:$0xff]  ;;  %v830_v30 = vld [vmem:[#allocation17 + $0x1d0] sm:$0xff] }
 0x1f2   : > { %3449 = vmatpush1.bf16.msra.mxu0 %v3448_v1  ;;  %3481 = vmatpush1.bf16.msra.mxu1 %v3480_v2  ;;  %v3490_v31 = vpack.c.bf16 %v835_v24, %v831_v23  ;;  %v834_v32 = vld [vmem:[#allocation17 + $0x1f0] sm:$0xff]  ;;  %v740_v33 = vld [vmem:[#allocation16 + $0x8] sm:$0xff]  ;;  %v742_v35 = vld [vmem:[#allocation16 + $0x18] sm:$0xff]  ;;  %v3460_v37 = vpack.c.bf16 %v832_v29, %v828_v28 }
 0x1f3   : > { %3451 = vmatprep.subr.bf16.mxu0 %v3450_v3  ;;  %3483 = vmatprep.subr.bf16.mxu1 %v3482_v7  ;;  %v744_v34 = vld [vmem:[#allocation16 + $0x28] sm:$0xff]  ;;  %v746_v36 = vld [vmem:[#allocation16 + $0x38] sm:$0xff]  ;;  %v3492_v38 = vpack.c.bf16 %v834_v32, %v830_v30  ;;  %v739_v40 = vld [vmem:[#allocation16] sm:$0xff] }
 0x1f4   : > { %v3494_v39 = vpack.c.bf16 %v744_v34, %v740_v33  ;;  %v743_v41 = vld [vmem:[#allocation16 + $0x20] sm:$0xff]  ;;  %v741_v42 = vld [vmem:[#allocation16 + $0x10] sm:$0xff]  ;;  %v3510_v43 = vpack.c.bf16 %v746_v36, %v742_v35  ;;  %v748_v45 = vld [vmem:[#allocation16 + $0x48] sm:$0xff] }
 0x1f5   : > { %v745_v44 = vld [vmem:[#allocation16 + $0x30] sm:$0xff]  ;;  %v752_v46 = vld [vmem:[#allocation16 + $0x68] sm:$0xff]  ;;  %v750_v47 = vld [vmem:[#allocation16 + $0x58] sm:$0xff]  ;;  %v3496_v50 = vpack.c.bf16 %v743_v41, %v739_v40 }
 0x1f6   : > { %3453 = vmatpush1.bf16.msra.mxu0 %v3452_v13  ;;  %3485 = vmatpush1.bf16.msra.mxu1 %v3484_v14  ;;  %v754_v48 = vld [vmem:[#allocation16 + $0x78] sm:$0xff]  ;;  %v771_v49 = vld [vmem:[#allocation8] sm:$0xff]  ;;  %v3512_v51 = vpack.c.bf16 %v745_v44, %v741_v42  ;;  %v3498_v52 = vpack.c.bf16 %v752_v46, %v748_v45  ;;  %v747_v53 = vld [vmem:[#allocation16 + $0x40] sm:$0xff] }
 0x1f7   : > { %3455 = vmatprep.subr.bf16.mxu0 %v3454_v15  ;;  %3487 = vmatprep.subr.bf16.mxu1 %v3486_v19  ;;  %v751_v54 = vld [vmem:[#allocation16 + $0x60] sm:$0xff]  ;;  %v749_v55 = vld [vmem:[#allocation16 + $0x50] sm:$0xff]  ;;  %v3514_v56 = vpack.c.bf16 %v754_v48, %v750_v47  ;;  %v756_v58 = vld [vmem:[#allocation16 + $0x88] sm:$0xff] }
 0x1f8   : > { %v753_v57 = vld [vmem:[#allocation16 + $0x70] sm:$0xff]  ;;  %v760_v59 = vld [vmem:[#allocation16 + $0xa8] sm:$0xff]  ;;  %v758_v60 = vld [vmem:[#allocation16 + $0x98] sm:$0xff]  ;;  %v3500_v62 = vpack.c.bf16 %v751_v54, %v747_v53 }
 0x1f9   : > { %v762_v61 = vld [vmem:[#allocation16 + $0xb8] sm:$0xff]  ;;  %v3516_v63 = vpack.c.bf16 %v753_v57, %v749_v55  ;;  %v3502_v1 = vpack.c.bf16 %v760_v59, %v756_v58  ;;  %v755_v2 = vld [vmem:[#allocation16 + $0x80] sm:$0xff]  ;;  %v757_v4 = vld [vmem:[#allocation16 + $0x90] sm:$0xff] }
 0x1fa   : > { %3457 = vmatpush1.bf16.msra.mxu0 %v3456_v25  ;;  %3489 = vmatpush1.bf16.msra.mxu1 %v3488_v26  ;;  %v759_v3 = vld [vmem:[#allocation16 + $0xa0] sm:$0xff]  ;;  %v3518_v5 = vpack.c.bf16 %v762_v61, %v758_v60  ;;  %v761_v6 = vld [vmem:[#allocation16 + $0xb0] sm:$0xff]  ;;  %v764_v7 = vld [vmem:[#allocation16 + $0xc8] sm:$0xff] }
 0x1fb   : > { %3459 = vmatprep.subr.bf16.mxu0 %v3458_v27  ;;  %3491 = vmatprep.subr.bf16.mxu1 %v3490_v31  ;;  %v768_v8 = vld [vmem:[#allocation16 + $0xe8] sm:$0xff]  ;;  %v766_v9 = vld [vmem:[#allocation16 + $0xd8] sm:$0xff]  ;;  %v3504_v11 = vpack.c.bf16 %v759_v3, %v755_v2  ;;  %v3520_v12 = vpack.c.bf16 %v761_v6, %v757_v4  ;;  %v763_v14 = vld [vmem:[#allocation16 + $0xc0] sm:$0xff] }
 0x1fc   : > { %v770_v10 = vld [vmem:[#allocation16 + $0xf8] sm:$0xff]  ;;  %v3506_v13 = vpack.c.bf16 %v768_v8, %v764_v7  ;;  %v767_v15 = vld [vmem:[#allocation16 + $0xe0] sm:$0xff]  ;;  %v765_v16 = vld [vmem:[#allocation16 + $0xd0] sm:$0xff] }
 0x1fd   : > { %v3522_v17 = vpack.c.bf16 %v770_v10, %v766_v9  ;;  %v769_v18 = vld [vmem:[#allocation16 + $0xf0] sm:$0xff]  ;;  %v1126_v19 = vld [vmem:[#allocation19 + $0x8] sm:$0xff]  ;;  %v1128_v21 = vld [vmem:[#allocation19 + $0x18] sm:$0xff]  ;;  %v3508_v23 = vpack.c.bf16 %v767_v15, %v763_v14 }
 0x1fe   : > { %3461 = vmatpush1.bf16.msra.mxu0 %v3460_v37  ;;  %3493 = vmatpush1.bf16.msra.mxu1 %v3492_v38  ;;  %v1130_v20 = vld [vmem:[#allocation19 + $0x28] sm:$0xff]  ;;  %v1132_v22 = vld [vmem:[#allocation19 + $0x38] sm:$0xff]  ;;  %v3524_v24 = vpack.c.bf16 %v769_v18, %v765_v16  ;;  %v1125_v26 = vld [vmem:[#allocation19] sm:$0xff] }
 0x1ff   : > { %3495 = vmatprep.subr.bf16.mxu0 %v3494_v39  ;;  %3511 = vmatprep.subr.bf16.mxu1 %v3510_v43  ;;  %v3526_v25 = vpack.c.bf16 %v1130_v20, %v1126_v19  ;;  %v1129_v27 = vld [vmem:[#allocation19 + $0x20] sm:$0xff]  ;;  %v1127_v28 = vld [vmem:[#allocation19 + $0x10] sm:$0xff]  ;;  %v3558_v29 = vpack.c.bf16 %v1132_v22, %v1128_v21  ;;  %v1134_v31 = vld [vmem:[#allocation19 + $0x48] sm:$0xff] }
 0x200   : > { %v1131_v30 = vld [vmem:[#allocation19 + $0x30] sm:$0xff]  ;;  %v1138_v32 = vld [vmem:[#allocation19 + $0x68] sm:$0xff]  ;;  %v1136_v33 = vld [vmem:[#allocation19 + $0x58] sm:$0xff]  ;;  %v3528_v36 = vpack.c.bf16 %v1129_v27, %v1125_v26 }
 0x201   : > { %901 = vmatmul.mubr.f32.vlgmr.msra.gmra.mrb[0].mxu0 %v771_v49  ;;  %972 = vmatmul.mubr.f32.vlgmr.msra.gmra.mrb[0].mxu1 %v771_v49  ;;  %v1140_v34 = vld [vmem:[#allocation19 + $0x78] sm:$0xff]  ;;  %v3560_v37 = vpack.c.bf16 %v1131_v30, %v1127_v28  ;;  %v3530_v38 = vpack.c.bf16 %v1138_v32, %v1134_v31  ;;  %v1133_v39 = vld [vmem:[#allocation19 + $0x40] sm:$0xff]  ;;  %v1135_v41 = vld [vmem:[#allocation19 + $0x50] sm:$0xff] }
 0x202   : > { %3497 = vmatpush1.bf16.msra.mxu0 %v3496_v50  ;;  %3513 = vmatpush1.bf16.msra.mxu1 %v3512_v51  ;;  %v738_v35 = vld [vmem:[#allocation2] sm:$0xff]  ;;  %v1137_v40 = vld [vmem:[#allocation19 + $0x60] sm:$0xff]  ;;  %v3562_v42 = vpack.c.bf16 %v1140_v34, %v1136_v33  ;;  %v1139_v43 = vld [vmem:[#allocation19 + $0x70] sm:$0xff] }
 0x203   : > { %3499 = vmatprep.subr.bf16.mxu0 %v3498_v52  ;;  %3515 = vmatprep.subr.bf16.mxu1 %v3514_v56  ;;  %v1142_v44 = vld [vmem:[#allocation19 + $0x88] sm:$0xff]  ;;  %v1144_v46 = vld [vmem:[#allocation19 + $0x98] sm:$0xff]  ;;  %v3532_v48 = vpack.c.bf16 %v1137_v40, %v1133_v39  ;;  %v3564_v49 = vpack.c.bf16 %v1139_v43, %v1135_v41  ;;  %v1141_v51 = vld [vmem:[#allocation19 + $0x80] sm:$0xff] }
 0x204   : > { %1046 = vmatprep.mubr.f32.mxu0 %v4534_v0  ;;  %1117 = vmatprep.mubr.f32.mxu1 %v4534_v0  ;;  %v1146_v45 = vld [vmem:[#allocation19 + $0xa8] sm:$0xff]  ;;  %v1148_v47 = vld [vmem:[#allocation19 + $0xb8] sm:$0xff]  ;;  %v1145_v52 = vld [vmem:[#allocation19 + $0xa0] sm:$0xff] }
 0x205   : > { %v3534_v50 = vpack.c.bf16 %v1146_v45, %v1142_v44  ;;  %v1143_v53 = vld [vmem:[#allocation19 + $0x90] sm:$0xff]  ;;  %v3566_v54 = vpack.c.bf16 %v1148_v47, %v1144_v46  ;;  %v1150_v56 = vld [vmem:[#allocation19 + $0xc8] sm:$0xff]  ;;  %v1152_v58 = vld [vmem:[#allocation19 + $0xd8] sm:$0xff]  ;;  %v3536_v60 = vpack.c.bf16 %v1145_v52, %v1141_v51 }
 0x206   : > { %3501 = vmatpush1.bf16.msra.mxu0 %v3500_v62  ;;  %3517 = vmatpush1.bf16.msra.mxu1 %v3516_v63  ;;  %v1147_v55 = vld [vmem:[#allocation19 + $0xb0] sm:$0xff]  ;;  %v1154_v57 = vld [vmem:[#allocation19 + $0xe8] sm:$0xff]  ;;  %v1156_v59 = vld [vmem:[#allocation19 + $0xf8] sm:$0xff] }
 0x207   : > { %3503 = vmatprep.subr.bf16.mxu0 %v3502_v1  ;;  %3519 = vmatprep.subr.bf16.mxu1 %v3518_v5  ;;  %v3568_v61 = vpack.c.bf16 %v1147_v55, %v1143_v53  ;;  %v3538_v62 = vpack.c.bf16 %v1154_v57, %v1150_v56  ;;  %v1149_v63 = vld [vmem:[#allocation19 + $0xc0] sm:$0xff]  ;;  %v1151_v2 = vld [vmem:[#allocation19 + $0xd0] sm:$0xff]  ;;  %v3570_v3 = vpack.c.bf16 %v1156_v59, %v1152_v58  ;;  %v1158_v5 = vld [vmem:[#allocation19 + $0x108] sm:$0xff]  ;;  %v4536_v59 = vmov 0.0|0.0  }
 0x208   : > { %v1153_v1 = vld [vmem:[#allocation19 + $0xe0] sm:$0xff]  ;;  %v1155_v4 = vld [vmem:[#allocation19 + $0xf0] sm:$0xff]  ;;  %v1162_v6 = vld [vmem:[#allocation19 + $0x128] sm:$0xff] }
 0x209   : > { %v1160_v7 = vld [vmem:[#allocation19 + $0x118] sm:$0xff]  ;;  %v3540_v9 = vpack.c.bf16 %v1153_v1, %v1149_v63  ;;  %v3572_v10 = vpack.c.bf16 %v1155_v4, %v1151_v2  ;;  %v1159_v14 = vld [vmem:[#allocation19 + $0x110] sm:$0xff]  ;;  %v1170_v18 = vld [vmem:[#allocation19 + $0x168] sm:$0xff]  ;;  %v1337_v63 = vlaneseq }
 0x20a   : > { %3505 = vmatpush1.bf16.msra.mxu0 %v3504_v11  ;;  %3521 = vmatpush1.bf16.msra.mxu1 %v3520_v12  ;;  %v1164_v8 = vld [vmem:[#allocation19 + $0x138] sm:$0xff]  ;;  %v3542_v11 = vpack.c.bf16 %v1162_v6, %v1158_v5  ;;  %v1157_v12 = vld [vmem:[#allocation19 + $0x100] sm:$0xff]  ;;  %v1163_v16 = vld [vmem:[#allocation19 + $0x130] sm:$0xff] }
 0x20b   : > { %3507 = vmatprep.subr.bf16.mxu0 %v3506_v13  ;;  %3523 = vmatprep.subr.bf16.mxu1 %v3522_v17  ;;  %v1161_v13 = vld [vmem:[#allocation19 + $0x120] sm:$0xff]  ;;  %v3574_v15 = vpack.c.bf16 %v1164_v8, %v1160_v7  ;;  %v1166_v17 = vld [vmem:[#allocation19 + $0x148] sm:$0xff]  ;;  %v1168_v19 = vld [vmem:[#allocation19 + $0x158] sm:$0xff]  ;;  %v3576_v22 = vpack.c.bf16 %v1163_v16, %v1159_v14  ;;  %v1338_v1 = vshrl.u32 %v1337_v63, 7 }
 0x20c   : > { %v1172_v20 = vld [vmem:[#allocation19 + $0x178] sm:$0xff]  ;;  %v3544_v21 = vpack.c.bf16 %v1161_v13, %v1157_v12  ;;  %v1167_v26 = vld [vmem:[#allocation19 + $0x150] sm:$0xff]  ;;  %v1178_v30 = vld [vmem:[#allocation19 + $0x1a8] sm:$0xff] }
 0x20d   : > { %v3578_v27 = vpack.c.bf16 %v1172_v20, %v1168_v19  ;;  %v1171_v28 = vld [vmem:[#allocation19 + $0x170] sm:$0xff]  ;;  %v1176_v31 = vld [vmem:[#allocation19 + $0x198] sm:$0xff]  ;;  %v1182_v41 = vld [vmem:[#allocation19 + $0x1c8] sm:$0xff]  ;;  %v1339_v2 = vsub.s32 0, %v1338_v1  ;;  %v1343_v4 = vsub.s32 1, %v1338_v1  ;;  %v1351_v8 = vsub.s32 3, %v1338_v1 }
 0x20e   : > { %3509 = vmatpush1.bf16.msra.mxu0 %v3508_v23  ;;  %3525 = vmatpush1.bf16.msra.mxu1 %v3524_v24  ;;  %v3546_v23 = vpack.c.bf16 %v1170_v18, %v1166_v17  ;;  %v1165_v24 = vld [vmem:[#allocation19 + $0x140] sm:$0xff]  ;;  %v1180_v32 = vld [vmem:[#allocation19 + $0x1b8] sm:$0xff]  ;;  %v3580_v34 = vpack.c.bf16 %v1171_v28, %v1167_v26  ;;  %v1179_v40 = vld [vmem:[#allocation19 + $0x1b0] sm:$0xff]  ;;  %v1347_v17 = vsub.s32 2, %v1338_v1 }
 0x20f   : > { %3527 = vmatprep.subr.bf16.mxu0 %v3526_v25  ;;  %3559 = vmatprep.subr.bf16.mxu1 %v3558_v29  ;;  %v1169_v25 = vld [vmem:[#allocation19 + $0x160] sm:$0xff]  ;;  %v1174_v29 = vld [vmem:[#allocation19 + $0x188] sm:$0xff]  ;;  %v3582_v39 = vpack.c.bf16 %v1180_v32, %v1176_v31  ;;  %v1184_v43 = vld [vmem:[#allocation19 + $0x1d8] sm:$0xff] }
 0x210   : > { %v3548_v33 = vpack.c.bf16 %v1169_v25, %v1165_v24  ;;  %v1188_v44 = vld [vmem:[#allocation19 + $0x1f8] sm:$0xff]  ;;  %v1183_v51 = vld [vmem:[#allocation19 + $0x1d0] sm:$0xff]  ;;  %v1124_v55 = vld [vmem:[%s5390_s20] sm:$0xff] }
 0x211   : > { %3235 = vmatmul.mubr.msk.f32.vlgmr.msra.gmra.mrb[0].mxu0 %vm978_vm1, %v738_v35  ;;  %3236 = vmatmul.mubr.msk.f32.vlgmr.msra.gmra.mrb[0].mxu1 %vm978_vm1, %v738_v35  ;;  %v3550_v35 = vpack.c.bf16 %v1178_v30, %v1174_v29  ;;  %v1187_v52 = vld [vmem:[#allocation19 + $0x1f0] sm:$0xff]  ;;  %v1446_v56 = vld [vmem:[#allocation13] sm:$0xff]  ;;  %v1447_v57 = vld [vmem:[#allocation13 + $0x8] sm:$0xff] }
 0x212   : > { %3529 = vmatpush1.bf16.msra.mxu0 %v3528_v36  ;;  %3561 = vmatpush1.bf16.msra.mxu1 %v3560_v37  ;;  %v1173_v36 = vld [vmem:[#allocation19 + $0x180] sm:$0xff]  ;;  %v1448_v58 = vld [vmem:[#allocation13 + $0x10] sm:$0xff]  ;;  %v1380_v28 = vld [vmem:[#allocation11] sm:$0xff] }
 0x213   : > { %3531 = vmatprep.subr.bf16.mxu0 %v3530_v38  ;;  %3563 = vmatprep.subr.bf16.mxu1 %v3562_v42  ;;  %v1177_v37 = vld [vmem:[#allocation19 + $0x1a0] sm:$0xff]  ;;  %v1175_v38 = vld [vmem:[#allocation19 + $0x190] sm:$0xff]  ;;  %v1186_v42 = vld [vmem:[#allocation19 + $0x1e8] sm:$0xff] }
 0x214   : > { %1253 = vmatprep.mubr.f32.mxu0 %v4534_v0  ;;  %1324 = vmatprep.mubr.f32.mxu1 %v4534_v0  ;;  %v3552_v45 = vpack.c.bf16 %v1177_v37, %v1173_v36  ;;  %v3584_v46 = vpack.c.bf16 %v1179_v40, %v1175_v38  ;;  %v3554_v47 = vpack.c.bf16 %v1186_v42, %v1182_v41  ;;  %v1450_v42 = vld [vmem:[#allocation13 + $0x20] sm:$0xff] }
 0x215   : > { %v1458_v63 = vld [vmem:[#allocation13 + $0x60] sm:$0xff] }
 0x216   : > { %3533 = vmatpush1.bf16.msra.mxu0 %v3532_v48  ;;  %3565 = vmatpush1.bf16.msra.mxu1 %v3564_v49  ;;  %v1181_v48 = vld [vmem:[#allocation19 + $0x1c0] sm:$0xff] }
 0x217   : > { %3535 = vmatprep.subr.bf16.mxu0 %v3534_v50  ;;  %3567 = vmatprep.subr.bf16.mxu1 %v3566_v54  ;;  %v1185_v49 = vld [vmem:[#allocation19 + $0x1e0] sm:$0xff]  ;;  %v3586_v50 = vpack.c.bf16 %v1188_v44, %v1184_v43  ;;  %v3588_v54 = vpack.c.bf16 %v1187_v52, %v1183_v51  ;;  %v1451_v43 = vld [vmem:[#allocation13 + $0x28] sm:$0xff] }
 0x218   : > { %v3556_v53 = vpack.c.bf16 %v1185_v49, %v1181_v48  ;;  %v1454_v52 = vld [vmem:[#allocation13 + $0x40] sm:$0xff] }
 0x21a   : > { %3537 = vmatpush1.bf16.msra.mxu0 %v3536_v60  ;;  %3569 = vmatpush1.bf16.msra.mxu1 %v3568_v61  ;;  %v3591_v60 = vpack.c.bf16 %v1447_v57, %v1446_v56  ;;  %v1449_v61 = vld [vmem:[#allocation13 + $0x18] sm:$0xff] }
 0x21b   : > { %3539 = vmatprep.subr.bf16.mxu0 %v3538_v62  ;;  %3571 = vmatprep.subr.bf16.mxu1 %v3570_v3  ;;  %v3594_v62 = vpack.c.bf16 %v1449_v61, %v1448_v58  ;;  %v1335_v3 = vld [vmem:[%s5391_s14] sm:$0xf] }
 0x21c   : > { %v1340_v5 = vrot.slane %v1335_v3, %v1339_v2  ;;  %v1344_v6 = vrot.slane %v1335_v3, %v1343_v4  ;;  %v1352_v16 = vrot.slane %v1335_v3, %v1351_v8  ;;  %v1348_v19 = vrot.slane %v1335_v3, %v1347_v17  ;;  %v1460_v3 = vld [vmem:[#allocation13 + $0x70] sm:$0xff]  ;;  %v1461_v4 = vld [vmem:[#allocation13 + $0x78] sm:$0xff] }
 0x21e   : > { %3541 = vmatpush1.bf16.msra.mxu0 %v3540_v9  ;;  %3573 = vmatpush1.bf16.msra.mxu1 %v3572_v10 }
 0x21f   : > { %3543 = vmatprep.subr.bf16.mxu0 %v3542_v11  ;;  %3575 = vmatprep.subr.bf16.mxu1 %v3574_v15 }
 0x222   : > { %3545 = vmatpush1.bf16.msra.mxu0 %v3544_v21  ;;  %3577 = vmatpush1.bf16.msra.mxu1 %v3576_v22 }
 0x223   : > { %3547 = vmatprep.subr.bf16.mxu0 %v3546_v23  ;;  %3579 = vmatprep.subr.bf16.mxu1 %v3578_v27 }
 0x226   : > { %3549 = vmatpush1.bf16.msra.mxu0 %v3548_v33  ;;  %3581 = vmatpush1.bf16.msra.mxu1 %v3580_v34 }
 0x227   : > { %3551 = vmatprep.subr.bf16.mxu0 %v3550_v35  ;;  %3583 = vmatprep.subr.bf16.mxu1 %v3582_v39  ;;  %v4538_v35 = vmov 1966171168  }
 0x228   : > { %v1391_v36 = vunpack.c.l.s4 %v4538_v35 }
 0x22a   : > { %3553 = vmatpush1.bf16.msra.mxu0 %v3552_v45  ;;  %3585 = vmatpush1.bf16.msra.mxu1 %v3584_v46  ;;  %v1392_v37 = vunpack.c.0.s8 %v1391_v36  ;;  %v1452_v45 = vld [vmem:[#allocation13 + $0x30] sm:$0xff]  ;;  %v1453_v46 = vld [vmem:[#allocation13 + $0x38] sm:$0xff] }
 0x22b   : > { %3555 = vmatprep.subr.bf16.mxu0 %v3554_v47  ;;  %3587 = vmatprep.subr.bf16.mxu1 %v3586_v50  ;;  %v3597_v47 = vpack.c.bf16 %v1451_v43, %v1450_v42  ;;  %v3600_v50 = vpack.c.bf16 %v1453_v46, %v1452_v45 }
 0x22c   : > { %v1395_v39 = vsub.s32 %v1392_v37, %v1338_v1  ;;  %v1459_v1 = vld [vmem:[#allocation13 + $0x68] sm:$0xff] }
 0x22e   : > { %3557 = vmatpush1.bf16.msra.mxu0 %v3556_v53  ;;  %3589 = vmatpush1.bf16.msra.mxu1 %v3588_v54  ;;  %v1455_v53 = vld [vmem:[#allocation13 + $0x48] sm:$0xff]  ;;  %v1456_v54 = vld [vmem:[#allocation13 + $0x50] sm:$0xff] }
 0x22f   : > { %3590 = vmatprep.subr.bf16.mxu0 %v4536_v59  ;;  %3593 = vmatprep.subr.bf16.mxu1 %v4536_v59  ;;  %v3603_v57 = vpack.c.bf16 %v1455_v53, %v1454_v52 }
 0x231   : > { %1254 = vmatmul.mubr.f32.vlgmr.msra.gmra.mrb[0].mxu0 %v1124_v55  ;;  %1325 = vmatmul.mubr.f32.vlgmr.msra.gmra.mrb[0].mxu1 %v1124_v55  ;;  %v1457_v55 = vld [vmem:[#allocation13 + $0x58] sm:$0xff] }
 0x232   : > { %3322 = vmatprep.mubr.msk.f32.mxu0 %vm4537_vm2, %v4534_v0  ;;  %3329 = vmatprep.mubr.msk.f32.mxu1 %vm4537_vm2, %v4534_v0 }
 0x237   : > { %3592 = vmatpush3.bf16.xpose.msra.mxu0 %v3591_v60  ;;  %3595 = vmatpush3.bf16.xpose.msra.mxu1 %v3594_v62  ;;  %v3606_v60 = vpack.c.bf16 %v1457_v55, %v1456_v54 }
 0x238   : > { %3596 = vmatprep.subr.bf16.mxu0 %v4536_v59  ;;  %3599 = vmatprep.subr.bf16.mxu1 %v4536_v59 }
 0x304   : > { %v1255_v7 = vpop.f32.mrb[0].mxu0  ;;  %v1326_v10 = vpop.f32.mrb[0].mxu1 }
 0x305   : > { %v1357_v9 = vadd.f32 %v1340_v5, %v1255_v7  ;;  %v1257_v11 = vpop.f32.mrb[1].mxu0  ;;  %v1328_v13 = vpop.f32.mrb[1].mxu1  ;;  %v1359_v21 = vadd.f32 %v1348_v19, %v1326_v10  ;;  %v3609_v5 = vpack.c.bf16 %v1459_v1, %v1458_v63  ;;  %v3612_v7 = vpack.c.bf16 %v1461_v4, %v1460_v3 }
 0x306   : > { %v1358_v12 = vadd.f32 %v1344_v6, %v1257_v11  ;;  %v1360_v18 = vadd.f32 %v1352_v16, %v1328_v13 }
 0x307   : > { %v3237_v14 = vmul.f32 -1.442695, %v1357_v9 }
 0x308   : > { %v3238_v15 = vmul.f32 -1.442695, %v1358_v12  ;;  %v3239_v20 = vmul.f32 -1.442695, %v1360_v18 }
 0x309   : > { %3839 = vpow2.f32 %v3237_v14 }
 0x30a   : > { %3841 = vpow2.f32 %v3238_v15 }
 0x30b   : > { %3843 = vpow2.f32 %v3239_v20 }
 0x30c   : > { %3845 = vtanh.f32 %v1359_v21 }
 0x313   : > { %v3840_v22 = vpop.eup %3839 }
 0x314   : > { %v3842_v23 = vpop.eup %3841  ;;  %v1364_v24 = vadd.f32 1.0, %v3840_v22 }
 0x315   : > { %v1370_v25 = vadd.f32 1.0, %v3842_v23  ;;  %v3844_v26 = vpop.eup %3843 }
 0x316   : > { %3847 = vrcp.f32 %v1364_v24  ;;  %v3846_v27 = vpop.eup %3845  ;;  %v1377_v32 = vadd.f32 1.0, %v3844_v26 }
 0x317   : > { %3849 = vrcp.f32 %v1370_v25 }
 0x318   : > { %3851 = vrcp.f32 %v1377_v32 }
 0x320   : > { %v3848_v29 = vpop.eup %3847 }
 0x321   : > { %v3850_v30 = vpop.eup %3849  ;;  %v1382_v31 = vmul.f32 %v3848_v29, %v3846_v27 }
 0x322   : > { %v1381_v33 = vmul.f32 %v3850_v30, %v1380_v28  ;;  %v3852_v38 = vpop.eup %3851 }
 0x324   : > { %v1383_v34 = vadd.f32 %v1382_v31, %v1381_v33 }
 0x326   : > { %3853 = vtanh.f32 %v1383_v34  ;;  %1387 = vst [vmem:[#allocation25] sm:$0xff] %v1383_v34 }
 0x330   : > { %v3854_v40 = vpop.eup %3853 }
 0x331   : > { %v1385_v41 = vmul.f32 %v3854_v40, %v3852_v38 }
 0x333   : > { %1386 = vst [vmem:[#allocation23] sm:$0xff] %v1385_v41  ;;  %v1396_v44 = vrot.slane %v1385_v41, %v1395_v39  ;;  %v1389_v56 = vcombine.high %v1385_v41, %v1385_v41 }
 0x335   : > { %v1412_v48 = vrot.slane %v1396_v44, %v1395_v39  ;;  %v1404_v49 = vcombine.high %v1396_v44, %v1396_v44  ;;  %v1403_v62 = vrot.slane %v1389_v56, %v1395_v39 }
 0x337   : > { %3323 = vmatmul.mubr.f32.vlgmr.msra.gmra.mrb[2].mxu0 %v1412_v48  ;;  %v1426_v51 = vrot.slane %v1404_v49, %v1395_v39  ;;  %v1434_v58 = vcombine.high %v1412_v48, %v1412_v48  ;;  %v1405_v2 = vcombine.high %v1403_v62, %v1403_v62  ;;  %v1419_v6 = vrot.slane %v1403_v62, %v1395_v39 }
 0x338   : > { %3598 = vmatpush3.bf16.xpose.msra.mxu0 %v3597_v47  ;;  %3336 = vmatprep.mubr.msk.f32.mxu0 %vm4537_vm2, %v4534_v0 }
 0x339   : > { %3330 = vmatmul.mubr.f32.vlgmr.msra.gmra.mrb[2].mxu1 %v1426_v51  ;;  %3602 = vmatprep.subr.bf16.mxu0 %v4536_v59  ;;  %v1436_v61 = vcombine.high %v1426_v51, %v1426_v51  ;;  %v1433_v8 = vrot.slane %v1405_v2, %v1395_v39  ;;  %v1435_v9 = vcombine.high %v1419_v6, %v1419_v6 }
 0x33a   : > { %3601 = vmatpush3.bf16.xpose.msra.mxu1 %v3600_v50  ;;  %3343 = vmatprep.mubr.msk.f32.mxu1 %vm4537_vm2, %v4534_v0 }
 0x33b   : > { %3605 = vmatprep.subr.bf16.mxu1 %v4536_v59  ;;  %v1437_v10 = vcombine.high %v1433_v8, %v1433_v8 }
 0x33f   : > { %3337 = vmatmul.mubr.f32.vlgmr.msra.gmra.mrb[4].mxu0 %v1434_v58 }
 0x340   : > { %3604 = vmatpush3.bf16.xpose.msra.mxu0 %v3603_v57  ;;  %3350 = vmatprep.mubr.msk.f32.mxu0 %vm4537_vm2, %v4534_v0 }
 0x341   : > { %3344 = vmatmul.mubr.f32.vlgmr.msra.gmra.mrb[4].mxu1 %v1436_v61  ;;  %3608 = vmatprep.subr.bf16.mxu0 %v4536_v59 }
 0x342   : > { %3607 = vmatpush3.bf16.xpose.msra.mxu1 %v3606_v60  ;;  %3357 = vmatprep.mubr.msk.f32.mxu1 %vm4537_vm2, %v4534_v0 }
 0x343   : > { %3611 = vmatprep.subr.bf16.mxu1 %v4536_v59 }
 0x347   : > { %3351 = vmatmul.mubr.f32.vlgmr.msra.gmra.mrb[6].mxu0 %v1419_v6 }
 0x348   : > { %3610 = vmatpush3.bf16.xpose.msra.mxu0 %v3609_v5  ;;  %3364 = vmatprep.mubr.msk.f32.mxu0 %vm4537_vm2, %v4534_v0 }
 0x349   : > { %3358 = vmatmul.mubr.f32.vlgmr.msra.gmra.mrb[6].mxu1 %v1433_v8  ;;  %3614 = vmatprep.subr.bf16.mxu0 %v4536_v59 }
 0x34a   : > { %3613 = vmatpush3.bf16.xpose.msra.mxu1 %v3612_v7  ;;  %3371 = vmatprep.mubr.msk.f32.mxu1 %vm4537_vm2, %v4534_v0 }
 0x34b   : > { %3617 = vmatprep.subr.bf16.mxu1 %v4536_v59 }
 0x34f   : > { %3365 = vmatmul.mubr.f32.vlgmr.msra.gmra.mrb[8].mxu0 %v1435_v9 }
 0x350   : > { %3378 = vmatprep.mubr.msk.f32.mxu0 %vm4537_vm2, %v4534_v0 }
 0x351   : > { %3372 = vmatmul.mubr.f32.vlgmr.msra.gmra.mrb[8].mxu1 %v1437_v10  ;;  %v2111_v10 = vld [vmem:[#allocation14] sm:$0xff] }
 0x352   : > { %3385 = vmatprep.mubr.msk.f32.mxu1 %vm4537_vm2, %v4534_v0 }
 0x40a   : > { %v1528_v11 = vpop.f32.mrb[2].mxu0 }
 0x40b   : > { %v3324_v12 = vpop.f32.mrb[3].mxu0  ;;  %v2023_v13 = vsel %vm2022_vm3, %v1528_v11, -inf }
 0x40c   : > { %2024 = vmax.xlane.f32.xlu0 %v2023_v13  ;;  %v1598_v14 = vpop.f32.mrb[2].mxu1 }
 0x40d   : > { %v3331_v15 = vpop.f32.mrb[3].mxu1  ;;  %v2026_v16 = vsel %vm2022_vm3, %v1598_v14, -inf }
 0x410   : > { %2027 = vmax.xlane.f32.xlu0 %v2026_v16  ;;  %v2113_v16 = vld [vmem:[#allocation14 + $0x10] sm:$0xff] }
 0x412   : > { %v1668_v17 = vpop.f32.mrb[4].mxu0 }
 0x413   : > { %v3338_v18 = vpop.f32.mrb[5].mxu0  ;;  %v2029_v19 = vsel %vm2022_vm3, %v1668_v17, -inf }
 0x414   : > { %2030 = vmax.xlane.f32.xlu1 %v2029_v19  ;;  %v1738_v20 = vpop.f32.mrb[4].mxu1 }
 0x415   : > { %v3345_v21 = vpop.f32.mrb[5].mxu1  ;;  %v2032_v22 = vsel %vm2022_vm3, %v1738_v20, -inf }
 0x418   : > { %2033 = vmax.xlane.f32.xlu1 %v2032_v22  ;;  %v2115_v22 = vld [vmem:[#allocation14 + $0x20] sm:$0xff] }
 0x41a   : > { %v1808_v23 = vpop.f32.mrb[6].mxu0 }
 0x41b   : > { %v3352_v24 = vpop.f32.mrb[7].mxu0  ;;  %v2035_v25 = vsel %vm2022_vm3, %v1808_v23, -inf }
 0x41c   : > { %2036 = vmax.xlane.f32.xlu0 %v2035_v25  ;;  %v1878_v26 = vpop.f32.mrb[6].mxu1 }
 0x41d   : > { %v3359_v27 = vpop.f32.mrb[7].mxu1  ;;  %v2038_v28 = vsel %vm2022_vm3, %v1878_v26, -inf }
 0x41e   : > { %2039 = vmax.xlane.f32.xlu1 %v2038_v28  ;;  %v2117_v28 = vld [vmem:[#allocation14 + $0x30] sm:$0xff] }
 0x422   : > { %v1948_v29 = vpop.f32.mrb[8].mxu0 }
 0x423   : > { %v3366_v30 = vpop.f32.mrb[9].mxu0  ;;  %v2041_v31 = vsel %vm2022_vm3, %v1948_v29, -inf }
 0x424   : > { %2042 = vmax.xlane.f32.xlu0 %v2041_v31  ;;  %v2018_v32 = vpop.f32.mrb[8].mxu1 }
 0x425   : > { %v3373_v33 = vpop.f32.mrb[9].mxu1  ;;  %v2044_v34 = vsel %vm2022_vm3, %v2018_v32, -inf }
 0x426   : > { %2045 = vmax.xlane.f32.xlu1 %v2044_v34  ;;  %v2119_v34 = vld [vmem:[#allocation14 + $0x40] sm:$0xff] }
 0x499   : > { %v2025_v35 = vpop.xlane.xlu0 %2024 }
 0x49a   : > { %v2047_v36 = vsub.f32 %v1528_v11, %v2025_v35  ;;  %v2112_v11 = vld [vmem:[#allocation14 + $0x8] sm:$0xff] }
 0x49b   : > { %v3615_v13 = vpack.c.bf16 %v2112_v11, %v2111_v10  ;;  %v2120_v35 = vld [vmem:[#allocation14 + $0x48] sm:$0xff] }
 0x49c   : > { %v2055_v37 = vmul.f32 1.442695, %v2047_v36 }
 0x49d   : > { %v2028_v38 = vpop.xlane.xlu0 %2027  ;;  %3616 = vmatpush3.bf16.msra.mxu0 %v3615_v13 }
 0x49e   : > { %3855 = vpow2.f32 %v2055_v37  ;;  %v2048_v39 = vsub.f32 %v1598_v14, %v2028_v38  ;;  %3620 = vmatprep.subr.bf16.mxu0 %v4536_v59  ;;  %v3627_v38 = vpack.c.bf16 %v2120_v35, %v2119_v34 }
 0x4a0   : > { %v2057_v40 = vmul.f32 1.442695, %v2048_v39 }
 0x4a1   : > { %v2031_v41 = vpop.xlane.xlu1 %2030 }
 0x4a2   : > { %3857 = vpow2.f32 %v2057_v40  ;;  %v2049_v42 = vsub.f32 %v1668_v17, %v2031_v41  ;;  %v2114_v17 = vld [vmem:[#allocation14 + $0x18] sm:$0xff]  ;;  %v2121_v40 = vld [vmem:[#allocation14 + $0x50] sm:$0xff] }
 0x4a3   : > { %v3618_v18 = vpack.c.bf16 %v2114_v17, %v2113_v16  ;;  %v2122_v41 = vld [vmem:[#allocation14 + $0x58] sm:$0xff] }
 0x4a4   : > { %v2059_v43 = vmul.f32 1.442695, %v2049_v42 }
 0x4a5   : > { %v2034_v44 = vpop.xlane.xlu1 %2033  ;;  %3619 = vmatpush3.bf16.msra.mxu1 %v3618_v18 }
 0x4a6   : > { %3859 = vpow2.f32 %v2059_v43  ;;  %v2050_v45 = vsub.f32 %v1738_v20, %v2034_v44  ;;  %3623 = vmatprep.subr.bf16.mxu1 %v4536_v59  ;;  %v3630_v43 = vpack.c.bf16 %v2122_v41, %v2121_v40 }
 0x4a8   : > { %v5117_v46 = vpop.eup %3855  ;;  %v2061_v47 = vmul.f32 1.442695, %v2050_v45 }
 0x4a9   : > { %v2037_v48 = vpop.xlane.xlu0 %2036  ;;  %v2071_v49 = vsel %vm2022_vm3, %v5117_v46, 0.0 }
 0x4aa   : > { %3861 = vpow2.f32 %v2061_v47  ;;  %v2051_v50 = vsub.f32 %v1808_v23, %v2037_v48  ;;  %2072 = vadd.xlane.f32.xlu0 %v2071_v49  ;;  %v2116_v23 = vld [vmem:[#allocation14 + $0x28] sm:$0xff]  ;;  %v2125_v49 = vld [vmem:[#allocation14 + $0x70] sm:$0xff] }
 0x4ab   : > { %v2040_v51 = vpop.xlane.xlu1 %2039  ;;  %v3621_v25 = vpack.c.bf16 %v2116_v23, %v2115_v22  ;;  %v2124_v47 = vld [vmem:[#allocation14 + $0x68] sm:$0xff] }
 0x4ac   : > { %v5121_v52 = vpop.eup %3857  ;;  %v2063_v53 = vmul.f32 1.442695, %v2051_v50  ;;  %v2052_v54 = vsub.f32 %v1878_v26, %v2040_v51  ;;  %v2126_v50 = vld [vmem:[#allocation14 + $0x78] sm:$0xff] }
 0x4ad   : > { %v2074_v55 = vsel %vm2022_vm3, %v5121_v52, 0.0 }
 0x4ae   : > { %3863 = vpow2.f32 %v2063_v53  ;;  %v2065_v56 = vmul.f32 1.442695, %v2052_v54  ;;  %2075 = vadd.xlane.f32.xlu1 %v2074_v55  ;;  %v3636_v55 = vpack.c.bf16 %v2126_v50, %v2125_v49 }
 0x4b0   : > { %v5125_v57 = vpop.eup %3859  ;;  %3865 = vpow2.f32 %v2065_v56 }
 0x4b1   : > { %v2043_v58 = vpop.xlane.xlu0 %2042  ;;  %v2077_v60 = vsel %vm2022_vm3, %v5125_v57, 0.0 }
 0x4b2   : > { %v2053_v61 = vsub.f32 %v1948_v29, %v2043_v58  ;;  %2078 = vadd.xlane.f32.xlu0 %v2077_v60  ;;  %v2118_v29 = vld [vmem:[#allocation14 + $0x38] sm:$0xff] }
 0x4b3   : > { %v2046_v62 = vpop.xlane.xlu1 %2045  ;;  %v3624_v31 = vpack.c.bf16 %v2118_v29, %v2117_v28 }
 0x4b4   : > { %v5129_v63 = vpop.eup %3861  ;;  %v2067_v1 = vmul.f32 1.442695, %v2053_v61  ;;  %v2054_v2 = vsub.f32 %v2018_v32, %v2046_v62 }
 0x4b5   : > { %v2080_v3 = vsel %vm2022_vm3, %v5129_v63, 0.0 }
 0x4b6   : > { %3867 = vpow2.f32 %v2067_v1  ;;  %v2069_v4 = vmul.f32 1.442695, %v2054_v2  ;;  %2081 = vadd.xlane.f32.xlu1 %v2080_v3 }
 0x4b8   : > { %v5133_v5 = vpop.eup %3863  ;;  %3869 = vpow2.f32 %v2069_v4 }
 0x4b9   : > { %v2083_v6 = vsel %vm2022_vm3, %v5133_v5, 0.0 }
 0x4ba   : > { %v5137_v7 = vpop.eup %3865  ;;  %2084 = vadd.xlane.f32.xlu0 %v2083_v6 }
 0x4bb   : > { %v2086_v8 = vsel %vm2022_vm3, %v5137_v7, 0.0 }
 0x4bc   : > { %2087 = vadd.xlane.f32.xlu1 %v2086_v8 }
 0x4c0   : > { %v5141_v9 = vpop.eup %3867 }
 0x4c1   : > { %v2089_v12 = vsel %vm2022_vm3, %v5141_v9, 0.0 }
 0x4c2   : > { %v5145_v14 = vpop.eup %3869  ;;  %2090 = vadd.xlane.f32.xlu0 %v2089_v12 }
 0x4c3   : > { %v2092_v15 = vsel %vm2022_vm3, %v5145_v14, 0.0 }
 0x4c4   : > { %2093 = vadd.xlane.f32.xlu1 %v2092_v15 }
 0x537   : > { %v2073_v19 = vpop.xlane.xlu0 %2072 }
 0x538   : > { %3871 = vrcp.f32 %v2073_v19 }
 0x53b   : > { %v2076_v20 = vpop.xlane.xlu1 %2075 }
 0x53c   : > { %3873 = vrcp.f32 %v2076_v20 }
 0x53f   : > { %v2079_v21 = vpop.xlane.xlu0 %2078 }
 0x540   : > { %3875 = vrcp.f32 %v2079_v21 }
 0x542   : > { %v3872_v24 = vpop.eup %3871 }
 0x543   : > { %v2096_v26 = vmul.f32 %v3872_v24, %v5117_v46  ;;  %v2082_v27 = vpop.xlane.xlu1 %2081  ;;  %v2123_v46 = vld [vmem:[#allocation14 + $0x60] sm:$0xff] }
 0x544   : > { %3877 = vrcp.f32 %v2082_v27 }
 0x545   : > { %3379 = vmatmul.mubr.msk.f32.vlgmr.msra.gmra.mrb[10].mxu0 %vm2127_vm4, %v2096_v26 }
 0x546   : > { %v3874_v30 = vpop.eup %3873  ;;  %3622 = vmatpush3.bf16.msra.mxu0 %v3621_v25  ;;  %3392 = vmatprep.mubr.msk.f32.mxu0 %vm4537_vm2, %v4534_v0 }
 0x547   : > { %v2098_v32 = vmul.f32 %v3874_v30, %v5121_v52  ;;  %v2085_v33 = vpop.xlane.xlu0 %2084  ;;  %3626 = vmatprep.subr.bf16.mxu0 %v4536_v59  ;;  %v3633_v52 = vpack.c.bf16 %v2124_v47, %v2123_v46 }
 0x548   : > { %3879 = vrcp.f32 %v2085_v33 }
 0x549   : > { %v2088_v36 = vpop.xlane.xlu1 %2087  ;;  %3386 = vmatmul.mubr.msk.f32.vlgmr.msra.gmra.mrb[10].mxu1 %vm2127_vm4, %v2098_v32 }
 0x54a   : > { %v3876_v37 = vpop.eup %3875  ;;  %3881 = vrcp.f32 %v2088_v36  ;;  %3625 = vmatpush3.bf16.msra.mxu1 %v3624_v31  ;;  %3399 = vmatprep.mubr.msk.f32.mxu1 %vm4537_vm2, %v4534_v0 }
 0x54b   : > { %v2100_v39 = vmul.f32 %v3876_v37, %v5125_v57  ;;  %3629 = vmatprep.subr.bf16.mxu1 %v4536_v59 }
 0x54d   : > { %3393 = vmatmul.mubr.msk.f32.vlgmr.msra.gmra.mrb[12].mxu0 %vm2127_vm4, %v2100_v39 }
 0x54e   : > { %v3878_v42 = vpop.eup %3877  ;;  %3628 = vmatpush3.bf16.msra.mxu0 %v3627_v38  ;;  %3406 = vmatprep.mubr.msk.f32.mxu0 %vm4537_vm2, %v4534_v0 }
 0x54f   : > { %v2102_v44 = vmul.f32 %v3878_v42, %v5129_v63  ;;  %v2091_v45 = vpop.xlane.xlu0 %2090  ;;  %3632 = vmatprep.subr.bf16.mxu0 %v4536_v59 }
 0x550   : > { %3883 = vrcp.f32 %v2091_v45 }
 0x551   : > { %3400 = vmatmul.mubr.msk.f32.vlgmr.msra.gmra.mrb[12].mxu1 %vm2127_vm4, %v2102_v44  ;;  %v2094_v48 = vpop.xlane.xlu1 %2093 }
 0x552   : > { %v3880_v51 = vpop.eup %3879  ;;  %3885 = vrcp.f32 %v2094_v48  ;;  %3631 = vmatpush3.bf16.msra.mxu1 %v3630_v43  ;;  %3413 = vmatprep.mubr.msk.f32.mxu1 %vm4537_vm2, %v4534_v0 }
 0x553   : > { %v2104_v53 = vmul.f32 %v3880_v51, %v5133_v5  ;;  %3635 = vmatprep.subr.bf16.mxu1 %v4536_v59 }
 0x554   : > { %v3882_v54 = vpop.eup %3881 }
 0x555   : > { %v2106_v56 = vmul.f32 %v3882_v54, %v5137_v7  ;;  %3407 = vmatmul.mubr.msk.f32.vlgmr.msra.gmra.mrb[14].mxu0 %vm2127_vm4, %v2104_v53 }
 0x556   : > { %3634 = vmatpush3.bf16.msra.mxu0 %v3633_v52  ;;  %3420 = vmatprep.mubr.msk.f32.mxu0 %vm4537_vm2, %v4534_v0 }
 0x557   : > { %3414 = vmatmul.mubr.msk.f32.vlgmr.msra.gmra.mrb[14].mxu1 %vm2127_vm4, %v2106_v56 }
 0x558   : > { %3637 = vmatpush3.bf16.msra.mxu1 %v3636_v55  ;;  %3427 = vmatprep.mubr.msk.f32.mxu1 %vm4537_vm2, %v4534_v0 }
 0x55a   : > { %v3884_v57 = vpop.eup %3883 }
 0x55b   : > { %v2108_v58 = vmul.f32 %v3884_v57, %v5141_v9 }
 0x55c   : > { %v3886_v59 = vpop.eup %3885 }
 0x55d   : > { %v2110_v60 = vmul.f32 %v3886_v59, %v5145_v14  ;;  %3421 = vmatmul.mubr.msk.f32.vlgmr.msra.gmra.mrb[16].mxu0 %vm2127_vm4, %v2108_v58 }
 0x55f   : > { %3428 = vmatmul.mubr.msk.f32.vlgmr.msra.gmra.mrb[16].mxu1 %vm2127_vm4, %v2110_v60 }
 0x618   : > { %v2197_v61 = vpop.f32.mrb[10].mxu0 }
 0x619   : > { %v3380_v62 = vpop.f32.mrb[11].mxu0 }
 0x61c   : > { %v2270_v63 = vpop.f32.mrb[10].mxu1 }
 0x61d   : > { %v2720_v1 = vrot.slane %v2270_v63, 7  ;;  %v3387_v2 = vpop.f32.mrb[11].mxu1 }
 0x61f   : > { %v2722_v3 = vsel %vm2721_vm5, %v2720_v1, %v2197_v61 }
 0x620   : > { %v2343_v4 = vpop.f32.mrb[12].mxu0 }
 0x621   : > { %v2723_v0 = vrot.slane %v2343_v4, 6  ;;  %v3394_v5 = vpop.f32.mrb[13].mxu0 }
 0x623   : > { %v2725_v6 = vsel %vm2724_vm6, %v2723_v0, %v2722_v3 }
 0x624   : > { %v2416_v7 = vpop.f32.mrb[12].mxu1 }
 0x625   : > { %v2726_v8 = vrot.slane %v2416_v7, 5  ;;  %v3401_v9 = vpop.f32.mrb[13].mxu1 }
 0x627   : > { %v2728_v10 = vsel %vm2727_vm7, %v2726_v8, %v2725_v6 }
 0x628   : > { %v2489_v11 = vpop.f32.mrb[14].mxu0 }
 0x629   : > { %v2729_v12 = vrot.slane %v2489_v11, 4  ;;  %v3408_v13 = vpop.f32.mrb[15].mxu0 }
 0x62a   : > { %v2562_v14 = vpop.f32.mrb[14].mxu1 }
 0x62b   : > { %v2731_v15 = vsel %vm2730_vm8, %v2729_v12, %v2728_v10  ;;  %v2732_v16 = vrot.slane %v2562_v14, 3  ;;  %v3415_v17 = vpop.f32.mrb[15].mxu1 }
 0x62d   : > { %v2734_v18 = vsel %vm2733_vm9, %v2732_v16, %v2731_v15 }
 0x630   : > { %v2635_v19 = vpop.f32.mrb[16].mxu0 }
 0x631   : > { %v2735_v20 = vrot.slane %v2635_v19, 2  ;;  %v3422_v21 = vpop.f32.mrb[17].mxu0 }
 0x632   : > { %v2708_v22 = vpop.f32.mrb[16].mxu1 }
 0x633   : > { %v2737_v23 = vsel %vm2736_vm10, %v2735_v20, %v2734_v18  ;;  %v2738_v24 = vrot.slane %v2708_v22, 1  ;;  %v3429_v25 = vpop.f32.mrb[17].mxu1 }
 0x635   : > { %v2740_v26 = vsel %vm2739_vm11, %v2738_v24, %v2737_v23 }
 0x636   : > { %2742 = vst [vmem:[#allocation26] sm:$0xff] %v2740_v26 }
 0x637 PF: > { %v2748_v27 = vld [vmem:[%s4921_s15 + $0x8] sm:$0xff]  ;;  %v2750_v28 = vld [vmem:[%s4921_s15 + $0x18] sm:$0xff]  ;;  %v2747_v29 = vld [vmem:[%s4921_s15] sm:$0xff]  ;;  %v4539_v34 = vmov 0.0   ;;  %v2781_v13 = vlaneseq  ;;  %s3248_s5 = sshll.u32 %s4664_s21, 8  ;;  %s5392_s6 = scalar_lea.vmem %s5334_s12, %s5402_s30  ;;  %v4540_v25 = vmov 0  }
 0x638   : > { %v3638_v30 = vpack.c.bf16 %v2750_v28, %v2748_v27  ;;  %v2749_v31 = vld [vmem:[%s4921_s15 + $0x10] sm:$0xff]  ;;  %v2752_v32 = vld [vmem:[%s4921_s15 + $0x28] sm:$0xff]  ;;  %v2754_v33 = vld [vmem:[%s4921_s15 + $0x38] sm:$0xff]  ;;  %2855 = vmatprep.mubr.f32.mxu0 %v4539_v34  ;;  %s2863_s28 = sshra.s32 %s3248_s5, 7  ;;  %3887 = vset.pattern.permute.xlu0 %v4540_v25  ;;  %vm2894_vm12 = vcmask 7168   ;;  %p3250_p3 = scmp.ne.s32.totalorder %s4664_s21, 1 }
 0x639   : > { %v3640_v35 = vpack.c.bf16 %v2749_v31, %v2747_v29  ;;  %v3642_v36 = vpack.c.bf16 %v2754_v33, %v2752_v32  ;;  %v2751_v37 = vld [vmem:[%s4921_s15 + $0x20] sm:$0xff]  ;;  %v2753_v38 = vld [vmem:[%s4921_s15 + $0x30] sm:$0xff]  ;;  %v2756_v39 = vld [vmem:[%s4921_s15 + $0x48] sm:$0xff]  ;;  %v2782_v14 = vshrl.u32 %v2781_v13, 7  ;;  %s3249_s10 = sshll.u32 %s2863_s28, 3 }
 0x63a   : > { %3639 = vmatprep.subr.bf16.mxu0 %v3638_v30  ;;  %v2758_v40 = vld [vmem:[%s4921_s15 + $0x58] sm:$0xff]  ;;  %v3644_v41 = vpack.c.bf16 %v2753_v38, %v2751_v37  ;;  %v2755_v43 = vld [vmem:[%s4921_s15 + $0x40] sm:$0xff]  ;;  %v2757_v44 = vld [vmem:[%s4921_s15 + $0x50] sm:$0xff] }
 0x63b   : > { %3641 = vmatpush1.bf16.msra.mxu0 %v3640_v35  ;;  %v3646_v42 = vpack.c.bf16 %v2758_v40, %v2756_v39  ;;  %v2760_v45 = vld [vmem:[%s4921_s15 + $0x68] sm:$0xff]  ;;  %v2762_v46 = vld [vmem:[%s4921_s15 + $0x78] sm:$0xff]  ;;  %v3648_v47 = vpack.c.bf16 %v2757_v44, %v2755_v43  ;;  %v2759_v49 = vld [vmem:[%s4921_s15 + $0x60] sm:$0xff]  ;;  %v2783_v15 = vsub.s32 0, %v2782_v14  ;;  %v2787_v17 = vsub.s32 1, %v2782_v14 }
 0x63c   : > { %3643 = vmatprep.subr.bf16.mxu0 %v3642_v36  ;;  %v3650_v48 = vpack.c.bf16 %v2762_v46, %v2760_v45  ;;  %v2761_v50 = vld [vmem:[%s4921_s15 + $0x70] sm:$0xff]  ;;  %v2764_v51 = vld [vmem:[%s4921_s15 + $0x88] sm:$0xff]  ;;  %v2766_v52 = vld [vmem:[%s4921_s15 + $0x98] sm:$0xff]  ;;  %v4541_v45 = vmov (!%p3250_p3), 0  }
 0x63d   : > { %v3652_v53 = vpack.c.bf16 %v2761_v50, %v2759_v49  ;;  %v3654_v54 = vpack.c.bf16 %v2766_v52, %v2764_v51  ;;  %v2763_v55 = vld [vmem:[%s4921_s15 + $0x80] sm:$0xff]  ;;  %v2765_v56 = vld [vmem:[%s4921_s15 + $0x90] sm:$0xff]  ;;  %v2768_v57 = vld [vmem:[%s4921_s15 + $0xa8] sm:$0xff] }
 0x63e   : > { %v2770_v58 = vld [vmem:[%s4921_s15 + $0xb8] sm:$0xff]  ;;  %v3656_v59 = vpack.c.bf16 %v2765_v56, %v2763_v55  ;;  %v2767_v61 = vld [vmem:[%s4921_s15 + $0xa0] sm:$0xff]  ;;  %v2769_v62 = vld [vmem:[%s4921_s15 + $0xb0] sm:$0xff] }
 0x63f   : > { %3645 = vmatpush1.bf16.msra.mxu0 %v3644_v41  ;;  %v3658_v60 = vpack.c.bf16 %v2770_v58, %v2768_v57  ;;  %v2772_v63 = vld [vmem:[%s4921_s15 + $0xc8] sm:$0xff]  ;;  %v2774_v1 = vld [vmem:[%s4921_s15 + $0xd8] sm:$0xff]  ;;  %v3660_v2 = vpack.c.bf16 %v2769_v62, %v2767_v61  ;;  %v2771_v4 = vld [vmem:[%s4921_s15 + $0xc0] sm:$0xff] }
 0x640   : > { %3647 = vmatprep.subr.bf16.mxu0 %v3646_v42  ;;  %v3662_v3 = vpack.c.bf16 %v2774_v1, %v2772_v63  ;;  %v2773_v0 = vld [vmem:[%s4921_s15 + $0xd0] sm:$0xff]  ;;  %v2776_v5 = vld [vmem:[%s4921_s15 + $0xe8] sm:$0xff]  ;;  %v2778_v6 = vld [vmem:[%s4921_s15 + $0xf8] sm:$0xff] }
 0x641   : > { %v3664_v7 = vpack.c.bf16 %v2773_v0, %v2771_v4  ;;  %v3666_v8 = vpack.c.bf16 %v2778_v6, %v2776_v5  ;;  %v2775_v9 = vld [vmem:[%s4921_s15 + $0xe0] sm:$0xff]  ;;  %v2777_v10 = vld [vmem:[%s4921_s15 + $0xf0] sm:$0xff]  ;;  %s2866_s15 = scalar_lea.vmem [#allocation22], %s3249_s10  ;;  %v2874_v40 = vld [vmem:[#allocation5] sm:$0xff] }
 0x642   : > { %v3668_v11 = vpack.c.bf16 %v2777_v10, %v2775_v9  ;;  %v2746_v12 = vld [vmem:[#allocation8] sm:$0xff]  ;;  %v2779_v16 = vld [vmem:[%s5392_s6] sm:$0x3] }
 0x643   : > { %3649 = vmatpush1.bf16.msra.mxu0 %v3648_v47  ;;  %v2784_v18 = vrot.slane %v2779_v16, %v2783_v15  ;;  %v2788_v19 = vrot.slane %v2779_v16, %v2787_v17  ;;  %v2869_v26 = vld [vmem:[#allocation4] sm:$0xff] }
 0x644   : > { %3651 = vmatprep.subr.bf16.mxu0 %v3650_v48 }
 0x647   : > { %3653 = vmatpush1.bf16.msra.mxu0 %v3652_v53 }
 0x648   : > { %3655 = vmatprep.subr.bf16.mxu0 %v3654_v54 }
 0x64b   : > { %3657 = vmatpush1.bf16.msra.mxu0 %v3656_v59 }
 0x64c   : > { %3659 = vmatprep.subr.bf16.mxu0 %v3658_v60 }
 0x64f   : > { %3661 = vmatpush1.bf16.msra.mxu0 %v3660_v2 }
 0x650   : > { %3663 = vmatprep.subr.bf16.mxu0 %v3662_v3 }
 0x653   : > { %3665 = vmatpush1.bf16.msra.mxu0 %v3664_v7 }
 0x654   : > { %3667 = vmatprep.subr.bf16.mxu0 %v3666_v8 }
 0x657   : > { %3669 = vmatpush1.bf16.msra.mxu0 %v3668_v11 }
 0x65a   : > { %2856 = vmatmul.mubr.f32.vlgmr.msra.gmra.mrb[0].mxu0 %v2746_v12 }
 0x72d   : > { %v2857_v20 = vpop.f32.mrb[0].mxu0 }
 0x72e   : > { %v2858_v21 = vadd.f32 %v2857_v20, %v2784_v18  ;;  %v2859_v22 = vpop.f32.mrb[1].mxu0 }
 0x72f   : > { %v2860_v23 = vadd.f32 %v2859_v22, %v2788_v19 }
 0x730   : > { %2867 = vst [vmem:[%s2866_s15] sm:$0xff] %v2858_v21 }
 0x731   : > { %2868 = vst [vmem:[%s2866_s15 + $0x8] sm:$0xff] %v2860_v23  ;;  %v2870_v24 = vmax.f32 %v2858_v21, %v2860_v23 }
 0x733   : > { %2871 = vmax.xlane.f32.xlu0 %v2870_v24 }
 0x738   : > { %v2901_v50 = vld [vmem:[#allocation22] sm:$0xff] (!%p3250_p3)  ;;  %v2902_v51 = vld [vmem:[#allocation22 + $0x8] sm:$0xff] (!%p3250_p3)  ;;  %v2903_v52 = vld [vmem:[#allocation22 + $0x10] sm:$0xff] (!%p3250_p3) }
 0x739   : > { %v2904_v53 = vld [vmem:[#allocation22 + $0x18] sm:$0xff] (!%p3250_p3) }
 0x7c0   : > { %v2872_v27 = vpop.xlane.xlu0 %2871 }
 0x7c1   : > { %v2873_v28 = vmax.f32 %v2869_v26, %v2872_v27 }
 0x7c3   : > { %v2875_v29 = vsub.f32 %v2869_v26, %v2873_v28  ;;  %2896 = vst.msk [vmem:[#allocation4] sm:$0xff] %vm2894_vm12, %v2873_v28  ;;  %2881 = vperm.xlu0 %3887, %v2873_v28  }
 0x7c5   : > { %v2876_v38 = vmul.f32 1.442695, %v2875_v29 }
 0x7c7   : > { %3894 = vset.pattern.permute.xlu0 (!%p3250_p3), %v4541_v45 }
 0x7ca   : > { %v2905_v47 = vld [vmem:[#allocation4] sm:$0xff] (!%p3250_p3) }
 0x842   : > { %v2882_v30 = vpop.permute.xlu0 %2881 }
 0x843   : > { %v2884_v31 = vsub.f32 %v2858_v21, %v2882_v30  ;;  %v2885_v32 = vsub.f32 %v2860_v23, %v2882_v30 }
 0x845   : > { %v2886_v33 = vmul.f32 1.442695, %v2884_v31  ;;  %v2888_v34 = vmul.f32 1.442695, %v2885_v32 }
 0x847   : > { %3888 = vpow2.f32 %v2886_v33 }
 0x848   : > { %3890 = vpow2.f32 %v2888_v34 }
 0x849   : > { %3892 = vpow2.f32 %v2876_v38 }
 0x851   : > { %v3889_v35 = vpop.eup %3888 }
 0x852   : > { %v3891_v36 = vpop.eup %3890 }
 0x853   : > { %v2890_v37 = vadd.f32 %v3891_v36, %v3889_v35  ;;  %v3893_v39 = vpop.eup %3892 }
 0x854   : > { %v2878_v41 = vmul.f32 %v3893_v39, %v2874_v40 }
 0x855   : > { %2891 = vadd.xlane.f32.xlu1 %v2890_v37 }
 0x8df   : > { %2900 = sbr.rel (%p3250_p3) target bundleno = 2432 (0x980), region = 136 }
 0x8e2   : > { %v2892_v42 = vpop.xlane.xlu1 %2891 }
 0x8e3   : > { %v2893_v43 = vadd.f32 %v2892_v42, %v2878_v41 }
 0x8e5   : > { %2895 = vst.msk [vmem:[#allocation5] sm:$0xff] %vm2894_vm12, %v2893_v43 }
 0x8ec   : > { %v2906_v44 = vld [vmem:[#allocation5] sm:$0xff] }
 0x8ed   : > { %3895 = vlog2.f32 %v2906_v44 }
 0x8f7   : > { %v3896_v46 = vpop.eup %3895 }
 0x8f8   : > { %v2908_v48 = vmul.f32 0.6931472, %v3896_v46 }
 0x8fa   : > { %v2909_v49 = vadd.f32 %v2908_v48, %v2905_v47 }
 0x8fc   : > { %2912 = vperm.xlu0 %3894, %v2909_v49  }
 0x97b   : > { %v2913_v54 = vpop.permute.xlu0 %2912 }
 0x97c   : > { %v2915_v55 = vsub.f32 %v2901_v50, %v2913_v54  ;;  %v2916_v56 = vsub.f32 %v2902_v51, %v2913_v54  ;;  %v2917_v57 = vsub.f32 %v2903_v52, %v2913_v54  ;;  %v2918_v58 = vsub.f32 %v2904_v53, %v2913_v54 }
 0x97e   : > { %2919 = vst [vmem:[#allocation22] sm:$0xff] %v2915_v55  ;;  %2920 = vst [vmem:[#allocation22 + $0x8] sm:$0xff] %v2916_v56 }
 0x97f   : > { %2921 = vst [vmem:[#allocation22 + $0x10] sm:$0xff] %v2917_v57  ;;  %2922 = vst [vmem:[#allocation22 + $0x18] sm:$0xff] %v2918_v58 }
 0x980 PF: > { %p3765_p8 = scmp.eq.s32.totalorder %s4664_s21, 1  ;;  %s4542_s30 = smov [#allocation23]  }
 0x981   : > { %s2941_s29 = sshll.u32 %s4542_s30, 4  ;;  %s4543_s13 = smov [#allocation22]   ;;  %s2942_s29 = int_to_ptr.vmem [resolvable:$true] %s2941_s29 }
 0x982   : > { %s2930_s16 = sshll.u32 %s4543_s13, 4  ;;  %s4325_s1 = scalar_lea.vmem %s2942_s29, 128  ;;  %s2931_s16 = int_to_ptr.vmem [resolvable:$true] %s2930_s16 }
 0x983   : > { %p4326_p13 = scmp.ne.s32.totalorder %s2942_s29, %s4325_s1  ;;  %p4332_p2 = scmp.lt.s32.totalorder %s2942_s29, %s2942_s29 }
 0x984   : > { %p4333_p5 = scmp.lt.s32.totalorder %s4325_s1, %s4325_s1 }
 0x985   : > { %p4327_p11 = pnand %p4326_p13, %p3765_p8 }
 0x986   : > { %p4334_p12 = por %p4333_p5, %p4332_p2 }
 0x987   : > { %p4328_p10 = pneg %p4327_p11 }
 0x989   : > { %p4335_p6 = pnand %p4334_p12, %p4328_p10 }
 0x98b   : > { %4338 = shalt.err (!%p4335_p6)
}
 0x98c   : > { %s5393_s27 = sld [smem:[#allocation73_spill]] }
 0x992   : > { %s4339_s2 = scalar_lea.hbm %s5393_s27, 128 }
 0x993   : > { %p4340_p4 = scmp.ne.s32.totalorder %s5393_s27, %s4339_s2  ;;  %p4345_p0 = scmp.lt.u32.totalorder %s4339_s2, %s5393_s27 }
 0x995   : > { %p4341_p7 = pnand %p4340_p4, %p3765_p8 }
 0x997   : > { %p4342_p9 = pneg %p4341_p7 }
 0x999   : > { %p4347_p1 = pnand %p4345_p0, %p4342_p9 }
 0x99b   : > { %4350 = shalt.err (!%p4347_p1)
}
 0x99c   : > { %3711 = dma.vmem_to_hbm [thread:$0]  (%p3765_p8), %s2942_s29, 128, %s5393_s27, [#allocation24]  }
 0x99d   : > { %s4351_s3 = scalar_lea.vmem %s2931_s16, 512  ;;  %p4358_p10 = scmp.lt.s32.totalorder %s2931_s16, %s2931_s16 }
 0x99e   : > { %p4352_p3 = scmp.ne.s32.totalorder %s2931_s16, %s4351_s3  ;;  %p4359_p2 = scmp.lt.s32.totalorder %s4351_s3, %s4351_s3 }
 0x9a0   : > { %p4353_p13 = pnand %p4352_p3, %p3765_p8  ;;  %p4360_p5 = por %p4359_p2, %p4358_p10 }
 0x9a2   : > { %p4354_p11 = pneg %p4353_p13 }
 0x9a4   : > { %p4361_p12 = pnand %p4360_p5, %p4354_p11 }
 0x9a6   : > { %4364 = shalt.err (!%p4361_p12)
}
 0x9a7   : > { %s5394_s28 = sld [smem:[#allocation72_spill]] }
 0x9ad   : > { %s4365_s10 = scalar_lea.hbm %s5394_s28, 512 }
 0x9ae   : > { %p4366_p6 = scmp.ne.s32.totalorder %s5394_s28, %s4365_s10  ;;  %p4371_p9 = scmp.lt.u32.totalorder %s4365_s10, %s5394_s28 }
 0x9b0   : > { %p4367_p4 = pnand %p4366_p6, %p3765_p8 }
 0x9b2   : > { %p4368_p7 = pneg %p4367_p4 }
 0x9b4   : > { %p4373_p0 = pnand %p4371_p9, %p4368_p7 }
 0x9b6   : > { %4376 = shalt.err (!%p4373_p0)
}
 0x9b7   : > { %3709 = dma.vmem_to_hbm [thread:$0]  (%p3765_p8), %s2931_s16, 512, %s5394_s28, [#allocation10]  }
 0x9b8   : > { %s4544_s26 = smov [#allocation25]   ;;  %s4545_s23 = smov [#allocation26]  }
 0x9b9   : > { %s2952_s2 = sshll.u32 %s4544_s26, 4  ;;  %s2963_s20 = sshll.u32 %s4545_s23, 4  ;;  %s2953_s2 = int_to_ptr.vmem [resolvable:$true] %s2952_s2  ;;  %s2964_s20 = int_to_ptr.vmem [resolvable:$true] %s2963_s20 }
 0x9ba   : > { %s4377_s18 = scalar_lea.vmem %s2953_s2, 128  ;;  %p4384_p11 = scmp.lt.s32.totalorder %s2953_s2, %s2953_s2 }
 0x9bb   : > { %p4378_p1 = scmp.ne.s32.totalorder %s2953_s2, %s4377_s18  ;;  %p4385_p10 = scmp.lt.s32.totalorder %s4377_s18, %s4377_s18 }
 0x9bd   : > { %p4379_p3 = pnand %p4378_p1, %p3765_p8  ;;  %p4386_p2 = por %p4385_p10, %p4384_p11 }
 0x9bf   : > { %p4380_p13 = pneg %p4379_p3 }
 0x9c1   : > { %p4387_p5 = pnand %p4386_p2, %p4380_p13 }
 0x9c3   : > { %4390 = shalt.err (!%p4387_p5)
}
 0x9c4   : > { %s5395_s5 = sld [smem:[#allocation74_spill]] }
 0x9ca   : > { %s4391_s16 = scalar_lea.hbm %s5395_s5, 128 }
 0x9cb   : > { %p4392_p12 = scmp.ne.s32.totalorder %s5395_s5, %s4391_s16  ;;  %p4397_p7 = scmp.lt.u32.totalorder %s4391_s16, %s5395_s5 }
 0x9cd   : > { %p4393_p6 = pnand %p4392_p12, %p3765_p8 }
 0x9cf   : > { %p4394_p4 = pneg %p4393_p6 }
 0x9d1   : > { %p4399_p9 = pnand %p4397_p7, %p4394_p4 }
 0x9d3   : > { %4402 = shalt.err (!%p4399_p9)
}
 0x9d4   : > { %3713 = dma.vmem_to_hbm [thread:$0]  (%p3765_p8), %s2953_s2, 128, %s5395_s5, [#allocation24]  }
 0x9d5   : > { %s4403_s29 = scalar_lea.vmem %s2964_s20, 128  ;;  %p4410_p13 = scmp.lt.s32.totalorder %s2964_s20, %s2964_s20 }
 0x9d6   : > { %p4404_p0 = scmp.ne.s32.totalorder %s2964_s20, %s4403_s29  ;;  %p4411_p11 = scmp.lt.s32.totalorder %s4403_s29, %s4403_s29 }
 0x9d8   : > { %p4405_p1 = pnand %p4404_p0, %p3765_p8  ;;  %p4412_p10 = por %p4411_p11, %p4410_p13 }
 0x9da   : > { %p4406_p3 = pneg %p4405_p1 }
 0x9dc   : > { %p4413_p2 = pnand %p4412_p10, %p4406_p3 }
 0x9de   : > { %4416 = shalt.err (!%p4413_p2)
}
 0x9df   : > { %s5396_s22 = sld [smem:[#allocation75_spill]] }
 0x9e5   : > { %s4417_s26 = scalar_lea.hbm %s5396_s22, 128 }
 0x9e6   : > { %p4418_p5 = scmp.ne.s32.totalorder %s5396_s22, %s4417_s26  ;;  %p4423_p4 = scmp.lt.u32.totalorder %s4417_s26, %s5396_s22 }
 0x9e8   : > { %p4419_p12 = pnand %p4418_p5, %p3765_p8 }
 0x9ea   : > { %p4420_p6 = pneg %p4419_p12 }
 0x9ec   : > { %p4425_p7 = pnand %p4423_p4, %p4420_p6 }
 0x9ee   : > { %4428 = shalt.err (!%p4425_p7)
}
 0x9ef   : > { %3715 = dma.vmem_to_hbm [thread:$0]  (%p3765_p8), %s2964_s20, 128, %s5396_s22, [#allocation27]  }
 0x9f0   : > { %4484 = dma.done.wait (%p3765_p8), [#allocation10], 512  }
 0x9f1   : > { %4486 = vsyncadd (%p3765_p8), [#allocation10], 4294966784 }
 0x9f2   : > { %4488 = dma.done.wait (%p3765_p8), [#allocation24], 256  }
 0x9f3   : > { %4490 = vsyncadd (%p3765_p8), [#allocation24], 4294967040 }
 0x9f4   : > { %4492 = dma.done.wait (%p3765_p8), [#allocation27], 128  }
 0x9f5   : > { %4494 = vsyncadd (%p3765_p8), [#allocation27], 4294967168 }
 0x9f6 PF: > { %p38_p9 = scmp.ge.s32.totalorder %s4840_s25, 4   ;;  %s5397_s10 = smov %s4501_s0 }
 0x9f7   : > { %s5398_s0 = smov %s4505_s17  ;;  %s5399_s17 = smov %s4851_s24 }
 0x9f8   : > { %s5400_s18 = smov %s4840_s25  ;;  %40 = sbr.rel (!%p38_p9) target bundleno = 31 (0x1f), region = 227 }
 0x9ff   :  { %2988 = vsyncpa [#allocation9], 1 }
 0xa00   :  { %2990 = vsyncpa [#allocation9 + $0x1], 1 }
 0xa01   :  { %2991 = vsyncpa [#allocation12], 1 }
 0xa02   :  { %2992 = vsyncpa [#allocation15], 1 }
 0xa03   :  { %2993 = vsyncpa [#allocation18], 1 }
 0xa04   :  { %2994 = vsyncpa [#allocation21], 1 }
 0xa05   :  { %2996 = vsyncpa [#allocation21 + $0x1], 1 }
 0xa06   :  { %2997 = vsyncpa [#allocation10], 1 }
 0xa07   :  { %2999 = vsyncpa [#allocation10 + $0x1], 1 }
 0xa08   :  { %3000 = vsyncpa [#allocation24], 1 }
 0xa09   :  { %3001 = vsyncpa [#allocation27], 1 }
 0xa0a   :  { %3002 = vsyncmov [#allocation3] }
 0xa0d   :  { %s3003_s21 = vpop.sfrf %3002 }
 0xa0e   :  { %p3261_p8 = scmp.ne.s32.totalorder %s3003_s21, 0 }
 0xa10   :  { %3007 = shalt.err (%p3261_p8)  }
 0xa11   :  { %3009 = vsyncmov [#allocation3 + $0x1] }
 0xa14   :  { %s3010_s24 = vpop.sfrf %3009 }
 0xa15   :  { %p3262_p0 = scmp.ne.s32.totalorder %s3010_s24, 0 }
 0xa17   :  { %3014 = shalt.err (%p3262_p0)  }
 0xa18   :  { %3016 = vsyncmov [#allocation3 + $0x2] }
 0xa1b   :  { %s3017_s8 = vpop.sfrf %3016 }
 0xa1c   :  { %p3263_p1 = scmp.ne.s32.totalorder %s3017_s8, 0 }
 0xa1e   :  { %3021 = shalt.err (%p3263_p1)  }
 0xa1f   :  { %3023 = vsyncmov [#allocation3 + $0x3] }
 0xa22   :  { %s3024_s9 = vpop.sfrf %3023 }
 0xa23   :  { %p3264_p3 = scmp.ne.s32.totalorder %s3024_s9, 0 }
 0xa25   :  { %3028 = shalt.err (%p3264_p3)  }
 0xa26   :  { %3030 = vsyncmov [#allocation3 + $0x4] }
 0xa29   :  { %s3031_s11 = vpop.sfrf %3030 }
 0xa2a   :  { %p3265_p13 = scmp.ne.s32.totalorder %s3031_s11, 0 }
 0xa2c   :  { %3035 = shalt.err (%p3265_p13)  }
 0xa2d   :  { %3037 = vsyncmov [#allocation3 + $0x5] }
 0xa30   :  { %s3038_s12 = vpop.sfrf %3037 }
 0xa31   :  { %p3266_p11 = scmp.ne.s32.totalorder %s3038_s12, 0 }
 0xa33   :  { %3042 = shalt.err (%p3266_p11)  }
 0xa34   :  { %3044 = vsyncmov [#allocation3 + $0x6] }
 0xa37   :  { %s3045_s0 = vpop.sfrf %3044 }
 0xa38   :  { %p3267_p10 = scmp.ne.s32.totalorder %s3045_s0, 0 }
 0xa3a   :  { %3049 = shalt.err (%p3267_p10)  }
 0xa3b   :  { %3051 = vsyncmov [#allocation3 + $0x7] }
 0xa3e   :  { %s3052_s17 = vpop.sfrf %3051 }
 0xa3f   :  { %p3268_p2 = scmp.ne.s32.totalorder %s3052_s17, 0 }
 0xa41   :  { %3056 = shalt.err (%p3268_p2)  }

</bundles_post_ra>
